<compile_context>
chip_gen: v7x
topology: tpu7x:2x2x1
jax: 0.10.0
libtpu: 0.0.40
codegen_flags: <defaults>
</compile_context>

<pallas_src>
import functools
import math

import jax
import jax.numpy as jnp
from jax.experimental import pallas as pl
from jax.experimental.pallas import tpu as pltpu


# ----------------------------------------------------------------------------
# In-kernel building blocks (operate on VMEM-resident values)
# ----------------------------------------------------------------------------
def _layer_norm(x, g, b, eps=1e-6):
    """openvqa LayerNorm: g*(x-mean)/(std+eps)+b with unbiased (n-1) std."""
    H = x.shape[-1]
    mean = jnp.mean(x, axis=-1, keepdims=True)
    d = x - mean
    var = jnp.sum(d * d, axis=-1, keepdims=True) * (1.0 / (H - 1))
    std = jnp.sqrt(var)
    # Exact division (review: approx reciprocal drifts vs. PyTorch reference).
    return g * (d / (std + eps)) + b


def _ffn(x, w1, b1, w2, b2):
    """MLP(H -> FF -> H) with ReLU; bf16 MXU operands, f32 accumulation."""
    h = jnp.dot(x.astype(jnp.bfloat16), w1, preferred_element_type=jnp.float32) + b1
    h = jnp.maximum(h, 0.0)
    return jnp.dot(h.astype(jnp.bfloat16), w2, preferred_element_type=jnp.float32) + b2


def _mhatt(q_in, kv_in, att_mask, head_mask, wq, bq, wk, bk, wv, bv, wm, bm,
           n_heads, indirect):
    """Multi-head attention for one batch element, head-batched (no lane slices).

    q_in: (Lq, H) f32, kv_in: (Lk, H) f32.
    att_mask: (1, Lk) bool, True == masked (hoisted outside the kernel loops).
    head_mask: (nh*Lq, H) f32 0/1 head-block mask (row group h keeps only the
               dh columns of head h).  Precomputed on the host.
    wq/wk/wv/wm: (H, H) bf16 (wq/bq already carry 1/sqrt(d_head)).
    Returns (Lq, H) f32.
    """
    Lq = q_in.shape[0]
    qb = q_in.astype(jnp.bfloat16)
    kvb = kv_in.astype(jnp.bfloat16)

    qp = jnp.dot(qb, wq, preferred_element_type=jnp.float32) + bq   # (Lq, H), scaled
    kp = jnp.dot(kvb, wk, preferred_element_type=jnp.float32) + bk  # (Lk, H)
    vp = jnp.dot(kvb, wv, preferred_element_type=jnp.float32) + bv  # (Lk, H)

    # Replicate queries along rows (one Lq-row group per head) and keep only
    # that head's feature columns -> ONE scores matmul and ONE softmax chain
    # over all heads (rows = nh*Lq), instead of nh separate dh=8 lane slices.
    qp_rep = jnp.concatenate([qp] * n_heads, axis=0) * head_mask    # (nh*Lq, H)
    s = jax.lax.dot_general(
        qp_rep.astype(jnp.bfloat16), kp.astype(jnp.bfloat16),
        (((1,), (1,)), ((), ())), preferred_element_type=jnp.float32)  # (nh*Lq, Lk)

    if indirect:
        # Indirect_MHAtt: exp(scores - max) BEFORE masked_fill (as in the spec)
        s = jnp.exp(s - jnp.max(s, axis=-1, keepdims=True))
    s = jnp.where(att_mask, jnp.float32(-1e9), s)                   # masked_fill
    s = s - jnp.max(s, axis=-1, keepdims=True)
    e = jnp.exp(s)
    p = e / jnp.sum(e, axis=-1, keepdims=True)                      # exact softmax

    pv = jnp.dot(p.astype(jnp.bfloat16), vp.astype(jnp.bfloat16),
                 preferred_element_type=jnp.float32)                # (nh*Lq, H)
    pv = pv * head_mask                                             # own head cols only

    # Fold the per-head row groups back to the concatenated (Lq, H) "atted"
    # (sublane-aligned static slices + adds), then a SINGLE merge matmul.
    atted = pv[0:Lq, :]
    for h in range(1, n_heads):
        atted = atted + pv[h * Lq:(h + 1) * Lq, :]
    return jnp.dot(atted.astype(jnp.bfloat16), wm,
                   preferred_element_type=jnp.float32) + bm


# ----------------------------------------------------------------------------
# Fused encoder+decoder kernel (one batch element per grid step)
# ----------------------------------------------------------------------------
_ENC_W_KEYS = ["wq", "bq", "wk", "bk", "wv", "bv", "wm", "bm",
               "w1", "b1", "w2", "b2", "g1", "n1", "g2", "n2"]

_DEC_W_KEYS = ["wq1", "bq1", "wk1", "bk1", "wv1", "bv1", "wm1", "bm1",
               "wq2", "bq2", "wk2", "bk2", "wv2", "bv2", "wm2", "bm2",
               "w1", "b1", "w2", "b2",
               "g1", "n1", "g2", "n2", "g3", "n3"]


def trar_ed_kernel(n_layers, n_heads, *refs):
    y_ref, x_ref, ym_ref, xm_ref, hmy_ref, hmx_ref = refs[:6]
    n_enc = len(_ENC_W_KEYS)
    n_dec = len(_DEC_W_KEYS)
    enc = dict(zip(_ENC_W_KEYS, refs[6:6 + n_enc]))
    dec = dict(zip(_DEC_W_KEYS, refs[6 + n_enc:6 + n_enc + n_dec]))
    yo_ref, xo_ref = refs[6 + n_enc + n_dec:]

    y = y_ref[0]                       # (Ly, H) f32
    x = x_ref[0]                       # (Lx, H) f32
    ymask = ym_ref[0] > 0.0            # (1, Ly) bool, hoisted across layers
    xmask = xm_ref[0] > 0.0            # (1, Lx)
    hm_y = hmy_ref[...]                # (nh*Ly, H) head-block mask (enc self-attn)
    hm_x = hmx_ref[...]                # (nh*Lx, H) head-block mask (dec self/cross)

    # ---- encoder stack (static unroll over layers) ----
    for l in range(n_layers):
        att = _mhatt(y, y, ymask, hm_y,
                     enc["wq"][l], enc["bq"][l], enc["wk"][l], enc["bk"][l],
                     enc["wv"][l], enc["bv"][l], enc["wm"][l], enc["bm"][l],
                     n_heads, indirect=False)
        y = _layer_norm(y + att, enc["g1"][l], enc["n1"][l])
        ff = _ffn(y, enc["w1"][l], enc["b1"][l], enc["w2"][l], enc["b2"][l])
        y = _layer_norm(y + ff, enc["g2"][l], enc["n2"][l])
    yo_ref[0] = y

    # ---- decoder stack (uses the freshly encoded y, never leaves VMEM) ----
    for l in range(n_layers):
        a1 = _mhatt(x, x, xmask, hm_x,
                    dec["wq1"][l], dec["bq1"][l], dec["wk1"][l], dec["bk1"][l],
                    dec["wv1"][l], dec["bv1"][l], dec["wm1"][l], dec["bm1"][l],
                    n_heads, indirect=True)
        x = _layer_norm(x + a1, dec["g1"][l], dec["n1"][l])
        a2 = _mhatt(x, y, ymask, hm_x,
                    dec["wq2"][l], dec["bq2"][l], dec["wk2"][l], dec["bk2"][l],
                    dec["wv2"][l], dec["bv2"][l], dec["wm2"][l], dec["bm2"][l],
                    n_heads, indirect=False)
        x = _layer_norm(x + a2, dec["g2"][l], dec["n2"][l])
        ff = _ffn(x, dec["w1"][l], dec["b1"][l], dec["w2"][l], dec["b2"][l])
        x = _layer_norm(x + ff, dec["g3"][l], dec["n3"][l])
    xo_ref[0] = x


# ----------------------------------------------------------------------------
# pallas_call wrapper
# ----------------------------------------------------------------------------
def _const_spec(shape):
    """Whole-array block, constant across grid steps (DMA'd once, VMEM-resident)."""
    zeros = (0,) * len(shape)
    return pl.BlockSpec(shape, lambda b, _z=zeros: _z)


def _head_block_mask(n_heads, Lq, H):
    """(nh*Lq, H) 0/1 mask: row group h keeps only head-h's dh columns."""
    dh = H // n_heads
    rows = jnp.arange(n_heads * Lq, dtype=jnp.int32)[:, None] // Lq
    cols = jnp.arange(H, dtype=jnp.int32)[None, :] // dh
    return (rows == cols).astype(jnp.float32)


def trar_ed_forward(y, x, y_mask, x_mask, params, n_heads):
    """TRAR_ED.forward(y, x, y_mask, x_mask) -> (y, x). Masks: (B,1,L), 1==masked."""
    B, Ly, H = y.shape
    Lx = x.shape[1]
    n_layers = params["enc"]["wq"].shape[0]

    enc_w = [params["enc"][k] for k in _ENC_W_KEYS]
    dec_w = [params["dec"][k] for k in _DEC_W_KEYS]
    hm_y = _head_block_mask(n_heads, Ly, H)
    hm_x = _head_block_mask(n_heads, Lx, H)

    kernel = functools.partial(trar_ed_kernel, n_layers, n_heads)
    y_out, x_out = pl.pallas_call(
        kernel,
        out_shape=(jax.ShapeDtypeStruct((B, Ly, H), jnp.float32),
                   jax.ShapeDtypeStruct((B, Lx, H), jnp.float32)),
        grid=(B,),
        in_specs=[pl.BlockSpec((1, Ly, H), lambda b: (b, 0, 0)),
                  pl.BlockSpec((1, Lx, H), lambda b: (b, 0, 0)),
                  pl.BlockSpec((1, 1, Ly), lambda b: (b, 0, 0)),
                  pl.BlockSpec((1, 1, Lx), lambda b: (b, 0, 0)),
                  _const_spec(hm_y.shape),
                  _const_spec(hm_x.shape)]
                 + [_const_spec(w.shape) for w in enc_w + dec_w],
        out_specs=[pl.BlockSpec((1, Ly, H), lambda b: (b, 0, 0)),
                   pl.BlockSpec((1, Lx, H), lambda b: (b, 0, 0))],
        compiler_params=pltpu.CompilerParams(
            dimension_semantics=("parallel",),
            vmem_limit_bytes=32 * 1024 * 1024),
    )(y, x, y_mask, x_mask, hm_y, hm_x, *enc_w, *dec_w)
    return y_out, x_out


# ----------------------------------------------------------------------------
# Deterministic synthetic parameters (stacked over layers, W matrices in bf16)
# ----------------------------------------------------------------------------
def _linear(key, din, dout):
    kw, kb = jax.random.split(key)
    lim = math.sqrt(6.0 / (din + dout))
    w = jax.random.uniform(kw, (din, dout), jnp.float32, -lim, lim)
    b = jax.random.uniform(kb, (1, dout), jnp.float32, -0.01, 0.01)
    return w, b


def init_encoder_layer(key, H, FF, n_heads):
    ks = jax.random.split(key, 6)
    scale = 1.0 / math.sqrt(H // n_heads)
    bf = jnp.bfloat16
    wq, bq = _linear(ks[0], H, H)
    wk, bk = _linear(ks[1], H, H)
    wv, bv = _linear(ks[2], H, H)
    wm, bm = _linear(ks[3], H, H)
    w1, b1 = _linear(ks[4], H, FF)
    w2, b2 = _linear(ks[5], FF, H)
    ones, zeros = jnp.ones((1, H), jnp.float32), jnp.zeros((1, H), jnp.float32)
    return dict(wq=(wq * scale).astype(bf), bq=bq * scale,     # fold 1/sqrt(d_head)
                wk=wk.astype(bf), bk=bk, wv=wv.astype(bf), bv=bv,
                wm=wm.astype(bf), bm=bm,
                w1=w1.astype(bf), b1=b1, w2=w2.astype(bf), b2=b2,
                g1=ones, n1=zeros, g2=ones, n2=zeros)


def init_decoder_layer(key, H, FF, n_heads):
    ks = jax.random.split(key, 10)
    scale = 1.0 / math.sqrt(H // n_heads)
    bf = jnp.bfloat16
    wq1, bq1 = _linear(ks[0], H, H); wk1, bk1 = _linear(ks[1], H, H)
    wv1, bv1 = _linear(ks[2], H, H); wm1, bm1 = _linear(ks[3], H, H)
    wq2, bq2 = _linear(ks[4], H, H); wk2, bk2 = _linear(ks[5], H, H)
    wv2, bv2 = _linear(ks[6], H, H); wm2, bm2 = _linear(ks[7], H, H)
    w1, b1 = _linear(ks[8], H, FF);  w2, b2 = _linear(ks[9], FF, H)
    ones, zeros = jnp.ones((1, H), jnp.float32), jnp.zeros((1, H), jnp.float32)
    return dict(wq1=(wq1 * scale).astype(bf), bq1=bq1 * scale,
                wk1=wk1.astype(bf), bk1=bk1, wv1=wv1.astype(bf), bv1=bv1,
                wm1=wm1.astype(bf), bm1=bm1,
                wq2=(wq2 * scale).astype(bf), bq2=bq2 * scale,
                wk2=wk2.astype(bf), bk2=bk2, wv2=wv2.astype(bf), bv2=bv2,
                wm2=wm2.astype(bf), bm2=bm2,
                w1=w1.astype(bf), b1=b1, w2=w2.astype(bf), b2=b2,
                g1=ones, n1=zeros, g2=ones, n2=zeros, g3=ones, n3=zeros)


def _stack(layer_dicts):
    return {k: jnp.stack([d[k] for d in layer_dicts], axis=0)
            for k in layer_dicts[0]}


def init_trar_ed(key, n_layers, H, FF, n_heads):
    keys = jax.random.split(key, 2 * n_layers)
    enc = _stack([init_encoder_layer(keys[i], H, FF, n_heads)
                  for i in range(n_layers)])
    dec = _stack([init_decoder_layer(keys[n_layers + i], H, FF, n_heads)
                  for i in range(n_layers)])
    return dict(enc=enc, dec=dec)


# ----------------------------------------------------------------------------
# Demo
# ----------------------------------------------------------------------------
if __name__ == "__main__":
    # Small config consistent with the module: HIDDEN_SIZE=32, FF_SIZE=128,
    # MULTI_HEAD=4 (HIDDEN_SIZE_HEAD=8), LAYER=2.
    B, Ly, Lx = 2, 8, 16
    H, FF, N_HEADS, LAYERS = 32, 128, 4, 2

    root = jax.random.PRNGKey(0)
    k_y, k_x, k_p = jax.random.split(root, 3)

    y = jax.random.normal(k_y, (B, Ly, H), jnp.float32)   # language features
    x = jax.random.normal(k_x, (B, Lx, H), jnp.float32)   # visual features

    # masks: (B, 1, L), 1.0 == masked (openvqa make_mask, broadcast over heads/queries)
    y_mask = jnp.zeros((B, 1, Ly), jnp.float32).at[:, :, Ly - 2:].set(1.0)
    x_mask = jnp.zeros((B, 1, Lx), jnp.float32)

    params = init_trar_ed(k_p, LAYERS, H, FF, N_HEADS)

    fwd = jax.jit(functools.partial(trar_ed_forward, n_heads=N_HEADS))
    y_out, x_out = fwd(y, x, y_mask, x_mask, params)
    jax.block_until_ready((y_out, x_out))

    assert y_out.shape == (B, Ly, H) and x_out.shape == (B, Lx, H)
    assert bool(jnp.all(jnp.isfinite(y_out))) and bool(jnp.all(jnp.isfinite(x_out)))
    print("KERNEL_OK")
</pallas_src>

<mosaic_0001>
module attributes {stable_mosaic.version = 11 : i64} {
  func.func @trar_ed_kernel(%arg0: i32, %arg1: memref<1x8x32xf32, #tpu.memory_space<vmem>>, %arg2: memref<1x16x32xf32, #tpu.memory_space<vmem>>, %arg3: memref<1x1x8xf32, #tpu.memory_space<vmem>>, %arg4: memref<1x1x16xf32, #tpu.memory_space<vmem>>, %arg5: memref<32x32xf32, #tpu.memory_space<vmem>>, %arg6: memref<64x32xf32, #tpu.memory_space<vmem>>, %arg7: memref<2x32x32xbf16, #tpu.memory_space<vmem>>, %arg8: memref<2x1x32xf32, #tpu.memory_space<vmem>>, %arg9: memref<2x32x32xbf16, #tpu.memory_space<vmem>>, %arg10: memref<2x1x32xf32, #tpu.memory_space<vmem>>, %arg11: memref<2x32x32xbf16, #tpu.memory_space<vmem>>, %arg12: memref<2x1x32xf32, #tpu.memory_space<vmem>>, %arg13: memref<2x32x32xbf16, #tpu.memory_space<vmem>>, %arg14: memref<2x1x32xf32, #tpu.memory_space<vmem>>, %arg15: memref<2x32x128xbf16, #tpu.memory_space<vmem>>, %arg16: memref<2x1x128xf32, #tpu.memory_space<vmem>>, %arg17: memref<2x128x32xbf16, #tpu.memory_space<vmem>>, %arg18: memref<2x1x32xf32, #tpu.memory_space<vmem>>, %arg19: memref<2x1x32xf32, #tpu.memory_space<vmem>>, %arg20: memref<2x1x32xf32, #tpu.memory_space<vmem>>, %arg21: memref<2x1x32xf32, #tpu.memory_space<vmem>>, %arg22: memref<2x1x32xf32, #tpu.memory_space<vmem>>, %arg23: memref<2x32x32xbf16, #tpu.memory_space<vmem>>, %arg24: memref<2x1x32xf32, #tpu.memory_space<vmem>>, %arg25: memref<2x32x32xbf16, #tpu.memory_space<vmem>>, %arg26: memref<2x1x32xf32, #tpu.memory_space<vmem>>, %arg27: memref<2x32x32xbf16, #tpu.memory_space<vmem>>, %arg28: memref<2x1x32xf32, #tpu.memory_space<vmem>>, %arg29: memref<2x32x32xbf16, #tpu.memory_space<vmem>>, %arg30: memref<2x1x32xf32, #tpu.memory_space<vmem>>, %arg31: memref<2x32x32xbf16, #tpu.memory_space<vmem>>, %arg32: memref<2x1x32xf32, #tpu.memory_space<vmem>>, %arg33: memref<2x32x32xbf16, #tpu.memory_space<vmem>>, %arg34: memref<2x1x32xf32, #tpu.memory_space<vmem>>, %arg35: memref<2x32x32xbf16, #tpu.memory_space<vmem>>, %arg36: memref<2x1x32xf32, #tpu.memory_space<vmem>>, %arg37: memref<2x32x32xbf16, #tpu.memory_space<vmem>>, %arg38: memref<2x1x32xf32, #tpu.memory_space<vmem>>, %arg39: memref<2x32x128xbf16, #tpu.memory_space<vmem>>, %arg40: memref<2x1x128xf32, #tpu.memory_space<vmem>>, %arg41: memref<2x128x32xbf16, #tpu.memory_space<vmem>>, %arg42: memref<2x1x32xf32, #tpu.memory_space<vmem>>, %arg43: memref<2x1x32xf32, #tpu.memory_space<vmem>>, %arg44: memref<2x1x32xf32, #tpu.memory_space<vmem>>, %arg45: memref<2x1x32xf32, #tpu.memory_space<vmem>>, %arg46: memref<2x1x32xf32, #tpu.memory_space<vmem>>, %arg47: memref<2x1x32xf32, #tpu.memory_space<vmem>>, %arg48: memref<2x1x32xf32, #tpu.memory_space<vmem>>, %arg49: memref<1x8x32xf32, #tpu.memory_space<vmem>>, %arg50: memref<1x16x32xf32, #tpu.memory_space<vmem>>) attributes {dimension_semantics = [#tpu.dimension_semantics<parallel>], iteration_bounds = array<i64: 2>, scalar_prefetch = 0 : i64, scratch_operands = 0 : i64, tpu.core_type = #tpu.core_type<tc>, window_params = [{transform_indices = @transform_0, window_bounds = array<i64: 1, 8, 32>}, {transform_indices = @transform_1, window_bounds = array<i64: 1, 16, 32>}, {transform_indices = @transform_2, window_bounds = array<i64: 1, 1, 8>}, {transform_indices = @transform_3, window_bounds = array<i64: 1, 1, 16>}, {pipeline_mode = #tpu.pipeline_mode<synchronous>, transform_indices = @transform_4, window_bounds = array<i64: 32, 32>}, {pipeline_mode = #tpu.pipeline_mode<synchronous>, transform_indices = @transform_5, window_bounds = array<i64: 64, 32>}, {pipeline_mode = #tpu.pipeline_mode<synchronous>, transform_indices = @transform_6, window_bounds = array<i64: 2, 32, 32>}, {pipeline_mode = #tpu.pipeline_mode<synchronous>, transform_indices = @transform_7, window_bounds = array<i64: 2, 1, 32>}, {pipeline_mode = #tpu.pipeline_mode<synchronous>, transform_indices = @transform_8, window_bounds = array<i64: 2, 32, 32>}, {pipeline_mode = #tpu.pipeline_mode<synchronous>, transform_indices = @transform_9, window_bounds = array<i64: 2, 1, 32>}, {pipeline_mode = #tpu.pipeline_mode<synchronous>, transform_indices = @transform_10, window_bounds = array<i64: 2, 32, 32>}, {pipeline_mode = #tpu.pipeline_mode<synchronous>, transform_indices = @transform_11, window_bounds = array<i64: 2, 1, 32>}, {pipeline_mode = #tpu.pipeline_mode<synchronous>, transform_indices = @transform_12, window_bounds = array<i64: 2, 32, 32>}, {pipeline_mode = #tpu.pipeline_mode<synchronous>, transform_indices = @transform_13, window_bounds = array<i64: 2, 1, 32>}, {pipeline_mode = #tpu.pipeline_mode<synchronous>, transform_indices = @transform_14, window_bounds = array<i64: 2, 32, 128>}, {pipeline_mode = #tpu.pipeline_mode<synchronous>, transform_indices = @transform_15, window_bounds = array<i64: 2, 1, 128>}, {pipeline_mode = #tpu.pipeline_mode<synchronous>, transform_indices = @transform_16, window_bounds = array<i64: 2, 128, 32>}, {pipeline_mode = #tpu.pipeline_mode<synchronous>, transform_indices = @transform_17, window_bounds = array<i64: 2, 1, 32>}, {pipeline_mode = #tpu.pipeline_mode<synchronous>, transform_indices = @transform_18, window_bounds = array<i64: 2, 1, 32>}, {pipeline_mode = #tpu.pipeline_mode<synchronous>, transform_indices = @transform_19, window_bounds = array<i64: 2, 1, 32>}, {pipeline_mode = #tpu.pipeline_mode<synchronous>, transform_indices = @transform_20, window_bounds = array<i64: 2, 1, 32>}, {pipeline_mode = #tpu.pipeline_mode<synchronous>, transform_indices = @transform_21, window_bounds = array<i64: 2, 1, 32>}, {pipeline_mode = #tpu.pipeline_mode<synchronous>, transform_indices = @transform_22, window_bounds = array<i64: 2, 32, 32>}, {pipeline_mode = #tpu.pipeline_mode<synchronous>, transform_indices = @transform_23, window_bounds = array<i64: 2, 1, 32>}, {pipeline_mode = #tpu.pipeline_mode<synchronous>, transform_indices = @transform_24, window_bounds = array<i64: 2, 32, 32>}, {pipeline_mode = #tpu.pipeline_mode<synchronous>, transform_indices = @transform_25, window_bounds = array<i64: 2, 1, 32>}, {pipeline_mode = #tpu.pipeline_mode<synchronous>, transform_indices = @transform_26, window_bounds = array<i64: 2, 32, 32>}, {pipeline_mode = #tpu.pipeline_mode<synchronous>, transform_indices = @transform_27, window_bounds = array<i64: 2, 1, 32>}, {pipeline_mode = #tpu.pipeline_mode<synchronous>, transform_indices = @transform_28, window_bounds = array<i64: 2, 32, 32>}, {pipeline_mode = #tpu.pipeline_mode<synchronous>, transform_indices = @transform_29, window_bounds = array<i64: 2, 1, 32>}, {pipeline_mode = #tpu.pipeline_mode<synchronous>, transform_indices = @transform_30, window_bounds = array<i64: 2, 32, 32>}, {pipeline_mode = #tpu.pipeline_mode<synchronous>, transform_indices = @transform_31, window_bounds = array<i64: 2, 1, 32>}, {pipeline_mode = #tpu.pipeline_mode<synchronous>, transform_indices = @transform_32, window_bounds = array<i64: 2, 32, 32>}, {pipeline_mode = #tpu.pipeline_mode<synchronous>, transform_indices = @transform_33, window_bounds = array<i64: 2, 1, 32>}, {pipeline_mode = #tpu.pipeline_mode<synchronous>, transform_indices = @transform_34, window_bounds = array<i64: 2, 32, 32>}, {pipeline_mode = #tpu.pipeline_mode<synchronous>, transform_indices = @transform_35, window_bounds = array<i64: 2, 1, 32>}, {pipeline_mode = #tpu.pipeline_mode<synchronous>, transform_indices = @transform_36, window_bounds = array<i64: 2, 32, 32>}, {pipeline_mode = #tpu.pipeline_mode<synchronous>, transform_indices = @transform_37, window_bounds = array<i64: 2, 1, 32>}, {pipeline_mode = #tpu.pipeline_mode<synchronous>, transform_indices = @transform_38, window_bounds = array<i64: 2, 32, 128>}, {pipeline_mode = #tpu.pipeline_mode<synchronous>, transform_indices = @transform_39, window_bounds = array<i64: 2, 1, 128>}, {pipeline_mode = #tpu.pipeline_mode<synchronous>, transform_indices = @transform_40, window_bounds = array<i64: 2, 128, 32>}, {pipeline_mode = #tpu.pipeline_mode<synchronous>, transform_indices = @transform_41, window_bounds = array<i64: 2, 1, 32>}, {pipeline_mode = #tpu.pipeline_mode<synchronous>, transform_indices = @transform_42, window_bounds = array<i64: 2, 1, 32>}, {pipeline_mode = #tpu.pipeline_mode<synchronous>, transform_indices = @transform_43, window_bounds = array<i64: 2, 1, 32>}, {pipeline_mode = #tpu.pipeline_mode<synchronous>, transform_indices = @transform_44, window_bounds = array<i64: 2, 1, 32>}, {pipeline_mode = #tpu.pipeline_mode<synchronous>, transform_indices = @transform_45, window_bounds = array<i64: 2, 1, 32>}, {pipeline_mode = #tpu.pipeline_mode<synchronous>, transform_indices = @transform_46, window_bounds = array<i64: 2, 1, 32>}, {pipeline_mode = #tpu.pipeline_mode<synchronous>, transform_indices = @transform_47, window_bounds = array<i64: 2, 1, 32>}, {transform_indices = @transform_48, window_bounds = array<i64: 1, 8, 32>}, {transform_indices = @transform_49, window_bounds = array<i64: 1, 16, 32>}]} {
    %c0 = arith.constant 0 : index
    %c0_0 = arith.constant 0 : index
    %c0_1 = arith.constant 0 : index
    %0 = vector.load %arg1[%c0, %c0_0, %c0_1] : memref<1x8x32xf32, #tpu.memory_space<vmem>>, vector<1x8x32xf32>
    %1 = vector.shape_cast %0 : vector<1x8x32xf32> to vector<8x32xf32>
    %c0_2 = arith.constant 0 : index
    %c0_3 = arith.constant 0 : index
    %c0_4 = arith.constant 0 : index
    %2 = vector.load %arg2[%c0_2, %c0_3, %c0_4] : memref<1x16x32xf32, #tpu.memory_space<vmem>>, vector<1x16x32xf32>
    %3 = vector.shape_cast %2 : vector<1x16x32xf32> to vector<16x32xf32>
    %c0_5 = arith.constant 0 : index
    %c0_6 = arith.constant 0 : index
    %c0_7 = arith.constant 0 : index
    %4 = vector.load %arg3[%c0_5, %c0_6, %c0_7] : memref<1x1x8xf32, #tpu.memory_space<vmem>>, vector<1x1x8xf32>
    %5 = vector.shape_cast %4 : vector<1x1x8xf32> to vector<1x8xf32>
    %cst = arith.constant 0.000000e+00 : f32
    %6 = vector.broadcast %cst : f32 to vector<1x8xf32>
    %7 = arith.cmpf ogt, %5, %6 : vector<1x8xf32>
    %c0_8 = arith.constant 0 : index
    %c0_9 = arith.constant 0 : index
    %c0_10 = arith.constant 0 : index
    %8 = vector.load %arg4[%c0_8, %c0_9, %c0_10] : memref<1x1x16xf32, #tpu.memory_space<vmem>>, vector<1x1x16xf32>
    %9 = vector.shape_cast %8 : vector<1x1x16xf32> to vector<1x16xf32>
    %cst_11 = arith.constant 0.000000e+00 : f32
    %10 = vector.broadcast %cst_11 : f32 to vector<1x16xf32>
    %11 = arith.cmpf ogt, %9, %10 : vector<1x16xf32>
    %c0_12 = arith.constant 0 : index
    %c0_13 = arith.constant 0 : index
    %12 = vector.load %arg5[%c0_12, %c0_13] : memref<32x32xf32, #tpu.memory_space<vmem>>, vector<32x32xf32>
    %c0_14 = arith.constant 0 : index
    %c0_15 = arith.constant 0 : index
    %13 = vector.load %arg6[%c0_14, %c0_15] : memref<64x32xf32, #tpu.memory_space<vmem>>, vector<64x32xf32>
    %c0_16 = arith.constant 0 : index
    %c0_17 = arith.constant 0 : index
    %c0_18 = arith.constant 0 : index
    %14 = vector.load %arg7[%c0_16, %c0_17, %c0_18] : memref<2x32x32xbf16, #tpu.memory_space<vmem>>, vector<1x32x32xbf16>
    %15 = vector.shape_cast %14 : vector<1x32x32xbf16> to vector<32x32xbf16>
    %c0_19 = arith.constant 0 : index
    %c0_20 = arith.constant 0 : index
    %c0_21 = arith.constant 0 : index
    %16 = vector.load %arg8[%c0_19, %c0_20, %c0_21] : memref<2x1x32xf32, #tpu.memory_space<vmem>>, vector<1x1x32xf32>
    %17 = vector.shape_cast %16 : vector<1x1x32xf32> to vector<1x32xf32>
    %c0_22 = arith.constant 0 : index
    %c0_23 = arith.constant 0 : index
    %c0_24 = arith.constant 0 : index
    %18 = vector.load %arg9[%c0_22, %c0_23, %c0_24] : memref<2x32x32xbf16, #tpu.memory_space<vmem>>, vector<1x32x32xbf16>
    %19 = vector.shape_cast %18 : vector<1x32x32xbf16> to vector<32x32xbf16>
    %c0_25 = arith.constant 0 : index
    %c0_26 = arith.constant 0 : index
    %c0_27 = arith.constant 0 : index
    %20 = vector.load %arg10[%c0_25, %c0_26, %c0_27] : memref<2x1x32xf32, #tpu.memory_space<vmem>>, vector<1x1x32xf32>
    %21 = vector.shape_cast %20 : vector<1x1x32xf32> to vector<1x32xf32>
    %c0_28 = arith.constant 0 : index
    %c0_29 = arith.constant 0 : index
    %c0_30 = arith.constant 0 : index
    %22 = vector.load %arg11[%c0_28, %c0_29, %c0_30] : memref<2x32x32xbf16, #tpu.memory_space<vmem>>, vector<1x32x32xbf16>
    %23 = vector.shape_cast %22 : vector<1x32x32xbf16> to vector<32x32xbf16>
    %c0_31 = arith.constant 0 : index
    %c0_32 = arith.constant 0 : index
    %c0_33 = arith.constant 0 : index
    %24 = vector.load %arg12[%c0_31, %c0_32, %c0_33] : memref<2x1x32xf32, #tpu.memory_space<vmem>>, vector<1x1x32xf32>
    %25 = vector.shape_cast %24 : vector<1x1x32xf32> to vector<1x32xf32>
    %c0_34 = arith.constant 0 : index
    %c0_35 = arith.constant 0 : index
    %c0_36 = arith.constant 0 : index
    %26 = vector.load %arg13[%c0_34, %c0_35, %c0_36] : memref<2x32x32xbf16, #tpu.memory_space<vmem>>, vector<1x32x32xbf16>
    %27 = vector.shape_cast %26 : vector<1x32x32xbf16> to vector<32x32xbf16>
    %c0_37 = arith.constant 0 : index
    %c0_38 = arith.constant 0 : index
    %c0_39 = arith.constant 0 : index
    %28 = vector.load %arg14[%c0_37, %c0_38, %c0_39] : memref<2x1x32xf32, #tpu.memory_space<vmem>>, vector<1x1x32xf32>
    %29 = vector.shape_cast %28 : vector<1x1x32xf32> to vector<1x32xf32>
    %30 = arith.truncf %1 : vector<8x32xf32> to vector<8x32xbf16>
    %31 = arith.truncf %1 : vector<8x32xf32> to vector<8x32xbf16>
    %cst_40 = arith.constant dense<0.000000e+00> : vector<8x32xf32>
    %32 = tpu.matmul %30, %15, %cst_40 {dimension_numbers = #tpu.dot_dimension_numbers<[1], [0], [0], [1], [0, 0, 1, 1], [], []>} : vector<8x32xbf16>, vector<32x32xbf16>, vector<8x32xf32> -> vector<8x32xf32>
    %33 = vector.broadcast %17 : vector<1x32xf32> to vector<8x32xf32>
    %34 = arith.addf %32, %33 : vector<8x32xf32>
    %cst_41 = arith.constant dense<0.000000e+00> : vector<8x32xf32>
    %35 = tpu.matmul %31, %19, %cst_41 {dimension_numbers = #tpu.dot_dimension_numbers<[1], [0], [0], [1], [0, 0, 1, 1], [], []>} : vector<8x32xbf16>, vector<32x32xbf16>, vector<8x32xf32> -> vector<8x32xf32>
    %36 = vector.broadcast %21 : vector<1x32xf32> to vector<8x32xf32>
    %37 = arith.addf %35, %36 : vector<8x32xf32>
    %cst_42 = arith.constant dense<0.000000e+00> : vector<8x32xf32>
    %38 = tpu.matmul %31, %23, %cst_42 {dimension_numbers = #tpu.dot_dimension_numbers<[1], [0], [0], [1], [0, 0, 1, 1], [], []>} : vector<8x32xbf16>, vector<32x32xbf16>, vector<8x32xf32> -> vector<8x32xf32>
    %39 = vector.broadcast %25 : vector<1x32xf32> to vector<8x32xf32>
    %40 = arith.addf %38, %39 : vector<8x32xf32>
    %41 = tpu.concatenate %34, %34, %34, %34 in 0 : vector<8x32xf32>, vector<8x32xf32>, vector<8x32xf32>, vector<8x32xf32> -> vector<32x32xf32>
    %42 = arith.mulf %41, %12 : vector<32x32xf32>
    %43 = arith.truncf %42 : vector<32x32xf32> to vector<32x32xbf16>
    %44 = arith.truncf %37 : vector<8x32xf32> to vector<8x32xbf16>
    %cst_43 = arith.constant dense<0.000000e+00> : vector<32x8xf32>
    %45 = tpu.matmul %43, %44, %cst_43 {dimension_numbers = #tpu.dot_dimension_numbers<[1], [1], [0], [0], [0, 0, 1, 0], [], []>} : vector<32x32xbf16>, vector<8x32xbf16>, vector<32x8xf32> -> vector<32x8xf32>
    %cst_44 = arith.constant -1.000000e+09 : f32
    %46 = vector.shape_cast %7 : vector<1x8xi1> to vector<1x8xi1>
    %47 = vector.broadcast %46 : vector<1x8xi1> to vector<32x8xi1>
    %48 = vector.broadcast %cst_44 : f32 to vector<32x8xf32>
    %49 = arith.select %47, %48, %45 : vector<32x8xi1>, vector<32x8xf32>
    %cst_45 = arith.constant dense<0xFF800000> : vector<32xf32>
    %50 = vector.multi_reduction <maximumf>, %49, %cst_45 [1] : vector<32x8xf32> to vector<32xf32>
    %51 = vector.shape_cast %50 : vector<32xf32> to vector<32x1xf32>
    %52 = vector.broadcast %51 : vector<32x1xf32> to vector<32x8xf32>
    %53 = arith.subf %49, %52 : vector<32x8xf32>
    %54 = math.exp %53 : vector<32x8xf32>
    %cst_46 = arith.constant dense<0.000000e+00> : vector<32xf32>
    %55 = vector.multi_reduction <add>, %54, %cst_46 [1] : vector<32x8xf32> to vector<32xf32>
    %56 = vector.shape_cast %55 : vector<32xf32> to vector<32x1xf32>
    %57 = vector.broadcast %56 : vector<32x1xf32> to vector<32x8xf32>
    %58 = arith.divf %54, %57 : vector<32x8xf32>
    %59 = arith.truncf %58 : vector<32x8xf32> to vector<32x8xbf16>
    %60 = arith.truncf %40 : vector<8x32xf32> to vector<8x32xbf16>
    %cst_47 = arith.constant dense<0.000000e+00> : vector<32x32xf32>
    %61 = tpu.matmul %59, %60, %cst_47 {dimension_numbers = #tpu.dot_dimension_numbers<[1], [0], [0], [1], [0, 0, 1, 1], [], []>} : vector<32x8xbf16>, vector<8x32xbf16>, vector<32x32xf32> -> vector<32x32xf32>
    %62 = arith.mulf %61, %12 : vector<32x32xf32>
    %63 = vector.extract_strided_slice %62 {offsets = [0, 0], sizes = [8, 32], strides = [1, 1]} : vector<32x32xf32> to vector<8x32xf32>
    %64 = vector.extract_strided_slice %62 {offsets = [8, 0], sizes = [8, 32], strides = [1, 1]} : vector<32x32xf32> to vector<8x32xf32>
    %65 = arith.addf %63, %64 : vector<8x32xf32>
    %66 = vector.extract_strided_slice %62 {offsets = [16, 0], sizes = [8, 32], strides = [1, 1]} : vector<32x32xf32> to vector<8x32xf32>
    %67 = arith.addf %65, %66 : vector<8x32xf32>
    %68 = vector.extract_strided_slice %62 {offsets = [24, 0], sizes = [8, 32], strides = [1, 1]} : vector<32x32xf32> to vector<8x32xf32>
    %69 = arith.addf %67, %68 : vector<8x32xf32>
    %70 = arith.truncf %69 : vector<8x32xf32> to vector<8x32xbf16>
    %cst_48 = arith.constant dense<0.000000e+00> : vector<8x32xf32>
    %71 = tpu.matmul %70, %27, %cst_48 {dimension_numbers = #tpu.dot_dimension_numbers<[1], [0], [0], [1], [0, 0, 1, 1], [], []>} : vector<8x32xbf16>, vector<32x32xbf16>, vector<8x32xf32> -> vector<8x32xf32>
    %72 = vector.broadcast %29 : vector<1x32xf32> to vector<8x32xf32>
    %73 = arith.addf %71, %72 : vector<8x32xf32>
    %74 = arith.addf %1, %73 : vector<8x32xf32>
    %c0_49 = arith.constant 0 : index
    %c0_50 = arith.constant 0 : index
    %c0_51 = arith.constant 0 : index
    %75 = vector.load %arg19[%c0_49, %c0_50, %c0_51] : memref<2x1x32xf32, #tpu.memory_space<vmem>>, vector<1x1x32xf32>
    %76 = vector.shape_cast %75 : vector<1x1x32xf32> to vector<1x32xf32>
    %c0_52 = arith.constant 0 : index
    %c0_53 = arith.constant 0 : index
    %c0_54 = arith.constant 0 : index
    %77 = vector.load %arg20[%c0_52, %c0_53, %c0_54] : memref<2x1x32xf32, #tpu.memory_space<vmem>>, vector<1x1x32xf32>
    %78 = vector.shape_cast %77 : vector<1x1x32xf32> to vector<1x32xf32>
    %cst_55 = arith.constant dense<0.000000e+00> : vector<8xf32>
    %79 = vector.multi_reduction <add>, %74, %cst_55 [1] : vector<8x32xf32> to vector<8xf32>
    %80 = vector.shape_cast %79 : vector<8xf32> to vector<8x1xf32>
    %cst_56 = arith.constant 3.200000e+01 : f32
    %81 = vector.broadcast %cst_56 : f32 to vector<8x1xf32>
    %82 = arith.divf %80, %81 : vector<8x1xf32>
    %83 = vector.broadcast %82 : vector<8x1xf32> to vector<8x32xf32>
    %84 = arith.subf %74, %83 : vector<8x32xf32>
    %85 = arith.mulf %84, %84 : vector<8x32xf32>
    %cst_57 = arith.constant dense<0.000000e+00> : vector<8xf32>
    %86 = vector.multi_reduction <add>, %85, %cst_57 [1] : vector<8x32xf32> to vector<8xf32>
    %87 = vector.shape_cast %86 : vector<8xf32> to vector<8x1xf32>
    %cst_58 = arith.constant 0.0322580636 : f32
    %88 = vector.broadcast %cst_58 : f32 to vector<8x1xf32>
    %89 = arith.mulf %87, %88 : vector<8x1xf32>
    %90 = math.sqrt %89 : vector<8x1xf32>
    %cst_59 = arith.constant 9.99999997E-7 : f32
    %91 = vector.broadcast %cst_59 : f32 to vector<8x1xf32>
    %92 = arith.addf %90, %91 : vector<8x1xf32>
    %93 = vector.broadcast %92 : vector<8x1xf32> to vector<8x32xf32>
    %94 = arith.divf %84, %93 : vector<8x32xf32>
    %95 = vector.broadcast %76 : vector<1x32xf32> to vector<8x32xf32>
    %96 = arith.mulf %95, %94 : vector<8x32xf32>
    %97 = vector.broadcast %78 : vector<1x32xf32> to vector<8x32xf32>
    %98 = arith.addf %96, %97 : vector<8x32xf32>
    %c0_60 = arith.constant 0 : index
    %c0_61 = arith.constant 0 : index
    %c0_62 = arith.constant 0 : index
    %99 = vector.load %arg15[%c0_60, %c0_61, %c0_62] : memref<2x32x128xbf16, #tpu.memory_space<vmem>>, vector<1x32x128xbf16>
    %100 = vector.shape_cast %99 : vector<1x32x128xbf16> to vector<32x128xbf16>
    %c0_63 = arith.constant 0 : index
    %c0_64 = arith.constant 0 : index
    %c0_65 = arith.constant 0 : index
    %101 = vector.load %arg16[%c0_63, %c0_64, %c0_65] : memref<2x1x128xf32, #tpu.memory_space<vmem>>, vector<1x1x128xf32>
    %102 = vector.shape_cast %101 : vector<1x1x128xf32> to vector<1x128xf32>
    %c0_66 = arith.constant 0 : index
    %c0_67 = arith.constant 0 : index
    %c0_68 = arith.constant 0 : index
    %103 = vector.load %arg17[%c0_66, %c0_67, %c0_68] : memref<2x128x32xbf16, #tpu.memory_space<vmem>>, vector<1x128x32xbf16>
    %104 = vector.shape_cast %103 : vector<1x128x32xbf16> to vector<128x32xbf16>
    %c0_69 = arith.constant 0 : index
    %c0_70 = arith.constant 0 : index
    %c0_71 = arith.constant 0 : index
    %105 = vector.load %arg18[%c0_69, %c0_70, %c0_71] : memref<2x1x32xf32, #tpu.memory_space<vmem>>, vector<1x1x32xf32>
    %106 = vector.shape_cast %105 : vector<1x1x32xf32> to vector<1x32xf32>
    %107 = arith.truncf %98 : vector<8x32xf32> to vector<8x32xbf16>
    %cst_72 = arith.constant dense<0.000000e+00> : vector<8x128xf32>
    %108 = tpu.matmul %107, %100, %cst_72 {dimension_numbers = #tpu.dot_dimension_numbers<[1], [0], [0], [1], [0, 0, 1, 1], [], []>} : vector<8x32xbf16>, vector<32x128xbf16>, vector<8x128xf32> -> vector<8x128xf32>
    %109 = vector.broadcast %102 : vector<1x128xf32> to vector<8x128xf32>
    %110 = arith.addf %108, %109 : vector<8x128xf32>
    %cst_73 = arith.constant 0.000000e+00 : f32
    %111 = vector.broadcast %cst_73 : f32 to vector<8x128xf32>
    %112 = arith.maximumf %110, %111 : vector<8x128xf32>
    %113 = arith.truncf %112 : vector<8x128xf32> to vector<8x128xbf16>
    %cst_74 = arith.constant dense<0.000000e+00> : vector<8x32xf32>
    %114 = tpu.matmul %113, %104, %cst_74 {dimension_numbers = #tpu.dot_dimension_numbers<[1], [0], [0], [1], [0, 0, 1, 1], [], []>} : vector<8x128xbf16>, vector<128x32xbf16>, vector<8x32xf32> -> vector<8x32xf32>
    %115 = vector.broadcast %106 : vector<1x32xf32> to vector<8x32xf32>
    %116 = arith.addf %114, %115 : vector<8x32xf32>
    %117 = arith.addf %98, %116 : vector<8x32xf32>
    %c0_75 = arith.constant 0 : index
    %c0_76 = arith.constant 0 : index
    %c0_77 = arith.constant 0 : index
    %118 = vector.load %arg21[%c0_75, %c0_76, %c0_77] : memref<2x1x32xf32, #tpu.memory_space<vmem>>, vector<1x1x32xf32>
    %119 = vector.shape_cast %118 : vector<1x1x32xf32> to vector<1x32xf32>
    %c0_78 = arith.constant 0 : index
    %c0_79 = arith.constant 0 : index
    %c0_80 = arith.constant 0 : index
    %120 = vector.load %arg22[%c0_78, %c0_79, %c0_80] : memref<2x1x32xf32, #tpu.memory_space<vmem>>, vector<1x1x32xf32>
    %121 = vector.shape_cast %120 : vector<1x1x32xf32> to vector<1x32xf32>
    %cst_81 = arith.constant dense<0.000000e+00> : vector<8xf32>
    %122 = vector.multi_reduction <add>, %117, %cst_81 [1] : vector<8x32xf32> to vector<8xf32>
    %123 = vector.shape_cast %122 : vector<8xf32> to vector<8x1xf32>
    %cst_82 = arith.constant 3.200000e+01 : f32
    %124 = vector.broadcast %cst_82 : f32 to vector<8x1xf32>
    %125 = arith.divf %123, %124 : vector<8x1xf32>
    %126 = vector.broadcast %125 : vector<8x1xf32> to vector<8x32xf32>
    %127 = arith.subf %117, %126 : vector<8x32xf32>
    %128 = arith.mulf %127, %127 : vector<8x32xf32>
    %cst_83 = arith.constant dense<0.000000e+00> : vector<8xf32>
    %129 = vector.multi_reduction <add>, %128, %cst_83 [1] : vector<8x32xf32> to vector<8xf32>
    %130 = vector.shape_cast %129 : vector<8xf32> to vector<8x1xf32>
    %cst_84 = arith.constant 0.0322580636 : f32
    %131 = vector.broadcast %cst_84 : f32 to vector<8x1xf32>
    %132 = arith.mulf %130, %131 : vector<8x1xf32>
    %133 = math.sqrt %132 : vector<8x1xf32>
    %cst_85 = arith.constant 9.99999997E-7 : f32
    %134 = vector.broadcast %cst_85 : f32 to vector<8x1xf32>
    %135 = arith.addf %133, %134 : vector<8x1xf32>
    %136 = vector.broadcast %135 : vector<8x1xf32> to vector<8x32xf32>
    %137 = arith.divf %127, %136 : vector<8x32xf32>
    %138 = vector.broadcast %119 : vector<1x32xf32> to vector<8x32xf32>
    %139 = arith.mulf %138, %137 : vector<8x32xf32>
    %140 = vector.broadcast %121 : vector<1x32xf32> to vector<8x32xf32>
    %141 = arith.addf %139, %140 : vector<8x32xf32>
    %c1 = arith.constant 1 : index
    %c0_86 = arith.constant 0 : index
    %c0_87 = arith.constant 0 : index
    %142 = vector.load %arg7[%c1, %c0_86, %c0_87] : memref<2x32x32xbf16, #tpu.memory_space<vmem>>, vector<1x32x32xbf16>
    %143 = vector.shape_cast %142 : vector<1x32x32xbf16> to vector<32x32xbf16>
    %c1_88 = arith.constant 1 : index
    %c0_89 = arith.constant 0 : index
    %c0_90 = arith.constant 0 : index
    %144 = vector.load %arg8[%c1_88, %c0_89, %c0_90] : memref<2x1x32xf32, #tpu.memory_space<vmem>>, vector<1x1x32xf32>
    %145 = vector.shape_cast %144 : vector<1x1x32xf32> to vector<1x32xf32>
    %c1_91 = arith.constant 1 : index
    %c0_92 = arith.constant 0 : index
    %c0_93 = arith.constant 0 : index
    %146 = vector.load %arg9[%c1_91, %c0_92, %c0_93] : memref<2x32x32xbf16, #tpu.memory_space<vmem>>, vector<1x32x32xbf16>
    %147 = vector.shape_cast %146 : vector<1x32x32xbf16> to vector<32x32xbf16>
    %c1_94 = arith.constant 1 : index
    %c0_95 = arith.constant 0 : index
    %c0_96 = arith.constant 0 : index
    %148 = vector.load %arg10[%c1_94, %c0_95, %c0_96] : memref<2x1x32xf32, #tpu.memory_space<vmem>>, vector<1x1x32xf32>
    %149 = vector.shape_cast %148 : vector<1x1x32xf32> to vector<1x32xf32>
    %c1_97 = arith.constant 1 : index
    %c0_98 = arith.constant 0 : index
    %c0_99 = arith.constant 0 : index
    %150 = vector.load %arg11[%c1_97, %c0_98, %c0_99] : memref<2x32x32xbf16, #tpu.memory_space<vmem>>, vector<1x32x32xbf16>
    %151 = vector.shape_cast %150 : vector<1x32x32xbf16> to vector<32x32xbf16>
    %c1_100 = arith.constant 1 : index
    %c0_101 = arith.constant 0 : index
    %c0_102 = arith.constant 0 : index
    %152 = vector.load %arg12[%c1_100, %c0_101, %c0_102] : memref<2x1x32xf32, #tpu.memory_space<vmem>>, vector<1x1x32xf32>
    %153 = vector.shape_cast %152 : vector<1x1x32xf32> to vector<1x32xf32>
    %c1_103 = arith.constant 1 : index
    %c0_104 = arith.constant 0 : index
    %c0_105 = arith.constant 0 : index
    %154 = vector.load %arg13[%c1_103, %c0_104, %c0_105] : memref<2x32x32xbf16, #tpu.memory_space<vmem>>, vector<1x32x32xbf16>
    %155 = vector.shape_cast %154 : vector<1x32x32xbf16> to vector<32x32xbf16>
    %c1_106 = arith.constant 1 : index
    %c0_107 = arith.constant 0 : index
    %c0_108 = arith.constant 0 : index
    %156 = vector.load %arg14[%c1_106, %c0_107, %c0_108] : memref<2x1x32xf32, #tpu.memory_space<vmem>>, vector<1x1x32xf32>
    %157 = vector.shape_cast %156 : vector<1x1x32xf32> to vector<1x32xf32>
    %158 = arith.truncf %141 : vector<8x32xf32> to vector<8x32xbf16>
    %159 = arith.truncf %141 : vector<8x32xf32> to vector<8x32xbf16>
    %cst_109 = arith.constant dense<0.000000e+00> : vector<8x32xf32>
    %160 = tpu.matmul %158, %143, %cst_109 {dimension_numbers = #tpu.dot_dimension_numbers<[1], [0], [0], [1], [0, 0, 1, 1], [], []>} : vector<8x32xbf16>, vector<32x32xbf16>, vector<8x32xf32> -> vector<8x32xf32>
    %161 = vector.broadcast %145 : vector<1x32xf32> to vector<8x32xf32>
    %162 = arith.addf %160, %161 : vector<8x32xf32>
    %cst_110 = arith.constant dense<0.000000e+00> : vector<8x32xf32>
    %163 = tpu.matmul %159, %147, %cst_110 {dimension_numbers = #tpu.dot_dimension_numbers<[1], [0], [0], [1], [0, 0, 1, 1], [], []>} : vector<8x32xbf16>, vector<32x32xbf16>, vector<8x32xf32> -> vector<8x32xf32>
    %164 = vector.broadcast %149 : vector<1x32xf32> to vector<8x32xf32>
    %165 = arith.addf %163, %164 : vector<8x32xf32>
    %cst_111 = arith.constant dense<0.000000e+00> : vector<8x32xf32>
    %166 = tpu.matmul %159, %151, %cst_111 {dimension_numbers = #tpu.dot_dimension_numbers<[1], [0], [0], [1], [0, 0, 1, 1], [], []>} : vector<8x32xbf16>, vector<32x32xbf16>, vector<8x32xf32> -> vector<8x32xf32>
    %167 = vector.broadcast %153 : vector<1x32xf32> to vector<8x32xf32>
    %168 = arith.addf %166, %167 : vector<8x32xf32>
    %169 = tpu.concatenate %162, %162, %162, %162 in 0 : vector<8x32xf32>, vector<8x32xf32>, vector<8x32xf32>, vector<8x32xf32> -> vector<32x32xf32>
    %170 = arith.mulf %169, %12 : vector<32x32xf32>
    %171 = arith.truncf %170 : vector<32x32xf32> to vector<32x32xbf16>
    %172 = arith.truncf %165 : vector<8x32xf32> to vector<8x32xbf16>
    %cst_112 = arith.constant dense<0.000000e+00> : vector<32x8xf32>
    %173 = tpu.matmul %171, %172, %cst_112 {dimension_numbers = #tpu.dot_dimension_numbers<[1], [1], [0], [0], [0, 0, 1, 0], [], []>} : vector<32x32xbf16>, vector<8x32xbf16>, vector<32x8xf32> -> vector<32x8xf32>
    %cst_113 = arith.constant -1.000000e+09 : f32
    %174 = vector.shape_cast %7 : vector<1x8xi1> to vector<1x8xi1>
    %175 = vector.broadcast %174 : vector<1x8xi1> to vector<32x8xi1>
    %176 = vector.broadcast %cst_113 : f32 to vector<32x8xf32>
    %177 = arith.select %175, %176, %173 : vector<32x8xi1>, vector<32x8xf32>
    %cst_114 = arith.constant dense<0xFF800000> : vector<32xf32>
    %178 = vector.multi_reduction <maximumf>, %177, %cst_114 [1] : vector<32x8xf32> to vector<32xf32>
    %179 = vector.shape_cast %178 : vector<32xf32> to vector<32x1xf32>
    %180 = vector.broadcast %179 : vector<32x1xf32> to vector<32x8xf32>
    %181 = arith.subf %177, %180 : vector<32x8xf32>
    %182 = math.exp %181 : vector<32x8xf32>
    %cst_115 = arith.constant dense<0.000000e+00> : vector<32xf32>
    %183 = vector.multi_reduction <add>, %182, %cst_115 [1] : vector<32x8xf32> to vector<32xf32>
    %184 = vector.shape_cast %183 : vector<32xf32> to vector<32x1xf32>
    %185 = vector.broadcast %184 : vector<32x1xf32> to vector<32x8xf32>
    %186 = arith.divf %182, %185 : vector<32x8xf32>
    %187 = arith.truncf %186 : vector<32x8xf32> to vector<32x8xbf16>
    %188 = arith.truncf %168 : vector<8x32xf32> to vector<8x32xbf16>
    %cst_116 = arith.constant dense<0.000000e+00> : vector<32x32xf32>
    %189 = tpu.matmul %187, %188, %cst_116 {dimension_numbers = #tpu.dot_dimension_numbers<[1], [0], [0], [1], [0, 0, 1, 1], [], []>} : vector<32x8xbf16>, vector<8x32xbf16>, vector<32x32xf32> -> vector<32x32xf32>
    %190 = arith.mulf %189, %12 : vector<32x32xf32>
    %191 = vector.extract_strided_slice %190 {offsets = [0, 0], sizes = [8, 32], strides = [1, 1]} : vector<32x32xf32> to vector<8x32xf32>
    %192 = vector.extract_strided_slice %190 {offsets = [8, 0], sizes = [8, 32], strides = [1, 1]} : vector<32x32xf32> to vector<8x32xf32>
    %193 = arith.addf %191, %192 : vector<8x32xf32>
    %194 = vector.extract_strided_slice %190 {offsets = [16, 0], sizes = [8, 32], strides = [1, 1]} : vector<32x32xf32> to vector<8x32xf32>
    %195 = arith.addf %193, %194 : vector<8x32xf32>
    %196 = vector.extract_strided_slice %190 {offsets = [24, 0], sizes = [8, 32], strides = [1, 1]} : vector<32x32xf32> to vector<8x32xf32>
    %197 = arith.addf %195, %196 : vector<8x32xf32>
    %198 = arith.truncf %197 : vector<8x32xf32> to vector<8x32xbf16>
    %cst_117 = arith.constant dense<0.000000e+00> : vector<8x32xf32>
    %199 = tpu.matmul %198, %155, %cst_117 {dimension_numbers = #tpu.dot_dimension_numbers<[1], [0], [0], [1], [0, 0, 1, 1], [], []>} : vector<8x32xbf16>, vector<32x32xbf16>, vector<8x32xf32> -> vector<8x32xf32>
    %200 = vector.broadcast %157 : vector<1x32xf32> to vector<8x32xf32>
    %201 = arith.addf %199, %200 : vector<8x32xf32>
    %202 = arith.addf %141, %201 : vector<8x32xf32>
    %c1_118 = arith.constant 1 : index
    %c0_119 = arith.constant 0 : index
    %c0_120 = arith.constant 0 : index
    %203 = vector.load %arg19[%c1_118, %c0_119, %c0_120] : memref<2x1x32xf32, #tpu.memory_space<vmem>>, vector<1x1x32xf32>
    %204 = vector.shape_cast %203 : vector<1x1x32xf32> to vector<1x32xf32>
    %c1_121 = arith.constant 1 : index
    %c0_122 = arith.constant 0 : index
    %c0_123 = arith.constant 0 : index
    %205 = vector.load %arg20[%c1_121, %c0_122, %c0_123] : memref<2x1x32xf32, #tpu.memory_space<vmem>>, vector<1x1x32xf32>
    %206 = vector.shape_cast %205 : vector<1x1x32xf32> to vector<1x32xf32>
    %cst_124 = arith.constant dense<0.000000e+00> : vector<8xf32>
    %207 = vector.multi_reduction <add>, %202, %cst_124 [1] : vector<8x32xf32> to vector<8xf32>
    %208 = vector.shape_cast %207 : vector<8xf32> to vector<8x1xf32>
    %cst_125 = arith.constant 3.200000e+01 : f32
    %209 = vector.broadcast %cst_125 : f32 to vector<8x1xf32>
    %210 = arith.divf %208, %209 : vector<8x1xf32>
    %211 = vector.broadcast %210 : vector<8x1xf32> to vector<8x32xf32>
    %212 = arith.subf %202, %211 : vector<8x32xf32>
    %213 = arith.mulf %212, %212 : vector<8x32xf32>
    %cst_126 = arith.constant dense<0.000000e+00> : vector<8xf32>
    %214 = vector.multi_reduction <add>, %213, %cst_126 [1] : vector<8x32xf32> to vector<8xf32>
    %215 = vector.shape_cast %214 : vector<8xf32> to vector<8x1xf32>
    %cst_127 = arith.constant 0.0322580636 : f32
    %216 = vector.broadcast %cst_127 : f32 to vector<8x1xf32>
    %217 = arith.mulf %215, %216 : vector<8x1xf32>
    %218 = math.sqrt %217 : vector<8x1xf32>
    %cst_128 = arith.constant 9.99999997E-7 : f32
    %219 = vector.broadcast %cst_128 : f32 to vector<8x1xf32>
    %220 = arith.addf %218, %219 : vector<8x1xf32>
    %221 = vector.broadcast %220 : vector<8x1xf32> to vector<8x32xf32>
    %222 = arith.divf %212, %221 : vector<8x32xf32>
    %223 = vector.broadcast %204 : vector<1x32xf32> to vector<8x32xf32>
    %224 = arith.mulf %223, %222 : vector<8x32xf32>
    %225 = vector.broadcast %206 : vector<1x32xf32> to vector<8x32xf32>
    %226 = arith.addf %224, %225 : vector<8x32xf32>
    %c1_129 = arith.constant 1 : index
    %c0_130 = arith.constant 0 : index
    %c0_131 = arith.constant 0 : index
    %227 = vector.load %arg15[%c1_129, %c0_130, %c0_131] : memref<2x32x128xbf16, #tpu.memory_space<vmem>>, vector<1x32x128xbf16>
    %228 = vector.shape_cast %227 : vector<1x32x128xbf16> to vector<32x128xbf16>
    %c1_132 = arith.constant 1 : index
    %c0_133 = arith.constant 0 : index
    %c0_134 = arith.constant 0 : index
    %229 = vector.load %arg16[%c1_132, %c0_133, %c0_134] : memref<2x1x128xf32, #tpu.memory_space<vmem>>, vector<1x1x128xf32>
    %230 = vector.shape_cast %229 : vector<1x1x128xf32> to vector<1x128xf32>
    %c1_135 = arith.constant 1 : index
    %c0_136 = arith.constant 0 : index
    %c0_137 = arith.constant 0 : index
    %231 = vector.load %arg17[%c1_135, %c0_136, %c0_137] : memref<2x128x32xbf16, #tpu.memory_space<vmem>>, vector<1x128x32xbf16>
    %232 = vector.shape_cast %231 : vector<1x128x32xbf16> to vector<128x32xbf16>
    %c1_138 = arith.constant 1 : index
    %c0_139 = arith.constant 0 : index
    %c0_140 = arith.constant 0 : index
    %233 = vector.load %arg18[%c1_138, %c0_139, %c0_140] : memref<2x1x32xf32, #tpu.memory_space<vmem>>, vector<1x1x32xf32>
    %234 = vector.shape_cast %233 : vector<1x1x32xf32> to vector<1x32xf32>
    %235 = arith.truncf %226 : vector<8x32xf32> to vector<8x32xbf16>
    %cst_141 = arith.constant dense<0.000000e+00> : vector<8x128xf32>
    %236 = tpu.matmul %235, %228, %cst_141 {dimension_numbers = #tpu.dot_dimension_numbers<[1], [0], [0], [1], [0, 0, 1, 1], [], []>} : vector<8x32xbf16>, vector<32x128xbf16>, vector<8x128xf32> -> vector<8x128xf32>
    %237 = vector.broadcast %230 : vector<1x128xf32> to vector<8x128xf32>
    %238 = arith.addf %236, %237 : vector<8x128xf32>
    %cst_142 = arith.constant 0.000000e+00 : f32
    %239 = vector.broadcast %cst_142 : f32 to vector<8x128xf32>
    %240 = arith.maximumf %238, %239 : vector<8x128xf32>
    %241 = arith.truncf %240 : vector<8x128xf32> to vector<8x128xbf16>
    %cst_143 = arith.constant dense<0.000000e+00> : vector<8x32xf32>
    %242 = tpu.matmul %241, %232, %cst_143 {dimension_numbers = #tpu.dot_dimension_numbers<[1], [0], [0], [1], [0, 0, 1, 1], [], []>} : vector<8x128xbf16>, vector<128x32xbf16>, vector<8x32xf32> -> vector<8x32xf32>
    %243 = vector.broadcast %234 : vector<1x32xf32> to vector<8x32xf32>
    %244 = arith.addf %242, %243 : vector<8x32xf32>
    %245 = arith.addf %226, %244 : vector<8x32xf32>
    %c1_144 = arith.constant 1 : index
    %c0_145 = arith.constant 0 : index
    %c0_146 = arith.constant 0 : index
    %246 = vector.load %arg21[%c1_144, %c0_145, %c0_146] : memref<2x1x32xf32, #tpu.memory_space<vmem>>, vector<1x1x32xf32>
    %247 = vector.shape_cast %246 : vector<1x1x32xf32> to vector<1x32xf32>
    %c1_147 = arith.constant 1 : index
    %c0_148 = arith.constant 0 : index
    %c0_149 = arith.constant 0 : index
    %248 = vector.load %arg22[%c1_147, %c0_148, %c0_149] : memref<2x1x32xf32, #tpu.memory_space<vmem>>, vector<1x1x32xf32>
    %249 = vector.shape_cast %248 : vector<1x1x32xf32> to vector<1x32xf32>
    %cst_150 = arith.constant dense<0.000000e+00> : vector<8xf32>
    %250 = vector.multi_reduction <add>, %245, %cst_150 [1] : vector<8x32xf32> to vector<8xf32>
    %251 = vector.shape_cast %250 : vector<8xf32> to vector<8x1xf32>
    %cst_151 = arith.constant 3.200000e+01 : f32
    %252 = vector.broadcast %cst_151 : f32 to vector<8x1xf32>
    %253 = arith.divf %251, %252 : vector<8x1xf32>
    %254 = vector.broadcast %253 : vector<8x1xf32> to vector<8x32xf32>
    %255 = arith.subf %245, %254 : vector<8x32xf32>
    %256 = arith.mulf %255, %255 : vector<8x32xf32>
    %cst_152 = arith.constant dense<0.000000e+00> : vector<8xf32>
    %257 = vector.multi_reduction <add>, %256, %cst_152 [1] : vector<8x32xf32> to vector<8xf32>
    %258 = vector.shape_cast %257 : vector<8xf32> to vector<8x1xf32>
    %cst_153 = arith.constant 0.0322580636 : f32
    %259 = vector.broadcast %cst_153 : f32 to vector<8x1xf32>
    %260 = arith.mulf %258, %259 : vector<8x1xf32>
    %261 = math.sqrt %260 : vector<8x1xf32>
    %cst_154 = arith.constant 9.99999997E-7 : f32
    %262 = vector.broadcast %cst_154 : f32 to vector<8x1xf32>
    %263 = arith.addf %261, %262 : vector<8x1xf32>
    %264 = vector.broadcast %263 : vector<8x1xf32> to vector<8x32xf32>
    %265 = arith.divf %255, %264 : vector<8x32xf32>
    %266 = vector.broadcast %247 : vector<1x32xf32> to vector<8x32xf32>
    %267 = arith.mulf %266, %265 : vector<8x32xf32>
    %268 = vector.broadcast %249 : vector<1x32xf32> to vector<8x32xf32>
    %269 = arith.addf %267, %268 : vector<8x32xf32>
    %c0_155 = arith.constant 0 : index
    %c0_156 = arith.constant 0 : index
    %c0_157 = arith.constant 0 : index
    %270 = vector.load %arg49[%c0_155, %c0_156, %c0_157] : memref<1x8x32xf32, #tpu.memory_space<vmem>>, vector<1x8x32xf32>
    %271 = vector.shape_cast %270 : vector<1x8x32xf32> to vector<8x32xf32>
    %272 = vector.shape_cast %269 : vector<8x32xf32> to vector<1x8x32xf32>
    tpu.vector_store %arg49[%c0_155, %c0_156, %c0_157], %272 {strides = array<i32>} : memref<1x8x32xf32, #tpu.memory_space<vmem>>, vector<1x8x32xf32>,
    %c0_158 = arith.constant 0 : index
    %c0_159 = arith.constant 0 : index
    %c0_160 = arith.constant 0 : index
    %273 = vector.load %arg23[%c0_158, %c0_159, %c0_160] : memref<2x32x32xbf16, #tpu.memory_space<vmem>>, vector<1x32x32xbf16>
    %274 = vector.shape_cast %273 : vector<1x32x32xbf16> to vector<32x32xbf16>
    %c0_161 = arith.constant 0 : index
    %c0_162 = arith.constant 0 : index
    %c0_163 = arith.constant 0 : index
    %275 = vector.load %arg24[%c0_161, %c0_162, %c0_163] : memref<2x1x32xf32, #tpu.memory_space<vmem>>, vector<1x1x32xf32>
    %276 = vector.shape_cast %275 : vector<1x1x32xf32> to vector<1x32xf32>
    %c0_164 = arith.constant 0 : index
    %c0_165 = arith.constant 0 : index
    %c0_166 = arith.constant 0 : index
    %277 = vector.load %arg25[%c0_164, %c0_165, %c0_166] : memref<2x32x32xbf16, #tpu.memory_space<vmem>>, vector<1x32x32xbf16>
    %278 = vector.shape_cast %277 : vector<1x32x32xbf16> to vector<32x32xbf16>
    %c0_167 = arith.constant 0 : index
    %c0_168 = arith.constant 0 : index
    %c0_169 = arith.constant 0 : index
    %279 = vector.load %arg26[%c0_167, %c0_168, %c0_169] : memref<2x1x32xf32, #tpu.memory_space<vmem>>, vector<1x1x32xf32>
    %280 = vector.shape_cast %279 : vector<1x1x32xf32> to vector<1x32xf32>
    %c0_170 = arith.constant 0 : index
    %c0_171 = arith.constant 0 : index
    %c0_172 = arith.constant 0 : index
    %281 = vector.load %arg27[%c0_170, %c0_171, %c0_172] : memref<2x32x32xbf16, #tpu.memory_space<vmem>>, vector<1x32x32xbf16>
    %282 = vector.shape_cast %281 : vector<1x32x32xbf16> to vector<32x32xbf16>
    %c0_173 = arith.constant 0 : index
    %c0_174 = arith.constant 0 : index
    %c0_175 = arith.constant 0 : index
    %283 = vector.load %arg28[%c0_173, %c0_174, %c0_175] : memref<2x1x32xf32, #tpu.memory_space<vmem>>, vector<1x1x32xf32>
    %284 = vector.shape_cast %283 : vector<1x1x32xf32> to vector<1x32xf32>
    %c0_176 = arith.constant 0 : index
    %c0_177 = arith.constant 0 : index
    %c0_178 = arith.constant 0 : index
    %285 = vector.load %arg29[%c0_176, %c0_177, %c0_178] : memref<2x32x32xbf16, #tpu.memory_space<vmem>>, vector<1x32x32xbf16>
    %286 = vector.shape_cast %285 : vector<1x32x32xbf16> to vector<32x32xbf16>
    %c0_179 = arith.constant 0 : index
    %c0_180 = arith.constant 0 : index
    %c0_181 = arith.constant 0 : index
    %287 = vector.load %arg30[%c0_179, %c0_180, %c0_181] : memref<2x1x32xf32, #tpu.memory_space<vmem>>, vector<1x1x32xf32>
    %288 = vector.shape_cast %287 : vector<1x1x32xf32> to vector<1x32xf32>
    %289 = arith.truncf %3 : vector<16x32xf32> to vector<16x32xbf16>
    %290 = arith.truncf %3 : vector<16x32xf32> to vector<16x32xbf16>
    %cst_182 = arith.constant dense<0.000000e+00> : vector<16x32xf32>
    %291 = tpu.matmul %289, %274, %cst_182 {dimension_numbers = #tpu.dot_dimension_numbers<[1], [0], [0], [1], [0, 0, 1, 1], [], []>} : vector<16x32xbf16>, vector<32x32xbf16>, vector<16x32xf32> -> vector<16x32xf32>
    %292 = vector.broadcast %276 : vector<1x32xf32> to vector<16x32xf32>
    %293 = arith.addf %291, %292 : vector<16x32xf32>
    %cst_183 = arith.constant dense<0.000000e+00> : vector<16x32xf32>
    %294 = tpu.matmul %290, %278, %cst_183 {dimension_numbers = #tpu.dot_dimension_numbers<[1], [0], [0], [1], [0, 0, 1, 1], [], []>} : vector<16x32xbf16>, vector<32x32xbf16>, vector<16x32xf32> -> vector<16x32xf32>
    %295 = vector.broadcast %280 : vector<1x32xf32> to vector<16x32xf32>
    %296 = arith.addf %294, %295 : vector<16x32xf32>
    %cst_184 = arith.constant dense<0.000000e+00> : vector<16x32xf32>
    %297 = tpu.matmul %290, %282, %cst_184 {dimension_numbers = #tpu.dot_dimension_numbers<[1], [0], [0], [1], [0, 0, 1, 1], [], []>} : vector<16x32xbf16>, vector<32x32xbf16>, vector<16x32xf32> -> vector<16x32xf32>
    %298 = vector.broadcast %284 : vector<1x32xf32> to vector<16x32xf32>
    %299 = arith.addf %297, %298 : vector<16x32xf32>
    %300 = tpu.concatenate %293, %293, %293, %293 in 0 : vector<16x32xf32>, vector<16x32xf32>, vector<16x32xf32>, vector<16x32xf32> -> vector<64x32xf32>
    %301 = arith.mulf %300, %13 : vector<64x32xf32>
    %302 = arith.truncf %301 : vector<64x32xf32> to vector<64x32xbf16>
    %303 = arith.truncf %296 : vector<16x32xf32> to vector<16x32xbf16>
    %cst_185 = arith.constant dense<0.000000e+00> : vector<64x16xf32>
    %304 = tpu.matmul %302, %303, %cst_185 {dimension_numbers = #tpu.dot_dimension_numbers<[1], [1], [0], [0], [0, 0, 1, 0], [], []>} : vector<64x32xbf16>, vector<16x32xbf16>, vector<64x16xf32> -> vector<64x16xf32>
    %cst_186 = arith.constant dense<0xFF800000> : vector<64xf32>
    %305 = vector.multi_reduction <maximumf>, %304, %cst_186 [1] : vector<64x16xf32> to vector<64xf32>
    %306 = vector.shape_cast %305 : vector<64xf32> to vector<64x1xf32>
    %307 = vector.broadcast %306 : vector<64x1xf32> to vector<64x16xf32>
    %308 = arith.subf %304, %307 : vector<64x16xf32>
    %309 = math.exp %308 : vector<64x16xf32>
    %cst_187 = arith.constant -1.000000e+09 : f32
    %310 = vector.shape_cast %11 : vector<1x16xi1> to vector<1x16xi1>
    %311 = vector.broadcast %310 : vector<1x16xi1> to vector<64x16xi1>
    %312 = vector.broadcast %cst_187 : f32 to vector<64x16xf32>
    %313 = arith.select %311, %312, %309 : vector<64x16xi1>, vector<64x16xf32>
    %cst_188 = arith.constant dense<0xFF800000> : vector<64xf32>
    %314 = vector.multi_reduction <maximumf>, %313, %cst_188 [1] : vector<64x16xf32> to vector<64xf32>
    %315 = vector.shape_cast %314 : vector<64xf32> to vector<64x1xf32>
    %316 = vector.broadcast %315 : vector<64x1xf32> to vector<64x16xf32>
    %317 = arith.subf %313, %316 : vector<64x16xf32>
    %318 = math.exp %317 : vector<64x16xf32>
    %cst_189 = arith.constant dense<0.000000e+00> : vector<64xf32>
    %319 = vector.multi_reduction <add>, %318, %cst_189 [1] : vector<64x16xf32> to vector<64xf32>
    %320 = vector.shape_cast %319 : vector<64xf32> to vector<64x1xf32>
    %321 = vector.broadcast %320 : vector<64x1xf32> to vector<64x16xf32>
    %322 = arith.divf %318, %321 : vector<64x16xf32>
    %323 = arith.truncf %322 : vector<64x16xf32> to vector<64x16xbf16>
    %324 = arith.truncf %299 : vector<16x32xf32> to vector<16x32xbf16>
    %cst_190 = arith.constant dense<0.000000e+00> : vector<64x32xf32>
    %325 = tpu.matmul %323, %324, %cst_190 {dimension_numbers = #tpu.dot_dimension_numbers<[1], [0], [0], [1], [0, 0, 1, 1], [], []>} : vector<64x16xbf16>, vector<16x32xbf16>, vector<64x32xf32> -> vector<64x32xf32>
    %326 = arith.mulf %325, %13 : vector<64x32xf32>
    %327 = vector.extract_strided_slice %326 {offsets = [0, 0], sizes = [16, 32], strides = [1, 1]} : vector<64x32xf32> to vector<16x32xf32>
    %328 = vector.extract_strided_slice %326 {offsets = [16, 0], sizes = [16, 32], strides = [1, 1]} : vector<64x32xf32> to vector<16x32xf32>
    %329 = arith.addf %327, %328 : vector<16x32xf32>
    %330 = vector.extract_strided_slice %326 {offsets = [32, 0], sizes = [16, 32], strides = [1, 1]} : vector<64x32xf32> to vector<16x32xf32>
    %331 = arith.addf %329, %330 : vector<16x32xf32>
    %332 = vector.extract_strided_slice %326 {offsets = [48, 0], sizes = [16, 32], strides = [1, 1]} : vector<64x32xf32> to vector<16x32xf32>
    %333 = arith.addf %331, %332 : vector<16x32xf32>
    %334 = arith.truncf %333 : vector<16x32xf32> to vector<16x32xbf16>
    %cst_191 = arith.constant dense<0.000000e+00> : vector<16x32xf32>
    %335 = tpu.matmul %334, %286, %cst_191 {dimension_numbers = #tpu.dot_dimension_numbers<[1], [0], [0], [1], [0, 0, 1, 1], [], []>} : vector<16x32xbf16>, vector<32x32xbf16>, vector<16x32xf32> -> vector<16x32xf32>
    %336 = vector.broadcast %288 : vector<1x32xf32> to vector<16x32xf32>
    %337 = arith.addf %335, %336 : vector<16x32xf32>
    %338 = arith.addf %3, %337 : vector<16x32xf32>
    %c0_192 = arith.constant 0 : index
    %c0_193 = arith.constant 0 : index
    %c0_194 = arith.constant 0 : index
    %339 = vector.load %arg43[%c0_192, %c0_193, %c0_194] : memref<2x1x32xf32, #tpu.memory_space<vmem>>, vector<1x1x32xf32>
    %340 = vector.shape_cast %339 : vector<1x1x32xf32> to vector<1x32xf32>
    %c0_195 = arith.constant 0 : index
    %c0_196 = arith.constant 0 : index
    %c0_197 = arith.constant 0 : index
    %341 = vector.load %arg44[%c0_195, %c0_196, %c0_197] : memref<2x1x32xf32, #tpu.memory_space<vmem>>, vector<1x1x32xf32>
    %342 = vector.shape_cast %341 : vector<1x1x32xf32> to vector<1x32xf32>
    %cst_198 = arith.constant dense<0.000000e+00> : vector<16xf32>
    %343 = vector.multi_reduction <add>, %338, %cst_198 [1] : vector<16x32xf32> to vector<16xf32>
    %344 = vector.shape_cast %343 : vector<16xf32> to vector<16x1xf32>
    %cst_199 = arith.constant 3.200000e+01 : f32
    %345 = vector.broadcast %cst_199 : f32 to vector<16x1xf32>
    %346 = arith.divf %344, %345 : vector<16x1xf32>
    %347 = vector.broadcast %346 : vector<16x1xf32> to vector<16x32xf32>
    %348 = arith.subf %338, %347 : vector<16x32xf32>
    %349 = arith.mulf %348, %348 : vector<16x32xf32>
    %cst_200 = arith.constant dense<0.000000e+00> : vector<16xf32>
    %350 = vector.multi_reduction <add>, %349, %cst_200 [1] : vector<16x32xf32> to vector<16xf32>
    %351 = vector.shape_cast %350 : vector<16xf32> to vector<16x1xf32>
    %cst_201 = arith.constant 0.0322580636 : f32
    %352 = vector.broadcast %cst_201 : f32 to vector<16x1xf32>
    %353 = arith.mulf %351, %352 : vector<16x1xf32>
    %354 = math.sqrt %353 : vector<16x1xf32>
    %cst_202 = arith.constant 9.99999997E-7 : f32
    %355 = vector.broadcast %cst_202 : f32 to vector<16x1xf32>
    %356 = arith.addf %354, %355 : vector<16x1xf32>
    %357 = vector.broadcast %356 : vector<16x1xf32> to vector<16x32xf32>
    %358 = arith.divf %348, %357 : vector<16x32xf32>
    %359 = vector.broadcast %340 : vector<1x32xf32> to vector<16x32xf32>
    %360 = arith.mulf %359, %358 : vector<16x32xf32>
    %361 = vector.broadcast %342 : vector<1x32xf32> to vector<16x32xf32>
    %362 = arith.addf %360, %361 : vector<16x32xf32>
    %c0_203 = arith.constant 0 : index
    %c0_204 = arith.constant 0 : index
    %c0_205 = arith.constant 0 : index
    %363 = vector.load %arg31[%c0_203, %c0_204, %c0_205] : memref<2x32x32xbf16, #tpu.memory_space<vmem>>, vector<1x32x32xbf16>
    %364 = vector.shape_cast %363 : vector<1x32x32xbf16> to vector<32x32xbf16>
    %c0_206 = arith.constant 0 : index
    %c0_207 = arith.constant 0 : index
    %c0_208 = arith.constant 0 : index
    %365 = vector.load %arg32[%c0_206, %c0_207, %c0_208] : memref<2x1x32xf32, #tpu.memory_space<vmem>>, vector<1x1x32xf32>
    %366 = vector.shape_cast %365 : vector<1x1x32xf32> to vector<1x32xf32>
    %c0_209 = arith.constant 0 : index
    %c0_210 = arith.constant 0 : index
    %c0_211 = arith.constant 0 : index
    %367 = vector.load %arg33[%c0_209, %c0_210, %c0_211] : memref<2x32x32xbf16, #tpu.memory_space<vmem>>, vector<1x32x32xbf16>
    %368 = vector.shape_cast %367 : vector<1x32x32xbf16> to vector<32x32xbf16>
    %c0_212 = arith.constant 0 : index
    %c0_213 = arith.constant 0 : index
    %c0_214 = arith.constant 0 : index
    %369 = vector.load %arg34[%c0_212, %c0_213, %c0_214] : memref<2x1x32xf32, #tpu.memory_space<vmem>>, vector<1x1x32xf32>
    %370 = vector.shape_cast %369 : vector<1x1x32xf32> to vector<1x32xf32>
    %c0_215 = arith.constant 0 : index
    %c0_216 = arith.constant 0 : index
    %c0_217 = arith.constant 0 : index
    %371 = vector.load %arg35[%c0_215, %c0_216, %c0_217] : memref<2x32x32xbf16, #tpu.memory_space<vmem>>, vector<1x32x32xbf16>
    %372 = vector.shape_cast %371 : vector<1x32x32xbf16> to vector<32x32xbf16>
    %c0_218 = arith.constant 0 : index
    %c0_219 = arith.constant 0 : index
    %c0_220 = arith.constant 0 : index
    %373 = vector.load %arg36[%c0_218, %c0_219, %c0_220] : memref<2x1x32xf32, #tpu.memory_space<vmem>>, vector<1x1x32xf32>
    %374 = vector.shape_cast %373 : vector<1x1x32xf32> to vector<1x32xf32>
    %c0_221 = arith.constant 0 : index
    %c0_222 = arith.constant 0 : index
    %c0_223 = arith.constant 0 : index
    %375 = vector.load %arg37[%c0_221, %c0_222, %c0_223] : memref<2x32x32xbf16, #tpu.memory_space<vmem>>, vector<1x32x32xbf16>
    %376 = vector.shape_cast %375 : vector<1x32x32xbf16> to vector<32x32xbf16>
    %c0_224 = arith.constant 0 : index
    %c0_225 = arith.constant 0 : index
    %c0_226 = arith.constant 0 : index
    %377 = vector.load %arg38[%c0_224, %c0_225, %c0_226] : memref<2x1x32xf32, #tpu.memory_space<vmem>>, vector<1x1x32xf32>
    %378 = vector.shape_cast %377 : vector<1x1x32xf32> to vector<1x32xf32>
    %379 = arith.truncf %362 : vector<16x32xf32> to vector<16x32xbf16>
    %380 = arith.truncf %269 : vector<8x32xf32> to vector<8x32xbf16>
    %cst_227 = arith.constant dense<0.000000e+00> : vector<16x32xf32>
    %381 = tpu.matmul %379, %364, %cst_227 {dimension_numbers = #tpu.dot_dimension_numbers<[1], [0], [0], [1], [0, 0, 1, 1], [], []>} : vector<16x32xbf16>, vector<32x32xbf16>, vector<16x32xf32> -> vector<16x32xf32>
    %382 = vector.broadcast %366 : vector<1x32xf32> to vector<16x32xf32>
    %383 = arith.addf %381, %382 : vector<16x32xf32>
    %cst_228 = arith.constant dense<0.000000e+00> : vector<8x32xf32>
    %384 = tpu.matmul %380, %368, %cst_228 {dimension_numbers = #tpu.dot_dimension_numbers<[1], [0], [0], [1], [0, 0, 1, 1], [], []>} : vector<8x32xbf16>, vector<32x32xbf16>, vector<8x32xf32> -> vector<8x32xf32>
    %385 = vector.broadcast %370 : vector<1x32xf32> to vector<8x32xf32>
    %386 = arith.addf %384, %385 : vector<8x32xf32>
    %cst_229 = arith.constant dense<0.000000e+00> : vector<8x32xf32>
    %387 = tpu.matmul %380, %372, %cst_229 {dimension_numbers = #tpu.dot_dimension_numbers<[1], [0], [0], [1], [0, 0, 1, 1], [], []>} : vector<8x32xbf16>, vector<32x32xbf16>, vector<8x32xf32> -> vector<8x32xf32>
    %388 = vector.broadcast %374 : vector<1x32xf32> to vector<8x32xf32>
    %389 = arith.addf %387, %388 : vector<8x32xf32>
    %390 = tpu.concatenate %383, %383, %383, %383 in 0 : vector<16x32xf32>, vector<16x32xf32>, vector<16x32xf32>, vector<16x32xf32> -> vector<64x32xf32>
    %391 = arith.mulf %390, %13 : vector<64x32xf32>
    %392 = arith.truncf %391 : vector<64x32xf32> to vector<64x32xbf16>
    %393 = arith.truncf %386 : vector<8x32xf32> to vector<8x32xbf16>
    %cst_230 = arith.constant dense<0.000000e+00> : vector<64x8xf32>
    %394 = tpu.matmul %392, %393, %cst_230 {dimension_numbers = #tpu.dot_dimension_numbers<[1], [1], [0], [0], [0, 0, 1, 0], [], []>} : vector<64x32xbf16>, vector<8x32xbf16>, vector<64x8xf32> -> vector<64x8xf32>
    %cst_231 = arith.constant -1.000000e+09 : f32
    %395 = vector.shape_cast %7 : vector<1x8xi1> to vector<1x8xi1>
    %396 = vector.broadcast %395 : vector<1x8xi1> to vector<64x8xi1>
    %397 = vector.broadcast %cst_231 : f32 to vector<64x8xf32>
    %398 = arith.select %396, %397, %394 : vector<64x8xi1>, vector<64x8xf32>
    %cst_232 = arith.constant dense<0xFF800000> : vector<64xf32>
    %399 = vector.multi_reduction <maximumf>, %398, %cst_232 [1] : vector<64x8xf32> to vector<64xf32>
    %400 = vector.shape_cast %399 : vector<64xf32> to vector<64x1xf32>
    %401 = vector.broadcast %400 : vector<64x1xf32> to vector<64x8xf32>
    %402 = arith.subf %398, %401 : vector<64x8xf32>
    %403 = math.exp %402 : vector<64x8xf32>
    %cst_233 = arith.constant dense<0.000000e+00> : vector<64xf32>
    %404 = vector.multi_reduction <add>, %403, %cst_233 [1] : vector<64x8xf32> to vector<64xf32>
    %405 = vector.shape_cast %404 : vector<64xf32> to vector<64x1xf32>
    %406 = vector.broadcast %405 : vector<64x1xf32> to vector<64x8xf32>
    %407 = arith.divf %403, %406 : vector<64x8xf32>
    %408 = arith.truncf %407 : vector<64x8xf32> to vector<64x8xbf16>
    %409 = arith.truncf %389 : vector<8x32xf32> to vector<8x32xbf16>
    %cst_234 = arith.constant dense<0.000000e+00> : vector<64x32xf32>
    %410 = tpu.matmul %408, %409, %cst_234 {dimension_numbers = #tpu.dot_dimension_numbers<[1], [0], [0], [1], [0, 0, 1, 1], [], []>} : vector<64x8xbf16>, vector<8x32xbf16>, vector<64x32xf32> -> vector<64x32xf32>
    %411 = arith.mulf %410, %13 : vector<64x32xf32>
    %412 = vector.extract_strided_slice %411 {offsets = [0, 0], sizes = [16, 32], strides = [1, 1]} : vector<64x32xf32> to vector<16x32xf32>
    %413 = vector.extract_strided_slice %411 {offsets = [16, 0], sizes = [16, 32], strides = [1, 1]} : vector<64x32xf32> to vector<16x32xf32>
    %414 = arith.addf %412, %413 : vector<16x32xf32>
    %415 = vector.extract_strided_slice %411 {offsets = [32, 0], sizes = [16, 32], strides = [1, 1]} : vector<64x32xf32> to vector<16x32xf32>
    %416 = arith.addf %414, %415 : vector<16x32xf32>
    %417 = vector.extract_strided_slice %411 {offsets = [48, 0], sizes = [16, 32], strides = [1, 1]} : vector<64x32xf32> to vector<16x32xf32>
    %418 = arith.addf %416, %417 : vector<16x32xf32>
    %419 = arith.truncf %418 : vector<16x32xf32> to vector<16x32xbf16>
    %cst_235 = arith.constant dense<0.000000e+00> : vector<16x32xf32>
    %420 = tpu.matmul %419, %376, %cst_235 {dimension_numbers = #tpu.dot_dimension_numbers<[1], [0], [0], [1], [0, 0, 1, 1], [], []>} : vector<16x32xbf16>, vector<32x32xbf16>, vector<16x32xf32> -> vector<16x32xf32>
    %421 = vector.broadcast %378 : vector<1x32xf32> to vector<16x32xf32>
    %422 = arith.addf %420, %421 : vector<16x32xf32>
    %423 = arith.addf %362, %422 : vector<16x32xf32>
    %c0_236 = arith.constant 0 : index
    %c0_237 = arith.constant 0 : index
    %c0_238 = arith.constant 0 : index
    %424 = vector.load %arg45[%c0_236, %c0_237, %c0_238] : memref<2x1x32xf32, #tpu.memory_space<vmem>>, vector<1x1x32xf32>
    %425 = vector.shape_cast %424 : vector<1x1x32xf32> to vector<1x32xf32>
    %c0_239 = arith.constant 0 : index
    %c0_240 = arith.constant 0 : index
    %c0_241 = arith.constant 0 : index
    %426 = vector.load %arg46[%c0_239, %c0_240, %c0_241] : memref<2x1x32xf32, #tpu.memory_space<vmem>>, vector<1x1x32xf32>
    %427 = vector.shape_cast %426 : vector<1x1x32xf32> to vector<1x32xf32>
    %cst_242 = arith.constant dense<0.000000e+00> : vector<16xf32>
    %428 = vector.multi_reduction <add>, %423, %cst_242 [1] : vector<16x32xf32> to vector<16xf32>
    %429 = vector.shape_cast %428 : vector<16xf32> to vector<16x1xf32>
    %cst_243 = arith.constant 3.200000e+01 : f32
    %430 = vector.broadcast %cst_243 : f32 to vector<16x1xf32>
    %431 = arith.divf %429, %430 : vector<16x1xf32>
    %432 = vector.broadcast %431 : vector<16x1xf32> to vector<16x32xf32>
    %433 = arith.subf %423, %432 : vector<16x32xf32>
    %434 = arith.mulf %433, %433 : vector<16x32xf32>
    %cst_244 = arith.constant dense<0.000000e+00> : vector<16xf32>
    %435 = vector.multi_reduction <add>, %434, %cst_244 [1] : vector<16x32xf32> to vector<16xf32>
    %436 = vector.shape_cast %435 : vector<16xf32> to vector<16x1xf32>
    %cst_245 = arith.constant 0.0322580636 : f32
    %437 = vector.broadcast %cst_245 : f32 to vector<16x1xf32>
    %438 = arith.mulf %436, %437 : vector<16x1xf32>
    %439 = math.sqrt %438 : vector<16x1xf32>
    %cst_246 = arith.constant 9.99999997E-7 : f32
    %440 = vector.broadcast %cst_246 : f32 to vector<16x1xf32>
    %441 = arith.addf %439, %440 : vector<16x1xf32>
    %442 = vector.broadcast %441 : vector<16x1xf32> to vector<16x32xf32>
    %443 = arith.divf %433, %442 : vector<16x32xf32>
    %444 = vector.broadcast %425 : vector<1x32xf32> to vector<16x32xf32>
    %445 = arith.mulf %444, %443 : vector<16x32xf32>
    %446 = vector.broadcast %427 : vector<1x32xf32> to vector<16x32xf32>
    %447 = arith.addf %445, %446 : vector<16x32xf32>
    %c0_247 = arith.constant 0 : index
    %c0_248 = arith.constant 0 : index
    %c0_249 = arith.constant 0 : index
    %448 = vector.load %arg39[%c0_247, %c0_248, %c0_249] : memref<2x32x128xbf16, #tpu.memory_space<vmem>>, vector<1x32x128xbf16>
    %449 = vector.shape_cast %448 : vector<1x32x128xbf16> to vector<32x128xbf16>
    %c0_250 = arith.constant 0 : index
    %c0_251 = arith.constant 0 : index
    %c0_252 = arith.constant 0 : index
    %450 = vector.load %arg40[%c0_250, %c0_251, %c0_252] : memref<2x1x128xf32, #tpu.memory_space<vmem>>, vector<1x1x128xf32>
    %451 = vector.shape_cast %450 : vector<1x1x128xf32> to vector<1x128xf32>
    %c0_253 = arith.constant 0 : index
    %c0_254 = arith.constant 0 : index
    %c0_255 = arith.constant 0 : index
    %452 = vector.load %arg41[%c0_253, %c0_254, %c0_255] : memref<2x128x32xbf16, #tpu.memory_space<vmem>>, vector<1x128x32xbf16>
    %453 = vector.shape_cast %452 : vector<1x128x32xbf16> to vector<128x32xbf16>
    %c0_256 = arith.constant 0 : index
    %c0_257 = arith.constant 0 : index
    %c0_258 = arith.constant 0 : index
    %454 = vector.load %arg42[%c0_256, %c0_257, %c0_258] : memref<2x1x32xf32, #tpu.memory_space<vmem>>, vector<1x1x32xf32>
    %455 = vector.shape_cast %454 : vector<1x1x32xf32> to vector<1x32xf32>
    %456 = arith.truncf %447 : vector<16x32xf32> to vector<16x32xbf16>
    %cst_259 = arith.constant dense<0.000000e+00> : vector<16x128xf32>
    %457 = tpu.matmul %456, %449, %cst_259 {dimension_numbers = #tpu.dot_dimension_numbers<[1], [0], [0], [1], [0, 0, 1, 1], [], []>} : vector<16x32xbf16>, vector<32x128xbf16>, vector<16x128xf32> -> vector<16x128xf32>
    %458 = vector.broadcast %451 : vector<1x128xf32> to vector<16x128xf32>
    %459 = arith.addf %457, %458 : vector<16x128xf32>
    %cst_260 = arith.constant 0.000000e+00 : f32
    %460 = vector.broadcast %cst_260 : f32 to vector<16x128xf32>
    %461 = arith.maximumf %459, %460 : vector<16x128xf32>
    %462 = arith.truncf %461 : vector<16x128xf32> to vector<16x128xbf16>
    %cst_261 = arith.constant dense<0.000000e+00> : vector<16x32xf32>
    %463 = tpu.matmul %462, %453, %cst_261 {dimension_numbers = #tpu.dot_dimension_numbers<[1], [0], [0], [1], [0, 0, 1, 1], [], []>} : vector<16x128xbf16>, vector<128x32xbf16>, vector<16x32xf32> -> vector<16x32xf32>
    %464 = vector.broadcast %455 : vector<1x32xf32> to vector<16x32xf32>
    %465 = arith.addf %463, %464 : vector<16x32xf32>
    %466 = arith.addf %447, %465 : vector<16x32xf32>
    %c0_262 = arith.constant 0 : index
    %c0_263 = arith.constant 0 : index
    %c0_264 = arith.constant 0 : index
    %467 = vector.load %arg47[%c0_262, %c0_263, %c0_264] : memref<2x1x32xf32, #tpu.memory_space<vmem>>, vector<1x1x32xf32>
    %468 = vector.shape_cast %467 : vector<1x1x32xf32> to vector<1x32xf32>
    %c0_265 = arith.constant 0 : index
    %c0_266 = arith.constant 0 : index
    %c0_267 = arith.constant 0 : index
    %469 = vector.load %arg48[%c0_265, %c0_266, %c0_267] : memref<2x1x32xf32, #tpu.memory_space<vmem>>, vector<1x1x32xf32>
    %470 = vector.shape_cast %469 : vector<1x1x32xf32> to vector<1x32xf32>
    %cst_268 = arith.constant dense<0.000000e+00> : vector<16xf32>
    %471 = vector.multi_reduction <add>, %466, %cst_268 [1] : vector<16x32xf32> to vector<16xf32>
    %472 = vector.shape_cast %471 : vector<16xf32> to vector<16x1xf32>
    %cst_269 = arith.constant 3.200000e+01 : f32
    %473 = vector.broadcast %cst_269 : f32 to vector<16x1xf32>
    %474 = arith.divf %472, %473 : vector<16x1xf32>
    %475 = vector.broadcast %474 : vector<16x1xf32> to vector<16x32xf32>
    %476 = arith.subf %466, %475 : vector<16x32xf32>
    %477 = arith.mulf %476, %476 : vector<16x32xf32>
    %cst_270 = arith.constant dense<0.000000e+00> : vector<16xf32>
    %478 = vector.multi_reduction <add>, %477, %cst_270 [1] : vector<16x32xf32> to vector<16xf32>
    %479 = vector.shape_cast %478 : vector<16xf32> to vector<16x1xf32>
    %cst_271 = arith.constant 0.0322580636 : f32
    %480 = vector.broadcast %cst_271 : f32 to vector<16x1xf32>
    %481 = arith.mulf %479, %480 : vector<16x1xf32>
    %482 = math.sqrt %481 : vector<16x1xf32>
    %cst_272 = arith.constant 9.99999997E-7 : f32
    %483 = vector.broadcast %cst_272 : f32 to vector<16x1xf32>
    %484 = arith.addf %482, %483 : vector<16x1xf32>
    %485 = vector.broadcast %484 : vector<16x1xf32> to vector<16x32xf32>
    %486 = arith.divf %476, %485 : vector<16x32xf32>
    %487 = vector.broadcast %468 : vector<1x32xf32> to vector<16x32xf32>
    %488 = arith.mulf %487, %486 : vector<16x32xf32>
    %489 = vector.broadcast %470 : vector<1x32xf32> to vector<16x32xf32>
    %490 = arith.addf %488, %489 : vector<16x32xf32>
    %c1_273 = arith.constant 1 : index
    %c0_274 = arith.constant 0 : index
    %c0_275 = arith.constant 0 : index
    %491 = vector.load %arg23[%c1_273, %c0_274, %c0_275] : memref<2x32x32xbf16, #tpu.memory_space<vmem>>, vector<1x32x32xbf16>
    %492 = vector.shape_cast %491 : vector<1x32x32xbf16> to vector<32x32xbf16>
    %c1_276 = arith.constant 1 : index
    %c0_277 = arith.constant 0 : index
    %c0_278 = arith.constant 0 : index
    %493 = vector.load %arg24[%c1_276, %c0_277, %c0_278] : memref<2x1x32xf32, #tpu.memory_space<vmem>>, vector<1x1x32xf32>
    %494 = vector.shape_cast %493 : vector<1x1x32xf32> to vector<1x32xf32>
    %c1_279 = arith.constant 1 : index
    %c0_280 = arith.constant 0 : index
    %c0_281 = arith.constant 0 : index
    %495 = vector.load %arg25[%c1_279, %c0_280, %c0_281] : memref<2x32x32xbf16, #tpu.memory_space<vmem>>, vector<1x32x32xbf16>
    %496 = vector.shape_cast %495 : vector<1x32x32xbf16> to vector<32x32xbf16>
    %c1_282 = arith.constant 1 : index
    %c0_283 = arith.constant 0 : index
    %c0_284 = arith.constant 0 : index
    %497 = vector.load %arg26[%c1_282, %c0_283, %c0_284] : memref<2x1x32xf32, #tpu.memory_space<vmem>>, vector<1x1x32xf32>
    %498 = vector.shape_cast %497 : vector<1x1x32xf32> to vector<1x32xf32>
    %c1_285 = arith.constant 1 : index
    %c0_286 = arith.constant 0 : index
    %c0_287 = arith.constant 0 : index
    %499 = vector.load %arg27[%c1_285, %c0_286, %c0_287] : memref<2x32x32xbf16, #tpu.memory_space<vmem>>, vector<1x32x32xbf16>
    %500 = vector.shape_cast %499 : vector<1x32x32xbf16> to vector<32x32xbf16>
    %c1_288 = arith.constant 1 : index
    %c0_289 = arith.constant 0 : index
    %c0_290 = arith.constant 0 : index
    %501 = vector.load %arg28[%c1_288, %c0_289, %c0_290] : memref<2x1x32xf32, #tpu.memory_space<vmem>>, vector<1x1x32xf32>
    %502 = vector.shape_cast %501 : vector<1x1x32xf32> to vector<1x32xf32>
    %c1_291 = arith.constant 1 : index
    %c0_292 = arith.constant 0 : index
    %c0_293 = arith.constant 0 : index
    %503 = vector.load %arg29[%c1_291, %c0_292, %c0_293] : memref<2x32x32xbf16, #tpu.memory_space<vmem>>, vector<1x32x32xbf16>
    %504 = vector.shape_cast %503 : vector<1x32x32xbf16> to vector<32x32xbf16>
    %c1_294 = arith.constant 1 : index
    %c0_295 = arith.constant 0 : index
    %c0_296 = arith.constant 0 : index
    %505 = vector.load %arg30[%c1_294, %c0_295, %c0_296] : memref<2x1x32xf32, #tpu.memory_space<vmem>>, vector<1x1x32xf32>
    %506 = vector.shape_cast %505 : vector<1x1x32xf32> to vector<1x32xf32>
    %507 = arith.truncf %490 : vector<16x32xf32> to vector<16x32xbf16>
    %508 = arith.truncf %490 : vector<16x32xf32> to vector<16x32xbf16>
    %cst_297 = arith.constant dense<0.000000e+00> : vector<16x32xf32>
    %509 = tpu.matmul %507, %492, %cst_297 {dimension_numbers = #tpu.dot_dimension_numbers<[1], [0], [0], [1], [0, 0, 1, 1], [], []>} : vector<16x32xbf16>, vector<32x32xbf16>, vector<16x32xf32> -> vector<16x32xf32>
    %510 = vector.broadcast %494 : vector<1x32xf32> to vector<16x32xf32>
    %511 = arith.addf %509, %510 : vector<16x32xf32>
    %cst_298 = arith.constant dense<0.000000e+00> : vector<16x32xf32>
    %512 = tpu.matmul %508, %496, %cst_298 {dimension_numbers = #tpu.dot_dimension_numbers<[1], [0], [0], [1], [0, 0, 1, 1], [], []>} : vector<16x32xbf16>, vector<32x32xbf16>, vector<16x32xf32> -> vector<16x32xf32>
    %513 = vector.broadcast %498 : vector<1x32xf32> to vector<16x32xf32>
    %514 = arith.addf %512, %513 : vector<16x32xf32>
    %cst_299 = arith.constant dense<0.000000e+00> : vector<16x32xf32>
    %515 = tpu.matmul %508, %500, %cst_299 {dimension_numbers = #tpu.dot_dimension_numbers<[1], [0], [0], [1], [0, 0, 1, 1], [], []>} : vector<16x32xbf16>, vector<32x32xbf16>, vector<16x32xf32> -> vector<16x32xf32>
    %516 = vector.broadcast %502 : vector<1x32xf32> to vector<16x32xf32>
    %517 = arith.addf %515, %516 : vector<16x32xf32>
    %518 = tpu.concatenate %511, %511, %511, %511 in 0 : vector<16x32xf32>, vector<16x32xf32>, vector<16x32xf32>, vector<16x32xf32> -> vector<64x32xf32>
    %519 = arith.mulf %518, %13 : vector<64x32xf32>
    %520 = arith.truncf %519 : vector<64x32xf32> to vector<64x32xbf16>
    %521 = arith.truncf %514 : vector<16x32xf32> to vector<16x32xbf16>
    %cst_300 = arith.constant dense<0.000000e+00> : vector<64x16xf32>
    %522 = tpu.matmul %520, %521, %cst_300 {dimension_numbers = #tpu.dot_dimension_numbers<[1], [1], [0], [0], [0, 0, 1, 0], [], []>} : vector<64x32xbf16>, vector<16x32xbf16>, vector<64x16xf32> -> vector<64x16xf32>
    %cst_301 = arith.constant dense<0xFF800000> : vector<64xf32>
    %523 = vector.multi_reduction <maximumf>, %522, %cst_301 [1] : vector<64x16xf32> to vector<64xf32>
    %524 = vector.shape_cast %523 : vector<64xf32> to vector<64x1xf32>
    %525 = vector.broadcast %524 : vector<64x1xf32> to vector<64x16xf32>
    %526 = arith.subf %522, %525 : vector<64x16xf32>
    %527 = math.exp %526 : vector<64x16xf32>
    %cst_302 = arith.constant -1.000000e+09 : f32
    %528 = vector.shape_cast %11 : vector<1x16xi1> to vector<1x16xi1>
    %529 = vector.broadcast %528 : vector<1x16xi1> to vector<64x16xi1>
    %530 = vector.broadcast %cst_302 : f32 to vector<64x16xf32>
    %531 = arith.select %529, %530, %527 : vector<64x16xi1>, vector<64x16xf32>
    %cst_303 = arith.constant dense<0xFF800000> : vector<64xf32>
    %532 = vector.multi_reduction <maximumf>, %531, %cst_303 [1] : vector<64x16xf32> to vector<64xf32>
    %533 = vector.shape_cast %532 : vector<64xf32> to vector<64x1xf32>
    %534 = vector.broadcast %533 : vector<64x1xf32> to vector<64x16xf32>
    %535 = arith.subf %531, %534 : vector<64x16xf32>
    %536 = math.exp %535 : vector<64x16xf32>
    %cst_304 = arith.constant dense<0.000000e+00> : vector<64xf32>
    %537 = vector.multi_reduction <add>, %536, %cst_304 [1] : vector<64x16xf32> to vector<64xf32>
    %538 = vector.shape_cast %537 : vector<64xf32> to vector<64x1xf32>
    %539 = vector.broadcast %538 : vector<64x1xf32> to vector<64x16xf32>
    %540 = arith.divf %536, %539 : vector<64x16xf32>
    %541 = arith.truncf %540 : vector<64x16xf32> to vector<64x16xbf16>
    %542 = arith.truncf %517 : vector<16x32xf32> to vector<16x32xbf16>
    %cst_305 = arith.constant dense<0.000000e+00> : vector<64x32xf32>
    %543 = tpu.matmul %541, %542, %cst_305 {dimension_numbers = #tpu.dot_dimension_numbers<[1], [0], [0], [1], [0, 0, 1, 1], [], []>} : vector<64x16xbf16>, vector<16x32xbf16>, vector<64x32xf32> -> vector<64x32xf32>
    %544 = arith.mulf %543, %13 : vector<64x32xf32>
    %545 = vector.extract_strided_slice %544 {offsets = [0, 0], sizes = [16, 32], strides = [1, 1]} : vector<64x32xf32> to vector<16x32xf32>
    %546 = vector.extract_strided_slice %544 {offsets = [16, 0], sizes = [16, 32], strides = [1, 1]} : vector<64x32xf32> to vector<16x32xf32>
    %547 = arith.addf %545, %546 : vector<16x32xf32>
    %548 = vector.extract_strided_slice %544 {offsets = [32, 0], sizes = [16, 32], strides = [1, 1]} : vector<64x32xf32> to vector<16x32xf32>
    %549 = arith.addf %547, %548 : vector<16x32xf32>
    %550 = vector.extract_strided_slice %544 {offsets = [48, 0], sizes = [16, 32], strides = [1, 1]} : vector<64x32xf32> to vector<16x32xf32>
    %551 = arith.addf %549, %550 : vector<16x32xf32>
    %552 = arith.truncf %551 : vector<16x32xf32> to vector<16x32xbf16>
    %cst_306 = arith.constant dense<0.000000e+00> : vector<16x32xf32>
    %553 = tpu.matmul %552, %504, %cst_306 {dimension_numbers = #tpu.dot_dimension_numbers<[1], [0], [0], [1], [0, 0, 1, 1], [], []>} : vector<16x32xbf16>, vector<32x32xbf16>, vector<16x32xf32> -> vector<16x32xf32>
    %554 = vector.broadcast %506 : vector<1x32xf32> to vector<16x32xf32>
    %555 = arith.addf %553, %554 : vector<16x32xf32>
    %556 = arith.addf %490, %555 : vector<16x32xf32>
    %c1_307 = arith.constant 1 : index
    %c0_308 = arith.constant 0 : index
    %c0_309 = arith.constant 0 : index
    %557 = vector.load %arg43[%c1_307, %c0_308, %c0_309] : memref<2x1x32xf32, #tpu.memory_space<vmem>>, vector<1x1x32xf32>
    %558 = vector.shape_cast %557 : vector<1x1x32xf32> to vector<1x32xf32>
    %c1_310 = arith.constant 1 : index
    %c0_311 = arith.constant 0 : index
    %c0_312 = arith.constant 0 : index
    %559 = vector.load %arg44[%c1_310, %c0_311, %c0_312] : memref<2x1x32xf32, #tpu.memory_space<vmem>>, vector<1x1x32xf32>
    %560 = vector.shape_cast %559 : vector<1x1x32xf32> to vector<1x32xf32>
    %cst_313 = arith.constant dense<0.000000e+00> : vector<16xf32>
    %561 = vector.multi_reduction <add>, %556, %cst_313 [1] : vector<16x32xf32> to vector<16xf32>
    %562 = vector.shape_cast %561 : vector<16xf32> to vector<16x1xf32>
    %cst_314 = arith.constant 3.200000e+01 : f32
    %563 = vector.broadcast %cst_314 : f32 to vector<16x1xf32>
    %564 = arith.divf %562, %563 : vector<16x1xf32>
    %565 = vector.broadcast %564 : vector<16x1xf32> to vector<16x32xf32>
    %566 = arith.subf %556, %565 : vector<16x32xf32>
    %567 = arith.mulf %566, %566 : vector<16x32xf32>
    %cst_315 = arith.constant dense<0.000000e+00> : vector<16xf32>
    %568 = vector.multi_reduction <add>, %567, %cst_315 [1] : vector<16x32xf32> to vector<16xf32>
    %569 = vector.shape_cast %568 : vector<16xf32> to vector<16x1xf32>
    %cst_316 = arith.constant 0.0322580636 : f32
    %570 = vector.broadcast %cst_316 : f32 to vector<16x1xf32>
    %571 = arith.mulf %569, %570 : vector<16x1xf32>
    %572 = math.sqrt %571 : vector<16x1xf32>
    %cst_317 = arith.constant 9.99999997E-7 : f32
    %573 = vector.broadcast %cst_317 : f32 to vector<16x1xf32>
    %574 = arith.addf %572, %573 : vector<16x1xf32>
    %575 = vector.broadcast %574 : vector<16x1xf32> to vector<16x32xf32>
    %576 = arith.divf %566, %575 : vector<16x32xf32>
    %577 = vector.broadcast %558 : vector<1x32xf32> to vector<16x32xf32>
    %578 = arith.mulf %577, %576 : vector<16x32xf32>
    %579 = vector.broadcast %560 : vector<1x32xf32> to vector<16x32xf32>
    %580 = arith.addf %578, %579 : vector<16x32xf32>
    %c1_318 = arith.constant 1 : index
    %c0_319 = arith.constant 0 : index
    %c0_320 = arith.constant 0 : index
    %581 = vector.load %arg31[%c1_318, %c0_319, %c0_320] : memref<2x32x32xbf16, #tpu.memory_space<vmem>>, vector<1x32x32xbf16>
    %582 = vector.shape_cast %581 : vector<1x32x32xbf16> to vector<32x32xbf16>
    %c1_321 = arith.constant 1 : index
    %c0_322 = arith.constant 0 : index
    %c0_323 = arith.constant 0 : index
    %583 = vector.load %arg32[%c1_321, %c0_322, %c0_323] : memref<2x1x32xf32, #tpu.memory_space<vmem>>, vector<1x1x32xf32>
    %584 = vector.shape_cast %583 : vector<1x1x32xf32> to vector<1x32xf32>
    %c1_324 = arith.constant 1 : index
    %c0_325 = arith.constant 0 : index
    %c0_326 = arith.constant 0 : index
    %585 = vector.load %arg33[%c1_324, %c0_325, %c0_326] : memref<2x32x32xbf16, #tpu.memory_space<vmem>>, vector<1x32x32xbf16>
    %586 = vector.shape_cast %585 : vector<1x32x32xbf16> to vector<32x32xbf16>
    %c1_327 = arith.constant 1 : index
    %c0_328 = arith.constant 0 : index
    %c0_329 = arith.constant 0 : index
    %587 = vector.load %arg34[%c1_327, %c0_328, %c0_329] : memref<2x1x32xf32, #tpu.memory_space<vmem>>, vector<1x1x32xf32>
    %588 = vector.shape_cast %587 : vector<1x1x32xf32> to vector<1x32xf32>
    %c1_330 = arith.constant 1 : index
    %c0_331 = arith.constant 0 : index
    %c0_332 = arith.constant 0 : index
    %589 = vector.load %arg35[%c1_330, %c0_331, %c0_332] : memref<2x32x32xbf16, #tpu.memory_space<vmem>>, vector<1x32x32xbf16>
    %590 = vector.shape_cast %589 : vector<1x32x32xbf16> to vector<32x32xbf16>
    %c1_333 = arith.constant 1 : index
    %c0_334 = arith.constant 0 : index
    %c0_335 = arith.constant 0 : index
    %591 = vector.load %arg36[%c1_333, %c0_334, %c0_335] : memref<2x1x32xf32, #tpu.memory_space<vmem>>, vector<1x1x32xf32>
    %592 = vector.shape_cast %591 : vector<1x1x32xf32> to vector<1x32xf32>
    %c1_336 = arith.constant 1 : index
    %c0_337 = arith.constant 0 : index
    %c0_338 = arith.constant 0 : index
    %593 = vector.load %arg37[%c1_336, %c0_337, %c0_338] : memref<2x32x32xbf16, #tpu.memory_space<vmem>>, vector<1x32x32xbf16>
    %594 = vector.shape_cast %593 : vector<1x32x32xbf16> to vector<32x32xbf16>
    %c1_339 = arith.constant 1 : index
    %c0_340 = arith.constant 0 : index
    %c0_341 = arith.constant 0 : index
    %595 = vector.load %arg38[%c1_339, %c0_340, %c0_341] : memref<2x1x32xf32, #tpu.memory_space<vmem>>, vector<1x1x32xf32>
    %596 = vector.shape_cast %595 : vector<1x1x32xf32> to vector<1x32xf32>
    %597 = arith.truncf %580 : vector<16x32xf32> to vector<16x32xbf16>
    %598 = arith.truncf %269 : vector<8x32xf32> to vector<8x32xbf16>
    %cst_342 = arith.constant dense<0.000000e+00> : vector<16x32xf32>
    %599 = tpu.matmul %597, %582, %cst_342 {dimension_numbers = #tpu.dot_dimension_numbers<[1], [0], [0], [1], [0, 0, 1, 1], [], []>} : vector<16x32xbf16>, vector<32x32xbf16>, vector<16x32xf32> -> vector<16x32xf32>
    %600 = vector.broadcast %584 : vector<1x32xf32> to vector<16x32xf32>
    %601 = arith.addf %599, %600 : vector<16x32xf32>
    %cst_343 = arith.constant dense<0.000000e+00> : vector<8x32xf32>
    %602 = tpu.matmul %598, %586, %cst_343 {dimension_numbers = #tpu.dot_dimension_numbers<[1], [0], [0], [1], [0, 0, 1, 1], [], []>} : vector<8x32xbf16>, vector<32x32xbf16>, vector<8x32xf32> -> vector<8x32xf32>
    %603 = vector.broadcast %588 : vector<1x32xf32> to vector<8x32xf32>
    %604 = arith.addf %602, %603 : vector<8x32xf32>
    %cst_344 = arith.constant dense<0.000000e+00> : vector<8x32xf32>
    %605 = tpu.matmul %598, %590, %cst_344 {dimension_numbers = #tpu.dot_dimension_numbers<[1], [0], [0], [1], [0, 0, 1, 1], [], []>} : vector<8x32xbf16>, vector<32x32xbf16>, vector<8x32xf32> -> vector<8x32xf32>
    %606 = vector.broadcast %592 : vector<1x32xf32> to vector<8x32xf32>
    %607 = arith.addf %605, %606 : vector<8x32xf32>
    %608 = tpu.concatenate %601, %601, %601, %601 in 0 : vector<16x32xf32>, vector<16x32xf32>, vector<16x32xf32>, vector<16x32xf32> -> vector<64x32xf32>
    %609 = arith.mulf %608, %13 : vector<64x32xf32>
    %610 = arith.truncf %609 : vector<64x32xf32> to vector<64x32xbf16>
    %611 = arith.truncf %604 : vector<8x32xf32> to vector<8x32xbf16>
    %cst_345 = arith.constant dense<0.000000e+00> : vector<64x8xf32>
    %612 = tpu.matmul %610, %611, %cst_345 {dimension_numbers = #tpu.dot_dimension_numbers<[1], [1], [0], [0], [0, 0, 1, 0], [], []>} : vector<64x32xbf16>, vector<8x32xbf16>, vector<64x8xf32> -> vector<64x8xf32>
    %cst_346 = arith.constant -1.000000e+09 : f32
    %613 = vector.shape_cast %7 : vector<1x8xi1> to vector<1x8xi1>
    %614 = vector.broadcast %613 : vector<1x8xi1> to vector<64x8xi1>
    %615 = vector.broadcast %cst_346 : f32 to vector<64x8xf32>
    %616 = arith.select %614, %615, %612 : vector<64x8xi1>, vector<64x8xf32>
    %cst_347 = arith.constant dense<0xFF800000> : vector<64xf32>
    %617 = vector.multi_reduction <maximumf>, %616, %cst_347 [1] : vector<64x8xf32> to vector<64xf32>
    %618 = vector.shape_cast %617 : vector<64xf32> to vector<64x1xf32>
    %619 = vector.broadcast %618 : vector<64x1xf32> to vector<64x8xf32>
    %620 = arith.subf %616, %619 : vector<64x8xf32>
    %621 = math.exp %620 : vector<64x8xf32>
    %cst_348 = arith.constant dense<0.000000e+00> : vector<64xf32>
    %622 = vector.multi_reduction <add>, %621, %cst_348 [1] : vector<64x8xf32> to vector<64xf32>
    %623 = vector.shape_cast %622 : vector<64xf32> to vector<64x1xf32>
    %624 = vector.broadcast %623 : vector<64x1xf32> to vector<64x8xf32>
    %625 = arith.divf %621, %624 : vector<64x8xf32>
    %626 = arith.truncf %625 : vector<64x8xf32> to vector<64x8xbf16>
    %627 = arith.truncf %607 : vector<8x32xf32> to vector<8x32xbf16>
    %cst_349 = arith.constant dense<0.000000e+00> : vector<64x32xf32>
    %628 = tpu.matmul %626, %627, %cst_349 {dimension_numbers = #tpu.dot_dimension_numbers<[1], [0], [0], [1], [0, 0, 1, 1], [], []>} : vector<64x8xbf16>, vector<8x32xbf16>, vector<64x32xf32> -> vector<64x32xf32>
    %629 = arith.mulf %628, %13 : vector<64x32xf32>
    %630 = vector.extract_strided_slice %629 {offsets = [0, 0], sizes = [16, 32], strides = [1, 1]} : vector<64x32xf32> to vector<16x32xf32>
    %631 = vector.extract_strided_slice %629 {offsets = [16, 0], sizes = [16, 32], strides = [1, 1]} : vector<64x32xf32> to vector<16x32xf32>
    %632 = arith.addf %630, %631 : vector<16x32xf32>
    %633 = vector.extract_strided_slice %629 {offsets = [32, 0], sizes = [16, 32], strides = [1, 1]} : vector<64x32xf32> to vector<16x32xf32>
    %634 = arith.addf %632, %633 : vector<16x32xf32>
    %635 = vector.extract_strided_slice %629 {offsets = [48, 0], sizes = [16, 32], strides = [1, 1]} : vector<64x32xf32> to vector<16x32xf32>
    %636 = arith.addf %634, %635 : vector<16x32xf32>
    %637 = arith.truncf %636 : vector<16x32xf32> to vector<16x32xbf16>
    %cst_350 = arith.constant dense<0.000000e+00> : vector<16x32xf32>
    %638 = tpu.matmul %637, %594, %cst_350 {dimension_numbers = #tpu.dot_dimension_numbers<[1], [0], [0], [1], [0, 0, 1, 1], [], []>} : vector<16x32xbf16>, vector<32x32xbf16>, vector<16x32xf32> -> vector<16x32xf32>
    %639 = vector.broadcast %596 : vector<1x32xf32> to vector<16x32xf32>
    %640 = arith.addf %638, %639 : vector<16x32xf32>
    %641 = arith.addf %580, %640 : vector<16x32xf32>
    %c1_351 = arith.constant 1 : index
    %c0_352 = arith.constant 0 : index
    %c0_353 = arith.constant 0 : index
    %642 = vector.load %arg45[%c1_351, %c0_352, %c0_353] : memref<2x1x32xf32, #tpu.memory_space<vmem>>, vector<1x1x32xf32>
    %643 = vector.shape_cast %642 : vector<1x1x32xf32> to vector<1x32xf32>
    %c1_354 = arith.constant 1 : index
    %c0_355 = arith.constant 0 : index
    %c0_356 = arith.constant 0 : index
    %644 = vector.load %arg46[%c1_354, %c0_355, %c0_356] : memref<2x1x32xf32, #tpu.memory_space<vmem>>, vector<1x1x32xf32>
    %645 = vector.shape_cast %644 : vector<1x1x32xf32> to vector<1x32xf32>
    %cst_357 = arith.constant dense<0.000000e+00> : vector<16xf32>
    %646 = vector.multi_reduction <add>, %641, %cst_357 [1] : vector<16x32xf32> to vector<16xf32>
    %647 = vector.shape_cast %646 : vector<16xf32> to vector<16x1xf32>
    %cst_358 = arith.constant 3.200000e+01 : f32
    %648 = vector.broadcast %cst_358 : f32 to vector<16x1xf32>
    %649 = arith.divf %647, %648 : vector<16x1xf32>
    %650 = vector.broadcast %649 : vector<16x1xf32> to vector<16x32xf32>
    %651 = arith.subf %641, %650 : vector<16x32xf32>
    %652 = arith.mulf %651, %651 : vector<16x32xf32>
    %cst_359 = arith.constant dense<0.000000e+00> : vector<16xf32>
    %653 = vector.multi_reduction <add>, %652, %cst_359 [1] : vector<16x32xf32> to vector<16xf32>
    %654 = vector.shape_cast %653 : vector<16xf32> to vector<16x1xf32>
    %cst_360 = arith.constant 0.0322580636 : f32
    %655 = vector.broadcast %cst_360 : f32 to vector<16x1xf32>
    %656 = arith.mulf %654, %655 : vector<16x1xf32>
    %657 = math.sqrt %656 : vector<16x1xf32>
    %cst_361 = arith.constant 9.99999997E-7 : f32
    %658 = vector.broadcast %cst_361 : f32 to vector<16x1xf32>
    %659 = arith.addf %657, %658 : vector<16x1xf32>
    %660 = vector.broadcast %659 : vector<16x1xf32> to vector<16x32xf32>
    %661 = arith.divf %651, %660 : vector<16x32xf32>
    %662 = vector.broadcast %643 : vector<1x32xf32> to vector<16x32xf32>
    %663 = arith.mulf %662, %661 : vector<16x32xf32>
    %664 = vector.broadcast %645 : vector<1x32xf32> to vector<16x32xf32>
    %665 = arith.addf %663, %664 : vector<16x32xf32>
    %c1_362 = arith.constant 1 : index
    %c0_363 = arith.constant 0 : index
    %c0_364 = arith.constant 0 : index
    %666 = vector.load %arg39[%c1_362, %c0_363, %c0_364] : memref<2x32x128xbf16, #tpu.memory_space<vmem>>, vector<1x32x128xbf16>
    %667 = vector.shape_cast %666 : vector<1x32x128xbf16> to vector<32x128xbf16>
    %c1_365 = arith.constant 1 : index
    %c0_366 = arith.constant 0 : index
    %c0_367 = arith.constant 0 : index
    %668 = vector.load %arg40[%c1_365, %c0_366, %c0_367] : memref<2x1x128xf32, #tpu.memory_space<vmem>>, vector<1x1x128xf32>
    %669 = vector.shape_cast %668 : vector<1x1x128xf32> to vector<1x128xf32>
    %c1_368 = arith.constant 1 : index
    %c0_369 = arith.constant 0 : index
    %c0_370 = arith.constant 0 : index
    %670 = vector.load %arg41[%c1_368, %c0_369, %c0_370] : memref<2x128x32xbf16, #tpu.memory_space<vmem>>, vector<1x128x32xbf16>
    %671 = vector.shape_cast %670 : vector<1x128x32xbf16> to vector<128x32xbf16>
    %c1_371 = arith.constant 1 : index
    %c0_372 = arith.constant 0 : index
    %c0_373 = arith.constant 0 : index
    %672 = vector.load %arg42[%c1_371, %c0_372, %c0_373] : memref<2x1x32xf32, #tpu.memory_space<vmem>>, vector<1x1x32xf32>
    %673 = vector.shape_cast %672 : vector<1x1x32xf32> to vector<1x32xf32>
    %674 = arith.truncf %665 : vector<16x32xf32> to vector<16x32xbf16>
    %cst_374 = arith.constant dense<0.000000e+00> : vector<16x128xf32>
    %675 = tpu.matmul %674, %667, %cst_374 {dimension_numbers = #tpu.dot_dimension_numbers<[1], [0], [0], [1], [0, 0, 1, 1], [], []>} : vector<16x32xbf16>, vector<32x128xbf16>, vector<16x128xf32> -> vector<16x128xf32>
    %676 = vector.broadcast %669 : vector<1x128xf32> to vector<16x128xf32>
    %677 = arith.addf %675, %676 : vector<16x128xf32>
    %cst_375 = arith.constant 0.000000e+00 : f32
    %678 = vector.broadcast %cst_375 : f32 to vector<16x128xf32>
    %679 = arith.maximumf %677, %678 : vector<16x128xf32>
    %680 = arith.truncf %679 : vector<16x128xf32> to vector<16x128xbf16>
    %cst_376 = arith.constant dense<0.000000e+00> : vector<16x32xf32>
    %681 = tpu.matmul %680, %671, %cst_376 {dimension_numbers = #tpu.dot_dimension_numbers<[1], [0], [0], [1], [0, 0, 1, 1], [], []>} : vector<16x128xbf16>, vector<128x32xbf16>, vector<16x32xf32> -> vector<16x32xf32>
    %682 = vector.broadcast %673 : vector<1x32xf32> to vector<16x32xf32>
    %683 = arith.addf %681, %682 : vector<16x32xf32>
    %684 = arith.addf %665, %683 : vector<16x32xf32>
    %c1_377 = arith.constant 1 : index
    %c0_378 = arith.constant 0 : index
    %c0_379 = arith.constant 0 : index
    %685 = vector.load %arg47[%c1_377, %c0_378, %c0_379] : memref<2x1x32xf32, #tpu.memory_space<vmem>>, vector<1x1x32xf32>
    %686 = vector.shape_cast %685 : vector<1x1x32xf32> to vector<1x32xf32>
    %c1_380 = arith.constant 1 : index
    %c0_381 = arith.constant 0 : index
    %c0_382 = arith.constant 0 : index
    %687 = vector.load %arg48[%c1_380, %c0_381, %c0_382] : memref<2x1x32xf32, #tpu.memory_space<vmem>>, vector<1x1x32xf32>
    %688 = vector.shape_cast %687 : vector<1x1x32xf32> to vector<1x32xf32>
    %cst_383 = arith.constant dense<0.000000e+00> : vector<16xf32>
    %689 = vector.multi_reduction <add>, %684, %cst_383 [1] : vector<16x32xf32> to vector<16xf32>
    %690 = vector.shape_cast %689 : vector<16xf32> to vector<16x1xf32>
    %cst_384 = arith.constant 3.200000e+01 : f32
    %691 = vector.broadcast %cst_384 : f32 to vector<16x1xf32>
    %692 = arith.divf %690, %691 : vector<16x1xf32>
    %693 = vector.broadcast %692 : vector<16x1xf32> to vector<16x32xf32>
    %694 = arith.subf %684, %693 : vector<16x32xf32>
    %695 = arith.mulf %694, %694 : vector<16x32xf32>
    %cst_385 = arith.constant dense<0.000000e+00> : vector<16xf32>
    %696 = vector.multi_reduction <add>, %695, %cst_385 [1] : vector<16x32xf32> to vector<16xf32>
    %697 = vector.shape_cast %696 : vector<16xf32> to vector<16x1xf32>
    %cst_386 = arith.constant 0.0322580636 : f32
    %698 = vector.broadcast %cst_386 : f32 to vector<16x1xf32>
    %699 = arith.mulf %697, %698 : vector<16x1xf32>
    %700 = math.sqrt %699 : vector<16x1xf32>
    %cst_387 = arith.constant 9.99999997E-7 : f32
    %701 = vector.broadcast %cst_387 : f32 to vector<16x1xf32>
    %702 = arith.addf %700, %701 : vector<16x1xf32>
    %703 = vector.broadcast %702 : vector<16x1xf32> to vector<16x32xf32>
    %704 = arith.divf %694, %703 : vector<16x32xf32>
    %705 = vector.broadcast %686 : vector<1x32xf32> to vector<16x32xf32>
    %706 = arith.mulf %705, %704 : vector<16x32xf32>
    %707 = vector.broadcast %688 : vector<1x32xf32> to vector<16x32xf32>
    %708 = arith.addf %706, %707 : vector<16x32xf32>
    %c0_388 = arith.constant 0 : index
    %c0_389 = arith.constant 0 : index
    %c0_390 = arith.constant 0 : index
    %709 = vector.load %arg50[%c0_388, %c0_389, %c0_390] : memref<1x16x32xf32, #tpu.memory_space<vmem>>, vector<1x16x32xf32>
    %710 = vector.shape_cast %709 : vector<1x16x32xf32> to vector<16x32xf32>
    %711 = vector.shape_cast %708 : vector<16x32xf32> to vector<1x16x32xf32>
    tpu.vector_store %arg50[%c0_388, %c0_389, %c0_390], %711 {strides = array<i32>} : memref<1x16x32xf32, #tpu.memory_space<vmem>>, vector<1x16x32xf32>,
    return
  }
  func.func @transform_0(%arg0: i32) -> (i32, i32, i32) {
    %c0_i32 = arith.constant 0 : i32
    %c0_i32_0 = arith.constant 0 : i32
    %c0_i32_1 = arith.constant 0 : i32
    return %arg0, %c0_i32, %c0_i32_0 : i32, i32, i32
  }
  func.func @transform_1(%arg0: i32) -> (i32, i32, i32) {
    %c0_i32 = arith.constant 0 : i32
    %c0_i32_0 = arith.constant 0 : i32
    %c0_i32_1 = arith.constant 0 : i32
    return %arg0, %c0_i32, %c0_i32_0 : i32, i32, i32
  }
  func.func @transform_2(%arg0: i32) -> (i32, i32, i32) {
    %c0_i32 = arith.constant 0 : i32
    %c0_i32_0 = arith.constant 0 : i32
    %c0_i32_1 = arith.constant 0 : i32
    return %arg0, %c0_i32, %c0_i32_0 : i32, i32, i32
  }
  func.func @transform_3(%arg0: i32) -> (i32, i32, i32) {
    %c0_i32 = arith.constant 0 : i32
    %c0_i32_0 = arith.constant 0 : i32
    %c0_i32_1 = arith.constant 0 : i32
    return %arg0, %c0_i32, %c0_i32_0 : i32, i32, i32
  }
  func.func @transform_4(%arg0: i32) -> (i32, i32) {
    %c0_i32 = arith.constant 0 : i32
    %c0_i32_0 = arith.constant 0 : i32
    %c0_i32_1 = arith.constant 0 : i32
    return %c0_i32, %c0_i32_0 : i32, i32
  }
  func.func @transform_5(%arg0: i32) -> (i32, i32) {
    %c0_i32 = arith.constant 0 : i32
    %c0_i32_0 = arith.constant 0 : i32
    %c0_i32_1 = arith.constant 0 : i32
    return %c0_i32, %c0_i32_0 : i32, i32
  }
  func.func @transform_6(%arg0: i32) -> (i32, i32, i32) {
    %c0_i32 = arith.constant 0 : i32
    %c0_i32_0 = arith.constant 0 : i32
    %c0_i32_1 = arith.constant 0 : i32
    %c0_i32_2 = arith.constant 0 : i32
    return %c0_i32, %c0_i32_0, %c0_i32_1 : i32, i32, i32
  }
  func.func @transform_7(%arg0: i32) -> (i32, i32, i32) {
    %c0_i32 = arith.constant 0 : i32
    %c0_i32_0 = arith.constant 0 : i32
    %c0_i32_1 = arith.constant 0 : i32
    %c0_i32_2 = arith.constant 0 : i32
    return %c0_i32, %c0_i32_0, %c0_i32_1 : i32, i32, i32
  }
  func.func @transform_8(%arg0: i32) -> (i32, i32, i32) {
    %c0_i32 = arith.constant 0 : i32
    %c0_i32_0 = arith.constant 0 : i32
    %c0_i32_1 = arith.constant 0 : i32
    %c0_i32_2 = arith.constant 0 : i32
    return %c0_i32, %c0_i32_0, %c0_i32_1 : i32, i32, i32
  }
  func.func @transform_9(%arg0: i32) -> (i32, i32, i32) {
    %c0_i32 = arith.constant 0 : i32
    %c0_i32_0 = arith.constant 0 : i32
    %c0_i32_1 = arith.constant 0 : i32
    %c0_i32_2 = arith.constant 0 : i32
    return %c0_i32, %c0_i32_0, %c0_i32_1 : i32, i32, i32
  }
  func.func @transform_10(%arg0: i32) -> (i32, i32, i32) {
    %c0_i32 = arith.constant 0 : i32
    %c0_i32_0 = arith.constant 0 : i32
    %c0_i32_1 = arith.constant 0 : i32
    %c0_i32_2 = arith.constant 0 : i32
    return %c0_i32, %c0_i32_0, %c0_i32_1 : i32, i32, i32
  }
  func.func @transform_11(%arg0: i32) -> (i32, i32, i32) {
    %c0_i32 = arith.constant 0 : i32
    %c0_i32_0 = arith.constant 0 : i32
    %c0_i32_1 = arith.constant 0 : i32
    %c0_i32_2 = arith.constant 0 : i32
    return %c0_i32, %c0_i32_0, %c0_i32_1 : i32, i32, i32
  }
  func.func @transform_12(%arg0: i32) -> (i32, i32, i32) {
    %c0_i32 = arith.constant 0 : i32
    %c0_i32_0 = arith.constant 0 : i32
    %c0_i32_1 = arith.constant 0 : i32
    %c0_i32_2 = arith.constant 0 : i32
    return %c0_i32, %c0_i32_0, %c0_i32_1 : i32, i32, i32
  }
  func.func @transform_13(%arg0: i32) -> (i32, i32, i32) {
    %c0_i32 = arith.constant 0 : i32
    %c0_i32_0 = arith.constant 0 : i32
    %c0_i32_1 = arith.constant 0 : i32
    %c0_i32_2 = arith.constant 0 : i32
    return %c0_i32, %c0_i32_0, %c0_i32_1 : i32, i32, i32
  }
  func.func @transform_14(%arg0: i32) -> (i32, i32, i32) {
    %c0_i32 = arith.constant 0 : i32
    %c0_i32_0 = arith.constant 0 : i32
    %c0_i32_1 = arith.constant 0 : i32
    %c0_i32_2 = arith.constant 0 : i32
    return %c0_i32, %c0_i32_0, %c0_i32_1 : i32, i32, i32
  }
  func.func @transform_15(%arg0: i32) -> (i32, i32, i32) {
    %c0_i32 = arith.constant 0 : i32
    %c0_i32_0 = arith.constant 0 : i32
    %c0_i32_1 = arith.constant 0 : i32
    %c0_i32_2 = arith.constant 0 : i32
    return %c0_i32, %c0_i32_0, %c0_i32_1 : i32, i32, i32
  }
  func.func @transform_16(%arg0: i32) -> (i32, i32, i32) {
    %c0_i32 = arith.constant 0 : i32
    %c0_i32_0 = arith.constant 0 : i32
    %c0_i32_1 = arith.constant 0 : i32
    %c0_i32_2 = arith.constant 0 : i32
    return %c0_i32, %c0_i32_0, %c0_i32_1 : i32, i32, i32
  }
  func.func @transform_17(%arg0: i32) -> (i32, i32, i32) {
    %c0_i32 = arith.constant 0 : i32
    %c0_i32_0 = arith.constant 0 : i32
    %c0_i32_1 = arith.constant 0 : i32
    %c0_i32_2 = arith.constant 0 : i32
    return %c0_i32, %c0_i32_0, %c0_i32_1 : i32, i32, i32
  }
  func.func @transform_18(%arg0: i32) -> (i32, i32, i32) {
    %c0_i32 = arith.constant 0 : i32
    %c0_i32_0 = arith.constant 0 : i32
    %c0_i32_1 = arith.constant 0 : i32
    %c0_i32_2 = arith.constant 0 : i32
    return %c0_i32, %c0_i32_0, %c0_i32_1 : i32, i32, i32
  }
  func.func @transform_19(%arg0: i32) -> (i32, i32, i32) {
    %c0_i32 = arith.constant 0 : i32
    %c0_i32_0 = arith.constant 0 : i32
    %c0_i32_1 = arith.constant 0 : i32
    %c0_i32_2 = arith.constant 0 : i32
    return %c0_i32, %c0_i32_0, %c0_i32_1 : i32, i32, i32
  }
  func.func @transform_20(%arg0: i32) -> (i32, i32, i32) {
    %c0_i32 = arith.constant 0 : i32
    %c0_i32_0 = arith.constant 0 : i32
    %c0_i32_1 = arith.constant 0 : i32
    %c0_i32_2 = arith.constant 0 : i32
    return %c0_i32, %c0_i32_0, %c0_i32_1 : i32, i32, i32
  }
  func.func @transform_21(%arg0: i32) -> (i32, i32, i32) {
    %c0_i32 = arith.constant 0 : i32
    %c0_i32_0 = arith.constant 0 : i32
    %c0_i32_1 = arith.constant 0 : i32
    %c0_i32_2 = arith.constant 0 : i32
    return %c0_i32, %c0_i32_0, %c0_i32_1 : i32, i32, i32
  }
  func.func @transform_22(%arg0: i32) -> (i32, i32, i32) {
    %c0_i32 = arith.constant 0 : i32
    %c0_i32_0 = arith.constant 0 : i32
    %c0_i32_1 = arith.constant 0 : i32
    %c0_i32_2 = arith.constant 0 : i32
    return %c0_i32, %c0_i32_0, %c0_i32_1 : i32, i32, i32
  }
  func.func @transform_23(%arg0: i32) -> (i32, i32, i32) {
    %c0_i32 = arith.constant 0 : i32
    %c0_i32_0 = arith.constant 0 : i32
    %c0_i32_1 = arith.constant 0 : i32
    %c0_i32_2 = arith.constant 0 : i32
    return %c0_i32, %c0_i32_0, %c0_i32_1 : i32, i32, i32
  }
  func.func @transform_24(%arg0: i32) -> (i32, i32, i32) {
    %c0_i32 = arith.constant 0 : i32
    %c0_i32_0 = arith.constant 0 : i32
    %c0_i32_1 = arith.constant 0 : i32
    %c0_i32_2 = arith.constant 0 : i32
    return %c0_i32, %c0_i32_0, %c0_i32_1 : i32, i32, i32
  }
  func.func @transform_25(%arg0: i32) -> (i32, i32, i32) {
    %c0_i32 = arith.constant 0 : i32
    %c0_i32_0 = arith.constant 0 : i32
    %c0_i32_1 = arith.constant 0 : i32
    %c0_i32_2 = arith.constant 0 : i32
    return %c0_i32, %c0_i32_0, %c0_i32_1 : i32, i32, i32
  }
  func.func @transform_26(%arg0: i32) -> (i32, i32, i32) {
    %c0_i32 = arith.constant 0 : i32
    %c0_i32_0 = arith.constant 0 : i32
    %c0_i32_1 = arith.constant 0 : i32
    %c0_i32_2 = arith.constant 0 : i32
    return %c0_i32, %c0_i32_0, %c0_i32_1 : i32, i32, i32
  }
  func.func @transform_27(%arg0: i32) -> (i32, i32, i32) {
    %c0_i32 = arith.constant 0 : i32
    %c0_i32_0 = arith.constant 0 : i32
    %c0_i32_1 = arith.constant 0 : i32
    %c0_i32_2 = arith.constant 0 : i32
    return %c0_i32, %c0_i32_0, %c0_i32_1 : i32, i32, i32
  }
  func.func @transform_28(%arg0: i32) -> (i32, i32, i32) {
    %c0_i32 = arith.constant 0 : i32
    %c0_i32_0 = arith.constant 0 : i32
    %c0_i32_1 = arith.constant 0 : i32
    %c0_i32_2 = arith.constant 0 : i32
    return %c0_i32, %c0_i32_0, %c0_i32_1 : i32, i32, i32
  }
  func.func @transform_29(%arg0: i32) -> (i32, i32, i32) {
    %c0_i32 = arith.constant 0 : i32
    %c0_i32_0 = arith.constant 0 : i32
    %c0_i32_1 = arith.constant 0 : i32
    %c0_i32_2 = arith.constant 0 : i32
    return %c0_i32, %c0_i32_0, %c0_i32_1 : i32, i32, i32
  }
  func.func @transform_30(%arg0: i32) -> (i32, i32, i32) {
    %c0_i32 = arith.constant 0 : i32
    %c0_i32_0 = arith.constant 0 : i32
    %c0_i32_1 = arith.constant 0 : i32
    %c0_i32_2 = arith.constant 0 : i32
    return %c0_i32, %c0_i32_0, %c0_i32_1 : i32, i32, i32
  }
  func.func @transform_31(%arg0: i32) -> (i32, i32, i32) {
    %c0_i32 = arith.constant 0 : i32
    %c0_i32_0 = arith.constant 0 : i32
    %c0_i32_1 = arith.constant 0 : i32
    %c0_i32_2 = arith.constant 0 : i32
    return %c0_i32, %c0_i32_0, %c0_i32_1 : i32, i32, i32
  }
  func.func @transform_32(%arg0: i32) -> (i32, i32, i32) {
    %c0_i32 = arith.constant 0 : i32
    %c0_i32_0 = arith.constant 0 : i32
    %c0_i32_1 = arith.constant 0 : i32
    %c0_i32_2 = arith.constant 0 : i32
    return %c0_i32, %c0_i32_0, %c0_i32_1 : i32, i32, i32
  }
  func.func @transform_33(%arg0: i32) -> (i32, i32, i32) {
    %c0_i32 = arith.constant 0 : i32
    %c0_i32_0 = arith.constant 0 : i32
    %c0_i32_1 = arith.constant 0 : i32
    %c0_i32_2 = arith.constant 0 : i32
    return %c0_i32, %c0_i32_0, %c0_i32_1 : i32, i32, i32
  }
  func.func @transform_34(%arg0: i32) -> (i32, i32, i32) {
    %c0_i32 = arith.constant 0 : i32
    %c0_i32_0 = arith.constant 0 : i32
    %c0_i32_1 = arith.constant 0 : i32
    %c0_i32_2 = arith.constant 0 : i32
    return %c0_i32, %c0_i32_0, %c0_i32_1 : i32, i32, i32
  }
  func.func @transform_35(%arg0: i32) -> (i32, i32, i32) {
    %c0_i32 = arith.constant 0 : i32
    %c0_i32_0 = arith.constant 0 : i32
    %c0_i32_1 = arith.constant 0 : i32
    %c0_i32_2 = arith.constant 0 : i32
    return %c0_i32, %c0_i32_0, %c0_i32_1 : i32, i32, i32
  }
  func.func @transform_36(%arg0: i32) -> (i32, i32, i32) {
    %c0_i32 = arith.constant 0 : i32
    %c0_i32_0 = arith.constant 0 : i32
    %c0_i32_1 = arith.constant 0 : i32
    %c0_i32_2 = arith.constant 0 : i32
    return %c0_i32, %c0_i32_0, %c0_i32_1 : i32, i32, i32
  }
  func.func @transform_37(%arg0: i32) -> (i32, i32, i32) {
    %c0_i32 = arith.constant 0 : i32
    %c0_i32_0 = arith.constant 0 : i32
    %c0_i32_1 = arith.constant 0 : i32
    %c0_i32_2 = arith.constant 0 : i32
    return %c0_i32, %c0_i32_0, %c0_i32_1 : i32, i32, i32
  }
  func.func @transform_38(%arg0: i32) -> (i32, i32, i32) {
    %c0_i32 = arith.constant 0 : i32
    %c0_i32_0 = arith.constant 0 : i32
    %c0_i32_1 = arith.constant 0 : i32
    %c0_i32_2 = arith.constant 0 : i32
    return %c0_i32, %c0_i32_0, %c0_i32_1 : i32, i32, i32
  }
  func.func @transform_39(%arg0: i32) -> (i32, i32, i32) {
    %c0_i32 = arith.constant 0 : i32
    %c0_i32_0 = arith.constant 0 : i32
    %c0_i32_1 = arith.constant 0 : i32
    %c0_i32_2 = arith.constant 0 : i32
    return %c0_i32, %c0_i32_0, %c0_i32_1 : i32, i32, i32
  }
  func.func @transform_40(%arg0: i32) -> (i32, i32, i32) {
    %c0_i32 = arith.constant 0 : i32
    %c0_i32_0 = arith.constant 0 : i32
    %c0_i32_1 = arith.constant 0 : i32
    %c0_i32_2 = arith.constant 0 : i32
    return %c0_i32, %c0_i32_0, %c0_i32_1 : i32, i32, i32
  }
  func.func @transform_41(%arg0: i32) -> (i32, i32, i32) {
    %c0_i32 = arith.constant 0 : i32
    %c0_i32_0 = arith.constant 0 : i32
    %c0_i32_1 = arith.constant 0 : i32
    %c0_i32_2 = arith.constant 0 : i32
    return %c0_i32, %c0_i32_0, %c0_i32_1 : i32, i32, i32
  }
  func.func @transform_42(%arg0: i32) -> (i32, i32, i32) {
    %c0_i32 = arith.constant 0 : i32
    %c0_i32_0 = arith.constant 0 : i32
    %c0_i32_1 = arith.constant 0 : i32
    %c0_i32_2 = arith.constant 0 : i32
    return %c0_i32, %c0_i32_0, %c0_i32_1 : i32, i32, i32
  }
  func.func @transform_43(%arg0: i32) -> (i32, i32, i32) {
    %c0_i32 = arith.constant 0 : i32
    %c0_i32_0 = arith.constant 0 : i32
    %c0_i32_1 = arith.constant 0 : i32
    %c0_i32_2 = arith.constant 0 : i32
    return %c0_i32, %c0_i32_0, %c0_i32_1 : i32, i32, i32
  }
  func.func @transform_44(%arg0: i32) -> (i32, i32, i32) {
    %c0_i32 = arith.constant 0 : i32
    %c0_i32_0 = arith.constant 0 : i32
    %c0_i32_1 = arith.constant 0 : i32
    %c0_i32_2 = arith.constant 0 : i32
    return %c0_i32, %c0_i32_0, %c0_i32_1 : i32, i32, i32
  }
  func.func @transform_45(%arg0: i32) -> (i32, i32, i32) {
    %c0_i32 = arith.constant 0 : i32
    %c0_i32_0 = arith.constant 0 : i32
    %c0_i32_1 = arith.constant 0 : i32
    %c0_i32_2 = arith.constant 0 : i32
    return %c0_i32, %c0_i32_0, %c0_i32_1 : i32, i32, i32
  }
  func.func @transform_46(%arg0: i32) -> (i32, i32, i32) {
    %c0_i32 = arith.constant 0 : i32
    %c0_i32_0 = arith.constant 0 : i32
    %c0_i32_1 = arith.constant 0 : i32
    %c0_i32_2 = arith.constant 0 : i32
    return %c0_i32, %c0_i32_0, %c0_i32_1 : i32, i32, i32
  }
  func.func @transform_47(%arg0: i32) -> (i32, i32, i32) {
    %c0_i32 = arith.constant 0 : i32
    %c0_i32_0 = arith.constant 0 : i32
    %c0_i32_1 = arith.constant 0 : i32
    %c0_i32_2 = arith.constant 0 : i32
    return %c0_i32, %c0_i32_0, %c0_i32_1 : i32, i32, i32
  }
  func.func @transform_48(%arg0: i32) -> (i32, i32, i32) {
    %c0_i32 = arith.constant 0 : i32
    %c0_i32_0 = arith.constant 0 : i32
    %c0_i32_1 = arith.constant 0 : i32
    return %arg0, %c0_i32, %c0_i32_0 : i32, i32, i32
  }
  func.func @transform_49(%arg0: i32) -> (i32, i32, i32) {
    %c0_i32 = arith.constant 0 : i32
    %c0_i32_0 = arith.constant 0 : i32
    %c0_i32_1 = arith.constant 0 : i32
    return %arg0, %c0_i32, %c0_i32_0 : i32, i32, i32
  }
}

</mosaic_0001>

<bundles_post_ra>
// kernel: trar_ed_forward.1
= control target key start
LH: loop header
LB: loop body
LE: loop exit
PB: predicated region body
PF: predicated region fallthrough
CT: control target
= control target key end

     0   :  { %s9018_s6 = smov 1   ;;  %s9019_s10 = smov 2   ;;  %s10722_s0 = inlined_call_operand.smem [shape: u32[50], index: -1, kind: input, shape index: {}] }
   0x1   :  { %s9106_s5 = sld [smem:[%s10722_s0]]   ;;  %s9020_s14 = smov 3  }
   0x2   :  { %s9111_s9 = sld [smem:[%s10722_s0 + %s9018_s6]]   ;;  %s9021_s18 = smov 4  }
   0x3   :  { %s9116_s13 = sld [smem:[%s10722_s0 + %s9019_s10]]   ;;  %s9022_s22 = smov 5  }
   0x4   :  { %s9121_s17 = sld [smem:[%s10722_s0 + %s9020_s14]]   ;;  %s9023_s26 = smov 6  }
   0x5   :  { %s9126_s21 = sld [smem:[%s10722_s0 + %s9021_s18]]   ;;  %s9024_s30 = smov 7  }
   0x6   :  { %s9131_s25 = sld [smem:[%s10722_s0 + %s9022_s22]]   ;;  %s9025_s4 = smov 8  }
   0x7   :  { %10811 = sst [smem:[#allocation50_spill]] %s9106_s5  ;;  %s9026_s10 = smov 9  }
   0x8   :  { %10812 = sst [smem:[#allocation51_spill]] %s9111_s9  ;;  %s9027_s15 = smov 10  }
   0x9   :  { %10813 = sst [smem:[#allocation52_spill]] %s9116_s13  ;;  %s9028_s20 = smov 11  }
   0xa   :  { %10814 = sst [smem:[#allocation53_spill]] %s9121_s17  ;;  %s9030_s1 = smov 13  }
   0xb   :  { %10815 = sst [smem:[#allocation54_spill]] %s9126_s21  ;;  %s9031_s7 = smov 14  }
   0xc   :  { %10816 = sst [smem:[#allocation55_spill]] %s9131_s25  ;;  %s9033_s22 = smov 16  }
   0xd   :  { %s9136_s29 = sld [smem:[%s10722_s0 + %s9023_s26]]   ;;  %s9029_s26 = smov 12  }
   0xe   :  { %s9141_s3 = sld [smem:[%s10722_s0 + %s9024_s30]]   ;;  %s9034_s28 = smov 17  }
   0xf   :  { %s9146_s8 = sld [smem:[%s10722_s0 + %s9025_s4]]  }
  0x10   :  { %s9151_s14 = sld [smem:[%s10722_s0 + %s9026_s10]]  }
  0x11   :  { %s9156_s19 = sld [smem:[%s10722_s0 + %s9027_s15]]   ;;  %s9032_s15 = smov 15  }
  0x12   :  { %s9161_s24 = sld [smem:[%s10722_s0 + %s9028_s20]]  }
  0x13   :  { %10817 = sst [smem:[#allocation56_spill]] %s9136_s29 }
  0x14   :  { %10818 = sst [smem:[#allocation57_spill]] %s9141_s3 }
  0x15   :  { %10819 = sst [smem:[#allocation58_spill]] %s9146_s8 }
  0x16   :  { %10820 = sst [smem:[#allocation59_spill]] %s9151_s14 }
  0x17   :  { %10821 = sst [smem:[#allocation60_spill]] %s9156_s19 }
  0x18   :  { %10822 = sst [smem:[#allocation61_spill]] %s9161_s24 }
  0x19   :  { %s9166_s30 = sld [smem:[%s10722_s0 + %s9029_s26]]  }
  0x1a   :  { %s9171_s6 = sld [smem:[%s10722_s0 + %s9030_s1]]  }
  0x1b   :  { %s9176_s12 = sld [smem:[%s10722_s0 + %s9031_s7]]   ;;  %s9035_s7 = smov 18  }
  0x1c   :  { %s9181_s20 = sld [smem:[%s10722_s0 + %s9032_s15]]   ;;  %s9036_s15 = smov 19  }
  0x1d   :  { %s9186_s27 = sld [smem:[%s10722_s0 + %s9033_s22]]   ;;  %s9037_s22 = smov 20  }
  0x1e   :  { %s9191_s4 = sld [smem:[%s10722_s0 + %s9034_s28]]   ;;  %s9038_s28 = smov 21  }
  0x1f   :  { %10823 = sst [smem:[#allocation62_spill]] %s9166_s30 }
  0x20   :  { %10824 = sst [smem:[#allocation63_spill]] %s9171_s6 }
  0x21   :  { %10825 = sst [smem:[#allocation64_spill]] %s9176_s12 }
  0x22   :  { %10826 = sst [smem:[#allocation65_spill]] %s9181_s20 }
  0x23   :  { %10827 = sst [smem:[#allocation66_spill]] %s9186_s27 }
  0x24   :  { %10828 = sst [smem:[#allocation67_spill]] %s9191_s4 }
  0x25   :  { %s9196_s25 = sld [smem:[%s10722_s0 + %s9035_s7]]   ;;  %s9039_s7 = smov 22  }
  0x26   :  { %s9201_s9 = sld [smem:[%s10722_s0 + %s9036_s15]]   ;;  %s9040_s15 = smov 23  }
  0x27   :  { %s9206_s20 = sld [smem:[%s10722_s0 + %s9037_s22]]   ;;  %s9041_s22 = smov 24  }
  0x28   :  { %s9211_s4 = sld [smem:[%s10722_s0 + %s9038_s28]]   ;;  %s9042_s28 = smov 25  }
  0x2b   :  { %10829 = sst [smem:[#allocation68_spill]] %s9196_s25 }
  0x2c   :  { %10830 = sst [smem:[#allocation69_spill]] %s9201_s9 }
  0x2d   :  { %10831 = sst [smem:[#allocation70_spill]] %s9206_s20 }
  0x2e   :  { %10832 = sst [smem:[#allocation71_spill]] %s9211_s4 }
  0x2f   :  { %s9216_s25 = sld [smem:[%s10722_s0 + %s9039_s7]]   ;;  %s9043_s7 = smov 26  }
  0x30   :  { %s9221_s9 = sld [smem:[%s10722_s0 + %s9040_s15]]   ;;  %s9044_s15 = smov 27  }
  0x31   :  { %s9226_s20 = sld [smem:[%s10722_s0 + %s9041_s22]]   ;;  %s9045_s22 = smov 28  }
  0x32   :  { %s9231_s4 = sld [smem:[%s10722_s0 + %s9042_s28]]   ;;  %s9046_s28 = smov 29  }
  0x33   :  { %s9241_s27 = sld [smem:[%s10722_s0 + %s9044_s15]]   ;;  %s9048_s15 = smov 31  }
  0x34   :  { %s9251_s12 = sld [smem:[%s10722_s0 + %s9046_s28]]   ;;  %s9050_s28 = smov 33  }
  0x35   :  { %10833 = sst [smem:[#allocation72_spill]] %s9216_s25 }
  0x36   :  { %10834 = sst [smem:[#allocation73_spill]] %s9221_s9 }
  0x37   :  { %10835 = sst [smem:[#allocation74_spill]] %s9226_s20 }
  0x38   :  { %10836 = sst [smem:[#allocation75_spill]] %s9231_s4 }
  0x39   :  { %s9236_s25 = sld [smem:[%s10722_s0 + %s9043_s7]]   ;;  %s9047_s7 = smov 30  }
  0x3a   :  { %10838 = sst [smem:[#allocation77_spill]] %s9241_s27 }
  0x3b   :  { %s9246_s20 = sld [smem:[%s10722_s0 + %s9045_s22]]   ;;  %s9049_s22 = smov 32  }
  0x3c   :  { %10840 = sst [smem:[#allocation79_spill]] %s9251_s12 }
  0x3d   :  { %s9261_s6 = sld [smem:[%s10722_s0 + %s9048_s15]]   ;;  %s9052_s15 = smov 35  }
  0x3e   :  { %s9271_s30 = sld [smem:[%s10722_s0 + %s9050_s28]]   ;;  %s9054_s28 = smov 37  }
  0x3f   :  { %10837 = sst [smem:[#allocation76_spill]] %s9236_s25 }
  0x40   :  { %s9256_s25 = sld [smem:[%s10722_s0 + %s9047_s7]]   ;;  %s9051_s7 = smov 34  }
  0x41   :  { %10839 = sst [smem:[#allocation78_spill]] %s9246_s20 }
  0x42   :  { %s9266_s20 = sld [smem:[%s10722_s0 + %s9049_s22]]   ;;  %s9053_s22 = smov 36  }
  0x43   :  { %10842 = sst [smem:[#allocation81_spill]] %s9261_s6 }
  0x44   :  { %s9281_s24 = sld [smem:[%s10722_s0 + %s9052_s15]]   ;;  %s9056_s15 = smov 39  }
  0x45   :  { %s9291_s19 = sld [smem:[%s10722_s0 + %s9054_s28]]   ;;  %s9058_s28 = smov 41  }
  0x46   :  { %10841 = sst [smem:[#allocation80_spill]] %s9256_s25 }
  0x47   :  { %s9276_s25 = sld [smem:[%s10722_s0 + %s9051_s7]]   ;;  %s9055_s7 = smov 38  }
  0x48   :  { %10843 = sst [smem:[#allocation82_spill]] %s9266_s20 }
  0x49   :  { %s9286_s20 = sld [smem:[%s10722_s0 + %s9053_s22]]   ;;  %s9057_s22 = smov 40  }
  0x4a   :  { %10845 = sst [smem:[#allocation84_spill]] %s9281_s24 }
  0x4b   :  { %s9301_s21 = sld [smem:[%s10722_s0 + %s9056_s15]]   ;;  %s9060_s15 = smov 43  }
  0x4c   :  { %s9311_s3 = sld [smem:[%s10722_s0 + %s9058_s28]]   ;;  %s9062_s28 = smov 45  }
  0x4d   :  { %10844 = sst [smem:[#allocation83_spill]] %s9276_s25 }
  0x4e   :  { %s9296_s25 = sld [smem:[%s10722_s0 + %s9055_s7]]   ;;  %s9059_s7 = smov 42  }
  0x4f   :  { %10846 = sst [smem:[#allocation85_spill]] %s9286_s20 }
  0x50   :  { %s9306_s20 = sld [smem:[%s10722_s0 + %s9057_s22]]   ;;  %s9061_s22 = smov 44  }
  0x51   :  { %s9316_s14 = sld [smem:[%s10722_s0 + %s9059_s7]]   ;;  %s9063_s7 = smov 46  }
  0x52   :  { %10849 = sst [smem:[#allocation88_spill]] %s9311_s3 }
  0x53   :  { %s9321_s29 = sld [smem:[%s10722_s0 + %s9060_s15]]   ;;  %s9064_s15 = smov 47  }
  0x54   :  { %10847 = sst [smem:[#allocation86_spill]] %s9296_s25 }
  0x55   :  { %s9331_s8 = sld [smem:[%s10722_s0 + %s9062_s28]]   ;;  %s9066_s28 = smov 49  }
  0x56   :  { %10848 = sst [smem:[#allocation87_spill]] %s9306_s20 }
  0x57   :  { %10850 = sst [smem:[#allocation89_spill]] %s9316_s14 }
  0x58   :  { %s9326_s20 = sld [smem:[%s10722_s0 + %s9061_s22]]   ;;  %s9065_s22 = smov 48  }
  0x59   :  { %10851 = sst [smem:[#allocation90_spill]] %s9321_s29 }
  0x5a   :  { %s9336_s17 = sld [smem:[%s10722_s0 + %s9063_s7]]  }
  0x5b   :  { %10853 = sst [smem:[#allocation92_spill]] %s9331_s8 }
  0x5c   :  { %s9341_s5 = sld [smem:[%s10722_s0 + %s9064_s15]]  }
  0x5d   :  { %s9351_s14 = sld [smem:[%s10722_s0 + %s9066_s28]]  }
  0x5e   :  { %10852 = sst [smem:[#allocation91_spill]] %s9326_s20 }
  0x5f   :  { %s9346_s20 = sld [smem:[%s10722_s0 + %s9065_s22]]  }
  0x62   :  { %10854 = sst [smem:[#allocation93_spill]] %s9341_s5 }
  0x63   :  { %10856 = sst [smem:[#allocation95_spill]] %s9351_s14 }
  0x65   :  { %10855 = sst [smem:[#allocation94_spill]] %s9346_s20 }
  0x66   :  { %105 = vsyncpa [#allocation3], 0 }
  0x67   :  { %107 = vsyncpa [#allocation3 + $0x1], 0 }
  0x68   :  { %108 = vsyncpa [#allocation6], 0 }
  0x69   :  { %110 = vsyncpa [#allocation6 + $0x1], 0 }
  0x6a   :  { %111 = vsyncpa [#allocation9], 0 }
  0x6b   :  { %112 = vsyncpa [#allocation12], 0 }
  0x6c   :  { %113 = vsyncpa [#allocation15], 0 }
  0x6d   :  { %114 = vsyncpa [#allocation18], 0 }
  0x6e   :  { %115 = vsyncpa [#allocation21], 0 }
  0x6f   :  { %116 = vsyncpa [#allocation24], 0 }
  0x70   :  { %117 = vsyncpa [#allocation27], 0 }
  0x71   :  { %118 = vsyncpa [#allocation30], 0 }
  0x72   :  { %119 = vsyncpa [#allocation33], 0 }
  0x73   :  { %120 = vsyncpa [#allocation4], 0 }
  0x74   :  { %122 = vsyncpa [#allocation4 + $0x1], 0 }
  0x75   :  { %123 = vsyncpa [#allocation36], 0 }
  0x76   :  { %125 = vsyncpa [#allocation36 + $0x1], 0  ;;  %s9353_s7 = smov 0   ;;  %s9355_s0 = smov 0  }
  0x77   :  { %s9357_s10 = smov 0   ;;  %s9359_s11 = smov 0  }
  0x78 LB: > { %s10857_s12 = sld [smem:[#allocation79_spill]]  ;;  %s10858_s5 = sld [smem:[#allocation93_spill]]  ;;  %s9016_s11 = sphi %s9359_s11, %s10950_s11   ;;  %s9012_s10 = sphi %s9357_s10, %s10952_s10   ;;  %s9008_s0 = sphi %s9355_s0, %s10954_s0   ;;  %s9004_s7 = sphi %s9353_s7, %s10953_s7  }
  0x79   : > { %s10859_s4 = sld [smem:[#allocation75_spill]]  ;;  %s10860_s13 = sld [smem:[#allocation52_spill]] }
  0x7a   : > { %s10861_s29 = sld [smem:[#allocation90_spill]]  ;;  %s10862_s25 = sld [smem:[#allocation86_spill]] }
  0x7b   : > { %s10863_s24 = sld [smem:[#allocation84_spill]]  ;;  %s10865_s6 = sld [smem:[#allocation81_spill]] }
  0x7c   : > { %s10864_s8 = sld [smem:[#allocation92_spill]]  ;;  %s10866_s3 = sld [smem:[#allocation88_spill]] }
  0x7d   : > { %s10867_s27 = sld [smem:[#allocation77_spill]]  ;;  %s10868_s9 = sld [smem:[#allocation73_spill]] }
  0x7e   : > { %10869 = sst [smem:[#allocation96_spill]] %s9012_s10  ;;  %s9067_s15 = smov [#allocation8]  }
  0x7f   : > { %s1285_s16 = sshll.u32 %s9067_s15, 4  ;;  %s9374_s18 = sadd.s32 4294967295, %s9016_s11   ;;  %s9379_s16 = int_to_ptr.vmem [resolvable:$true] %s1285_s16 }
  0x80   : > { %p6715_p0 = scmp.ge.s32.totalorder %s9016_s11, 1  ;;  %p10755_p1 = scmp.eq.s32.totalorder %s9374_s18, 0 }
  0x81   : > { %p1216_p2 = scmp.lt.s32.totalorder %s9016_s11, 3  ;;  %s9068_s23 = smov [#allocation11]  }
  0x82   : > { %s1317_s26 = sshll.u32 %s9068_s23, 4  ;;  %s9069_s1 = smov [#allocation14]   ;;  %s9394_s26 = int_to_ptr.vmem [resolvable:$true] %s1317_s26 }
  0x83   : > { %p9381_p3 = pnand %p6715_p0, %p1216_p2  ;;  %s1349_s2 = sshll.u32 %s9069_s1, 4  ;;  %s9396_s2 = int_to_ptr.vmem [resolvable:$true] %s1349_s2 }
  0x84   : > { %s8312_s15 = scalar_lea.hbm %s10868_s9, 32 }
  0x85   : > { %s10870_s22 = scalar_select %p9381_p3, 1, 0 }
  0x86   : > { %p7740_p5 = pneg %p9381_p3  ;;  %p8313_p7 = scmp.ne.s32.totalorder %s10868_s9, %s8312_s15 }
  0x87   : > { %p8319_p11 = scmp.lt.u32.totalorder %s8312_s15, %s10868_s9 }
  0x88   : > { %p9390_p6 = pnand %p7740_p5, %p10755_p1 }
  0x8a   : > { %s10871_s28 = scalar_select %p9390_p6, 1, 0 }
  0x8b   : > { %p9402_p8 = pneg %p9390_p6 }
  0x8d   : > { %s10872_s14 = scalar_select %p9402_p8, 1, 0 }
  0x8e   : > { %p8315_p9 = pnand %p9402_p8, %p8313_p7 }
  0x90   : > { %p8316_p10 = pneg %p8315_p9 }
  0x92   : > { %p8321_p12 = pnand %p8319_p11, %p8316_p10 }
  0x94   : > { %8324 = shalt.err (!%p8321_p12)
}
  0x95   : > { %s8325_s23 = scalar_lea.vmem %s9379_s16, 32  ;;  %p8333_p5 = scmp.lt.s32.totalorder %s9379_s16, %s9379_s16 }
  0x96   : > { %p8326_p13 = scmp.ne.s32.totalorder %s9379_s16, %s8325_s23  ;;  %p8334_p4 = scmp.lt.s32.totalorder %s8325_s23, %s8325_s23 }
  0x98   : > { %p8328_p0 = pnand %p8326_p13, %p9402_p8  ;;  %p8335_p1 = por %p8334_p4, %p8333_p5 }
  0x9a   : > { %p8329_p2 = pneg %p8328_p0 }
  0x9c   : > { %p8336_p3 = pnand %p8335_p1, %p8329_p2 }
  0x9e   : > { %8339 = shalt.err (!%p8336_p3)
}
  0x9f   : > { %s10760_s1 = smov 16   ;;  %s10762_s15 = smov 1  }
  0xa0   : > { %7743 = dma.hbm_to_vmem [thread:$0]  (!%p9390_p6), %s10868_s9, 32, %s9379_s16, [#allocation9], %s10760_s1, %s10760_s1, %s10762_s15  }
  0xa1   : > { %s8340_s20 = scalar_lea.hbm %s10867_s27, 32 }
  0xa2   : > { %p8341_p7 = scmp.ne.s32.totalorder %s10867_s27, %s8340_s20  ;;  %p8347_p3 = scmp.lt.u32.totalorder %s8340_s20, %s10867_s27 }
  0xa4   : > { %p8343_p4 = pnand %p8341_p7, %p9402_p8 }
  0xa6   : > { %p8344_p1 = pneg %p8343_p4 }
  0xa8   : > { %p8349_p9 = pnand %p8347_p3, %p8344_p1 }
  0xaa   : > { %8352 = shalt.err (!%p8349_p9)
}
  0xab   : > { %s8353_s23 = scalar_lea.vmem %s9394_s26, 32  ;;  %p8361_p13 = scmp.lt.s32.totalorder %s9394_s26, %s9394_s26 }
  0xac   : > { %p8354_p10 = scmp.ne.s32.totalorder %s9394_s26, %s8353_s23  ;;  %p8362_p0 = scmp.lt.s32.totalorder %s8353_s23, %s8353_s23 }
  0xae   : > { %p8356_p11 = pnand %p8354_p10, %p9402_p8  ;;  %p8363_p2 = por %p8362_p0, %p8361_p13 }
  0xb0   : > { %p8357_p12 = pneg %p8356_p11 }
  0xb2   : > { %p8364_p5 = pnand %p8363_p2, %p8357_p12 }
  0xb4   : > { %8367 = shalt.err (!%p8364_p5)
}
  0xb5   : > { %7749 = dma.hbm_to_vmem [thread:$0]  (!%p9390_p6), %s10867_s27, 32, %s9394_s26, [#allocation12], %s10760_s1, %s10760_s1, %s10762_s15  }
  0xb6   : > { %s8368_s20 = scalar_lea.hbm %s10865_s6, 32 }
  0xb7   : > { %p8369_p7 = scmp.ne.s32.totalorder %s10865_s6, %s8368_s20  ;;  %p8375_p3 = scmp.lt.u32.totalorder %s8368_s20, %s10865_s6 }
  0xb9   : > { %p8371_p4 = pnand %p8369_p7, %p9402_p8 }
  0xbb   : > { %p8372_p1 = pneg %p8371_p4 }
  0xbd   : > { %p8377_p9 = pnand %p8375_p3, %p8372_p1 }
  0xbf   : > { %8380 = shalt.err (!%p8377_p9)
}
  0xc0   : > { %s8381_s16 = scalar_lea.vmem %s9396_s2, 32  ;;  %p8389_p13 = scmp.lt.s32.totalorder %s9396_s2, %s9396_s2 }
  0xc1   : > { %p8382_p10 = scmp.ne.s32.totalorder %s9396_s2, %s8381_s16  ;;  %p8390_p0 = scmp.lt.s32.totalorder %s8381_s16, %s8381_s16 }
  0xc3   : > { %p8384_p11 = pnand %p8382_p10, %p9402_p8  ;;  %p8391_p2 = por %p8390_p0, %p8389_p13 }
  0xc5   : > { %p8385_p12 = pneg %p8384_p11 }
  0xc7   : > { %p8392_p5 = pnand %p8391_p2, %p8385_p12 }
  0xc9   : > { %8395 = shalt.err (!%p8392_p5)
}
  0xca   : > { %7755 = dma.hbm_to_vmem [thread:$0]  (!%p9390_p6), %s10865_s6, 32, %s9396_s2, [#allocation15], %s10760_s1, %s10760_s1, %s10762_s15  }
  0xcb   : > { %s9072_s26 = smov [#allocation17]   ;;  %s9073_s20 = smov [#allocation20]  }
  0xcc   : > { %s1381_s23 = sshll.u32 %s9072_s26, 4  ;;  %s1410_s16 = sshll.u32 %s9073_s20, 4  ;;  %s1382_s23 = int_to_ptr.vmem [resolvable:$true] %s1381_s23  ;;  %s1411_s16 = int_to_ptr.vmem [resolvable:$true] %s1410_s16 }
  0xcd   : > { %s8396_s9 = scalar_lea.hbm %s10863_s24, 32 }
  0xce   : > { %p8397_p7 = scmp.ne.s32.totalorder %s10863_s24, %s8396_s9  ;;  %p8403_p3 = scmp.lt.u32.totalorder %s8396_s9, %s10863_s24 }
  0xd0   : > { %p8399_p4 = pnand %p8397_p7, %p9402_p8 }
  0xd2   : > { %p8400_p1 = pneg %p8399_p4 }
  0xd4   : > { %p8405_p9 = pnand %p8403_p3, %p8400_p1 }
  0xd6   : > { %8408 = shalt.err (!%p8405_p9)
}
  0xd7   : > { %s8409_s27 = scalar_lea.vmem %s1382_s23, 32  ;;  %p8417_p13 = scmp.lt.s32.totalorder %s1382_s23, %s1382_s23 }
  0xd8   : > { %p8410_p10 = scmp.ne.s32.totalorder %s1382_s23, %s8409_s27  ;;  %p8418_p0 = scmp.lt.s32.totalorder %s8409_s27, %s8409_s27 }
  0xda   : > { %p8412_p11 = pnand %p8410_p10, %p9402_p8  ;;  %p8419_p2 = por %p8418_p0, %p8417_p13 }
  0xdc   : > { %p8413_p12 = pneg %p8412_p11 }
  0xde   : > { %p8420_p5 = pnand %p8419_p2, %p8413_p12 }
  0xe0   : > { %8423 = shalt.err (!%p8420_p5)
}
  0xe1   : > { %7761 = dma.hbm_to_vmem [thread:$0]  (!%p9390_p6), %s10863_s24, 32, %s1382_s23, [#allocation18], %s10760_s1, %s10760_s1, %s10762_s15  }
  0xe2   : > { %s8424_s9 = scalar_lea.hbm %s10862_s25, 512 }
  0xe3   : > { %p8425_p7 = scmp.ne.s32.totalorder %s10862_s25, %s8424_s9  ;;  %p8431_p3 = scmp.lt.u32.totalorder %s8424_s9, %s10862_s25 }
  0xe5   : > { %p8427_p4 = pnand %p8425_p7, %p9402_p8 }
  0xe7   : > { %p8428_p1 = pneg %p8427_p4 }
  0xe9   : > { %p8433_p9 = pnand %p8431_p3, %p8428_p1 }
  0xeb   : > { %8436 = shalt.err (!%p8433_p9)
}
  0xec   : > { %s8437_s27 = scalar_lea.vmem %s1411_s16, 512  ;;  %p8445_p13 = scmp.lt.s32.totalorder %s1411_s16, %s1411_s16 }
  0xed   : > { %p8438_p10 = scmp.ne.s32.totalorder %s1411_s16, %s8437_s27  ;;  %p8446_p0 = scmp.lt.s32.totalorder %s8437_s27, %s8437_s27 }
  0xef   : > { %p8440_p11 = pnand %p8438_p10, %p9402_p8  ;;  %p8447_p2 = por %p8446_p0, %p8445_p13 }
  0xf1   : > { %p8441_p12 = pneg %p8440_p11 }
  0xf3   : > { %p8448_p5 = pnand %p8447_p2, %p8441_p12 }
  0xf5   : > { %8451 = shalt.err (!%p8448_p5)
}
  0xf6   : > { %s9074_s2 = smov 64   ;;  %s9075_s26 = smov 4  }
  0xf7   : > { %7767 = dma.hbm_to_vmem [thread:$0]  (!%p9390_p6), %s10862_s25, 512, %s1411_s16, [#allocation21], %s9074_s2, %s9074_s2, %s9075_s26  }
  0xf8   : > { %s9076_s23 = smov [#allocation23]   ;;  %s9077_s9 = smov [#allocation26]  }
  0xf9   : > { %s1439_s20 = sshll.u32 %s9076_s23, 4  ;;  %s1465_s1 = sshll.u32 %s9077_s9, 4  ;;  %s1440_s20 = int_to_ptr.vmem [resolvable:$true] %s1439_s20  ;;  %s1466_s1 = int_to_ptr.vmem [resolvable:$true] %s1465_s1 }
  0xfa   : > { %s8452_s15 = scalar_lea.hbm %s10866_s3, 32 }
  0xfb   : > { %p8453_p7 = scmp.ne.s32.totalorder %s10866_s3, %s8452_s15  ;;  %p8459_p3 = scmp.lt.u32.totalorder %s8452_s15, %s10866_s3 }
  0xfd   : > { %p8455_p4 = pnand %p8453_p7, %p9402_p8 }
  0xff   : > { %p8456_p1 = pneg %p8455_p4 }
 0x101   : > { %p8461_p9 = pnand %p8459_p3, %p8456_p1 }
 0x103   : > { %8464 = shalt.err (!%p8461_p9)
}
 0x104   : > { %s8465_s27 = scalar_lea.vmem %s1440_s20, 32  ;;  %p8473_p13 = scmp.lt.s32.totalorder %s1440_s20, %s1440_s20 }
 0x105   : > { %p8466_p10 = scmp.ne.s32.totalorder %s1440_s20, %s8465_s27  ;;  %p8474_p0 = scmp.lt.s32.totalorder %s8465_s27, %s8465_s27 }
 0x107   : > { %p8468_p11 = pnand %p8466_p10, %p9402_p8  ;;  %p8475_p2 = por %p8474_p0, %p8473_p13 }
 0x109   : > { %p8469_p12 = pneg %p8468_p11 }
 0x10b   : > { %p8476_p5 = pnand %p8475_p2, %p8469_p12 }
 0x10d   : > { %8479 = shalt.err (!%p8476_p5)
}
 0x10e   : > { %s10873_s16 = smov 1   ;;  %s10874_s2 = smov 16  }
 0x10f   : > { %7773 = dma.hbm_to_vmem [thread:$0]  (!%p9390_p6), %s10866_s3, 32, %s1440_s20, [#allocation24], %s10874_s2, %s10874_s2, %s10873_s16  }
 0x110   : > { %s8480_s15 = scalar_lea.hbm %s10861_s29, 32 }
 0x111   : > { %p8481_p7 = scmp.ne.s32.totalorder %s10861_s29, %s8480_s15  ;;  %p8487_p3 = scmp.lt.u32.totalorder %s8480_s15, %s10861_s29 }
 0x113   : > { %p8483_p4 = pnand %p8481_p7, %p9402_p8 }
 0x115   : > { %p8484_p1 = pneg %p8483_p4 }
 0x117   : > { %p8489_p9 = pnand %p8487_p3, %p8484_p1 }
 0x119   : > { %8492 = shalt.err (!%p8489_p9)
}
 0x11a   : > { %s8493_s26 = scalar_lea.vmem %s1466_s1, 32  ;;  %p8501_p13 = scmp.lt.s32.totalorder %s1466_s1, %s1466_s1 }
 0x11b   : > { %p8494_p10 = scmp.ne.s32.totalorder %s1466_s1, %s8493_s26  ;;  %p8502_p0 = scmp.lt.s32.totalorder %s8493_s26, %s8493_s26 }
 0x11d   : > { %p8496_p11 = pnand %p8494_p10, %p9402_p8  ;;  %p8503_p2 = por %p8502_p0, %p8501_p13 }
 0x11f   : > { %p8497_p12 = pneg %p8496_p11 }
 0x121   : > { %p8504_p5 = pnand %p8503_p2, %p8497_p12 }
 0x123   : > { %8507 = shalt.err (!%p8504_p5)
}
 0x124   : > { %7779 = dma.hbm_to_vmem [thread:$0]  (!%p9390_p6), %s10861_s29, 32, %s1466_s1, [#allocation27], %s10874_s2, %s10874_s2, %s10873_s16  }
 0x125   : > { %s9078_s23 = smov [#allocation29]   ;;  %s8508_s9 = scalar_lea.hbm %s10864_s8, 32 }
 0x126   : > { %s1491_s20 = sshll.u32 %s9078_s23, 4  ;;  %p8509_p7 = scmp.ne.s32.totalorder %s10864_s8, %s8508_s9  ;;  %s1492_s20 = int_to_ptr.vmem [resolvable:$true] %s1491_s20 }
 0x127   : > { %p8515_p3 = scmp.lt.u32.totalorder %s8508_s9, %s10864_s8 }
 0x128   : > { %p8511_p4 = pnand %p8509_p7, %p9402_p8 }
 0x12a   : > { %p8512_p1 = pneg %p8511_p4 }
 0x12c   : > { %p8517_p9 = pnand %p8515_p3, %p8512_p1 }
 0x12e   : > { %8520 = shalt.err (!%p8517_p9)
}
 0x12f   : > { %s8521_s27 = scalar_lea.vmem %s1492_s20, 32  ;;  %p8529_p13 = scmp.lt.s32.totalorder %s1492_s20, %s1492_s20 }
 0x130   : > { %p8522_p10 = scmp.ne.s32.totalorder %s1492_s20, %s8521_s27  ;;  %p8530_p0 = scmp.lt.s32.totalorder %s8521_s27, %s8521_s27 }
 0x132   : > { %p8524_p11 = pnand %p8522_p10, %p9402_p8  ;;  %p8531_p2 = por %p8530_p0, %p8529_p13 }
 0x134   : > { %p8525_p12 = pneg %p8524_p11 }
 0x136   : > { %p8532_p5 = pnand %p8531_p2, %p8525_p12 }
 0x138   : > { %8535 = shalt.err (!%p8532_p5)
}
 0x139   : > { %7785 = dma.hbm_to_vmem [thread:$0]  (!%p9390_p6), %s10864_s8, 32, %s1492_s20, [#allocation30], %s10874_s2, %s10874_s2, %s10873_s16  }
 0x13a   : > { %s6714_s1 = sadd.s32 4294967294, %s9016_s11   ;;  %s9522_s15 = sadd.s32 1, %s9016_s11  }
 0x13b   : > { %10875 = sst [smem:[#allocation97_spill]] %s9522_s15  ;;  %s135_s26 = ssub.s32 %s9016_s11, %s9522_s15 }
 0x13c   : > { %s138_s23 = sadd.s32 1, %s9012_s10  ;;  %p136_p7 = scmp.eq.s32.totalorder %s135_s26, 0 }
 0x13d   : > { %p145_p4 = scmp.ne.s32.totalorder %s9012_s10, %s9008_s0  ;;  %p146_p1 = scmp.eq.s32.totalorder %s9016_s11, 0 }
 0x13e   : > { %p151_p3 = scmp.ne.s32.totalorder %s9008_s0, %s9004_s7  ;;  %p10877_p10 = scmp.eq.s32.totalorder %s9374_s18, 0 }
 0x13f   : > { %s9533_s9 = scalar_select %p136_p7, %s9012_s10, %s138_s23  }
 0x140   : > { %p147_p9 = por %p146_p1, %p145_p4  ;;  %p9537_p11 = por %p10877_p10, %p151_p3 }
 0x141   : > { %10876 = sst [smem:[#allocation98_spill]] %s9533_s9  ;;  %p1177_p12 = scmp.eq.s32.totalorder %s9374_s18, 1 }
 0x142   : > { %s10878_s20 = scalar_select %p9537_p11, 1, 0 }
 0x143   : > { %p1183_p13 = scmp.eq.s32.totalorder %s6714_s1, 1  ;;  %p7826_p0 = scmp.lt.s32.totalorder %s9016_s11, 2 }
 0x144   : > { %s9544_s27 = sand.u32 1, %s9012_s10   ;;  %p9546_p2 = por %p1177_p12, %p145_p4 }
 0x145   : > { %p9550_p5 = por %p1183_p13, %p151_p3  ;;  %p9554_p7 = pnand %p7826_p0, %p147_p9 }
 0x146   : > { %s10879_s26 = scalar_select %p9546_p2, 1, 0 }
 0x147   : > { %s10880_s23 = scalar_select %p9550_p5, 1, 0 }
 0x148   : > { %s10882_s3 = scalar_select %p9554_p7, 1, 0 }
 0x149   : > { %10881 = sst [smem:[#allocation99_spill]] %s10880_s23  ;;  %s1557_s1 = sand.u32 1, %s9016_s11  }
 0x14a   : > { %s10771_s6 = sshll.u32 %s9016_s11, 4  ;;  %s1560_s24 = scalar_lea.vmem [#allocation5], %s9544_s27 }
 0x14b   : > { %s9563_s8 = scalar_lea.hbm %s10860_s13, %s10771_s6  ;;  %s1567_s25 = sshll.u32 %s1560_s24, 4  ;;  %s9566_s25 = int_to_ptr.vmem [resolvable:$true] %s1567_s25 }
 0x14c   : > { %s9568_s29 = scalar_lea.sflag [#allocation6], %s1557_s1  ;;  %s8536_s9 = scalar_lea.hbm %s9563_s8, 16 }
 0x14d   : > { %p8537_p4 = scmp.ne.s32.totalorder %s9563_s8, %s8536_s9  ;;  %p9574_p1 = pneg %p9554_p7 }
 0x14e   : > { %s8541_s6 = scalar_lea.hbm %s10860_s13, 32  ;;  %p8542_p10 = scmp.lt.u32.totalorder %s9563_s8, %s10860_s13 }
 0x14f   : > { %s10883_s10 = scalar_select %p9574_p1, 1, 0 }
 0x150   : > { %p8539_p3 = pnand %p9574_p1, %p8537_p4  ;;  %p8543_p12 = scmp.lt.u32.totalorder %s8541_s6, %s8536_s9 }
 0x151   : > { %p8545_p0 = scmp.lt.u32.totalorder %s8536_s9, %s9563_s8 }
 0x152   : > { %p8540_p9 = pneg %p8539_p3  ;;  %p8544_p13 = por %p8543_p12, %p8542_p10 }
 0x154   : > { %p8546_p5 = por %p8545_p0, %p8544_p13 }
 0x156   : > { %p8547_p2 = pnand %p8546_p5, %p8540_p9 }
 0x158   : > { %8550 = shalt.err (!%p8547_p2)
}
 0x159   : > { %s8551_s24 = scalar_lea.vmem %s9566_s25, 16  ;;  %s9079_s1 = smov [#allocation5]  }
 0x15a   : > { %p8552_p11 = scmp.ne.s32.totalorder %s9566_s25, %s8551_s24  ;;  %s8556_s15 = sshll.u32 %s9079_s1, 4  ;;  %s8557_s15 = int_to_ptr.vmem [resolvable:$false] %s8556_s15 }
 0x15b   : > { %s8558_s23 = scalar_lea.vmem %s8557_s15, 32  ;;  %p8559_p4 = scmp.lt.s32.totalorder %s9566_s25, %s8557_s15 }
 0x15c   : > { %p8554_p6 = pnand %p8552_p11, %p9574_p1  ;;  %p8560_p3 = scmp.lt.s32.totalorder %s8558_s23, %s8551_s24 }
 0x15e   : > { %p8555_p8 = pneg %p8554_p6  ;;  %p8561_p10 = por %p8560_p3, %p8559_p4 }
 0x160   : > { %p8562_p12 = pnand %p8561_p10, %p8555_p8 }
 0x162   : > { %8565 = shalt.err (!%p8562_p12)
}
 0x163   : > { %7798 = dma.hbm_to_vmem [thread:$0]  (!%p9554_p7), %s9563_s8, 16, %s9566_s25, %s9568_s29  }
 0x164   : > { %s9080_s6 = smov [#allocation10]   ;;  %s9081_s1 = smov [#allocation13]  }
 0x165   : > { %s1301_s9 = sshll.u32 %s9080_s6, 4  ;;  %s1333_s13 = sshll.u32 %s9081_s1, 4  ;;  %s1302_s9 = int_to_ptr.vmem [resolvable:$true] %s1301_s9  ;;  %s9594_s13 = int_to_ptr.vmem [resolvable:$true] %s1333_s13 }
 0x166   : > { %s8566_s15 = scalar_lea.hbm %s10859_s4, 32  ;;  %p10884_p8 = scmp.ne.s32.totalorder %s10872_s14, 0 }
 0x167   : > { %p8567_p6 = scmp.ne.s32.totalorder %s10859_s4, %s8566_s15  ;;  %p8573_p5 = scmp.lt.u32.totalorder %s8566_s15, %s10859_s4 }
 0x169   : > { %p8569_p11 = pnand %p8567_p6, %p10884_p8 }
 0x16b   : > { %p8570_p2 = pneg %p8569_p11 }
 0x16d   : > { %p8575_p9 = pnand %p8573_p5, %p8570_p2 }
 0x16f   : > { %8578 = shalt.err (!%p8575_p9)
}
 0x170   : > { %s8579_s23 = scalar_lea.vmem %s1302_s9, 32  ;;  %p8587_p3 = scmp.lt.s32.totalorder %s1302_s9, %s1302_s9 }
 0x171   : > { %p8580_p13 = scmp.ne.s32.totalorder %s1302_s9, %s8579_s23  ;;  %p8588_p10 = scmp.lt.s32.totalorder %s8579_s23, %s8579_s23 }
 0x173   : > { %p8582_p0 = pnand %p8580_p13, %p10884_p8  ;;  %p8589_p12 = por %p8588_p10, %p8587_p3 }
 0x175   : > { %p8583_p4 = pneg %p8582_p0 }
 0x177   : > { %p8590_p7 = pnand %p8589_p12, %p8583_p4 }
 0x179   : > { %8593 = shalt.err (!%p8590_p7)
}
 0x17a   : > { %p10885_p1 = scmp.ne.s32.totalorder %s10871_s28, 0  ;;  %s8594_s25 = scalar_lea.hbm %s10857_s12, 32 }
 0x17b   : > { %p8595_p6 = scmp.ne.s32.totalorder %s10857_s12, %s8594_s25  ;;  %p8601_p5 = scmp.lt.u32.totalorder %s8594_s25, %s10857_s12 }
 0x17c   : > { %7746 = dma.hbm_to_vmem [thread:$0]  (!%p10885_p1), %s10859_s4, 32, %s1302_s9, [#allocation9], %s10874_s2, %s10874_s2, %s10873_s16  }
 0x17d   : > { %p8597_p11 = pnand %p8595_p6, %p10884_p8 }
 0x17f   : > { %p8598_p2 = pneg %p8597_p11 }
 0x181   : > { %p8603_p9 = pnand %p8601_p5, %p8598_p2 }
 0x183   : > { %8606 = shalt.err (!%p8603_p9)
}
 0x184   : > { %s8607_s8 = scalar_lea.vmem %s9594_s13, 32  ;;  %p8615_p4 = scmp.lt.s32.totalorder %s9594_s13, %s9594_s13 }
 0x185   : > { %p8608_p7 = scmp.ne.s32.totalorder %s9594_s13, %s8607_s8  ;;  %p8616_p3 = scmp.lt.s32.totalorder %s8607_s8, %s8607_s8 }
 0x187   : > { %p8610_p13 = pnand %p8608_p7, %p10884_p8  ;;  %p8617_p10 = por %p8616_p3, %p8615_p4 }
 0x189   : > { %p8611_p0 = pneg %p8610_p13 }
 0x18b   : > { %p8618_p12 = pnand %p8617_p10, %p8611_p0 }
 0x18d   : > { %8621 = shalt.err (!%p8618_p12)
}
 0x18e   : > { %7752 = dma.hbm_to_vmem [thread:$0]  (!%p10885_p1), %s10857_s12, 32, %s9594_s13, [#allocation12], %s10874_s2, %s10874_s2, %s10873_s16  }
 0x18f   : > { %s9082_s24 = smov [#allocation16]   ;;  %s9083_s9 = smov [#allocation19]  }
 0x190   : > { %s1365_s6 = sshll.u32 %s9082_s24, 4  ;;  %s1397_s1 = sshll.u32 %s9083_s9, 4  ;;  %s1366_s6 = int_to_ptr.vmem [resolvable:$true] %s1365_s6  ;;  %s9627_s1 = int_to_ptr.vmem [resolvable:$true] %s1397_s1 }
 0x191   : > { %s8622_s15 = scalar_lea.hbm %s9271_s30, 32 }
 0x192   : > { %p8623_p6 = scmp.ne.s32.totalorder %s9271_s30, %s8622_s15  ;;  %p8629_p5 = scmp.lt.u32.totalorder %s8622_s15, %s9271_s30 }
 0x194   : > { %p8625_p11 = pnand %p8623_p6, %p10884_p8 }
 0x196   : > { %p8626_p2 = pneg %p8625_p11 }
 0x198   : > { %p8631_p9 = pnand %p8629_p5, %p8626_p2 }
 0x19a   : > { %8634 = shalt.err (!%p8631_p9)
}
 0x19b   : > { %s8635_s23 = scalar_lea.vmem %s1366_s6, 32  ;;  %p8643_p4 = scmp.lt.s32.totalorder %s1366_s6, %s1366_s6 }
 0x19c   : > { %p8636_p7 = scmp.ne.s32.totalorder %s1366_s6, %s8635_s23  ;;  %p8644_p3 = scmp.lt.s32.totalorder %s8635_s23, %s8635_s23 }
 0x19e   : > { %p8638_p13 = pnand %p8636_p7, %p10884_p8  ;;  %p8645_p10 = por %p8644_p3, %p8643_p4 }
 0x1a0   : > { %p8639_p0 = pneg %p8638_p13 }
 0x1a2   : > { %p8646_p12 = pnand %p8645_p10, %p8639_p0 }
 0x1a4   : > { %8649 = shalt.err (!%p8646_p12)
}
 0x1a5   : > { %7758 = dma.hbm_to_vmem [thread:$0]  (!%p10885_p1), %s9271_s30, 32, %s1366_s6, [#allocation15], %s10874_s2, %s10874_s2, %s10873_s16  }
 0x1a6   : > { %s8650_s13 = scalar_lea.hbm %s9291_s19, 32 }
 0x1a7   : > { %p8651_p6 = scmp.ne.s32.totalorder %s9291_s19, %s8650_s13  ;;  %p8657_p5 = scmp.lt.u32.totalorder %s8650_s13, %s9291_s19 }
 0x1a9   : > { %p8653_p11 = pnand %p8651_p6, %p10884_p8 }
 0x1ab   : > { %p8654_p2 = pneg %p8653_p11 }
 0x1ad   : > { %p8659_p9 = pnand %p8657_p5, %p8654_p2 }
 0x1af   : > { %8662 = shalt.err (!%p8659_p9)
}
 0x1b0   : > { %s8663_s25 = scalar_lea.vmem %s9627_s1, 32  ;;  %p8671_p4 = scmp.lt.s32.totalorder %s9627_s1, %s9627_s1 }
 0x1b1   : > { %p8664_p7 = scmp.ne.s32.totalorder %s9627_s1, %s8663_s25  ;;  %p8672_p3 = scmp.lt.s32.totalorder %s8663_s25, %s8663_s25 }
 0x1b3   : > { %p8666_p13 = pnand %p8664_p7, %p10884_p8  ;;  %p8673_p10 = por %p8672_p3, %p8671_p4 }
 0x1b5   : > { %p8667_p0 = pneg %p8666_p13 }
 0x1b7   : > { %p8674_p12 = pnand %p8673_p10, %p8667_p0 }
 0x1b9   : > { %8677 = shalt.err (!%p8674_p12)
}
 0x1ba   : > { %7764 = dma.hbm_to_vmem [thread:$0]  (!%p10885_p1), %s9291_s19, 32, %s9627_s1, [#allocation18], %s10874_s2, %s10874_s2, %s10873_s16  }
 0x1bb   : > { %s9084_s8 = smov [#allocation22]   ;;  %s9085_s6 = smov [#allocation25]  }
 0x1bc   : > { %s1423_s24 = sshll.u32 %s9084_s8, 4  ;;  %s1452_s9 = sshll.u32 %s9085_s6, 4  ;;  %s1424_s24 = int_to_ptr.vmem [resolvable:$true] %s1423_s24  ;;  %s9660_s9 = int_to_ptr.vmem [resolvable:$true] %s1452_s9 }
 0x1bd   : > { %s8678_s15 = scalar_lea.hbm %s9301_s21, 32 }
 0x1be   : > { %p8679_p6 = scmp.ne.s32.totalorder %s9301_s21, %s8678_s15  ;;  %p8685_p5 = scmp.lt.u32.totalorder %s8678_s15, %s9301_s21 }
 0x1c0   : > { %p8681_p11 = pnand %p8679_p6, %p10884_p8 }
 0x1c2   : > { %p8682_p2 = pneg %p8681_p11 }
 0x1c4   : > { %p8687_p9 = pnand %p8685_p5, %p8682_p2 }
 0x1c6   : > { %8690 = shalt.err (!%p8687_p9)
}
 0x1c7   : > { %s8691_s23 = scalar_lea.vmem %s1424_s24, 32  ;;  %p8699_p4 = scmp.lt.s32.totalorder %s1424_s24, %s1424_s24 }
 0x1c8   : > { %p8692_p7 = scmp.ne.s32.totalorder %s1424_s24, %s8691_s23  ;;  %p8700_p3 = scmp.lt.s32.totalorder %s8691_s23, %s8691_s23 }
 0x1ca   : > { %p8694_p13 = pnand %p8692_p7, %p10884_p8  ;;  %p8701_p10 = por %p8700_p3, %p8699_p4 }
 0x1cc   : > { %p8695_p0 = pneg %p8694_p13 }
 0x1ce   : > { %p8702_p12 = pnand %p8701_p10, %p8695_p0 }
 0x1d0   : > { %8705 = shalt.err (!%p8702_p12)
}
 0x1d1   : > { %s10886_s1 = sld [smem:[#allocation89_spill]] }
 0x1d2   : > { %7770 = dma.hbm_to_vmem [thread:$0]  (!%p10885_p1), %s9301_s21, 32, %s1424_s24, [#allocation21], %s10874_s2, %s10874_s2, %s10873_s16  }
 0x1d7   : > { %s8706_s13 = scalar_lea.hbm %s10886_s1, 32 }
 0x1d8   : > { %p8707_p6 = scmp.ne.s32.totalorder %s10886_s1, %s8706_s13  ;;  %p8713_p5 = scmp.lt.u32.totalorder %s8706_s13, %s10886_s1 }
 0x1da   : > { %p8709_p11 = pnand %p8707_p6, %p10884_p8 }
 0x1dc   : > { %p8710_p2 = pneg %p8709_p11 }
 0x1de   : > { %p8715_p9 = pnand %p8713_p5, %p8710_p2 }
 0x1e0   : > { %8718 = shalt.err (!%p8715_p9)
}
 0x1e1   : > { %s8719_s25 = scalar_lea.vmem %s9660_s9, 32  ;;  %p8727_p4 = scmp.lt.s32.totalorder %s9660_s9, %s9660_s9 }
 0x1e2   : > { %p8720_p7 = scmp.ne.s32.totalorder %s9660_s9, %s8719_s25  ;;  %p8728_p3 = scmp.lt.s32.totalorder %s8719_s25, %s8719_s25 }
 0x1e4   : > { %p8722_p13 = pnand %p8720_p7, %p10884_p8  ;;  %p8729_p10 = por %p8728_p3, %p8727_p4 }
 0x1e6   : > { %p8723_p0 = pneg %p8722_p13 }
 0x1e8   : > { %p8730_p12 = pnand %p8729_p10, %p8723_p0 }
 0x1ea   : > { %8733 = shalt.err (!%p8730_p12)
}
 0x1eb   : > { %s10887_s8 = sld [smem:[#allocation91_spill]]  ;;  %s9086_s24 = smov [#allocation28]  }
 0x1ec   : > { %7776 = dma.hbm_to_vmem [thread:$0]  (!%p10885_p1), %s10886_s1, 32, %s9660_s9, [#allocation24], %s10874_s2, %s10874_s2, %s10873_s16  }
 0x1ed   : > { %s1478_s6 = sshll.u32 %s9086_s24, 4  ;;  %s9087_s15 = smov [#allocation31]   ;;  %s1479_s6 = int_to_ptr.vmem [resolvable:$true] %s1478_s6 }
 0x1ee   : > { %s1504_s23 = sshll.u32 %s9087_s15, 4  ;;  %s9693_s23 = int_to_ptr.vmem [resolvable:$true] %s1504_s23 }
 0x1f1   : > { %s8734_s13 = scalar_lea.hbm %s10887_s8, 32 }
 0x1f2   : > { %p8735_p6 = scmp.ne.s32.totalorder %s10887_s8, %s8734_s13  ;;  %p8741_p5 = scmp.lt.u32.totalorder %s8734_s13, %s10887_s8 }
 0x1f4   : > { %p8737_p11 = pnand %p8735_p6, %p10884_p8 }
 0x1f6   : > { %p8738_p2 = pneg %p8737_p11 }
 0x1f8   : > { %p8743_p9 = pnand %p8741_p5, %p8738_p2 }
 0x1fa   : > { %8746 = shalt.err (!%p8743_p9)
}
 0x1fb   : > { %s8747_s25 = scalar_lea.vmem %s1479_s6, 32  ;;  %p8755_p4 = scmp.lt.s32.totalorder %s1479_s6, %s1479_s6 }
 0x1fc   : > { %p8748_p7 = scmp.ne.s32.totalorder %s1479_s6, %s8747_s25  ;;  %p8756_p3 = scmp.lt.s32.totalorder %s8747_s25, %s8747_s25 }
 0x1fe   : > { %p8750_p13 = pnand %p8748_p7, %p10884_p8  ;;  %p8757_p10 = por %p8756_p3, %p8755_p4 }
 0x200   : > { %p8751_p0 = pneg %p8750_p13 }
 0x202   : > { %p8758_p12 = pnand %p8757_p10, %p8751_p0 }
 0x204   : > { %8761 = shalt.err (!%p8758_p12)
}
 0x205   : > { %7782 = dma.hbm_to_vmem [thread:$0]  (!%p10885_p1), %s10887_s8, 32, %s1479_s6, [#allocation27], %s10874_s2, %s10874_s2, %s10873_s16  }
 0x206   : > { %s8762_s9 = scalar_lea.hbm %s9336_s17, 32 }
 0x207   : > { %p8763_p6 = scmp.ne.s32.totalorder %s9336_s17, %s8762_s9  ;;  %p8769_p5 = scmp.lt.u32.totalorder %s8762_s9, %s9336_s17 }
 0x209   : > { %p8765_p11 = pnand %p8763_p6, %p10884_p8 }
 0x20b   : > { %p8766_p2 = pneg %p8765_p11 }
 0x20d   : > { %p8771_p9 = pnand %p8769_p5, %p8766_p2 }
 0x20f   : > { %8774 = shalt.err (!%p8771_p9)
}
 0x210   : > { %s8775_s24 = scalar_lea.vmem %s9693_s23, 32  ;;  %p8783_p4 = scmp.lt.s32.totalorder %s9693_s23, %s9693_s23 }
 0x211   : > { %p8776_p7 = scmp.ne.s32.totalorder %s9693_s23, %s8775_s24  ;;  %p8784_p3 = scmp.lt.s32.totalorder %s8775_s24, %s8775_s24 }
 0x213   : > { %p8778_p13 = pnand %p8776_p7, %p10884_p8  ;;  %p8785_p10 = por %p8784_p3, %p8783_p4 }
 0x215   : > { %p8779_p0 = pneg %p8778_p13 }
 0x217   : > { %p8786_p12 = pnand %p8785_p10, %p8779_p0 }
 0x219   : > { %8789 = shalt.err (!%p8786_p12)
}
 0x21a   : > { %7788 = dma.hbm_to_vmem [thread:$0]  (!%p10885_p1), %s9336_s17, 32, %s9693_s23, [#allocation30], %s10874_s2, %s10874_s2, %s10873_s16  }
 0x21b   : > { %s9088_s6 = smov [#allocation32]   ;;  %s6734_s13 = sshll.u32 %s9544_s27, 3 }
 0x21c   : > { %s1517_s15 = sshll.u32 %s9088_s6, 4  ;;  %s8790_s25 = scalar_lea.hbm %s10858_s5, 32  ;;  %s1518_s15 = int_to_ptr.vmem [resolvable:$true] %s1517_s15 }
 0x21d   : > { %p8791_p6 = scmp.ne.s32.totalorder %s10858_s5, %s8790_s25  ;;  %p8797_p5 = scmp.lt.u32.totalorder %s8790_s25, %s10858_s5 }
 0x21f   : > { %p8793_p11 = pnand %p8791_p6, %p10884_p8 }
 0x221   : > { %p8794_p2 = pneg %p8793_p11 }
 0x223   : > { %p8799_p9 = pnand %p8797_p5, %p8794_p2 }
 0x225   : > { %8802 = shalt.err (!%p8799_p9)
}
 0x226   : > { %s8803_s9 = scalar_lea.vmem %s1518_s15, 32  ;;  %p8811_p4 = scmp.lt.s32.totalorder %s1518_s15, %s1518_s15 }
 0x227   : > { %p8804_p7 = scmp.ne.s32.totalorder %s1518_s15, %s8803_s9  ;;  %p8812_p3 = scmp.lt.s32.totalorder %s8803_s9, %s8803_s9 }
 0x229   : > { %p8806_p13 = pnand %p8804_p7, %p10884_p8  ;;  %p8813_p10 = por %p8812_p3, %p8811_p4 }
 0x22b   : > { %p8807_p0 = pneg %p8806_p13 }
 0x22d   : > { %p8814_p12 = pnand %p8813_p10, %p8807_p0 }
 0x22f   : > { %8817 = shalt.err (!%p8814_p12)
}
 0x230   : > { %s10888_s23 = sld [smem:[#allocation50_spill]]  ;;  %s6735_s14 = sshll.u32 %s9016_s11, 7 }
 0x231   : > { %7791 = dma.hbm_to_vmem [thread:$0]  (!%p10885_p1), %s10858_s5, 32, %s1518_s15, [#allocation33], %s10874_s2, %s10874_s2, %s10873_s16  }
 0x232   : > { %s1535_s24 = scalar_lea.vmem [#allocation2], %s6734_s13  ;;  %s1532_s28 = scalar_lea.sflag [#allocation3], %s9544_s27 }
 0x233   : > { %s1542_s6 = sshll.u32 %s1535_s24, 4  ;;  %p10889_p6 = scmp.ne.s32.totalorder %s10883_s10, 0  ;;  %s1543_s6 = int_to_ptr.vmem [resolvable:$true] %s1542_s6 }
 0x236   : > { %s9742_s25 = scalar_lea.hbm %s10888_s23, %s6735_s14  ;;  %s8823_s1 = scalar_lea.hbm %s10888_s23, 256 }
 0x237   : > { %s8818_s9 = scalar_lea.hbm %s9742_s25, 128  ;;  %p8824_p5 = scmp.lt.u32.totalorder %s9742_s25, %s10888_s23 }
 0x238   : > { %p8819_p8 = scmp.ne.s32.totalorder %s9742_s25, %s8818_s9  ;;  %p8825_p9 = scmp.lt.u32.totalorder %s8823_s1, %s8818_s9 }
 0x239   : > { %p8827_p7 = scmp.lt.u32.totalorder %s8818_s9, %s9742_s25 }
 0x23a   : > { %p8821_p11 = pnand %p8819_p8, %p10889_p6  ;;  %p8826_p1 = por %p8825_p9, %p8824_p5 }
 0x23c   : > { %p8822_p2 = pneg %p8821_p11  ;;  %p8828_p13 = por %p8827_p7, %p8826_p1 }
 0x23e   : > { %p8829_p0 = pnand %p8828_p13, %p8822_p2 }
 0x240   : > { %8832 = shalt.err (!%p8829_p0)
}
 0x241   : > { %s8833_s16 = scalar_lea.vmem %s1543_s6, 128  ;;  %s9089_s2 = smov [#allocation2]  }
 0x242   : > { %p8834_p4 = scmp.ne.s32.totalorder %s1543_s6, %s8833_s16  ;;  %s8838_s15 = sshll.u32 %s9089_s2, 4  ;;  %s8839_s15 = int_to_ptr.vmem [resolvable:$false] %s8838_s15 }
 0x243   : > { %s8840_s13 = scalar_lea.vmem %s8839_s15, 256  ;;  %p8841_p12 = scmp.lt.s32.totalorder %s1543_s6, %s8839_s15 }
 0x244   : > { %p8836_p3 = pnand %p8834_p4, %p10889_p6  ;;  %p8842_p8 = scmp.lt.s32.totalorder %s8840_s13, %s8833_s16 }
 0x246   : > { %p8837_p10 = pneg %p8836_p3  ;;  %p8843_p11 = por %p8842_p8, %p8841_p12 }
 0x248   : > { %p8844_p5 = pnand %p8843_p11, %p8837_p10 }
 0x24a   : > { %8847 = shalt.err (!%p8844_p5)
}
 0x24b   : > { %p10890_p9 = scmp.ne.s32.totalorder %s10882_s3, 0  ;;  %s10891_s1 = sld [smem:[#allocation53_spill]] }
 0x24c   : > { %s10892_s14 = sshll.u32 %s9016_s11, 4  ;;  %s1577_s9 = scalar_lea.vmem [#allocation7], %s9544_s27 }
 0x24d   : > { %7795 = dma.hbm_to_vmem [thread:$0]  (!%p10890_p9), %s9742_s25, 128, %s1543_s6, %s1532_s28  }
 0x24e   : > { %s1584_s16 = sshll.u32 %s1577_s9, 4  ;;  %s1585_s16 = int_to_ptr.vmem [resolvable:$true] %s1584_s16 }
 0x251   : > { %s9761_s24 = scalar_lea.hbm %s10891_s1, %s10892_s14  ;;  %s8853_s15 = scalar_lea.hbm %s10891_s1, 32 }
 0x252   : > { %s8848_s2 = scalar_lea.hbm %s9761_s24, 16  ;;  %p8854_p13 = scmp.lt.u32.totalorder %s9761_s24, %s10891_s1 }
 0x253   : > { %p8849_p2 = scmp.ne.s32.totalorder %s9761_s24, %s8848_s2  ;;  %p8855_p0 = scmp.lt.u32.totalorder %s8853_s15, %s8848_s2 }
 0x254   : > { %p8857_p3 = scmp.lt.u32.totalorder %s8848_s2, %s9761_s24 }
 0x255   : > { %p8851_p1 = pnand %p8849_p2, %p10889_p6  ;;  %p8856_p4 = por %p8855_p0, %p8854_p13 }
 0x257   : > { %p8852_p7 = pneg %p8851_p1  ;;  %p8858_p10 = por %p8857_p3, %p8856_p4 }
 0x259   : > { %p8859_p12 = pnand %p8858_p10, %p8852_p7 }
 0x25b   : > { %8862 = shalt.err (!%p8859_p12)
}
 0x25c   : > { %s8863_s6 = scalar_lea.vmem %s1585_s16, 16  ;;  %s9090_s27 = smov [#allocation7]  }
 0x25d   : > { %p8864_p8 = scmp.ne.s32.totalorder %s1585_s16, %s8863_s6  ;;  %s8868_s25 = sshll.u32 %s9090_s27, 4  ;;  %s8869_s25 = int_to_ptr.vmem [resolvable:$false] %s8868_s25 }
 0x25e   : > { %s8870_s28 = scalar_lea.vmem %s8869_s25, 32  ;;  %p8871_p2 = scmp.lt.s32.totalorder %s1585_s16, %s8869_s25 }
 0x25f   : > { %p8866_p11 = pnand %p8864_p8, %p10889_p6  ;;  %p8872_p1 = scmp.lt.s32.totalorder %s8870_s28, %s8863_s6 }
 0x261   : > { %p8867_p5 = pneg %p8866_p11  ;;  %p8873_p9 = por %p8872_p1, %p8871_p2 }
 0x263   : > { %p8874_p0 = pnand %p8873_p9, %p8867_p5 }
 0x265   : > { %8877 = shalt.err (!%p8874_p0)
}
 0x266   : > { %p10893_p13 = scmp.ne.s32.totalorder %s10882_s3, 0  ;;  %p10894_p7 = scmp.ne.s32.totalorder %s10870_s22, 0 }
 0x267   : > { %s9781_s10 = sand.u32 (!%p10894_p7), 1, %s9008_s0   ;;  %p10895_p6 = scmp.ne.s32.totalorder (!%p10894_p7), %s10878_s20, 0 }
 0x268   : > { %7801 = dma.hbm_to_vmem [thread:$0]  (!%p10893_p13), %s9761_s24, 16, %s1585_s16, %s9568_s29  }
 0x269   : > { %1593 = sbr.rel (%p10894_p7) target bundleno = 12550 (0x3106), region = 212  ;;  %s10787_s13 = sshll.u32 (!%p10894_p7), %s9781_s10, 3 }
 0x26a   : > { %s1596_s14 = scalar_lea.sflag (!%p10894_p7), [#allocation3], %s9781_s10  ;;  %s9787_s9 = scalar_lea.vmem (!%p10894_p7), [#allocation2], %s10787_s13 }
 0x270   : > { %8951 = dma.done.wait (%p10895_p6), %s1596_s14, 128  }
 0x271   : > { %8953 = vsyncadd (%p10895_p6), %s1596_s14, 4294967168  ;;  %s1604_s29 = sand.u32 1, %s9374_s18   ;;  %s1607_s22 = scalar_lea.vmem [#allocation5], %s9781_s10 }
 0x272   : > { %s1605_s3 = scalar_lea.sflag [#allocation6], %s1604_s29 }
 0x273   : > { %8955 = dma.done.wait (%p10895_p6), %s1605_s3, 32  }
 0x274   : > { %8957 = vsyncadd (%p10895_p6), %s1605_s3, 4294967264  ;;  %p10896_p9 = scmp.eq.s32.totalorder %s9374_s18, 0 }
 0x276   : > { %8959 = dma.done.wait (%p10896_p9), [#allocation9], 64   ;;  %p10897_p4 = pmov %p10896_p9 }
 0x278   : > { %8961 = vsyncadd (%p10897_p4), [#allocation9], 4294967232  ;;  %p10898_p3 = pmov %p10897_p4 }
 0x27a   : > { %8963 = dma.done.wait (%p10898_p3), [#allocation12], 64   ;;  %p10899_p10 = pmov %p10898_p3 }
 0x27b   : > { %p10900_p12 = pmov %p10898_p3 }
 0x27c   : > { %8965 = vsyncadd (%p10899_p10), [#allocation12], 4294967232 }
 0x27d   : > { %8967 = dma.done.wait (%p10900_p12), [#allocation15], 64   ;;  %p10901_p8 = pmov %p10898_p3 }
 0x27e   : > { %p10902_p11 = pmov %p10898_p3 }
 0x27f   : > { %8969 = vsyncadd (%p10901_p8), [#allocation15], 4294967232 }
 0x280   : > { %8971 = dma.done.wait (%p10902_p11), [#allocation18], 64   ;;  %p10903_p5 = pmov %p10898_p3 }
 0x281   : > { %p10904_p2 = pmov %p10898_p3 }
 0x282   : > { %8973 = vsyncadd (%p10903_p5), [#allocation18], 4294967232 }
 0x283   : > { %8975 = dma.done.wait (%p10904_p2), [#allocation21], 544   ;;  %p10905_p1 = pmov %p10904_p2 }
 0x285   : > { %8977 = vsyncadd (%p10905_p1), [#allocation21], 4294966752  ;;  %p10906_p0 = pmov %p10905_p1 }
 0x287   : > { %8979 = dma.done.wait (%p10906_p0), [#allocation24], 64   ;;  %p10907_p13 = pmov %p10906_p0 }
 0x288   : > { %p10908_p7 = pmov %p10906_p0 }
 0x289   : > { %8981 = vsyncadd (%p10907_p13), [#allocation24], 4294967232 }
 0x28a   : > { %8983 = dma.done.wait (%p10908_p7), [#allocation27], 64   ;;  %p10909_p6 = pmov %p10906_p0 }
 0x28b   : > { %p10910_p9 = pmov %p10906_p0 }
 0x28c   : > { %8985 = vsyncadd (%p10909_p6), [#allocation27], 4294967232 }
 0x28d   : > { %8987 = dma.done.wait (%p10910_p9), [#allocation30], 64   ;;  %p10911_p4 = pmov %p10906_p0 }
 0x28e   : > { %p10912_p3 = pmov %p10906_p0 }
 0x28f   : > { %8989 = vsyncadd (%p10911_p4), [#allocation30], 4294967232 }
 0x290   : > { %8991 = dma.done.wait (%p10912_p3), [#allocation33], 32   ;;  %p10913_p10 = pmov %p10906_p0 }
 0x291   : > { %s10914_s20 = sld [smem:[#allocation58_spill]]  ;;  %s10915_s16 = sld [smem:[#allocation56_spill]]  ;;  %v9091_v0 = vmov 0.0   ;;  %vm9092_vm0 = vmmov 0   ;;  %v9849_v5 = vld [vmem:[%s9787_s9] sm:$0xff]  ;;  %vm1880_vm1 = vcmask 261120   ;;  %v2106_v33 = vlaneseq }
 0x292   : > { %8993 = vsyncadd (%p10913_p10), [#allocation33], 4294967264  ;;  %7252 = vmatprep.subr.bf16.mxu1 %v9091_v0  ;;  %7244 = vmatprep.subr.bf16.mxu0 %v9091_v0  ;;  %s10916_s2 = sld [smem:[#allocation59_spill]]  ;;  %s10917_s15 = sld [smem:[#allocation57_spill]]  ;;  %v1861_v6 = vpack.c.bf16 %v9849_v5, %v9849_v5  ;;  %v1825_v34 = vld [vmem:[%s1607_s22] sm:$0x1] }
 0x293   : > { %7256 = vmatprep.mubr.msk.bf16.mxu1 %vm9092_vm0, %v9091_v0  ;;  %7248 = vmatprep.mubr.msk.bf16.mxu0 %vm9092_vm0, %v9091_v0  ;;  %s10918_s6 = sld [smem:[#allocation54_spill]]  ;;  %s10919_s27 = sld [smem:[#allocation60_spill]]  ;;  %v9889_v35 = vshrl.u32 %v2106_v33, 7  ;;  %vm1826_vm2 = vcmp.gt.f32.partialorder %v1825_v34, 0.0  ;;  %v9093_v37 = vmov 0   ;;  %vm2115_vm4 = vcmask 64512  }
 0x294   : > { %v2105_v38 = vsel %vm1826_vm2, 1, %v9093_v37  ;;  %s10920_s25 = sld [smem:[#allocation61_spill]]  ;;  %vm2169_vm5 = vcmask 1043456   ;;  %s10921_s28 = sld [smem:[#allocation62_spill]]  ;;  %vm3552_vm12 = vcmask 130048  }
 0x295   : > { %v2108_v36 = vsub.s32 0, %v9889_v35  ;;  %s10922_s14 = sld [smem:[#allocation63_spill]]  ;;  %s10923_s9 = sld [smem:[#allocation64_spill]] }
 0x296   : > { %s10924_s29 = sld [smem:[#allocation66_spill]]  ;;  %s10925_s3 = sld [smem:[#allocation68_spill]] }
 0x297   : > { %v7952_v1 = vld [vmem:[%s10914_s20] sm:$0xff]   ;;  %v7954_v3 = vld [vmem:[%s10914_s20 + $0x8] sm:$0xff]   ;;  %v9895_v39 = vrot.slane %v2105_v38, %v2108_v36  ;;  %s10926_s22 = sld [smem:[#allocation69_spill]]  ;;  %s10927_s13 = sld [smem:[#allocation65_spill]] }
 0x298   : > { %v7953_v2 = vld [vmem:[%s10915_s16] sm:$0xff]   ;;  %7253 = vmatpush3.bf16.msra.mxu1 %v7952_v1  ;;  %v7955_v4 = vld [vmem:[%s10915_s16 + $0x8] sm:$0xff]   ;;  %s10928_s24 = sld [smem:[#allocation67_spill]]  ;;  %s10929_s1 = sld [smem:[#allocation70_spill]] }
 0x299   : > { %7245 = vmatpush3.bf16.msra.mxu0 %v7953_v2  ;;  %7254 = vmatprep.subr.bf16.mxu1 %v9091_v0  ;;  %v6765_v7 = vld [vmem:[%s10916_s2] ss:$0 sm:$0xff]  ;;  %v9864_v13 = vld [vmem:[%s10918_s6 + $0x8] sm:$0xff]  ;;  %v9867_v15 = vld [vmem:[%s10918_s6 + $0x10] sm:$0xff]  ;;  %vm2110_vm3 = vcmp.eq.s32.totalorder %v9895_v39, 1  ;;  %s10930_s4 = sld [smem:[#allocation71_spill]] }
 0x29a   : > { %7246 = vmatprep.subr.bf16.mxu0 %v9091_v0  ;;  %v6761_v8 = vld [vmem:[%s10917_s15] ss:$0 sm:$0xff]  ;;  %v9870_v16 = vld [vmem:[%s10918_s6 + $0x18] sm:$0xff]  ;;  %v7957_v32 = vld [vmem:[%s10919_s27 + $0x8] sm:$0xff]   ;;  %s10932_s5 = sld [smem:[#allocation51_spill]]  ;;  %p1816_p12 = scmp.lt.s32.totalorder %s9374_s18, 1 }
 0x29b   : > { %v9861_v12 = vld [vmem:[%s10918_s6] sm:$0xff]  ;;  %s10933_s8 = sld [smem:[#allocation74_spill]]  ;;  %p10945_p11 = scmp.ne.s32.totalorder %s10879_s26, 0 }
 0x29c   : > { %7255 = vmatpush3.bf16.msra.mxu1 %v7954_v3  ;;  %v7956_v31 = vld [vmem:[%s10919_s27] sm:$0xff]   ;;  %s1817_s6 = scalar_select %p1816_p12, %s9374_s18, 1 }
 0x29d   : > { %7247 = vmatpush3.bf16.msra.mxu0 %v7955_v4 }
 0x29e   : > { %7260 = vmatprep.subr.bf16.mxu0 %v9091_v0 }
 0x29f   : > { %7257 = vmatmul.mubr.msk.bf16.vlgmr.msra.gmra.mrb[0].mxu1 %vm1880_vm1, %v1861_v6 }
 0x2a0   : > { %7249 = vmatmul.mubr.msk.bf16.vlgmr.msra.gmra.mrb[0].mxu0 %vm1880_vm1, %v1861_v6 }
 0x2a1   : > { %7264 = vmatprep.mubr.msk.bf16.mxu0 %vm9092_vm0, %v9091_v0  ;;  %7261 = vmatpush3.bf16.msra.mxu0 %v7956_v31 }
 0x2a2   : > { %7262 = vmatprep.subr.bf16.mxu0 %v9091_v0 }
 0x2a5   : > { %7263 = vmatpush3.bf16.msra.mxu0 %v7957_v32 }
 0x2a8   : > { %7265 = vmatmul.mubr.msk.bf16.vlgmr.msra.gmra.mrb[4].mxu0 %vm1880_vm1, %v1861_v6 }
 0x372   : > { %v1976_v9 = vpop.f32.mrb[0].mxu1 }
 0x373   : > { %v1977_v10 = vadd.f32 %v6765_v7, %v1976_v9  ;;  %v7258_v11 = vpop.f32.mrb[1].mxu1  ;;  %v1918_v14 = vpop.f32.mrb[0].mxu0 }
 0x374   : > { %v1919_v17 = vadd.f32 %v6761_v8, %v1918_v14  ;;  %v1979_v18 = vpop.f32.mrb[2].mxu1  ;;  %v7250_v19 = vpop.f32.mrb[1].mxu0 }
 0x375   : > { %v2046_v20 = vpack.c.bf16 %v1977_v10, %v1977_v10  ;;  %v7259_v21 = vpop.f32.mrb[3].mxu1  ;;  %v1921_v22 = vpop.f32.mrb[2].mxu0 }
 0x376   : > { %v2040_v23 = vmul.f32 %v1919_v17, %v9861_v12  ;;  %v2041_v24 = vmul.f32 %v1919_v17, %v9864_v13  ;;  %v7251_v25 = vpop.f32.mrb[3].mxu0  ;;  %v2042_v27 = vmul.f32 %v1919_v17, %v9867_v15  ;;  %v2043_v28 = vmul.f32 %v1919_v17, %v9870_v16  ;;  %v6769_v17 = vld [vmem:[%s10920_s25] ss:$0 sm:$0xff] }
 0x377   : > { %v2054_v26 = vsel %vm1880_vm1, %v2046_v20, 0  ;;  %7652 = vmatprep.subr.msk.bf16.mxu1 %vm1880_vm1, %v2046_v20 }
 0x378   : > { %7269 = vmatpush3.bf16.xpose.msra.mxu1 %v2054_v26  ;;  %v2044_v29 = vpack.c.bf16 %v2041_v24, %v2040_v23  ;;  %v2045_v30 = vpack.c.bf16 %v2043_v28, %v2042_v27 }
 0x379   : > { %7280 = vmatprep.subr.bf16.mxu1 %v9091_v0 }
 0x37a   : > { %7270 = vmatprep.mubr.msk.bf16.mxu1 %vm1880_vm1, %v2044_v29 }
 0x37b   : > { %v2034_v10 = vpop.f32.mrb[4].mxu0 }
 0x37c   : > { %v7266_v11 = vpop.f32.mrb[5].mxu0  ;;  %v2035_v19 = vadd.f32 %v6769_v17, %v2034_v10  ;;  %v7966_v10 = vld [vmem:[%s10924_s29 + $0x20] sm:$0xff]  }
 0x37d   : > { %v2037_v14 = vpop.f32.mrb[6].mxu0  ;;  %v7967_v11 = vld [vmem:[%s10924_s29 + $0x28] sm:$0xff]  }
 0x37e   : > { %v7267_v18 = vpop.f32.mrb[7].mxu0  ;;  %v2162_v20 = vpack.c.bf16 %v2035_v19, %v2035_v19 }
 0x37f   : > { %7271 = vmatmul.mubr.msk.bf16.vlgmr.msra.gmra.mrb[4].mxu1 %vm1880_vm1, %v2045_v30 }
 0x380   : > { %7284 = vmatprep.mubr.msk.bf16.mxu1 %vm9092_vm0, %v9091_v0  ;;  %v2171_v21 = vsel %vm2169_vm5, %v2162_v20, 0  ;;  %7653 = vmatprep.subr.msk.bf16.mxu0 %vm2169_vm5, %v2162_v20 }
 0x381   : > { %7275 = vmatpush3.bf16.msra.mxu0 %v2171_v21 }
 0x382   : > { %7288 = vmatprep.subr.bf16.mxu0 %v9091_v0 }
 0x452   : > { %v7272_v40 = vpop.f32.mrb[4].mxu1 }
 0x453   : > { %v2113_v41 = vsel %vm2110_vm3, -1e+09, %v7272_v40  ;;  %v2090_v42 = vpop.f32.mrb[5].mxu1  ;;  %v7958_v40 = vld [vmem:[%s10921_s28] sm:$0xff]  }
 0x454   : > { %v2111_v43 = vsel %vm2110_vm3, -1e+09, %v2090_v42  ;;  %v7273_v44 = vpop.f32.mrb[6].mxu1  ;;  %v2122_v45 = vsel %vm2115_vm4, %v2113_v41, -inf  ;;  %7281 = vmatpush3.bf16.msra.mxu1 %v7958_v40 }
 0x455   : > { %v2114_v46 = vsel %vm2110_vm3, -1e+09, %v7273_v44  ;;  %2123 = vmax.xlane.f32.xlu1 %v2122_v45  ;;  %v2093_v47 = vpop.f32.mrb[7].mxu1  ;;  %v2116_v48 = vsel %vm2115_vm4, %v2111_v43, -inf  ;;  %7282 = vmatprep.subr.bf16.mxu1 %v9091_v0 }
 0x456   : > { %v2112_v49 = vsel %vm2110_vm3, -1e+09, %v2093_v47  ;;  %2117 = vmax.xlane.f32.xlu0 %v2116_v48  ;;  %v2125_v50 = vsel %vm2115_vm4, %v2114_v46, -inf }
 0x457   : > { %v2119_v51 = vsel %vm2115_vm4, %v2112_v49, -inf }
 0x459   : > { %2126 = vmax.xlane.f32.xlu1 %v2125_v50 }
 0x45a   : > { %2120 = vmax.xlane.f32.xlu0 %v2119_v51 }
 0x4e2   : > { %v2124_v52 = vpop.xlane.xlu1 %2123 }
 0x4e3   : > { %v2130_v53 = vsub.f32 %v2113_v41, %v2124_v52  ;;  %v2118_v54 = vpop.xlane.xlu0 %2117  ;;  %v7959_v41 = vld [vmem:[%s10921_s28 + $0x8] sm:$0xff]  }
 0x4e4   : > { %v2128_v55 = vsub.f32 %v2111_v43, %v2118_v54  ;;  %7283 = vmatpush3.bf16.msra.mxu1 %v7959_v41  ;;  %v6777_v54 = vld [vmem:[%s10922_s14] ss:$0 sm:$0xff] }
 0x4e5   : > { %v2136_v56 = vmul.f32 1.442695, %v2130_v53  ;;  %7296 = vmatprep.subr.bf16.mxu1 %v9091_v0 }
 0x4e6   : > { %v2132_v57 = vmul.f32 1.442695, %v2128_v55  ;;  %v2127_v58 = vpop.xlane.xlu1 %2126 }
 0x4e7   : > { %v2131_v59 = vsub.f32 %v2114_v46, %v2127_v58  ;;  %v2121_v60 = vpop.xlane.xlu0 %2120 }
 0x4e8   : > { %8040 = vpow2.f32 %v2132_v57  ;;  %v2129_v61 = vsub.f32 %v2112_v49, %v2121_v60 }
 0x4e9   : > { %8042 = vpow2.f32 %v2136_v56  ;;  %v2138_v62 = vmul.f32 1.442695, %v2131_v59 }
 0x4ea   : > { %v2134_v63 = vmul.f32 1.442695, %v2129_v61 }
 0x4ec   : > { %8044 = vpow2.f32 %v2134_v63 }
 0x4ed   : > { %8046 = vpow2.f32 %v2138_v62 }
 0x4f2   : > { %v8041_v1 = vpop.eup %8040 }
 0x4f3   : > { %v2140_v2 = vsel %vm2115_vm4, %v8041_v1, 0.0  ;;  %v8043_v3 = vpop.eup %8042 }
 0x4f4   : > { %2141 = vadd.xlane.f32.xlu0 %v2140_v2  ;;  %v2146_v6 = vsel %vm2115_vm4, %v8043_v3, 0.0 }
 0x4f6   : > { %v8045_v4 = vpop.eup %8044 }
 0x4f7   : > { %v2143_v7 = vsel %vm2115_vm4, %v8045_v4, 0.0  ;;  %v8047_v8 = vpop.eup %8046 }
 0x4f8   : > { %2147 = vadd.xlane.f32.xlu0 %v2146_v6  ;;  %2144 = vadd.xlane.f32.xlu1 %v2143_v7  ;;  %v2149_v9 = vsel %vm2115_vm4, %v8047_v8, 0.0  ;;  %v7961_v6 = vld [vmem:[%s10923_s9 + $0x8] sm:$0xff]  }
 0x4f9   : > { %v7963_v7 = vld [vmem:[%s10924_s29 + $0x8] sm:$0xff]  }
 0x4fc   : > { %2150 = vadd.xlane.f32.xlu1 %v2149_v9  ;;  %v7965_v9 = vld [vmem:[%s10924_s29 + $0x18] sm:$0xff]  }
 0x581   : > { %v2142_v22 = vpop.xlane.xlu0 %2141 }
 0x582   : > { %8048 = vrcp.f32 %v2142_v22 }
 0x585   : > { %v2145_v23 = vpop.xlane.xlu1 %2144  ;;  %v2148_v24 = vpop.xlane.xlu0 %2147 }
 0x586   : > { %8050 = vrcp.f32 %v2145_v23 }
 0x587   : > { %8052 = vrcp.f32 %v2148_v24 }
 0x589   : > { %v2151_v25 = vpop.xlane.xlu1 %2150 }
 0x58a   : > { %8054 = vrcp.f32 %v2151_v25  ;;  %v6781_v25 = vld [vmem:[%s10925_s3] ss:$0 sm:$0xff] }
 0x58c   : > { %v8049_v26 = vpop.eup %8048 }
 0x58d   : > { %v2153_v28 = vmul.f32 %v8049_v26, %v8041_v1 }
 0x590   : > { %v8051_v27 = vpop.eup %8050 }
 0x591   : > { %v2155_v29 = vmul.f32 %v8051_v27, %v8045_v4  ;;  %v8053_v30 = vpop.eup %8052  ;;  %v7960_v4 = vld [vmem:[%s10923_s9] sm:$0xff]  }
 0x592   : > { %v2157_v33 = vmul.f32 %v8053_v30, %v8043_v3  ;;  %v6782_v27 = vld [vmem:[%s10926_s22] ss:$0 sm:$0xff] }
 0x593   : > { %v2160_v31 = vpack.c.bf16 %v2155_v29, %v2153_v28 }
 0x594   : > { %v8055_v32 = vpop.eup %8054 }
 0x595   : > { %v2159_v34 = vmul.f32 %v8055_v32, %v8047_v8  ;;  %7276 = vmatprep.mubr.msk.bf16.mxu0 %vm2115_vm4, %v2160_v31  ;;  %v7964_v8 = vld [vmem:[%s10924_s29 + $0x10] sm:$0xff]   ;;  %v7969_v32 = vld [vmem:[%s10924_s29 + $0x38] sm:$0xff]  }
 0x596   : > { %v7968_v31 = vld [vmem:[%s10924_s29 + $0x30] sm:$0xff]  }
 0x597   : > { %v2161_v38 = vpack.c.bf16 %v2159_v34, %v2157_v33  ;;  %v6783_v33 = vld [vmem:[%s10927_s13] ss:$0 sm:$0xff] }
 0x599   : > { %7277 = vmatmul.mubr.msk.bf16.vlgmr.msra.gmra.mrb[8].mxu0 %vm2115_vm4, %v2161_v38 }
 0x59a   : > { %7292 = vmatprep.mubr.msk.bf16.mxu0 %vm9092_vm0, %v9091_v0  ;;  %7289 = vmatpush3.bf16.msra.mxu0 %v7960_v4 }
 0x59b   : > { %7290 = vmatprep.subr.bf16.mxu0 %v9091_v0 }
 0x59e   : > { %7291 = vmatpush3.bf16.msra.mxu0 %v7961_v6 }
 0x59f   : > { %7316 = vmatprep.subr.bf16.mxu0 %v9091_v0 }
 0x66c   : > { %v7278_v42 = vpop.f32.mrb[8].mxu0 }
 0x66d   : > { %v2207_v43 = vpop.f32.mrb[9].mxu0  ;;  %v2224_v48 = vmul.f32 %v7278_v42, %v9867_v15 }
 0x66e   : > { %v7279_v44 = vpop.f32.mrb[10].mxu0  ;;  %v2222_v46 = vmul.f32 %v2207_v43, %v9861_v12 }
 0x66f   : > { %v2210_v45 = vpop.f32.mrb[11].mxu0  ;;  %v2225_v50 = vmul.f32 %v7279_v44, %v9870_v16 }
 0x670   : > { %v2223_v47 = vmul.f32 %v2210_v45, %v9864_v13  ;;  %v6787_v45 = vld [vmem:[%s10928_s24] ss:$0 sm:$0xff] }
 0x672   : > { %v2226_v49 = vadd.f32 %v2223_v47, %v2222_v46 }
 0x674   : > { %v2227_v51 = vadd.f32 %v2226_v49, %v2224_v48 }
 0x676   : > { %v2228_v52 = vadd.f32 %v2227_v51, %v2225_v50 }
 0x678   : > { %v2229_v53 = vpack.c.bf16 %v2228_v52, %v2228_v52 }
 0x67a   : > { %7285 = vmatmul.mubr.msk.bf16.vlgmr.msra.gmra.mrb[8].mxu1 %vm1880_vm1, %v2229_v53 }
 0x67b   : > { %7312 = vmatprep.mubr.msk.bf16.mxu1 %vm9092_vm0, %v9091_v0 }
 0x74d   : > { %v2285_v55 = vpop.f32.mrb[8].mxu1 }
 0x74e   : > { %v2286_v56 = vadd.f32 %v6777_v54, %v2285_v55  ;;  %v7286_v57 = vpop.f32.mrb[9].mxu1 }
 0x74f   : > { %v2288_v58 = vpop.f32.mrb[10].mxu1 }
 0x750   : > { %v7287_v59 = vpop.f32.mrb[11].mxu1  ;;  %v2291_v60 = vadd.f32 %v2286_v56, %v9849_v5  ;;  %v7962_v5 = vld [vmem:[%s10924_s29] sm:$0xff]   ;;  %v7970_v58 = vld [vmem:[%s10915_s16 + $0x10] sm:$0xff]  }
 0x751   : > { %7297 = vmatpush3.bf16.msra.mxu1 %v7962_v5  ;;  %v7971_v59 = vld [vmem:[%s10915_s16 + $0x18] sm:$0xff]   ;;  %v6796_v5 = vld [vmem:[%s10929_s1] ss:$0 sm:$0xff] }
 0x752   : > { %v2294_v61 = vsel %vm1880_vm1, %v2291_v60, 0.0  ;;  %7298 = vmatprep.subr.bf16.mxu1 %v9091_v0 }
 0x753   : > { %2295 = vadd.xlane.f32.xlu0 %v2294_v61 }
 0x755   : > { %7299 = vmatpush3.bf16.msra.mxu1 %v7963_v7 }
 0x756   : > { %7300 = vmatprep.subr.bf16.mxu1 %v9091_v0 }
 0x759   : > { %7301 = vmatpush3.bf16.msra.mxu1 %v7964_v8  ;;  %v6797_v8 = vld [vmem:[%s10930_s4] ss:$0 sm:$0xff] }
 0x75a   : > { %7302 = vmatprep.subr.bf16.mxu1 %v9091_v0 }
 0x75d   : > { %7303 = vmatpush3.bf16.msra.mxu1 %v7965_v9 }
 0x75e   : > { %7304 = vmatprep.subr.bf16.mxu1 %v9091_v0 }
 0x761   : > { %7305 = vmatpush3.bf16.msra.mxu1 %v7966_v10 }
 0x762   : > { %7306 = vmatprep.subr.bf16.mxu1 %v9091_v0 }
 0x765   : > { %7307 = vmatpush3.bf16.msra.mxu1 %v7967_v11  ;;  %v7972_v11 = vld [vmem:[%s10914_s20 + $0x10] sm:$0xff]  }
 0x766   : > { %7308 = vmatprep.subr.bf16.mxu1 %v9091_v0 }
 0x769   : > { %7309 = vmatpush3.bf16.msra.mxu1 %v7968_v31 }
 0x76a   : > { %7310 = vmatprep.subr.bf16.mxu1 %v9091_v0 }
 0x76d   : > { %7311 = vmatpush3.bf16.msra.mxu1 %v7969_v32 }
 0x7e0   : > { %v2296_v62 = vpop.xlane.xlu0 %2295 }
 0x7e1   : > { %v2298_v63 = vmul.f32 0.03125, %v2296_v62 }
 0x7e3   : > { %v2299_v1 = vsub.f32 %v2291_v60, %v2298_v63 }
 0x7e5   : > { %v2300_v2 = vmul.f32 %v2299_v1, %v2299_v1 }
 0x7e7   : > { %v2301_v3 = vsel %vm1880_vm1, %v2300_v2, 0.0 }
 0x7e8   : > { %2302 = vadd.xlane.f32.xlu1 %v2301_v3 }
 0x875   : > { %v2303_v14 = vpop.xlane.xlu1 %2302 }
 0x876   : > { %v2304_v17 = vmul.f32 0.032258064, %v2303_v14 }
 0x878   : > { %8056 = vrsqrt.f32 %v2304_v17  ;;  %vm2307_vm6 = vcmp.eq.f32.partialorder %v2304_v17, inf  ;;  %v2310_v20 = vand.u32 2147483648, %v2304_v17  ;;  %vm2309_vm7 = vcmp.eq.f32.partialorder %v2304_v17, 0.0 }
 0x882   : > { %v8057_v18 = vpop.eup %8056 }
 0x883   : > { %v2306_v19 = vmul.f32 %v8057_v18, %v2304_v17  ;;  %v7974_v18 = vld [vmem:[%s10919_s27 + $0x10] sm:$0xff]  }
 0x885   : > { %v2308_v21 = vsel %vm2307_vm6, %v2304_v17, %v2306_v19  ;;  %v7973_v17 = vld [vmem:[%s10914_s20 + $0x18] sm:$0xff]  }
 0x886   : > { %v2311_v22 = vsel %vm2309_vm7, %v2310_v20, %v2308_v21  ;;  %v7975_v19 = vld [vmem:[%s10919_s27 + $0x18] sm:$0xff]   ;;  %v6818_v20 = vld [vmem:[%s10917_s15 + $0x1] ss:$0 sm:$0xff] }
 0x887   : > { %v2312_v23 = vadd.f32 1e-06, %v2311_v22 }
 0x889   : > { %8058 = vrcp.f32 %v2312_v23 }
 0x893   : > { %v8059_v24 = vpop.eup %8058 }
 0x894   : > { %v2314_v26 = vmul.f32 %v8059_v24, %v2299_v1 }
 0x896   : > { %v2321_v28 = vmul.f32 %v6781_v25, %v2314_v26 }
 0x898   : > { %v2328_v29 = vadd.f32 %v6782_v27, %v2321_v28 }
 0x89a   : > { %v2351_v30 = vpack.c.bf16 %v2328_v29, %v2328_v29 }
 0x89c   : > { %7293 = vmatmul.mubr.msk.bf16.vlgmr.msra.gmra.mrb[12].mxu0 %vm1880_vm1, %v2351_v30 }
 0x89d   : > { %7320 = vmatprep.mubr.msk.bf16.mxu0 %vm9092_vm0, %v9091_v0  ;;  %7317 = vmatpush3.bf16.msra.mxu0 %v7970_v58 }
 0x89e   : > { %7318 = vmatprep.subr.bf16.mxu0 %v9091_v0 }
 0x8a1   : > { %7319 = vmatpush3.bf16.msra.mxu0 %v7971_v59 }
 0x8a2   : > { %7324 = vmatprep.subr.bf16.mxu0 %v9091_v0 }
 0x96f   : > { %v2407_v34 = vpop.f32.mrb[12].mxu0 }
 0x970   : > { %v2408_v38 = vadd.f32 %v6783_v33, %v2407_v34  ;;  %v7294_v40 = vpop.f32.mrb[13].mxu0 }
 0x971   : > { %v2410_v41 = vpop.f32.mrb[14].mxu0 }
 0x972   : > { %v2413_v42 = vmax.f32 %v2408_v38, 0.0  ;;  %v7295_v43 = vpop.f32.mrb[15].mxu0  ;;  %v6826_v41 = vld [vmem:[%s10920_s25 + $0x1] ss:$0 sm:$0xff] }
 0x974   : > { %v2414_v44 = vpack.c.bf16 %v2413_v42, %v2413_v42 }
 0x976   : > { %7313 = vmatmul.mubr.bf16.vlgmr.msra.gmra.mrb[12].mxu1 %v2414_v44 }
 0xa49   : > { %v2503_v46 = vpop.f32.mrb[12].mxu1 }
 0xa4a   : > { %v2504_v47 = vadd.f32 %v6787_v45, %v2503_v46  ;;  %v7314_v48 = vpop.f32.mrb[13].mxu1 }
 0xa4b   : > { %v2506_v49 = vpop.f32.mrb[14].mxu1 }
 0xa4c   : > { %v7315_v50 = vpop.f32.mrb[15].mxu1  ;;  %v2509_v51 = vadd.f32 %v2504_v47, %v2328_v29  ;;  %v6822_v29 = vld [vmem:[%s10916_s2 + $0x1] ss:$0 sm:$0xff]  ;;  %s10931_s2 = sld [smem:[#allocation72_spill]] }
 0xa4e   : > { %v2512_v52 = vsel %vm1880_vm1, %v2509_v51, 0.0 }
 0xa4f   : > { %2513 = vadd.xlane.f32.xlu0 %v2512_v52 }
 0xadc   : > { %v2514_v53 = vpop.xlane.xlu0 %2513 }
 0xadd   : > { %v2515_v54 = vmul.f32 0.03125, %v2514_v53 }
 0xadf   : > { %v2516_v55 = vsub.f32 %v2509_v51, %v2515_v54 }
 0xae1   : > { %v2517_v56 = vmul.f32 %v2516_v55, %v2516_v55 }
 0xae3   : > { %v2518_v57 = vsel %vm1880_vm1, %v2517_v56, 0.0 }
 0xae4   : > { %2519 = vadd.xlane.f32.xlu1 %v2518_v57 }
 0xb71   : > { %v2520_v60 = vpop.xlane.xlu1 %2519 }
 0xb72   : > { %v2521_v61 = vmul.f32 0.032258064, %v2520_v60 }
 0xb74   : > { %8060 = vrsqrt.f32 %v2521_v61  ;;  %vm2524_vm8 = vcmp.eq.f32.partialorder %v2521_v61, inf  ;;  %v2527_v1 = vand.u32 2147483648, %v2521_v61  ;;  %vm2526_vm9 = vcmp.eq.f32.partialorder %v2521_v61, 0.0 }
 0xb7e   : > { %v8061_v62 = vpop.eup %8060 }
 0xb7f   : > { %v2523_v63 = vmul.f32 %v8061_v62, %v2521_v61 }
 0xb81   : > { %v2525_v2 = vsel %vm2524_vm8, %v2521_v61, %v2523_v63 }
 0xb82   : > { %v2528_v3 = vsel %vm2526_vm9, %v2527_v1, %v2525_v2 }
 0xb83   : > { %v2529_v4 = vadd.f32 1e-06, %v2528_v3 }
 0xb85   : > { %8062 = vrcp.f32 %v2529_v4 }
 0xb8f   : > { %v8063_v6 = vpop.eup %8062 }
 0xb90   : > { %v2531_v7 = vmul.f32 %v8063_v6, %v2516_v55 }
 0xb92   : > { %v2538_v9 = vmul.f32 %v6796_v5, %v2531_v7 }
 0xb94   : > { %v9971_v10 = vadd.f32 %v6797_v8, %v2538_v9 }
 0xb96   : > { %v2574_v14 = vpack.c.bf16 %v9971_v10, %v9971_v10 }
 0xb98   : > { %7321 = vmatmul.mubr.msk.bf16.vlgmr.msra.gmra.mrb[16].mxu0 %vm1880_vm1, %v2574_v14 }
 0xb99   : > { %7325 = vmatpush3.bf16.msra.mxu0 %v7972_v11  ;;  %7328 = vmatprep.mubr.msk.bf16.mxu0 %vm9092_vm0, %v9091_v0 }
 0xb9a   : > { %7326 = vmatprep.subr.bf16.mxu0 %v9091_v0 }
 0xb9d   : > { %7327 = vmatpush3.bf16.msra.mxu0 %v7973_v17 }
 0xb9e   : > { %7332 = vmatprep.subr.bf16.mxu0 %v9091_v0 }
 0xba0   : > { %7329 = vmatmul.mubr.msk.bf16.vlgmr.msra.gmra.mrb[20].mxu0 %vm1880_vm1, %v2574_v14 }
 0xba1   : > { %7333 = vmatpush3.bf16.msra.mxu0 %v7974_v18  ;;  %7336 = vmatprep.mubr.msk.bf16.mxu0 %vm9092_vm0, %v9091_v0 }
 0xba2   : > { %7334 = vmatprep.subr.bf16.mxu0 %v9091_v0 }
 0xba5   : > { %7335 = vmatpush3.bf16.msra.mxu0 %v7975_v19 }
 0xba8   : > { %7337 = vmatmul.mubr.msk.bf16.vlgmr.msra.gmra.mrb[24].mxu0 %vm1880_vm1, %v2574_v14 }
 0xc6b   : > { %v2630_v21 = vpop.f32.mrb[16].mxu0 }
 0xc6c   : > { %v2631_v22 = vadd.f32 %v6818_v20, %v2630_v21  ;;  %v7322_v23 = vpop.f32.mrb[17].mxu0 }
 0xc6d   : > { %v2633_v24 = vpop.f32.mrb[18].mxu0 }
 0xc6e   : > { %v2752_v25 = vmul.f32 %v2631_v22, %v9861_v12  ;;  %v2753_v26 = vmul.f32 %v2631_v22, %v9864_v13  ;;  %v7323_v27 = vpop.f32.mrb[19].mxu0  ;;  %v2754_v42 = vmul.f32 %v2631_v22, %v9867_v15  ;;  %v2755_v43 = vmul.f32 %v2631_v22, %v9870_v16 }
 0xc70   : > { %v2756_v28 = vpack.c.bf16 %v2753_v26, %v2752_v25  ;;  %v2757_v48 = vpack.c.bf16 %v2755_v43, %v2754_v42 }
 0xc72   : > { %7342 = vmatprep.mubr.msk.bf16.mxu0 %vm1880_vm1, %v2756_v28 }
 0xc73   : > { %v2688_v30 = vpop.f32.mrb[20].mxu0 }
 0xc74   : > { %v2689_v31 = vadd.f32 %v6822_v29, %v2688_v30  ;;  %v7330_v32 = vpop.f32.mrb[21].mxu0 }
 0xc75   : > { %v2691_v33 = vpop.f32.mrb[22].mxu0 }
 0xc76   : > { %v2758_v34 = vpack.c.bf16 %v2689_v31, %v2689_v31  ;;  %v7331_v38 = vpop.f32.mrb[23].mxu0 }
 0xc78   : > { %v2766_v40 = vsel %vm1880_vm1, %v2758_v34, 0  ;;  %7654 = vmatprep.subr.msk.bf16.mxu0 %vm1880_vm1, %v2758_v34 }
 0xc79   : > { %7341 = vmatpush3.bf16.xpose.msra.mxu0 %v2766_v40 }
 0xc7a   : > { %7352 = vmatprep.subr.bf16.mxu0 %v9091_v0 }
 0xc7b   : > { %v2746_v44 = vpop.f32.mrb[24].mxu0 }
 0xc7c   : > { %v2747_v45 = vadd.f32 %v6826_v41, %v2746_v44  ;;  %v7338_v46 = vpop.f32.mrb[25].mxu0  ;;  %v7976_v44 = vld [vmem:[%s10921_s28 + $0x10] sm:$0xff]  }
 0xc7d   : > { %v2749_v47 = vpop.f32.mrb[26].mxu0 }
 0xc7e   : > { %v2867_v49 = vpack.c.bf16 %v2747_v45, %v2747_v45  ;;  %v7339_v50 = vpop.f32.mrb[27].mxu0  ;;  %v7977_v45 = vld [vmem:[%s10921_s28 + $0x18] sm:$0xff]  }
 0xc80   : > { %v2875_v51 = vsel %vm2169_vm5, %v2867_v49, 0  ;;  %7343 = vmatmul.mubr.msk.bf16.vlgmr.msra.gmra.mrb[28].mxu0 %vm1880_vm1, %v2757_v48  ;;  %7655 = vmatprep.subr.msk.bf16.mxu1 %vm2169_vm5, %v2867_v49 }
 0xc81   : > { %7347 = vmatpush3.bf16.msra.mxu1 %v2875_v51  ;;  %7356 = vmatprep.mubr.msk.bf16.mxu0 %vm9092_vm0, %v9091_v0 }
 0xc82   : > { %7360 = vmatprep.subr.bf16.mxu1 %v9091_v0  ;;  %7353 = vmatpush3.bf16.msra.mxu0 %v7976_v44 }
 0xc83   : > { %7354 = vmatprep.subr.bf16.mxu0 %v9091_v0 }
 0xc86   : > { %7355 = vmatpush3.bf16.msra.mxu0 %v7977_v45 }
 0xc87   : > { %7368 = vmatprep.subr.bf16.mxu0 %v9091_v0 }
 0xd53   : > { %v7344_v52 = vpop.f32.mrb[28].mxu0 }
 0xd54   : > { %v2802_v53 = vpop.f32.mrb[29].mxu0  ;;  %v2819_v58 = vsel %vm2110_vm3, -1e+09, %v7344_v52 }
 0xd55   : > { %v2817_v54 = vsel %vm2110_vm3, -1e+09, %v2802_v53  ;;  %v7345_v55 = vpop.f32.mrb[30].mxu0  ;;  %v2827_v62 = vsel %vm2115_vm4, %v2819_v58, -inf }
 0xd56   : > { %v2805_v56 = vpop.f32.mrb[31].mxu0  ;;  %v2821_v57 = vsel %vm2115_vm4, %v2817_v54, -inf  ;;  %v2820_v61 = vsel %vm2110_vm3, -1e+09, %v7345_v55 }
 0xd57   : > { %v2818_v59 = vsel %vm2110_vm3, -1e+09, %v2805_v56  ;;  %2822 = vmax.xlane.f32.xlu0 %v2821_v57  ;;  %v2830_v63 = vsel %vm2115_vm4, %v2820_v61, -inf }
 0xd58   : > { %v2824_v60 = vsel %vm2115_vm4, %v2818_v59, -inf }
 0xd59   : > { %2825 = vmax.xlane.f32.xlu1 %v2824_v60 }
 0xd5b   : > { %2828 = vmax.xlane.f32.xlu0 %v2827_v62 }
 0xd5d   : > { %2831 = vmax.xlane.f32.xlu1 %v2830_v63 }
 0xde4   : > { %v2823_v1 = vpop.xlane.xlu0 %2822 }
 0xde5   : > { %v2833_v2 = vsub.f32 %v2817_v54, %v2823_v1 }
 0xde6   : > { %v2826_v3 = vpop.xlane.xlu1 %2825 }
 0xde7   : > { %v2837_v4 = vmul.f32 1.442695, %v2833_v2  ;;  %v2834_v6 = vsub.f32 %v2818_v59, %v2826_v3 }
 0xde8   : > { %v2829_v5 = vpop.xlane.xlu0 %2828 }
 0xde9   : > { %8064 = vpow2.f32 %v2837_v4  ;;  %v2839_v7 = vmul.f32 1.442695, %v2834_v6  ;;  %v2835_v8 = vsub.f32 %v2819_v58, %v2829_v5  ;;  %v6834_v58 = vld [vmem:[%s10922_s14 + $0x1] ss:$0 sm:$0xff]  ;;  %v7978_v4 = vld [vmem:[%s10923_s9 + $0x10] sm:$0xff]   ;;  %v7979_v6 = vld [vmem:[%s10923_s9 + $0x18] sm:$0xff]  }
 0xdea   : > { %v2832_v9 = vpop.xlane.xlu1 %2831  ;;  %v7985_v5 = vld [vmem:[%s10924_s29 + $0x48] sm:$0xff]   ;;  %s7070_s9 = sshll.u32 %s1817_s6, 4  ;;  %s10936_s6 = scalar_lea.vmem [#allocation7], %s9781_s10 }
 0xdeb   : > { %8066 = vpow2.f32 %v2839_v7  ;;  %v2841_v11 = vmul.f32 1.442695, %v2835_v8  ;;  %v2836_v14 = vsub.f32 %v2820_v61, %v2832_v9  ;;  %v7986_v7 = vld [vmem:[%s10924_s29 + $0x50] sm:$0xff]   ;;  %v7987_v8 = vld [vmem:[%s10924_s29 + $0x58] sm:$0xff]   ;;  %v7988_v9 = vld [vmem:[%s10924_s29 + $0x60] sm:$0xff]   ;;  %s1820_s12 = scalar_lea.vmem %s10932_s5, %s7070_s9  ;;  %s10934_s5 = sld [smem:[#allocation76_spill]] }
 0xdec   : > { %s10937_s9 = sld [smem:[#allocation78_spill]] }
 0xded   : > { %8068 = vpow2.f32 %v2841_v11  ;;  %v2843_v17 = vmul.f32 1.442695, %v2836_v14  ;;  %v7989_v11 = vld [vmem:[%s10924_s29 + $0x68] sm:$0xff]  }
 0xdef   : > { %8070 = vpow2.f32 %v2843_v17 }
 0xdf1   : > { %v7992_v44 = vld [vmem:[%s10934_s5] sm:$0xff]   ;;  %v7993_v45 = vld [vmem:[%s10934_s5 + $0x8] sm:$0xff]  }
 0xdf3   : > { %v8065_v18 = vpop.eup %8064 }
 0xdf4   : > { %v2845_v19 = vsel %vm2115_vm4, %v8065_v18, 0.0 }
 0xdf5   : > { %v8067_v20 = vpop.eup %8066  ;;  %2846 = vadd.xlane.f32.xlu0 %v2845_v19 }
 0xdf6   : > { %v2848_v21 = vsel %vm2115_vm4, %v8067_v20, 0.0 }
 0xdf7   : > { %v8069_v22 = vpop.eup %8068  ;;  %2849 = vadd.xlane.f32.xlu1 %v2848_v21 }
 0xdf8   : > { %v2851_v23 = vsel %vm2115_vm4, %v8069_v22, 0.0 }
 0xdf9   : > { %v8071_v24 = vpop.eup %8070  ;;  %2852 = vadd.xlane.f32.xlu0 %v2851_v23 }
 0xdfa   : > { %v2854_v25 = vsel %vm2115_vm4, %v8071_v24, 0.0 }
 0xdfb   : > { %2855 = vadd.xlane.f32.xlu1 %v2854_v25  ;;  %v6840_v25 = vld [vmem:[%s10925_s3 + $0x1] ss:$0 sm:$0xff]  ;;  %s10939_s3 = sld [smem:[#allocation80_spill]] }
 0xe82   : > { %v2847_v26 = vpop.xlane.xlu0 %2846 }
 0xe83   : > { %8072 = vrcp.f32 %v2847_v26 }
 0xe84   : > { %v2850_v27 = vpop.xlane.xlu1 %2849 }
 0xe85   : > { %8074 = vrcp.f32 %v2850_v27  ;;  %v6841_v27 = vld [vmem:[%s10926_s22 + $0x1] ss:$0 sm:$0xff] }
 0xe86   : > { %v2853_v28 = vpop.xlane.xlu0 %2852 }
 0xe87   : > { %8076 = vrcp.f32 %v2853_v28 }
 0xe88   : > { %v2856_v29 = vpop.xlane.xlu1 %2855 }
 0xe89   : > { %8078 = vrcp.f32 %v2856_v29 }
 0xe8d   : > { %v8073_v30 = vpop.eup %8072 }
 0xe8e   : > { %v2858_v32 = vmul.f32 %v8073_v30, %v8065_v18  ;;  %v7980_v30 = vld [vmem:[%s10931_s2] sm:$0xff]  }
 0xe8f   : > { %v8075_v31 = vpop.eup %8074 }
 0xe90   : > { %v2860_v33 = vmul.f32 %v8075_v31, %v8067_v20 }
 0xe91   : > { %v8077_v34 = vpop.eup %8076 }
 0xe92   : > { %v2865_v38 = vpack.c.bf16 %v2860_v33, %v2858_v32  ;;  %v2862_v41 = vmul.f32 %v8077_v34, %v8069_v22  ;;  %v7981_v32 = vld [vmem:[%s10931_s2 + $0x8] sm:$0xff]   ;;  %v10071_v33 = vld [vmem:[%s1820_s12] sm:$0xff] }
 0xe93   : > { %v8079_v40 = vpop.eup %8078  ;;  %v10073_v34 = vld [vmem:[%s1820_s12 + $0x8] sm:$0xff]  ;;  %s10935_s12 = sld [smem:[#allocation55_spill]] }
 0xe94   : > { %v2864_v42 = vmul.f32 %v8079_v40, %v8071_v24  ;;  %7348 = vmatprep.mubr.msk.bf16.mxu1 %vm2115_vm4, %v2865_v38  ;;  %v3278_v38 = vpack.c.bf16 %v10073_v34, %v10071_v33  ;;  %v7982_v40 = vld [vmem:[%s10933_s8] sm:$0xff]  }
 0xe96   : > { %v2866_v43 = vpack.c.bf16 %v2864_v42, %v2862_v41  ;;  %v7983_v41 = vld [vmem:[%s10933_s8 + $0x8] sm:$0xff]   ;;  %v7990_v42 = vld [vmem:[%s10924_s29 + $0x70] sm:$0xff]  }
 0xe98   : > { %7349 = vmatmul.mubr.msk.bf16.vlgmr.msra.gmra.mrb[16].mxu1 %vm2115_vm4, %v2866_v43  ;;  %v7991_v43 = vld [vmem:[%s10924_s29 + $0x78] sm:$0xff]  }
 0xe99   : > { %7364 = vmatprep.mubr.msk.bf16.mxu1 %vm9092_vm0, %v9091_v0  ;;  %7361 = vmatpush3.bf16.msra.mxu1 %v7978_v4 }
 0xe9a   : > { %7362 = vmatprep.subr.bf16.mxu1 %v9091_v0 }
 0xe9d   : > { %7363 = vmatpush3.bf16.msra.mxu1 %v7979_v6 }
 0xe9e   : > { %7388 = vmatprep.subr.bf16.mxu1 %v9091_v0 }
 0xf6b   : > { %v7350_v46 = vpop.f32.mrb[16].mxu1 }
 0xf6c   : > { %v2911_v47 = vpop.f32.mrb[17].mxu1  ;;  %v2928_v52 = vmul.f32 %v7350_v46, %v9867_v15  ;;  %v6864_v46 = vld [vmem:[%s10927_s13 + $0x1] ss:$0 sm:$0xff]  ;;  %s10940_s13 = sshll.u32 %s9781_s10, 3 }
 0xf6d   : > { %v7351_v48 = vpop.f32.mrb[18].mxu1  ;;  %v2926_v50 = vmul.f32 %v2911_v47, %v9861_v12  ;;  %s10238_s14 = scalar_lea.vmem [#allocation34], %s10940_s13  ;;  %s10941_s13 = sld [smem:[#allocation83_spill]] }
 0xf6e   : > { %v2914_v49 = vpop.f32.mrb[19].mxu1  ;;  %v2929_v54 = vmul.f32 %v7351_v48, %v9870_v16 }
 0xf6f   : > { %v2927_v51 = vmul.f32 %v2914_v49, %v9864_v13 }
 0xf71   : > { %v2930_v53 = vadd.f32 %v2927_v51, %v2926_v50 }
 0xf73   : > { %v2931_v55 = vadd.f32 %v2930_v53, %v2928_v52 }
 0xf75   : > { %v2932_v56 = vadd.f32 %v2931_v55, %v2929_v54  ;;  %v6881_v54 = vld [vmem:[#allocation8] ss:$0 sm:$0xff] }
 0xf77   : > { %v2933_v57 = vpack.c.bf16 %v2932_v56, %v2932_v56  ;;  %v10101_v56 = vld [vmem:[%s10935_s12] sm:$0xff] }
 0xf79   : > { %7357 = vmatmul.mubr.msk.bf16.vlgmr.msra.gmra.mrb[32].mxu0 %vm1880_vm1, %v2933_v57  ;;  %v10104_v57 = vld [vmem:[%s10935_s12 + $0x10] sm:$0xff] }
 0xf7a   : > { %7384 = vmatprep.mubr.msk.bf16.mxu0 %vm9092_vm0, %v9091_v0 }
0x104c   : > { %v2989_v59 = vpop.f32.mrb[32].mxu0 }
0x104d   : > { %v2990_v12 = vadd.f32 %v6834_v58, %v2989_v59  ;;  %v7358_v60 = vpop.f32.mrb[33].mxu0 }
0x104e   : > { %v2992_v13 = vpop.f32.mrb[34].mxu0  ;;  %v10110_v60 = vld [vmem:[%s10935_s12 + $0x30] sm:$0xff] }
0x104f   : > { %v7359_v61 = vpop.f32.mrb[35].mxu0  ;;  %v2995_v15 = vadd.f32 %v2990_v12, %v9971_v10  ;;  %v7984_v10 = vld [vmem:[%s10924_s29 + $0x40] sm:$0xff]   ;;  %v10113_v13 = vld [vmem:[%s10935_s12 + $0x8] sm:$0xff] }
0x1050   : > { %7369 = vmatpush3.bf16.msra.mxu0 %v7984_v10  ;;  %v10107_v12 = vld [vmem:[%s10935_s12 + $0x20] sm:$0xff] }
0x1051   : > { %v3000_v16 = vsel %vm1880_vm1, %v2995_v15, 0.0  ;;  %7370 = vmatprep.subr.bf16.mxu0 %v9091_v0 }
0x1052   : > { %3001 = vadd.xlane.f32.xlu0 %v3000_v16  ;;  %v10119_v16 = vld [vmem:[%s10935_s12 + $0x28] sm:$0xff] }
0x1054   : > { %7371 = vmatpush3.bf16.msra.mxu0 %v7985_v5 }
0x1055   : > { %7372 = vmatprep.subr.bf16.mxu0 %v9091_v0 }
0x1058   : > { %7373 = vmatpush3.bf16.msra.mxu0 %v7986_v7 }
0x1059   : > { %7374 = vmatprep.subr.bf16.mxu0 %v9091_v0 }
0x105c   : > { %7375 = vmatpush3.bf16.msra.mxu0 %v7987_v8 }
0x105d   : > { %7376 = vmatprep.subr.bf16.mxu0 %v9091_v0 }
0x1060   : > { %7377 = vmatpush3.bf16.msra.mxu0 %v7988_v9 }
0x1061   : > { %7378 = vmatprep.subr.bf16.mxu0 %v9091_v0 }
0x1064   : > { %7379 = vmatpush3.bf16.msra.mxu0 %v7989_v11  ;;  %v6885_v11 = vld [vmem:[#allocation10] ss:$0 sm:$0xff] }
0x1065   : > { %7380 = vmatprep.subr.bf16.mxu0 %v9091_v0 }
0x1068   : > { %7381 = vmatpush3.bf16.msra.mxu0 %v7990_v42 }
0x1069   : > { %7382 = vmatprep.subr.bf16.mxu0 %v9091_v0 }
0x106c   : > { %7383 = vmatpush3.bf16.msra.mxu0 %v7991_v43 }
0x106d   : > { %7440 = vmatprep.subr.bf16.mxu0 %v9091_v0 }
0x10df   : > { %v3002_v62 = vpop.xlane.xlu0 %3001 }
0x10e0   : > { %v3003_v63 = vmul.f32 0.03125, %v3002_v62  ;;  %v10122_v62 = vld [vmem:[%s10935_s12 + $0x38] sm:$0xff] }
0x10e2   : > { %v3004_v1 = vsub.f32 %v2995_v15, %v3003_v63  ;;  %v10116_v15 = vld [vmem:[%s10935_s12 + $0x18] sm:$0xff] }
0x10e4   : > { %v3005_v2 = vmul.f32 %v3004_v1, %v3004_v1 }
0x10e6   : > { %v3006_v3 = vsel %vm1880_vm1, %v3005_v2, 0.0 }
0x10e7   : > { %3007 = vadd.xlane.f32.xlu1 %v3006_v3 }
0x1174   : > { %v3008_v14 = vpop.xlane.xlu1 %3007 }
0x1175   : > { %v3009_v17 = vmul.f32 0.032258064, %v3008_v14 }
0x1177   : > { %8080 = vrsqrt.f32 %v3009_v17  ;;  %vm3012_vm10 = vcmp.eq.f32.partialorder %v3009_v17, inf  ;;  %v3015_v20 = vand.u32 2147483648, %v3009_v17  ;;  %vm3014_vm11 = vcmp.eq.f32.partialorder %v3009_v17, 0.0 }
0x1181   : > { %v8081_v18 = vpop.eup %8080 }
0x1182   : > { %v3011_v19 = vmul.f32 %v8081_v18, %v3009_v17 }
0x1184   : > { %v3013_v21 = vsel %vm3012_vm10, %v3009_v17, %v3011_v19 }
0x1185   : > { %v3016_v22 = vsel %vm3014_vm11, %v3015_v20, %v3013_v21 }
0x1186   : > { %v3017_v23 = vadd.f32 1e-06, %v3016_v22 }
0x1188   : > { %8082 = vrcp.f32 %v3017_v23 }
0x1192   : > { %v8083_v24 = vpop.eup %8082 }
0x1193   : > { %v3019_v26 = vmul.f32 %v8083_v24, %v3004_v1 }
0x1195   : > { %v3026_v28 = vmul.f32 %v6840_v25, %v3019_v26 }
0x1197   : > { %v10061_v29 = vadd.f32 %v6841_v27, %v3026_v28  ;;  %v6889_v27 = vld [vmem:[#allocation11] ss:$0 sm:$0xff] }
0x1199   : > { %v3060_v31 = vpack.c.bf16 %v10061_v29, %v10061_v29 }
0x119b   : > { %7365 = vmatmul.mubr.msk.bf16.vlgmr.msra.gmra.mrb[20].mxu1 %vm1880_vm1, %v3060_v31 }
0x119c   : > { %7389 = vmatpush3.bf16.msra.mxu1 %v7980_v30  ;;  %7392 = vmatprep.mubr.msk.bf16.mxu1 %vm9092_vm0, %v9091_v0 }
0x119d   : > { %7390 = vmatprep.subr.bf16.mxu1 %v9091_v0 }
0x11a0   : > { %7391 = vmatpush3.bf16.msra.mxu1 %v7981_v32 }
0x11a1   : > { %7396 = vmatprep.subr.bf16.mxu1 %v9091_v0 }
0x11a3   : > { %7393 = vmatmul.mubr.msk.bf16.vlgmr.msra.gmra.mrb[24].mxu1 %vm1880_vm1, %v3278_v38 }
0x11a4   : > { %7397 = vmatpush3.bf16.msra.mxu1 %v7982_v40  ;;  %7400 = vmatprep.mubr.msk.bf16.mxu1 %vm9092_vm0, %v9091_v0 }
0x11a5   : > { %7398 = vmatprep.subr.bf16.mxu1 %v9091_v0 }
0x11a8   : > { %7399 = vmatpush3.bf16.msra.mxu1 %v7983_v41 }
0x11a9   : > { %7404 = vmatprep.subr.bf16.mxu1 %v9091_v0 }
0x11ab   : > { %7401 = vmatmul.mubr.msk.bf16.vlgmr.msra.gmra.mrb[28].mxu1 %vm1880_vm1, %v3278_v38 }
0x11ac   : > { %7408 = vmatprep.mubr.msk.bf16.mxu1 %vm9092_vm0, %v9091_v0  ;;  %7405 = vmatpush3.bf16.msra.mxu1 %v7992_v44 }
0x11ad   : > { %7406 = vmatprep.subr.bf16.mxu1 %v9091_v0 }
0x11b0   : > { %7407 = vmatpush3.bf16.msra.mxu1 %v7993_v45 }
0x11b3   : > { %7409 = vmatmul.mubr.msk.bf16.vlgmr.msra.gmra.mrb[32].mxu1 %vm1880_vm1, %v3278_v38 }
0x126e   : > { %v3116_v47 = vpop.f32.mrb[20].mxu1 }
0x126f   : > { %v3117_v48 = vadd.f32 %v6864_v46, %v3116_v47  ;;  %v7366_v49 = vpop.f32.mrb[21].mxu1 }
0x1270   : > { %v3119_v50 = vpop.f32.mrb[22].mxu1 }
0x1271   : > { %v3122_v51 = vmax.f32 %v3117_v48, 0.0  ;;  %v7367_v52 = vpop.f32.mrb[23].mxu1 }
0x1273   : > { %v3123_v53 = vpack.c.bf16 %v3122_v51, %v3122_v51 }
0x1275   : > { %7385 = vmatmul.mubr.bf16.vlgmr.msra.gmra.mrb[36].mxu0 %v3123_v53 }
0x1276   : > { %v3334_v55 = vpop.f32.mrb[24].mxu1  ;;  %7444 = vmatprep.mubr.msk.bf16.mxu0 %vm9092_vm0, %v9091_v0 }
0x1277   : > { %v3335_v58 = vadd.f32 %v6881_v54, %v3334_v55  ;;  %v7394_v59 = vpop.f32.mrb[25].mxu1 }
0x1278   : > { %v3337_v61 = vpop.f32.mrb[26].mxu1 }
0x1279   : > { %v7395_v63 = vpop.f32.mrb[27].mxu1  ;;  %v3338_v1 = vadd.f32 %v6881_v54, %v3337_v61  ;;  %v3459_v2 = vmul.f32 %v3335_v58, %v10101_v56  ;;  %v3461_v3 = vmul.f32 %v3335_v58, %v10104_v57  ;;  %v3463_v4 = vmul.f32 %v3335_v58, %v10107_v12 }
0x127a   : > { %v3465_v6 = vmul.f32 %v3335_v58, %v10110_v60 }
0x127b   : > { %v3460_v10 = vmul.f32 %v3338_v1, %v10113_v13  ;;  %v3462_v5 = vmul.f32 %v3338_v1, %v10116_v15  ;;  %v3464_v7 = vmul.f32 %v3338_v1, %v10119_v16  ;;  %v3466_v8 = vmul.f32 %v3338_v1, %v10122_v62 }
0x127d   : > { %v3468_v9 = vpack.c.bf16 %v3462_v5, %v3461_v3  ;;  %v3467_v17 = vpack.c.bf16 %v3460_v10, %v3459_v2  ;;  %v3469_v18 = vpack.c.bf16 %v3464_v7, %v3463_v4  ;;  %v3470_v19 = vpack.c.bf16 %v3466_v8, %v3465_v6  ;;  %v1827_v4 = vld [vmem:[%s10936_s6] sm:$0x1]  ;;  %s10938_s6 = sld [smem:[#allocation82_spill]] }
0x127e   : > { %v3393_v14 = vpop.f32.mrb[28].mxu1  ;;  %vm1828_vm13 = vcmp.gt.f32.partialorder %v1827_v4, 0.0 }
0x127f   : > { %v7402_v20 = vpop.f32.mrb[29].mxu1  ;;  %7414 = vmatprep.mubr.msk.bf16.mxu1 %vm1880_vm1, %v3467_v17  ;;  %v3394_v22 = vadd.f32 %v6885_v11, %v3393_v14  ;;  %v3601_v17 = vsel %vm1828_vm13, 1, %v9093_v37 }
0x1280   : > { %v3396_v21 = vpop.f32.mrb[30].mxu1 }
0x1281   : > { %v3397_v23 = vadd.f32 %v6885_v11, %v3396_v21  ;;  %v7403_v24 = vpop.f32.mrb[31].mxu1 }
0x1283   : > { %v3471_v25 = vpack.c.bf16 %v3397_v23, %v3394_v22  ;;  %v10154_v23 = vrot.slane %v3601_v17, %v2108_v36 }
0x1285   : > { %7656 = vmatprep.subr.msk.bf16.mxu1 %vm1880_vm1, %v3471_v25  ;;  %v3485_v26 = vsel %vm1880_vm1, %v3471_v25, 0  ;;  %vm3606_vm14 = vcmp.eq.s32.totalorder %v10154_v23, 1 }
0x1286   : > { %7413 = vmatpush3.bf16.xpose.msra.mxu1 %v3485_v26  ;;  %v3452_v28 = vpop.f32.mrb[32].mxu1 }
0x1287   : > { %v3453_v30 = vadd.f32 %v6889_v27, %v3452_v28  ;;  %v7410_v31 = vpop.f32.mrb[33].mxu1 }
0x1288   : > { %v3455_v32 = vpop.f32.mrb[34].mxu1 }
0x1289   : > { %v3456_v38 = vadd.f32 %v6889_v27, %v3455_v32  ;;  %v7411_v40 = vpop.f32.mrb[35].mxu1 }
0x128b   : > { %v3707_v41 = vpack.c.bf16 %v3456_v38, %v3453_v30 }
0x128d   : > { %7415 = vmatmul.mubr.msk.bf16.vlgmr.msra.gmra.mrb[36].mxu1 %vm1880_vm1, %v3468_v9  ;;  %7422 = vmatprep.subr.bf16.mxu1 %v3707_v41 }
0x128e   : > { %7418 = vmatprep.mubr.msk.bf16.mxu1 %vm1880_vm1, %v3469_v18  ;;  %7423 = vmatpush3.bf16.msra.mxu1 %v3707_v41 }
0x128f   : > { %7432 = vmatprep.subr.bf16.mxu1 %v9091_v0 }
0x1295   : > { %7419 = vmatmul.mubr.msk.bf16.gmra.mrb[40].mxu1 %vm1880_vm1, %v3470_v19 }
0x1348   : > { %v10139_v42 = vpop.f32.mrb[36].mxu0 }
0x1349   : > { %v7386_v43 = vpop.f32.mrb[37].mxu0 }
0x134a   : > { %v3215_v44 = vpop.f32.mrb[38].mxu0 }
0x134b   : > { %v7387_v45 = vpop.f32.mrb[39].mxu0 }
0x1360   : > { %v7416_v46 = vpop.f32.mrb[36].mxu1 }
0x1361   : > { %v3521_v47 = vpop.f32.mrb[37].mxu1  ;;  %v3559_v52 = vsel %vm3552_vm12, %v7416_v46, -inf }
0x1362   : > { %v7417_v48 = vpop.f32.mrb[38].mxu1  ;;  %v3553_v49 = vsel %vm3552_vm12, %v3521_v47, -inf }
0x1363   : > { %3554 = vmax.xlane.f32.xlu0 %v3553_v49  ;;  %v3524_v50 = vpop.f32.mrb[39].mxu1  ;;  %v3562_v54 = vsel %vm3552_vm12, %v7417_v48, -inf }
0x1364   : > { %v3556_v51 = vsel %vm3552_vm12, %v3524_v50, -inf }
0x1365   : > { %3557 = vmax.xlane.f32.xlu1 %v3556_v51 }
0x1367   : > { %3560 = vmax.xlane.f32.xlu0 %v3559_v52 }
0x1368   : > { %v7420_v53 = vpop.f32.mrb[40].mxu1 }
0x1369   : > { %3563 = vmax.xlane.f32.xlu1 %v3562_v54  ;;  %v3537_v55 = vpop.f32.mrb[41].mxu1  ;;  %v3571_v1 = vsel %vm3552_vm12, %v7420_v53, -inf }
0x136a   : > { %v7421_v58 = vpop.f32.mrb[42].mxu1  ;;  %v3565_v59 = vsel %vm3552_vm12, %v3537_v55, -inf }
0x136b   : > { %3566 = vmax.xlane.f32.xlu0 %v3565_v59  ;;  %v3540_v61 = vpop.f32.mrb[43].mxu1  ;;  %v3574_v2 = vsel %vm3552_vm12, %v7421_v58, -inf }
0x136c   : > { %v3568_v63 = vsel %vm3552_vm12, %v3540_v61, -inf }
0x136d   : > { %3569 = vmax.xlane.f32.xlu1 %v3568_v63 }
0x136f   : > { %3572 = vmax.xlane.f32.xlu0 %v3571_v1 }
0x1371   : > { %3575 = vmax.xlane.f32.xlu1 %v3574_v2 }
0x13f0   : > { %v3555_v3 = vpop.xlane.xlu0 %3554 }
0x13f1   : > { %v3577_v6 = vsub.f32 %v3521_v47, %v3555_v3 }
0x13f2   : > { %v3558_v10 = vpop.xlane.xlu1 %3557 }
0x13f3   : > { %v3585_v5 = vmul.f32 1.442695, %v3577_v6  ;;  %v3578_v7 = vsub.f32 %v3524_v50, %v3558_v10 }
0x13f4   : > { %v3561_v8 = vpop.xlane.xlu0 %3560 }
0x13f5   : > { %8084 = vpow2.f32 %v3585_v5  ;;  %v3587_v9 = vmul.f32 1.442695, %v3578_v7  ;;  %v3579_v11 = vsub.f32 %v7416_v46, %v3561_v8 }
0x13f6   : > { %v3564_v14 = vpop.xlane.xlu1 %3563 }
0x13f7   : > { %8086 = vpow2.f32 %v3587_v9  ;;  %v3589_v18 = vmul.f32 1.442695, %v3579_v11  ;;  %v3580_v19 = vsub.f32 %v7417_v48, %v3564_v14 }
0x13f8   : > { %v3567_v20 = vpop.xlane.xlu0 %3566 }
0x13f9   : > { %8088 = vpow2.f32 %v3589_v18  ;;  %v3591_v21 = vmul.f32 1.442695, %v3580_v19  ;;  %v3581_v22 = vsub.f32 %v3537_v55, %v3567_v20 }
0x13fa   : > { %v3570_v24 = vpop.xlane.xlu1 %3569 }
0x13fb   : > { %8090 = vpow2.f32 %v3591_v21  ;;  %v3593_v25 = vmul.f32 1.442695, %v3581_v22  ;;  %v3582_v26 = vsub.f32 %v3540_v61, %v3570_v24 }
0x13fc   : > { %v3573_v27 = vpop.xlane.xlu0 %3572 }
0x13fd   : > { %8092 = vpow2.f32 %v3593_v25  ;;  %v3595_v28 = vmul.f32 1.442695, %v3582_v26  ;;  %v3583_v30 = vsub.f32 %v7420_v53, %v3573_v27 }
0x13fe   : > { %v3576_v37 = vpop.xlane.xlu1 %3575 }
0x13ff   : > { %v8085_v31 = vpop.eup %8084  ;;  %8094 = vpow2.f32 %v3595_v28  ;;  %v3597_v32 = vmul.f32 1.442695, %v3583_v30  ;;  %v3584_v38 = vsub.f32 %v7421_v58, %v3576_v37 }
0x1400   : > { %v3607_v35 = vsel %vm3606_vm14, -1e+09, %v8085_v31 }
0x1401   : > { %v8087_v36 = vpop.eup %8086  ;;  %8096 = vpow2.f32 %v3597_v32  ;;  %v3599_v40 = vmul.f32 1.442695, %v3584_v38  ;;  %v3615_v41 = vsel %vm3552_vm12, %v3607_v35, -inf }
0x1402   : > { %3616 = vmax.xlane.f32.xlu0 %v3615_v41  ;;  %v3608_v43 = vsel %vm3606_vm14, -1e+09, %v8087_v36 }
0x1403   : > { %v8089_v44 = vpop.eup %8088  ;;  %8098 = vpow2.f32 %v3599_v40  ;;  %v3618_v45 = vsel %vm3552_vm12, %v3608_v43, -inf }
0x1404   : > { %3619 = vmax.xlane.f32.xlu1 %v3618_v45  ;;  %v3609_v46 = vsel %vm3606_vm14, -1e+09, %v8089_v44  ;;  %v6868_v45 = vld [vmem:[%s10928_s24 + $0x1] ss:$0 sm:$0xff] }
0x1405   : > { %v8091_v47 = vpop.eup %8090  ;;  %v3621_v48 = vsel %vm3552_vm12, %v3609_v46, -inf }
0x1406   : > { %3622 = vmax.xlane.f32.xlu0 %v3621_v48  ;;  %v3610_v49 = vsel %vm3606_vm14, -1e+09, %v8091_v47  ;;  %v3213_v48 = vadd.f32 %v6868_v45, %v10139_v42 }
0x1407   : > { %v8093_v50 = vpop.eup %8092  ;;  %v3624_v51 = vsel %vm3552_vm12, %v3610_v49, -inf }
0x1408   : > { %3625 = vmax.xlane.f32.xlu1 %v3624_v51  ;;  %v3611_v52 = vsel %vm3606_vm14, -1e+09, %v8093_v50 }
0x1409   : > { %v8095_v53 = vpop.eup %8094  ;;  %v3627_v54 = vsel %vm3552_vm12, %v3611_v52, -inf }
0x140a   : > { %3628 = vmax.xlane.f32.xlu0 %v3627_v54  ;;  %v3612_v55 = vsel %vm3606_vm14, -1e+09, %v8095_v53  ;;  %v10191_v54 = vadd.f32 %v3213_v48, %v10061_v29 }
0x140b   : > { %v8097_v58 = vpop.eup %8096  ;;  %v3630_v59 = vsel %vm3552_vm12, %v3612_v55, -inf }
0x140c   : > { %3631 = vmax.xlane.f32.xlu1 %v3630_v59  ;;  %v3613_v61 = vsel %vm3606_vm14, -1e+09, %v8097_v58  ;;  %v3223_v42 = vsel %vm1880_vm1, %v10191_v54, 0.0 }
0x140d   : > { %v8099_v63 = vpop.eup %8098  ;;  %v3633_v1 = vsel %vm3552_vm12, %v3613_v61, -inf }
0x140e   : > { %3634 = vmax.xlane.f32.xlu0 %v3633_v1  ;;  %v3614_v2 = vsel %vm3606_vm14, -1e+09, %v8099_v63 }
0x140f   : > { %v3636_v3 = vsel %vm3552_vm12, %v3614_v2, -inf }
0x1410   : > { %3637 = vmax.xlane.f32.xlu1 %v3636_v3 }
0x148f   : > { %v3617_v4 = vpop.xlane.xlu0 %3616 }
0x1490   : > { %v3639_v6 = vsub.f32 %v3607_v35, %v3617_v4 }
0x1491   : > { %v3620_v10 = vpop.xlane.xlu1 %3619 }
0x1492   : > { %v3647_v5 = vmul.f32 1.442695, %v3639_v6  ;;  %v3640_v7 = vsub.f32 %v3608_v43, %v3620_v10 }
0x1493   : > { %v3623_v8 = vpop.xlane.xlu0 %3622 }
0x1494   : > { %8100 = vpow2.f32 %v3647_v5  ;;  %v3649_v9 = vmul.f32 1.442695, %v3640_v7  ;;  %v3641_v11 = vsub.f32 %v3609_v46, %v3623_v8 }
0x1495   : > { %v3626_v14 = vpop.xlane.xlu1 %3625 }
0x1496   : > { %8102 = vpow2.f32 %v3649_v9  ;;  %v3651_v17 = vmul.f32 1.442695, %v3641_v11  ;;  %v3642_v18 = vsub.f32 %v3610_v49, %v3626_v14 }
0x1497   : > { %v3629_v19 = vpop.xlane.xlu0 %3628 }
0x1498   : > { %8104 = vpow2.f32 %v3651_v17  ;;  %v3653_v20 = vmul.f32 1.442695, %v3642_v18  ;;  %v3643_v21 = vsub.f32 %v3611_v52, %v3629_v19 }
0x1499   : > { %v3632_v22 = vpop.xlane.xlu1 %3631 }
0x149a   : > { %8106 = vpow2.f32 %v3653_v20  ;;  %v3655_v24 = vmul.f32 1.442695, %v3643_v21  ;;  %v3644_v25 = vsub.f32 %v3612_v55, %v3632_v22 }
0x149b   : > { %v3635_v26 = vpop.xlane.xlu0 %3634 }
0x149c   : > { %8108 = vpow2.f32 %v3655_v24  ;;  %v3657_v27 = vmul.f32 1.442695, %v3644_v25  ;;  %v3645_v28 = vsub.f32 %v3613_v61, %v3635_v26 }
0x149d   : > { %v3638_v30 = vpop.xlane.xlu1 %3637 }
0x149e   : > { %v8101_v37 = vpop.eup %8100  ;;  %8110 = vpow2.f32 %v3657_v27  ;;  %v3659_v31 = vmul.f32 1.442695, %v3645_v28  ;;  %v3646_v32 = vsub.f32 %v3614_v2, %v3638_v30 }
0x149f   : > { %v3663_v38 = vsel %vm3552_vm12, %v8101_v37, 0.0 }
0x14a0   : > { %v8103_v35 = vpop.eup %8102  ;;  %8112 = vpow2.f32 %v3659_v31  ;;  %v3661_v36 = vmul.f32 1.442695, %v3646_v32  ;;  %3664 = vadd.xlane.f32.xlu0 %v3663_v38  ;;  %v7995_v31 = vld [vmem:[%s10937_s9 + $0x8] sm:$0xff]  }
0x14a1   : > { %v3666_v40 = vsel %vm3552_vm12, %v8103_v35, 0.0 }
0x14a2   : > { %v8105_v41 = vpop.eup %8104  ;;  %8114 = vpow2.f32 %v3661_v36  ;;  %3667 = vadd.xlane.f32.xlu1 %v3666_v40 }
0x14a3   : > { %v3669_v43 = vsel %vm3552_vm12, %v8105_v41, 0.0 }
0x14a4   : > { %v8107_v44 = vpop.eup %8106  ;;  %3670 = vadd.xlane.f32.xlu0 %v3669_v43 }
0x14a5   : > { %v3672_v46 = vsel %vm3552_vm12, %v8107_v44, 0.0 }
0x14a6   : > { %v8109_v47 = vpop.eup %8108  ;;  %3673 = vadd.xlane.f32.xlu1 %v3672_v46 }
0x14a7   : > { %v3675_v49 = vsel %vm3552_vm12, %v8109_v47, 0.0 }
0x14a8   : > { %v8111_v50 = vpop.eup %8110  ;;  %3676 = vadd.xlane.f32.xlu0 %v3675_v49 }
0x14a9   : > { %v3678_v51 = vsel %vm3552_vm12, %v8111_v50, 0.0 }
0x14aa   : > { %v8113_v52 = vpop.eup %8112  ;;  %3679 = vadd.xlane.f32.xlu1 %v3678_v51 }
0x14ab   : > { %v3681_v53 = vsel %vm3552_vm12, %v8113_v52, 0.0 }
0x14ac   : > { %v8115_v55 = vpop.eup %8114  ;;  %3682 = vadd.xlane.f32.xlu0 %v3681_v53 }
0x14ad   : > { %v3684_v58 = vsel %vm3552_vm12, %v8115_v55, 0.0 }
0x14ae   : > { %3685 = vadd.xlane.f32.xlu1 %v3684_v58 }
0x14b0   : > { %3224 = vadd.xlane.f32.xlu0 %v3223_v42 }
0x152d   : > { %v3665_v59 = vpop.xlane.xlu0 %3664 }
0x152e   : > { %8116 = vrcp.f32 %v3665_v59 }
0x152f   : > { %v3668_v61 = vpop.xlane.xlu1 %3667 }
0x1530   : > { %8118 = vrcp.f32 %v3668_v61 }
0x1531   : > { %v3671_v63 = vpop.xlane.xlu0 %3670 }
0x1532   : > { %8120 = vrcp.f32 %v3671_v63 }
0x1533   : > { %v3674_v1 = vpop.xlane.xlu1 %3673 }
0x1534   : > { %8122 = vrcp.f32 %v3674_v1 }
0x1535   : > { %v3677_v2 = vpop.xlane.xlu0 %3676 }
0x1536   : > { %8124 = vrcp.f32 %v3677_v2 }
0x1537   : > { %v3680_v29 = vpop.xlane.xlu1 %3679 }
0x1538   : > { %v8117_v3 = vpop.eup %8116  ;;  %8126 = vrcp.f32 %v3680_v29  ;;  %v6901_v29 = vld [vmem:[#allocation13] ss:$0 sm:$0xff] }
0x1539   : > { %v3683_v4 = vpop.xlane.xlu0 %3682  ;;  %v3688_v5 = vmul.f32 %v8117_v3, %v8101_v37  ;;  %v7994_v37 = vld [vmem:[%s10937_s9] sm:$0xff]  }
0x153a   : > { %v8119_v6 = vpop.eup %8118  ;;  %8128 = vrcp.f32 %v3683_v4 }
0x153b   : > { %v3686_v10 = vpop.xlane.xlu1 %3685  ;;  %v3690_v7 = vmul.f32 %v8119_v6, %v8103_v35 }
0x153c   : > { %v8121_v8 = vpop.eup %8120  ;;  %8130 = vrcp.f32 %v3686_v10 }
0x153d   : > { %v3703_v9 = vpack.c.bf16 %v3690_v7, %v3688_v5  ;;  %v3692_v14 = vmul.f32 %v8121_v8, %v8105_v41  ;;  %v3225_v1 = vpop.xlane.xlu0 %3224 }
0x153e   : > { %v8123_v11 = vpop.eup %8122  ;;  %v3226_v2 = vmul.f32 0.03125, %v3225_v1 }
0x153f   : > { %v3694_v17 = vmul.f32 %v8123_v11, %v8107_v44  ;;  %7424 = vmatprep.mubr.msk.bf16.mxu1 %vm3552_vm12, %v3703_v9 }
0x1540   : > { %v8125_v18 = vpop.eup %8124  ;;  %v3227_v4 = vsub.f32 %v10191_v54, %v3226_v2  ;;  %v7996_v54 = vld [vmem:[%s10938_s6] sm:$0xff]  }
0x1541   : > { %v3704_v19 = vpack.c.bf16 %v3694_v17, %v3692_v14  ;;  %v3696_v21 = vmul.f32 %v8125_v18, %v8109_v47 }
0x1542   : > { %v8127_v20 = vpop.eup %8126  ;;  %v3228_v17 = vmul.f32 %v3227_v4, %v3227_v4 }
0x1543   : > { %7425 = vmatmul.mubr.msk.bf16.vlgmr.msra.gmra.mrb[44].mxu1 %vm3552_vm12, %v3704_v19  ;;  %v3698_v22 = vmul.f32 %v8127_v20, %v8111_v50  ;;  %v7997_v20 = vld [vmem:[%s10938_s6 + $0x8] sm:$0xff]  }
0x1544   : > { %v8129_v24 = vpop.eup %8128  ;;  %7433 = vmatpush3.bf16.msra.mxu1 %v7994_v37  ;;  %v3229_v19 = vsel %vm1880_vm1, %v3228_v17, 0.0 }
0x1545   : > { %v3705_v25 = vpack.c.bf16 %v3698_v22, %v3696_v21  ;;  %v3700_v27 = vmul.f32 %v8129_v24, %v8113_v52  ;;  %7434 = vmatprep.subr.bf16.mxu1 %v9091_v0 }
0x1546   : > { %v8131_v26 = vpop.eup %8130 }
0x1547   : > { %7428 = vmatprep.mubr.msk.bf16.mxu1 %vm3552_vm12, %v3705_v25  ;;  %v3702_v28 = vmul.f32 %v8131_v26, %v8115_v55 }
0x1548   : > { %7435 = vmatpush3.bf16.msra.mxu1 %v7995_v31 }
0x1549   : > { %v3706_v30 = vpack.c.bf16 %v3702_v28, %v3700_v27  ;;  %7448 = vmatprep.subr.bf16.mxu1 %v9091_v0 }
0x154b   : > { %7429 = vmatmul.mubr.msk.bf16.gmra.mrb[48].mxu1 %vm3552_vm12, %v3706_v30 }
0x154c   : > { %7436 = vmatprep.mubr.msk.bf16.mxu1 %vm9092_vm0, %v9091_v0 }
0x1616   : > { %v7426_v32 = vpop.f32.mrb[44].mxu1 }
0x1617   : > { %v3787_v38 = vmul.f32 %v7426_v32, %v10104_v57  ;;  %v3754_v35 = vpop.f32.mrb[45].mxu1 }
0x1618   : > { %v3785_v36 = vmul.f32 %v3754_v35, %v10101_v56  ;;  %v7427_v40 = vpop.f32.mrb[46].mxu1 }
0x1619   : > { %v3788_v41 = vmul.f32 %v7427_v40, %v10116_v15  ;;  %v3757_v43 = vpop.f32.mrb[47].mxu1 }
0x161a   : > { %v3793_v44 = vadd.f32 %v3787_v38, %v3785_v36  ;;  %v3786_v45 = vmul.f32 %v3757_v43, %v10113_v13 }
0x161c   : > { %v3794_v46 = vadd.f32 %v3788_v41, %v3786_v45 }
0x161e   : > { %v7430_v47 = vpop.f32.mrb[48].mxu1 }
0x161f   : > { %v3770_v48 = vpop.f32.mrb[49].mxu1  ;;  %v3791_v52 = vmul.f32 %v7430_v47, %v10110_v60 }
0x1620   : > { %v3789_v49 = vmul.f32 %v3770_v48, %v10107_v12  ;;  %v7431_v50 = vpop.f32.mrb[50].mxu1 }
0x1621   : > { %v3773_v51 = vpop.f32.mrb[51].mxu1  ;;  %v3792_v42 = vmul.f32 %v7431_v50, %v10122_v62  ;;  %v7998_v50 = vld [vmem:[%s10939_s3] sm:$0xff]  }
0x1622   : > { %v3795_v53 = vadd.f32 %v3793_v44, %v3789_v49  ;;  %v3790_v55 = vmul.f32 %v3773_v51, %v10119_v16  ;;  %v6879_v44 = vld [vmem:[%s10929_s1 + $0x1] ss:$0 sm:$0xff]  ;;  %7441 = vmatpush3.bf16.msra.mxu0 %v7998_v50  ;;  %v7999_v51 = vld [vmem:[%s10939_s3 + $0x8] sm:$0xff]   ;;  %s10942_s1 = sld [smem:[#allocation85_spill]] }
0x1623   : > { %7442 = vmatprep.subr.bf16.mxu0 %v9091_v0 }
0x1624   : > { %v3797_v58 = vadd.f32 %v3795_v53, %v3791_v52  ;;  %v3796_v59 = vadd.f32 %v3794_v46, %v3790_v55  ;;  %v6880_v46 = vld [vmem:[%s10930_s4 + $0x1] ss:$0 sm:$0xff]  ;;  %s10943_s4 = sld [smem:[#allocation87_spill]] }
0x1626   : > { %v3798_v61 = vadd.f32 %v3796_v59, %v3792_v42  ;;  %7443 = vmatpush3.bf16.msra.mxu0 %v7999_v51 }
0x1627   : > { %7456 = vmatprep.subr.bf16.mxu0 %v9091_v0 }
0x1628   : > { %v3799_v63 = vpack.c.bf16 %v3798_v61, %v3797_v58 }
0x162a   : > { %7437 = vmatmul.mubr.msk.bf16.vlgmr.msra.gmra.mrb[52].mxu1 %vm1880_vm1, %v3799_v63 }
0x162b   : > { %7452 = vmatprep.mubr.msk.bf16.mxu1 %vm9092_vm0, %v9091_v0  ;;  %7449 = vmatpush3.bf16.msra.mxu1 %v7996_v54 }
0x162c   : > { %7450 = vmatprep.subr.bf16.mxu1 %v9091_v0 }
0x162f   : > { %7451 = vmatpush3.bf16.msra.mxu1 %v7997_v20 }
0x16fd   : > { %v3855_v3 = vpop.f32.mrb[52].mxu1 }
0x16fe   : > { %v3856_v6 = vadd.f32 %v6901_v29, %v3855_v3  ;;  %v7438_v10 = vpop.f32.mrb[53].mxu1 }
0x16ff   : > { %v3858_v5 = vpop.f32.mrb[54].mxu1 }
0x1700   : > { %v3859_v7 = vadd.f32 %v6901_v29, %v3858_v5  ;;  %v7439_v8 = vpop.f32.mrb[55].mxu1  ;;  %v3862_v9 = vadd.f32 %v3856_v6, %v10071_v33 }
0x1701   : > { %v6905_v8 = vld [vmem:[#allocation25] ss:$0 sm:$0xff] }
0x1702   : > { %v3866_v11 = vsel %vm1880_vm1, %v3862_v9, 0.0  ;;  %v3863_v14 = vadd.f32 %v3859_v7, %v10073_v34 }
0x1703   : > { %3867 = vadd.xlane.f32.xlu1 %v3866_v11 }
0x1704   : > { %v3869_v18 = vsel %vm1880_vm1, %v3863_v14, 0.0 }
0x1705   : > { %3870 = vadd.xlane.f32.xlu0 %v3869_v18  ;;  %v6906_v18 = vld [vmem:[#allocation26] ss:$0 sm:$0xff] }
0x1707   : > { %3230 = vadd.xlane.f32.xlu1 %v3229_v19 }
0x1790   : > { %v3868_v21 = vpop.xlane.xlu1 %3867 }
0x1791   : > { %v3872_v33 = vmul.f32 0.03125, %v3868_v21  ;;  %v8000_v21 = vld [vmem:[%s10941_s13] sm:$0xff]  }
0x1792   : > { %v3871_v22 = vpop.xlane.xlu0 %3870 }
0x1793   : > { %v10226_v24 = vsub.f32 %v3862_v9, %v3872_v33  ;;  %v3873_v34 = vmul.f32 0.03125, %v3871_v22  ;;  %v8001_v22 = vld [vmem:[%s10941_s13 + $0x8] sm:$0xff]  }
0x1794   : > { %v3231_v25 = vpop.xlane.xlu1 %3230 }
0x1795   : > { %v3875_v26 = vsub.f32 %v3863_v14, %v3873_v34  ;;  %v3232_v27 = vmul.f32 0.032258064, %v3231_v25  ;;  %v3876_v28 = vmul.f32 %v10226_v24, %v10226_v24 }
0x1797   : > { %8132 = vrsqrt.f32 %v3232_v27  ;;  %v3878_v30 = vsel %vm1880_vm1, %v3876_v28, 0.0  ;;  %v3877_v37 = vmul.f32 %v3875_v26, %v3875_v26  ;;  %vm3235_vm15 = vcmp.eq.f32.partialorder %v3232_v27, inf }
0x1798   : > { %3879 = vadd.xlane.f32.xlu0 %v3878_v30  ;;  %v3238_v35 = vand.u32 2147483648, %v3232_v27  ;;  %vm3237_vm2 = vcmp.eq.f32.partialorder %v3232_v27, 0.0 }
0x1799   : > { %v3881_v31 = vsel %vm1880_vm1, %v3877_v37, 0.0 }
0x179a   : > { %3882 = vadd.xlane.f32.xlu1 %v3881_v31  ;;  %v6907_v31 = vld [vmem:[#allocation14] ss:$0 sm:$0xff] }
0x17a1   : > { %v8133_v32 = vpop.eup %8132 }
0x17a2   : > { %v3234_v38 = vmul.f32 %v8133_v32, %v3232_v27 }
0x17a4   : > { %v3236_v36 = vsel %vm3235_vm15, %v3232_v27, %v3234_v38 }
0x17a5   : > { %v3239_v40 = vsel %vm3237_vm2, %v3238_v35, %v3236_v36 }
0x17a6   : > { %v3240_v41 = vadd.f32 1e-06, %v3239_v40 }
0x17a8   : > { %8134 = vrcp.f32 %v3240_v41 }
0x17b2   : > { %v8135_v43 = vpop.eup %8134 }
0x17b3   : > { %v3242_v45 = vmul.f32 %v8135_v43, %v3227_v4 }
0x17b5   : > { %v3249_v47 = vmul.f32 %v6879_v44, %v3242_v45 }
0x17b7   : > { %v3256_v48 = vadd.f32 %v6880_v46, %v3249_v47 }
0x17b9   : > { %v10234_v49 = vpack.c.bf16 %v3256_v48, %v3256_v48  ;;  %3257 = vst.msk [vmem:[%s10238_s14] sm:$0xff] %vm1880_vm1, %v3256_v48 }
0x17bb   : > { %7453 = vmatmul.mubr.msk.bf16.vlgmr.msra.gmra.mrb[56].mxu1 %vm1880_vm1, %v10234_v49 }
0x1825   : > { %v3880_v52 = vpop.xlane.xlu0 %3879 }
0x1826   : > { %v3884_v53 = vmul.f32 0.032258064, %v3880_v52  ;;  %v6915_v52 = vld [vmem:[#allocation17] ss:$0 sm:$0xff] }
0x1827   : > { %v3883_v55 = vpop.xlane.xlu1 %3882 }
0x1828   : > { %8136 = vrsqrt.f32 %v3884_v53  ;;  %v3885_v58 = vmul.f32 0.032258064, %v3883_v55  ;;  %vm3888_vm6 = vcmp.eq.f32.partialorder %v3884_v53, inf  ;;  %v3891_v61 = vand.u32 2147483648, %v3884_v53 }
0x1829   : > { %vm3890_vm7 = vcmp.eq.f32.partialorder %v3884_v53, 0.0 }
0x182a   : > { %8138 = vrsqrt.f32 %v3885_v58  ;;  %vm3895_vm8 = vcmp.eq.f32.partialorder %v3885_v58, inf  ;;  %v3898_v4 = vand.u32 2147483648, %v3885_v58  ;;  %vm3897_vm9 = vcmp.eq.f32.partialorder %v3885_v58, 0.0 }
0x1832   : > { %v8137_v42 = vpop.eup %8136 }
0x1833   : > { %v3887_v59 = vmul.f32 %v8137_v42, %v3884_v53 }
0x1834   : > { %v8139_v63 = vpop.eup %8138 }
0x1835   : > { %v3889_v1 = vsel %vm3888_vm6, %v3884_v53, %v3887_v59  ;;  %v3894_v29 = vmul.f32 %v8139_v63, %v3885_v58 }
0x1836   : > { %v3892_v2 = vsel %vm3890_vm7, %v3891_v61, %v3889_v1 }
0x1837   : > { %v3900_v3 = vadd.f32 1e-06, %v3892_v2  ;;  %v3896_v6 = vsel %vm3895_vm8, %v3885_v58, %v3894_v29 }
0x1838   : > { %v3899_v10 = vsel %vm3897_vm9, %v3898_v4, %v3896_v6 }
0x1839   : > { %8140 = vrcp.f32 %v3900_v3  ;;  %v3901_v5 = vadd.f32 1e-06, %v3899_v10 }
0x183b   : > { %8142 = vrcp.f32 %v3901_v5 }
0x1843   : > { %v8141_v7 = vpop.eup %8140 }
0x1844   : > { %v3903_v9 = vmul.f32 %v8141_v7, %v10226_v24  ;;  %v6911_v24 = vld [vmem:[#allocation16] ss:$0 sm:$0xff] }
0x1845   : > { %v8143_v11 = vpop.eup %8142 }
0x1846   : > { %v3905_v14 = vmul.f32 %v8143_v11, %v3875_v26  ;;  %v3912_v17 = vmul.f32 %v6905_v8, %v3903_v9 }
0x1848   : > { %v3913_v19 = vmul.f32 %v6905_v8, %v3905_v14  ;;  %v10249_v54 = vadd.f32 %v6906_v18, %v3912_v17 }
0x184a   : > { %v10251_v20 = vadd.f32 %v6906_v18, %v3913_v19 }
0x184c   : > { %v3942_v33 = vpack.c.bf16 %v10251_v20, %v10249_v54 }
0x184e   : > { %7445 = vmatmul.mubr.msk.bf16.vlgmr.msra.gmra.mrb[40].mxu0 %vm1880_vm1, %v3942_v33 }
0x184f   : > { %7457 = vmatpush3.bf16.msra.mxu0 %v8000_v21  ;;  %7460 = vmatprep.mubr.msk.bf16.mxu0 %vm9092_vm0, %v9091_v0 }
0x1850   : > { %7458 = vmatprep.subr.bf16.mxu0 %v9091_v0 }
0x1853   : > { %7459 = vmatpush3.bf16.msra.mxu0 %v8001_v22 }
0x1856   : > { %7461 = vmatmul.mubr.msk.bf16.vlgmr.msra.gmra.mrb[44].mxu0 %vm1880_vm1, %v10234_v49 }
0x188e   : > { %v4061_v34 = vpop.f32.mrb[56].mxu1 }
0x188f   : > { %v4062_v25 = vadd.f32 %v6911_v24, %v4061_v34  ;;  %v7454_v26 = vpop.f32.mrb[57].mxu1 }
0x1890   : > { %v4064_v27 = vpop.f32.mrb[58].mxu1 }
0x1891   : > { %v4137_v28 = vpack.c.bf16 %v4062_v25, %v4062_v25  ;;  %v7455_v30 = vpop.f32.mrb[59].mxu1 }
0x1893   : > { %v4151_v37 = vsel %vm1880_vm1, %v4137_v28, 0  ;;  %7657 = vmatprep.subr.msk.bf16.mxu1 %vm1880_vm1, %v4137_v28 }
0x1894   : > { %7465 = vmatpush3.bf16.xpose.msra.mxu1 %v4151_v37 }
0x1895   : > { %7484 = vmatprep.subr.bf16.mxu1 %v9091_v0 }
0x1921   : > { %v3999_v32 = vpop.f32.mrb[40].mxu0 }
0x1922   : > { %v4000_v38 = vadd.f32 %v6907_v31, %v3999_v32  ;;  %v7446_v35 = vpop.f32.mrb[41].mxu0 }
0x1923   : > { %v4002_v36 = vpop.f32.mrb[42].mxu0 }
0x1924   : > { %v7447_v40 = vpop.f32.mrb[43].mxu0  ;;  %v4003_v41 = vadd.f32 %v6907_v31, %v4002_v36  ;;  %v4125_v43 = vmul.f32 %v4000_v38, %v10101_v56  ;;  %v4127_v44 = vmul.f32 %v4000_v38, %v10104_v57  ;;  %v4129_v45 = vmul.f32 %v4000_v38, %v10107_v12 }
0x1925   : > { %v4131_v46 = vmul.f32 %v4000_v38, %v10110_v60 }
0x1926   : > { %v4126_v47 = vmul.f32 %v4003_v41, %v10113_v13  ;;  %v4128_v48 = vmul.f32 %v4003_v41, %v10116_v15  ;;  %v4130_v50 = vmul.f32 %v4003_v41, %v10119_v16  ;;  %v4132_v51 = vmul.f32 %v4003_v41, %v10122_v62 }
0x1928   : > { %v4134_v53 = vpack.c.bf16 %v4128_v48, %v4127_v44  ;;  %v4133_v58 = vpack.c.bf16 %v4126_v47, %v4125_v43  ;;  %v4135_v42 = vpack.c.bf16 %v4130_v50, %v4129_v45  ;;  %v4136_v56 = vpack.c.bf16 %v4132_v51, %v4131_v46 }
0x1929   : > { %v4119_v55 = vpop.f32.mrb[44].mxu0 }
0x192a   : > { %v4120_v59 = vadd.f32 %v6915_v52, %v4119_v55  ;;  %v7462_v57 = vpop.f32.mrb[45].mxu0  ;;  %7466 = vmatprep.mubr.msk.bf16.mxu1 %vm1880_vm1, %v4133_v58 }
0x192b   : > { %v4122_v12 = vpop.f32.mrb[46].mxu0  ;;  %7467 = vmatmul.mubr.msk.bf16.vlgmr.msra.gmra.mrb[60].mxu1 %vm1880_vm1, %v4134_v53 }
0x192c   : > { %v4318_v60 = vpack.c.bf16 %v4120_v59, %v4120_v59  ;;  %v7463_v13 = vpop.f32.mrb[47].mxu0  ;;  %7470 = vmatprep.mubr.msk.bf16.mxu1 %vm1880_vm1, %v4135_v42 }
0x192e   : > { %v4332_v15 = vsel %vm2169_vm5, %v4318_v60, 0  ;;  %7658 = vmatprep.subr.msk.bf16.mxu0 %vm2169_vm5, %v4318_v60 }
0x192f   : > { %7475 = vmatpush3.bf16.msra.mxu0 %v4332_v15 }
0x1930   : > { %7492 = vmatprep.subr.bf16.mxu0 %v9091_v0 }
0x1933   : > { %7471 = vmatmul.mubr.msk.bf16.gmra.mrb[64].mxu1 %vm1880_vm1, %v4136_v56 }
0x1934   : > { %7488 = vmatprep.mubr.msk.bf16.mxu1 %vm9092_vm0, %v9091_v0 }
0x19fe   : > { %v7468_v16 = vpop.f32.mrb[60].mxu1 }
0x19ff   : > { %v4187_v62 = vpop.f32.mrb[61].mxu1  ;;  %v4220_v29 = vsel %vm2110_vm3, -1e+09, %v7468_v16 }
0x1a00   : > { %v4218_v61 = vsel %vm2110_vm3, -1e+09, %v4187_v62  ;;  %v7469_v63 = vpop.f32.mrb[62].mxu1  ;;  %v4232_v10 = vsel %vm2115_vm4, %v4220_v29, -inf }
0x1a01   : > { %v4190_v1 = vpop.f32.mrb[63].mxu1  ;;  %v4226_v2 = vsel %vm2115_vm4, %v4218_v61, -inf  ;;  %v4221_v6 = vsel %vm2110_vm3, -1e+09, %v7469_v63 }
0x1a02   : > { %v4219_v3 = vsel %vm2110_vm3, -1e+09, %v4190_v1  ;;  %4227 = vmax.xlane.f32.xlu0 %v4226_v2  ;;  %v4235_v8 = vsel %vm2115_vm4, %v4221_v6, -inf }
0x1a03   : > { %v4229_v4 = vsel %vm2115_vm4, %v4219_v3, -inf }
0x1a04   : > { %4230 = vmax.xlane.f32.xlu1 %v4229_v4 }
0x1a06   : > { %4233 = vmax.xlane.f32.xlu0 %v4232_v10  ;;  %v7472_v5 = vpop.f32.mrb[64].mxu1 }
0x1a07   : > { %v4203_v7 = vpop.f32.mrb[65].mxu1  ;;  %v4224_v18 = vsel %vm2110_vm3, -1e+09, %v7472_v5 }
0x1a08   : > { %v4222_v9 = vsel %vm2110_vm3, -1e+09, %v4203_v7  ;;  %4236 = vmax.xlane.f32.xlu1 %v4235_v8  ;;  %v7473_v11 = vpop.f32.mrb[66].mxu1  ;;  %v4244_v22 = vsel %vm2115_vm4, %v4224_v18, -inf }
0x1a09   : > { %v4206_v14 = vpop.f32.mrb[67].mxu1  ;;  %v4238_v17 = vsel %vm2115_vm4, %v4222_v9, -inf  ;;  %v4225_v33 = vsel %vm2110_vm3, -1e+09, %v7473_v11 }
0x1a0a   : > { %v4223_v19 = vsel %vm2110_vm3, -1e+09, %v4206_v14  ;;  %4239 = vmax.xlane.f32.xlu0 %v4238_v17  ;;  %v4247_v24 = vsel %vm2115_vm4, %v4225_v33, -inf }
0x1a0b   : > { %v4241_v21 = vsel %vm2115_vm4, %v4223_v19, -inf }
0x1a0c   : > { %4242 = vmax.xlane.f32.xlu1 %v4241_v21 }
0x1a0e   : > { %4245 = vmax.xlane.f32.xlu0 %v4244_v22 }
0x1a10   : > { %4248 = vmax.xlane.f32.xlu1 %v4247_v24 }
0x1a8f   : > { %v4228_v34 = vpop.xlane.xlu0 %4227 }
0x1a90   : > { %v4250_v25 = vsub.f32 %v4218_v61, %v4228_v34 }
0x1a91   : > { %v4231_v26 = vpop.xlane.xlu1 %4230 }
0x1a92   : > { %v4258_v27 = vmul.f32 1.442695, %v4250_v25  ;;  %v4251_v28 = vsub.f32 %v4219_v3, %v4231_v26 }
0x1a93   : > { %v4234_v30 = vpop.xlane.xlu0 %4233 }
0x1a94   : > { %8144 = vpow2.f32 %v4258_v27  ;;  %v4260_v37 = vmul.f32 1.442695, %v4251_v28  ;;  %v4252_v31 = vsub.f32 %v4220_v29, %v4234_v30 }
0x1a95   : > { %v4237_v32 = vpop.xlane.xlu1 %4236 }
0x1a96   : > { %8146 = vpow2.f32 %v4260_v37  ;;  %v4262_v38 = vmul.f32 1.442695, %v4252_v31  ;;  %v4253_v35 = vsub.f32 %v4221_v6, %v4237_v32 }
0x1a97   : > { %v4240_v36 = vpop.xlane.xlu0 %4239 }
0x1a98   : > { %8148 = vpow2.f32 %v4262_v38  ;;  %v4264_v40 = vmul.f32 1.442695, %v4253_v35  ;;  %v4254_v41 = vsub.f32 %v4222_v9, %v4240_v36  ;;  %v8002_v35 = vld [vmem:[%s10942_s1] sm:$0xff]   ;;  %v8003_v36 = vld [vmem:[%s10942_s1 + $0x8] sm:$0xff]  }
0x1a99   : > { %v4243_v43 = vpop.xlane.xlu1 %4242  ;;  %7485 = vmatpush3.bf16.msra.mxu1 %v8002_v35  ;;  %v8010_v35 = vld [vmem:[%s10943_s4 + $0x20] sm:$0xff]  }
0x1a9a   : > { %8150 = vpow2.f32 %v4264_v40  ;;  %v4266_v44 = vmul.f32 1.442695, %v4254_v41  ;;  %v4255_v45 = vsub.f32 %v4223_v19, %v4243_v43  ;;  %7486 = vmatprep.subr.bf16.mxu1 %v9091_v0  ;;  %v10326_v41 = vld [vmem:[%s10935_s12 + $0x10] sm:$0xff] }
0x1a9b   : > { %v4246_v46 = vpop.xlane.xlu0 %4245 }
0x1a9c   : > { %8152 = vpow2.f32 %v4266_v44  ;;  %v4268_v47 = vmul.f32 1.442695, %v4255_v45  ;;  %v4256_v48 = vsub.f32 %v4224_v18, %v4246_v46  ;;  %v10330_v45 = vld [vmem:[%s10935_s12] sm:$0xff] }
0x1a9d   : > { %v4249_v50 = vpop.xlane.xlu1 %4248  ;;  %7487 = vmatpush3.bf16.msra.mxu1 %v8003_v36  ;;  %v8011_v36 = vld [vmem:[%s10943_s4 + $0x28] sm:$0xff]  }
0x1a9e   : > { %v8145_v51 = vpop.eup %8144  ;;  %8154 = vpow2.f32 %v4268_v47  ;;  %v4270_v52 = vmul.f32 1.442695, %v4256_v48  ;;  %v4257_v53 = vsub.f32 %v4225_v33, %v4249_v50  ;;  %7500 = vmatprep.subr.bf16.mxu1 %v9091_v0  ;;  %v10334_v48 = vld [vmem:[%s10935_s12 + $0x18] sm:$0xff] }
0x1a9f   : > { %v4274_v55 = vsel %vm2115_vm4, %v8145_v51, 0.0 }
0x1aa0   : > { %v8147_v58 = vpop.eup %8146  ;;  %8156 = vpow2.f32 %v4270_v52  ;;  %v4272_v42 = vmul.f32 1.442695, %v4257_v53  ;;  %4275 = vadd.xlane.f32.xlu0 %v4274_v55  ;;  %v10338_v53 = vld [vmem:[%s10935_s12 + $0x8] sm:$0xff] }
0x1aa1   : > { %v4277_v56 = vsel %vm2115_vm4, %v8147_v58, 0.0 }
0x1aa2   : > { %v8149_v59 = vpop.eup %8148  ;;  %8158 = vpow2.f32 %v4272_v42  ;;  %4278 = vadd.xlane.f32.xlu1 %v4277_v56 }
0x1aa3   : > { %v4280_v57 = vsel %vm2115_vm4, %v8149_v59, 0.0 }
0x1aa4   : > { %v8151_v12 = vpop.eup %8150  ;;  %4281 = vadd.xlane.f32.xlu0 %v4280_v57 }
0x1aa5   : > { %v4283_v60 = vsel %vm2115_vm4, %v8151_v12, 0.0 }
0x1aa6   : > { %v8153_v13 = vpop.eup %8152  ;;  %4284 = vadd.xlane.f32.xlu1 %v4283_v60 }
0x1aa7   : > { %v4286_v15 = vsel %vm2115_vm4, %v8153_v13, 0.0 }
0x1aa8   : > { %v8155_v16 = vpop.eup %8154  ;;  %4287 = vadd.xlane.f32.xlu0 %v4286_v15 }
0x1aa9   : > { %v4289_v62 = vsel %vm2115_vm4, %v8155_v16, 0.0 }
0x1aaa   : > { %v8157_v61 = vpop.eup %8156  ;;  %4290 = vadd.xlane.f32.xlu1 %v4289_v62  ;;  %v10350_v62 = vld [vmem:[%s10935_s12 + $0x28] sm:$0xff] }
0x1aab   : > { %v4292_v63 = vsel %vm2115_vm4, %v8157_v61, 0.0 }
0x1aac   : > { %v8159_v1 = vpop.eup %8158  ;;  %4293 = vadd.xlane.f32.xlu0 %v4292_v63 }
0x1aad   : > { %v4295_v2 = vsel %vm2115_vm4, %v8159_v1, 0.0 }
0x1aae   : > { %4296 = vadd.xlane.f32.xlu1 %v4295_v2 }
0x1b2d   : > { %v4276_v29 = vpop.xlane.xlu0 %4275 }
0x1b2e   : > { %8160 = vrcp.f32 %v4276_v29 }
0x1b2f   : > { %v4279_v3 = vpop.xlane.xlu1 %4278 }
0x1b30   : > { %8162 = vrcp.f32 %v4279_v3 }
0x1b31   : > { %v4282_v4 = vpop.xlane.xlu0 %4281 }
0x1b32   : > { %8164 = vrcp.f32 %v4282_v4 }
0x1b33   : > { %v4285_v6 = vpop.xlane.xlu1 %4284 }
0x1b34   : > { %8166 = vrcp.f32 %v4285_v6  ;;  %v6927_v6 = vld [vmem:[#allocation19] ss:$0 sm:$0xff] }
0x1b35   : > { %v4288_v10 = vpop.xlane.xlu0 %4287 }
0x1b36   : > { %8168 = vrcp.f32 %v4288_v10 }
0x1b37   : > { %v4291_v5 = vpop.xlane.xlu1 %4290 }
0x1b38   : > { %v8161_v7 = vpop.eup %8160  ;;  %8170 = vrcp.f32 %v4291_v5 }
0x1b39   : > { %v4294_v8 = vpop.xlane.xlu0 %4293  ;;  %v4299_v14 = vmul.f32 %v8161_v7, %v8145_v51 }
0x1b3a   : > { %v8163_v9 = vpop.eup %8162  ;;  %8172 = vrcp.f32 %v4294_v8 }
0x1b3b   : > { %v4297_v11 = vpop.xlane.xlu1 %4296  ;;  %v4301_v17 = vmul.f32 %v8163_v9, %v8147_v58 }
0x1b3c   : > { %v8165_v18 = vpop.eup %8164  ;;  %8174 = vrcp.f32 %v4297_v11 }
0x1b3d   : > { %v4314_v19 = vpack.c.bf16 %v4301_v17, %v4299_v14  ;;  %v4303_v33 = vmul.f32 %v8165_v18, %v8149_v59  ;;  %v10342_v59 = vld [vmem:[%s10935_s12 + $0x20] sm:$0xff] }
0x1b3e   : > { %v8167_v21 = vpop.eup %8166 }
0x1b3f   : > { %v4305_v22 = vmul.f32 %v8167_v21, %v8151_v12  ;;  %7476 = vmatprep.mubr.msk.bf16.mxu0 %vm2115_vm4, %v4314_v19 }
0x1b40   : > { %v8169_v24 = vpop.eup %8168 }
0x1b41   : > { %v4315_v34 = vpack.c.bf16 %v4305_v22, %v4303_v33  ;;  %v4307_v26 = vmul.f32 %v8169_v24, %v8153_v13  ;;  %v10346_v13 = vld [vmem:[%s10935_s12 + $0x30] sm:$0xff] }
0x1b42   : > { %v8171_v25 = vpop.eup %8170 }
0x1b43   : > { %7477 = vmatmul.mubr.msk.bf16.vlgmr.msra.gmra.mrb[48].mxu0 %vm2115_vm4, %v4315_v34  ;;  %v4309_v27 = vmul.f32 %v8171_v25, %v8155_v16 }
0x1b44   : > { %v8173_v28 = vpop.eup %8172 }
0x1b45   : > { %v4316_v30 = vpack.c.bf16 %v4309_v27, %v4307_v26  ;;  %v4311_v31 = vmul.f32 %v8173_v28, %v8157_v61  ;;  %v8004_v28 = vld [vmem:[#allocation20] sm:$0xff]  }
0x1b46   : > { %v8175_v37 = vpop.eup %8174  ;;  %7493 = vmatpush3.bf16.msra.mxu0 %v8004_v28 }
0x1b47   : > { %7480 = vmatprep.mubr.msk.bf16.mxu0 %vm2115_vm4, %v4316_v30  ;;  %v4313_v32 = vmul.f32 %v8175_v37, %v8159_v1  ;;  %v10354_v1 = vld [vmem:[%s10935_s12 + $0x38] sm:$0xff]  ;;  %v8005_v30 = vld [vmem:[#allocation20 + $0x8] sm:$0xff]   ;;  %7494 = vmatprep.subr.bf16.mxu0 %v9091_v0  ;;  %v8006_v37 = vld [vmem:[%s10943_s4] sm:$0xff]  }
0x1b49   : > { %v4317_v38 = vpack.c.bf16 %v4313_v32, %v4311_v31  ;;  %v8007_v31 = vld [vmem:[%s10943_s4 + $0x8] sm:$0xff]   ;;  %v8008_v32 = vld [vmem:[%s10943_s4 + $0x10] sm:$0xff]  }
0x1b4a   : > { %7495 = vmatpush3.bf16.msra.mxu0 %v8005_v30 }
0x1b4b   : > { %7481 = vmatmul.mubr.msk.bf16.gmra.mrb[52].mxu0 %vm2115_vm4, %v4317_v38  ;;  %7520 = vmatprep.subr.bf16.mxu0 %v9091_v0  ;;  %v8009_v38 = vld [vmem:[%s10943_s4 + $0x18] sm:$0xff]  }
0x1b4c   : > { %7496 = vmatprep.mubr.msk.bf16.mxu0 %vm9092_vm0, %v9091_v0 }
0x1c16   : > { %v7478_v40 = vpop.f32.mrb[48].mxu0 }
0x1c17   : > { %v4401_v43 = vmul.f32 %v10326_v41, %v7478_v40  ;;  %v4368_v44 = vpop.f32.mrb[49].mxu0 }
0x1c18   : > { %v4399_v46 = vmul.f32 %v10330_v45, %v4368_v44  ;;  %v7479_v47 = vpop.f32.mrb[50].mxu0 }
0x1c19   : > { %v4402_v50 = vmul.f32 %v10334_v48, %v7479_v47  ;;  %v4371_v51 = vpop.f32.mrb[51].mxu0 }
0x1c1a   : > { %v4407_v52 = vadd.f32 %v4401_v43, %v4399_v46  ;;  %v4400_v55 = vmul.f32 %v10338_v53, %v4371_v51 }
0x1c1c   : > { %v4408_v58 = vadd.f32 %v4402_v50, %v4400_v55 }
0x1c1e   : > { %v7482_v42 = vpop.f32.mrb[52].mxu0 }
0x1c1f   : > { %v4384_v56 = vpop.f32.mrb[53].mxu0  ;;  %v4405_v15 = vmul.f32 %v10346_v13, %v7482_v42 }
0x1c20   : > { %v4403_v57 = vmul.f32 %v10342_v59, %v4384_v56  ;;  %v7483_v12 = vpop.f32.mrb[54].mxu0 }
0x1c21   : > { %v4387_v60 = vpop.f32.mrb[55].mxu0  ;;  %v4406_v2 = vmul.f32 %v10354_v1, %v7483_v12 }
0x1c22   : > { %v4409_v16 = vadd.f32 %v4407_v52, %v4403_v57  ;;  %v4404_v61 = vmul.f32 %v10350_v62, %v4387_v60 }
0x1c24   : > { %v4411_v63 = vadd.f32 %v4409_v16, %v4405_v15  ;;  %v4410_v29 = vadd.f32 %v4408_v58, %v4404_v61  ;;  %v6931_v61 = vld [vmem:[#allocation28] ss:$0 sm:$0xff] }
0x1c26   : > { %v4412_v3 = vadd.f32 %v4410_v29, %v4406_v2 }
0x1c28   : > { %v4413_v4 = vpack.c.bf16 %v4412_v3, %v4411_v63 }
0x1c2a   : > { %7489 = vmatmul.mubr.msk.bf16.vlgmr.msra.gmra.mrb[68].mxu1 %vm1880_vm1, %v4413_v4  ;;  %v6932_v4 = vld [vmem:[#allocation29] ss:$0 sm:$0xff] }
0x1c2b   : > { %7516 = vmatprep.mubr.msk.bf16.mxu1 %vm9092_vm0, %v9091_v0  ;;  %7501 = vmatpush3.bf16.msra.mxu1 %v8006_v37 }
0x1c2c   : > { %7502 = vmatprep.subr.bf16.mxu1 %v9091_v0 }
0x1c2f   : > { %7503 = vmatpush3.bf16.msra.mxu1 %v8007_v31 }
0x1c30   : > { %7504 = vmatprep.subr.bf16.mxu1 %v9091_v0 }
0x1c33   : > { %7505 = vmatpush3.bf16.msra.mxu1 %v8008_v32 }
0x1c34   : > { %7506 = vmatprep.subr.bf16.mxu1 %v9091_v0 }
0x1c37   : > { %7507 = vmatpush3.bf16.msra.mxu1 %v8009_v38 }
0x1c38   : > { %7508 = vmatprep.subr.bf16.mxu1 %v9091_v0 }
0x1c3b   : > { %7509 = vmatpush3.bf16.msra.mxu1 %v8010_v35 }
0x1c3c   : > { %7510 = vmatprep.subr.bf16.mxu1 %v9091_v0 }
0x1c3f   : > { %7511 = vmatpush3.bf16.msra.mxu1 %v8011_v36 }
0x1c40   : > { %7512 = vmatprep.subr.bf16.mxu1 %v9091_v0 }
0x1cfd   : > { %v4469_v10 = vpop.f32.mrb[68].mxu1 }
0x1cfe   : > { %v4470_v5 = vadd.f32 %v6927_v6, %v4469_v10  ;;  %v7490_v7 = vpop.f32.mrb[69].mxu1 }
0x1cff   : > { %v4472_v8 = vpop.f32.mrb[70].mxu1 }
0x1d00   : > { %v4473_v9 = vadd.f32 %v6927_v6, %v4472_v8  ;;  %v7491_v11 = vpop.f32.mrb[71].mxu1  ;;  %v4476_v14 = vadd.f32 %v4470_v5, %v10249_v54  ;;  %v8012_v8 = vld [vmem:[%s10943_s4 + $0x30] sm:$0xff]  }
0x1d01   : > { %7513 = vmatpush3.bf16.msra.mxu1 %v8012_v8  ;;  %v6933_v11 = vld [vmem:[#allocation22] ss:$0 sm:$0xff]  ;;  %v6946_v8 = vld [vmem:[#allocation31] ss:$0 sm:$0xff] }
0x1d02   : > { %v4480_v17 = vsel %vm1880_vm1, %v4476_v14, 0.0  ;;  %v4477_v18 = vadd.f32 %v4473_v9, %v10251_v20  ;;  %7514 = vmatprep.subr.bf16.mxu1 %v9091_v0  ;;  %v8013_v9 = vld [vmem:[%s10943_s4 + $0x38] sm:$0xff]  }
0x1d03   : > { %4481 = vadd.xlane.f32.xlu0 %v4480_v17 }
0x1d04   : > { %v4483_v19 = vsel %vm1880_vm1, %v4477_v18, 0.0 }
0x1d05   : > { %4484 = vadd.xlane.f32.xlu1 %v4483_v19  ;;  %7515 = vmatpush3.bf16.msra.mxu1 %v8013_v9 }
0x1d90   : > { %v4482_v21 = vpop.xlane.xlu0 %4481 }
0x1d91   : > { %v4486_v33 = vmul.f32 0.03125, %v4482_v21 }
0x1d92   : > { %v4485_v22 = vpop.xlane.xlu1 %4484 }
0x1d93   : > { %v4488_v24 = vsub.f32 %v4476_v14, %v4486_v33  ;;  %v4487_v34 = vmul.f32 0.03125, %v4485_v22 }
0x1d95   : > { %v4489_v25 = vsub.f32 %v4477_v18, %v4487_v34  ;;  %v4490_v26 = vmul.f32 %v4488_v24, %v4488_v24 }
0x1d97   : > { %v4492_v27 = vsel %vm1880_vm1, %v4490_v26, 0.0  ;;  %v4491_v54 = vmul.f32 %v4489_v25, %v4489_v25 }
0x1d98   : > { %4493 = vadd.xlane.f32.xlu0 %v4492_v27 }
0x1d99   : > { %v4495_v20 = vsel %vm1880_vm1, %v4491_v54, 0.0 }
0x1d9a   : > { %4496 = vadd.xlane.f32.xlu1 %v4495_v20 }
0x1e25   : > { %v4494_v40 = vpop.xlane.xlu0 %4493 }
0x1e26   : > { %v4498_v43 = vmul.f32 0.032258064, %v4494_v40 }
0x1e27   : > { %v4497_v44 = vpop.xlane.xlu1 %4496 }
0x1e28   : > { %8176 = vrsqrt.f32 %v4498_v43  ;;  %v4499_v46 = vmul.f32 0.032258064, %v4497_v44  ;;  %vm4502_vm10 = vcmp.eq.f32.partialorder %v4498_v43, inf  ;;  %v4505_v51 = vand.u32 2147483648, %v4498_v43 }
0x1e29   : > { %vm4504_vm11 = vcmp.eq.f32.partialorder %v4498_v43, 0.0 }
0x1e2a   : > { %8178 = vrsqrt.f32 %v4499_v46  ;;  %vm4509_vm13 = vcmp.eq.f32.partialorder %v4499_v46, inf  ;;  %v4512_v57 = vand.u32 2147483648, %v4499_v46  ;;  %vm4511_vm15 = vcmp.eq.f32.partialorder %v4499_v46, 0.0 }
0x1e32   : > { %v8177_v47 = vpop.eup %8176 }
0x1e33   : > { %v4501_v50 = vmul.f32 %v8177_v47, %v4498_v43 }
0x1e34   : > { %v8179_v52 = vpop.eup %8178 }
0x1e35   : > { %v4503_v55 = vsel %vm4502_vm10, %v4498_v43, %v4501_v50  ;;  %v4508_v42 = vmul.f32 %v8179_v52, %v4499_v46 }
0x1e36   : > { %v4506_v58 = vsel %vm4504_vm11, %v4505_v51, %v4503_v55  ;;  %v8014_v55 = vld [vmem:[%s10931_s2 + $0x10] sm:$0xff]  }
0x1e37   : > { %v4514_v56 = vadd.f32 1e-06, %v4506_v58  ;;  %v4510_v12 = vsel %vm4509_vm13, %v4499_v46, %v4508_v42  ;;  %v8015_v58 = vld [vmem:[%s10931_s2 + $0x18] sm:$0xff]   ;;  %s7065_s2 = sshll.u32 %s9374_s18, 7 }
0x1e38   : > { %v4513_v60 = vsel %vm4511_vm15, %v4512_v57, %v4510_v12 }
0x1e39   : > { %8180 = vrcp.f32 %v4514_v56  ;;  %v4515_v15 = vadd.f32 1e-06, %v4513_v60 }
0x1e3b   : > { %8182 = vrcp.f32 %v4515_v15 }
0x1e43   : > { %v8181_v16 = vpop.eup %8180 }
0x1e44   : > { %v4517_v63 = vmul.f32 %v8181_v16, %v4488_v24 }
0x1e45   : > { %v8183_v2 = vpop.eup %8182 }
0x1e46   : > { %v4519_v29 = vmul.f32 %v8183_v2, %v4489_v25  ;;  %v4526_v3 = vmul.f32 %v6931_v61, %v4517_v63  ;;  %v6937_v25 = vld [vmem:[#allocation23] ss:$0 sm:$0xff] }
0x1e48   : > { %v4527_v6 = vmul.f32 %v6931_v61, %v4519_v29  ;;  %v4534_v10 = vadd.f32 %v6932_v4, %v4526_v3 }
0x1e4a   : > { %v4535_v5 = vadd.f32 %v6932_v4, %v4527_v6 }
0x1e4c   : > { %v4558_v7 = vpack.c.bf16 %v4535_v5, %v4534_v10 }
0x1e4e   : > { %7497 = vmatmul.mubr.msk.bf16.vlgmr.msra.gmra.mrb[56].mxu0 %vm1880_vm1, %v4558_v7 }
0x1e4f   : > { %7524 = vmatprep.mubr.msk.bf16.mxu0 %vm9092_vm0, %v9091_v0  ;;  %7521 = vmatpush3.bf16.msra.mxu0 %v8014_v55 }
0x1e50   : > { %7522 = vmatprep.subr.bf16.mxu0 %v9091_v0 }
0x1e53   : > { %7523 = vmatpush3.bf16.msra.mxu0 %v8015_v58 }
0x1e54   : > { %7528 = vmatprep.subr.bf16.mxu0 %v9091_v0 }
0x1f21   : > { %v4614_v14 = vpop.f32.mrb[56].mxu0 }
0x1f22   : > { %v4615_v17 = vadd.f32 %v6933_v11, %v4614_v14  ;;  %v7498_v18 = vpop.f32.mrb[57].mxu0 }
0x1f23   : > { %v4617_v19 = vpop.f32.mrb[58].mxu0  ;;  %v6947_v18 = vld [vmem:[#allocation32] ss:$0 sm:$0xff] }
0x1f24   : > { %v4618_v21 = vadd.f32 %v6933_v11, %v4617_v19  ;;  %v7499_v33 = vpop.f32.mrb[59].mxu0  ;;  %v4621_v22 = vmax.f32 %v4615_v17, 0.0 }
0x1f26   : > { %v4622_v24 = vmax.f32 %v4618_v21, 0.0 }
0x1f28   : > { %v4623_v34 = vpack.c.bf16 %v4622_v24, %v4621_v22  ;;  %v8016_v22 = vld [vmem:[%s10933_s8 + $0x10] sm:$0xff]  }
0x1f2a   : > { %7517 = vmatmul.mubr.bf16.vlgmr.msra.gmra.mrb[72].mxu1 %v4623_v34  ;;  %v8017_v34 = vld [vmem:[%s10933_s8 + $0x18] sm:$0xff]   ;;  %s9094_s8 = smov [#allocation34]  }
0x1ffd   : > { %v4712_v26 = vpop.f32.mrb[72].mxu1 }
0x1ffe   : > { %v4713_v27 = vadd.f32 %v6937_v25, %v4712_v26  ;;  %v7518_v54 = vpop.f32.mrb[73].mxu1  ;;  %v8019_v26 = vld [vmem:[%s10934_s5 + $0x18] sm:$0xff]  }
0x1fff   : > { %v4715_v20 = vpop.f32.mrb[74].mxu1 }
0x2000   : > { %v4716_v28 = vadd.f32 %v6937_v25, %v4715_v20  ;;  %v7519_v30 = vpop.f32.mrb[75].mxu1  ;;  %v4719_v37 = vadd.f32 %v4713_v27, %v4534_v10  ;;  %v8018_v25 = vld [vmem:[%s10934_s5 + $0x10] sm:$0xff]   ;;  %s6318_s5 = scalar_lea.sflag [#allocation4], %s9781_s10 }
0x2001   : > { %v6964_v27 = vld [vmem:[#allocation8 + $0x1] ss:$0 sm:$0xff] }
0x2002   : > { %v4723_v31 = vsel %vm1880_vm1, %v4719_v37, 0.0  ;;  %v4720_v32 = vadd.f32 %v4716_v28, %v4535_v5 }
0x2003   : > { %4724 = vadd.xlane.f32.xlu0 %v4723_v31 }
0x2004   : > { %v4726_v38 = vsel %vm1880_vm1, %v4720_v32, 0.0 }
0x2005   : > { %4727 = vadd.xlane.f32.xlu1 %v4726_v38 }
0x2090   : > { %v4725_v35 = vpop.xlane.xlu0 %4724 }
0x2091   : > { %v4729_v36 = vmul.f32 0.03125, %v4725_v35 }
0x2092   : > { %v4728_v40 = vpop.xlane.xlu1 %4727 }
0x2093   : > { %v4731_v43 = vsub.f32 %v4719_v37, %v4729_v36  ;;  %v4730_v44 = vmul.f32 0.03125, %v4728_v40 }
0x2095   : > { %v4732_v46 = vsub.f32 %v4720_v32, %v4730_v44  ;;  %v4733_v47 = vmul.f32 %v4731_v43, %v4731_v43 }
0x2097   : > { %v4735_v50 = vsel %vm1880_vm1, %v4733_v47, 0.0  ;;  %v4734_v51 = vmul.f32 %v4732_v46, %v4732_v46 }
0x2098   : > { %4736 = vadd.xlane.f32.xlu0 %v4735_v50  ;;  %v6968_v50 = vld [vmem:[#allocation10 + $0x1] ss:$0 sm:$0xff] }
0x2099   : > { %v4738_v52 = vsel %vm1880_vm1, %v4734_v51, 0.0 }
0x209a   : > { %4739 = vadd.xlane.f32.xlu1 %v4738_v52 }
0x2125   : > { %v4737_v42 = vpop.xlane.xlu0 %4736 }
0x2126   : > { %v4741_v56 = vmul.f32 0.032258064, %v4737_v42 }
0x2127   : > { %v4740_v57 = vpop.xlane.xlu1 %4739 }
0x2128   : > { %8184 = vrsqrt.f32 %v4741_v56  ;;  %v4742_v12 = vmul.f32 0.032258064, %v4740_v57  ;;  %vm4745_vm2 = vcmp.eq.f32.partialorder %v4741_v56, inf  ;;  %v4748_v16 = vand.u32 2147483648, %v4741_v56 }
0x2129   : > { %vm4747_vm6 = vcmp.eq.f32.partialorder %v4741_v56, 0.0 }
0x212a   : > { %8186 = vrsqrt.f32 %v4742_v12  ;;  %vm4752_vm7 = vcmp.eq.f32.partialorder %v4742_v12, inf  ;;  %v4755_v4 = vand.u32 2147483648, %v4742_v12  ;;  %vm4754_vm8 = vcmp.eq.f32.partialorder %v4742_v12, 0.0 }
0x2132   : > { %v8185_v60 = vpop.eup %8184 }
0x2133   : > { %v4744_v15 = vmul.f32 %v8185_v60, %v4741_v56 }
0x2134   : > { %v8187_v61 = vpop.eup %8186 }
0x2135   : > { %v4746_v63 = vsel %vm4745_vm2, %v4741_v56, %v4744_v15  ;;  %v4751_v29 = vmul.f32 %v8187_v61, %v4742_v12  ;;  %v6972_v61 = vld [vmem:[#allocation11 + $0x1] ss:$0 sm:$0xff] }
0x2136   : > { %v4749_v2 = vsel %vm4747_vm6, %v4748_v16, %v4746_v63 }
0x2137   : > { %v4757_v3 = vadd.f32 1e-06, %v4749_v2  ;;  %v4753_v6 = vsel %vm4752_vm7, %v4742_v12, %v4751_v29 }
0x2138   : > { %v4756_v10 = vsel %vm4754_vm8, %v4755_v4, %v4753_v6 }
0x2139   : > { %8188 = vrcp.f32 %v4757_v3  ;;  %v4758_v5 = vadd.f32 1e-06, %v4756_v10 }
0x213b   : > { %8190 = vrcp.f32 %v4758_v5 }
0x2143   : > { %v8189_v7 = vpop.eup %8188 }
0x2144   : > { %v4760_v9 = vmul.f32 %v8189_v7, %v4731_v43 }
0x2145   : > { %v8191_v11 = vpop.eup %8190 }
0x2146   : > { %v4762_v14 = vmul.f32 %v8191_v11, %v4732_v46  ;;  %v4769_v17 = vmul.f32 %v6946_v8, %v4760_v9 }
0x2148   : > { %v4770_v19 = vmul.f32 %v6946_v8, %v4762_v14  ;;  %v10394_v21 = vadd.f32 %v6947_v18, %v4769_v17 }
0x214a   : > { %v10396_v33 = vadd.f32 %v6947_v18, %v4770_v19 }
0x214c   : > { %v4807_v24 = vpack.c.bf16 %v10396_v33, %v10394_v21 }
0x214e   : > { %7525 = vmatmul.mubr.msk.bf16.vlgmr.msra.gmra.mrb[60].mxu0 %vm1880_vm1, %v4807_v24 }
0x214f   : > { %7529 = vmatpush3.bf16.msra.mxu0 %v8016_v22  ;;  %7532 = vmatprep.mubr.msk.bf16.mxu0 %vm9092_vm0, %v9091_v0 }
0x2150   : > { %7530 = vmatprep.subr.bf16.mxu0 %v9091_v0 }
0x2153   : > { %7531 = vmatpush3.bf16.msra.mxu0 %v8017_v34 }
0x2154   : > { %7536 = vmatprep.subr.bf16.mxu0 %v9091_v0 }
0x2156   : > { %7533 = vmatmul.mubr.msk.bf16.vlgmr.msra.gmra.mrb[64].mxu0 %vm1880_vm1, %v4807_v24 }
0x2157   : > { %7537 = vmatpush3.bf16.msra.mxu0 %v8018_v25  ;;  %7540 = vmatprep.mubr.msk.bf16.mxu0 %vm9092_vm0, %v9091_v0 }
0x2158   : > { %7538 = vmatprep.subr.bf16.mxu0 %v9091_v0 }
0x215b   : > { %7539 = vmatpush3.bf16.msra.mxu0 %v8019_v26 }
0x215e   : > { %7541 = vmatmul.mubr.msk.bf16.vlgmr.msra.gmra.mrb[68].mxu0 %vm1880_vm1, %v4807_v24 }
0x2221   : > { %v4863_v54 = vpop.f32.mrb[60].mxu0 }
0x2222   : > { %v4864_v20 = vadd.f32 %v6964_v27, %v4863_v54  ;;  %v7526_v28 = vpop.f32.mrb[61].mxu0 }
0x2223   : > { %v4866_v30 = vpop.f32.mrb[62].mxu0 }
0x2224   : > { %v7527_v37 = vpop.f32.mrb[63].mxu0  ;;  %v4867_v31 = vadd.f32 %v6964_v27, %v4866_v30  ;;  %v4988_v32 = vmul.f32 %v10330_v45, %v4864_v20  ;;  %v4990_v38 = vmul.f32 %v10326_v41, %v4864_v20  ;;  %v4992_v35 = vmul.f32 %v10342_v59, %v4864_v20 }
0x2225   : > { %v4994_v36 = vmul.f32 %v10346_v13, %v4864_v20 }
0x2226   : > { %v4989_v40 = vmul.f32 %v10338_v53, %v4867_v31  ;;  %v4991_v43 = vmul.f32 %v10334_v48, %v4867_v31  ;;  %v4993_v44 = vmul.f32 %v10350_v62, %v4867_v31  ;;  %v4995_v46 = vmul.f32 %v10354_v1, %v4867_v31 }
0x2228   : > { %v4997_v47 = vpack.c.bf16 %v4991_v43, %v4990_v38  ;;  %v4996_v52 = vpack.c.bf16 %v4989_v40, %v4988_v32  ;;  %v4998_v55 = vpack.c.bf16 %v4993_v44, %v4992_v35  ;;  %v4999_v58 = vpack.c.bf16 %v4995_v46, %v4994_v36 }
0x2229   : > { %v4922_v51 = vpop.f32.mrb[64].mxu0 }
0x222a   : > { %v7534_v42 = vpop.f32.mrb[65].mxu0  ;;  %7546 = vmatprep.mubr.msk.bf16.mxu0 %vm1880_vm1, %v4996_v52  ;;  %v4923_v57 = vadd.f32 %v6968_v50, %v4922_v51 }
0x222b   : > { %v4925_v56 = vpop.f32.mrb[66].mxu0 }
0x222c   : > { %v4926_v12 = vadd.f32 %v6968_v50, %v4925_v56  ;;  %v7535_v60 = vpop.f32.mrb[67].mxu0 }
0x222e   : > { %v5000_v15 = vpack.c.bf16 %v4926_v12, %v4923_v57 }
0x2230   : > { %7659 = vmatprep.subr.msk.bf16.mxu0 %vm1880_vm1, %v5000_v15  ;;  %v5014_v16 = vsel %vm1880_vm1, %v5000_v15, 0 }
0x2231   : > { %v4981_v63 = vpop.f32.mrb[68].mxu0  ;;  %7545 = vmatpush3.bf16.xpose.msra.mxu0 %v5014_v16 }
0x2232   : > { %v7542_v2 = vpop.f32.mrb[69].mxu0  ;;  %7564 = vmatprep.subr.bf16.mxu0 %v9091_v0  ;;  %v4982_v3 = vadd.f32 %v6972_v61, %v4981_v63 }
0x2233   : > { %v4984_v29 = vpop.f32.mrb[70].mxu0 }
0x2234   : > { %v4985_v4 = vadd.f32 %v6972_v61, %v4984_v29  ;;  %v7543_v6 = vpop.f32.mrb[71].mxu0 }
0x2236   : > { %v5229_v10 = vpack.c.bf16 %v4985_v4, %v4982_v3 }
0x2238   : > { %7547 = vmatmul.mubr.msk.bf16.vlgmr.msra.gmra.mrb[72].mxu0 %vm1880_vm1, %v4997_v47  ;;  %7554 = vmatprep.subr.bf16.mxu1 %v5229_v10 }
0x2239   : > { %7550 = vmatprep.mubr.msk.bf16.mxu0 %vm1880_vm1, %v4998_v55  ;;  %7555 = vmatpush3.bf16.msra.mxu1 %v5229_v10 }
0x223a   : > { %7572 = vmatprep.subr.bf16.mxu1 %v9091_v0 }
0x2240   : > { %7551 = vmatmul.mubr.msk.bf16.gmra.mrb[76].mxu0 %vm1880_vm1, %v4999_v58 }
0x2241   : > { %7568 = vmatprep.mubr.msk.bf16.mxu0 %vm9092_vm0, %v9091_v0 }
0x230b   : > { %v7548_v5 = vpop.f32.mrb[72].mxu0 }
0x230c   : > { %v5050_v7 = vpop.f32.mrb[73].mxu0  ;;  %v5087_v17 = vsel %vm3552_vm12, %v7548_v5, -inf }
0x230d   : > { %v7549_v8 = vpop.f32.mrb[74].mxu0  ;;  %v5081_v9 = vsel %vm3552_vm12, %v5050_v7, -inf }
0x230e   : > { %5082 = vmax.xlane.f32.xlu0 %v5081_v9  ;;  %v5053_v11 = vpop.f32.mrb[75].mxu0  ;;  %v5090_v19 = vsel %vm3552_vm12, %v7549_v8, -inf }
0x230f   : > { %v5084_v14 = vsel %vm3552_vm12, %v5053_v11, -inf }
0x2310   : > { %5085 = vmax.xlane.f32.xlu1 %v5084_v14 }
0x2312   : > { %5088 = vmax.xlane.f32.xlu0 %v5087_v17 }
0x2313   : > { %v7552_v18 = vpop.f32.mrb[76].mxu0 }
0x2314   : > { %5091 = vmax.xlane.f32.xlu1 %v5090_v19  ;;  %v5066_v22 = vpop.f32.mrb[77].mxu0  ;;  %v5099_v27 = vsel %vm3552_vm12, %v7552_v18, -inf }
0x2315   : > { %v7553_v24 = vpop.f32.mrb[78].mxu0  ;;  %v5093_v34 = vsel %vm3552_vm12, %v5066_v22, -inf }
0x2316   : > { %5094 = vmax.xlane.f32.xlu0 %v5093_v34  ;;  %v5069_v25 = vpop.f32.mrb[79].mxu0  ;;  %v5102_v54 = vsel %vm3552_vm12, %v7553_v24, -inf }
0x2317   : > { %v5096_v26 = vsel %vm3552_vm12, %v5069_v25, -inf }
0x2318   : > { %5097 = vmax.xlane.f32.xlu1 %v5096_v26 }
0x231a   : > { %5100 = vmax.xlane.f32.xlu0 %v5099_v27 }
0x231c   : > { %5103 = vmax.xlane.f32.xlu1 %v5102_v54 }
0x239b   : > { %v5083_v20 = vpop.xlane.xlu0 %5082 }
0x239c   : > { %v5105_v28 = vsub.f32 %v5050_v7, %v5083_v20 }
0x239d   : > { %v5086_v30 = vpop.xlane.xlu1 %5085 }
0x239e   : > { %v5113_v37 = vmul.f32 1.442695, %v5105_v28  ;;  %v5106_v31 = vsub.f32 %v5053_v11, %v5086_v30 }
0x239f   : > { %v5089_v32 = vpop.xlane.xlu0 %5088 }
0x23a0   : > { %8192 = vpow2.f32 %v5113_v37  ;;  %v5115_v38 = vmul.f32 1.442695, %v5106_v31  ;;  %v5107_v35 = vsub.f32 %v7548_v5, %v5089_v32 }
0x23a1   : > { %v5092_v36 = vpop.xlane.xlu1 %5091 }
0x23a2   : > { %8194 = vpow2.f32 %v5115_v38  ;;  %v5117_v40 = vmul.f32 1.442695, %v5107_v35  ;;  %v5108_v43 = vsub.f32 %v7549_v8, %v5092_v36 }
0x23a3   : > { %v5095_v44 = vpop.xlane.xlu0 %5094 }
0x23a4   : > { %8196 = vpow2.f32 %v5117_v40  ;;  %v5119_v46 = vmul.f32 1.442695, %v5108_v43  ;;  %v5109_v47 = vsub.f32 %v5066_v22, %v5095_v44 }
0x23a5   : > { %v5098_v50 = vpop.xlane.xlu1 %5097 }
0x23a6   : > { %8198 = vpow2.f32 %v5119_v46  ;;  %v5121_v51 = vmul.f32 1.442695, %v5109_v47  ;;  %v5110_v52 = vsub.f32 %v5069_v25, %v5098_v50 }
0x23a7   : > { %v5101_v55 = vpop.xlane.xlu0 %5100 }
0x23a8   : > { %8200 = vpow2.f32 %v5121_v51  ;;  %v5123_v58 = vmul.f32 1.442695, %v5110_v52  ;;  %v5111_v42 = vsub.f32 %v7552_v18, %v5101_v55 }
0x23a9   : > { %v5104_v56 = vpop.xlane.xlu1 %5103 }
0x23aa   : > { %v8193_v57 = vpop.eup %8192  ;;  %8202 = vpow2.f32 %v5123_v58  ;;  %v5125_v12 = vmul.f32 1.442695, %v5111_v42  ;;  %v5112_v60 = vsub.f32 %v7553_v24, %v5104_v56 }
0x23ab   : > { %v5129_v15 = vsel %vm3606_vm14, -1e+09, %v8193_v57 }
0x23ac   : > { %v8195_v16 = vpop.eup %8194  ;;  %8204 = vpow2.f32 %v5125_v12  ;;  %v5127_v61 = vmul.f32 1.442695, %v5112_v60  ;;  %v5137_v63 = vsel %vm3552_vm12, %v5129_v15, -inf }
0x23ad   : > { %5138 = vmax.xlane.f32.xlu0 %v5137_v63  ;;  %v5130_v2 = vsel %vm3606_vm14, -1e+09, %v8195_v16 }
0x23ae   : > { %v8197_v29 = vpop.eup %8196  ;;  %8206 = vpow2.f32 %v5127_v61  ;;  %v5140_v3 = vsel %vm3552_vm12, %v5130_v2, -inf }
0x23af   : > { %5141 = vmax.xlane.f32.xlu1 %v5140_v3  ;;  %v5131_v4 = vsel %vm3606_vm14, -1e+09, %v8197_v29 }
0x23b0   : > { %v8199_v6 = vpop.eup %8198  ;;  %v5143_v10 = vsel %vm3552_vm12, %v5131_v4, -inf }
0x23b1   : > { %5144 = vmax.xlane.f32.xlu0 %v5143_v10  ;;  %v5132_v5 = vsel %vm3606_vm14, -1e+09, %v8199_v6 }
0x23b2   : > { %v8201_v7 = vpop.eup %8200  ;;  %v5146_v8 = vsel %vm3552_vm12, %v5132_v5, -inf }
0x23b3   : > { %5147 = vmax.xlane.f32.xlu1 %v5146_v8  ;;  %v5133_v9 = vsel %vm3606_vm14, -1e+09, %v8201_v7 }
0x23b4   : > { %v8203_v11 = vpop.eup %8202  ;;  %v5149_v14 = vsel %vm3552_vm12, %v5133_v9, -inf }
0x23b5   : > { %5150 = vmax.xlane.f32.xlu0 %v5149_v14  ;;  %v5134_v17 = vsel %vm3606_vm14, -1e+09, %v8203_v11 }
0x23b6   : > { %v8205_v18 = vpop.eup %8204  ;;  %v5152_v19 = vsel %vm3552_vm12, %v5134_v17, -inf }
0x23b7   : > { %5153 = vmax.xlane.f32.xlu1 %v5152_v19  ;;  %v5135_v22 = vsel %vm3606_vm14, -1e+09, %v8205_v18 }
0x23b8   : > { %v8207_v24 = vpop.eup %8206  ;;  %v5155_v34 = vsel %vm3552_vm12, %v5135_v22, -inf }
0x23b9   : > { %5156 = vmax.xlane.f32.xlu0 %v5155_v34  ;;  %v5136_v25 = vsel %vm3606_vm14, -1e+09, %v8207_v24 }
0x23ba   : > { %v5158_v26 = vsel %vm3552_vm12, %v5136_v25, -inf }
0x23bb   : > { %5159 = vmax.xlane.f32.xlu1 %v5158_v26 }
0x243a   : > { %v5139_v27 = vpop.xlane.xlu0 %5138 }
0x243b   : > { %v5161_v54 = vsub.f32 %v5129_v15, %v5139_v27 }
0x243c   : > { %v5142_v20 = vpop.xlane.xlu1 %5141 }
0x243d   : > { %v5169_v28 = vmul.f32 1.442695, %v5161_v54  ;;  %v5162_v30 = vsub.f32 %v5130_v2, %v5142_v20 }
0x243e   : > { %v5145_v37 = vpop.xlane.xlu0 %5144 }
0x243f   : > { %8208 = vpow2.f32 %v5169_v28  ;;  %v5171_v31 = vmul.f32 1.442695, %v5162_v30  ;;  %v5163_v32 = vsub.f32 %v5131_v4, %v5145_v37 }
0x2440   : > { %v5148_v38 = vpop.xlane.xlu1 %5147 }
0x2441   : > { %8210 = vpow2.f32 %v5171_v31  ;;  %v5173_v35 = vmul.f32 1.442695, %v5163_v32  ;;  %v5164_v36 = vsub.f32 %v5132_v5, %v5148_v38 }
0x2442   : > { %v5151_v40 = vpop.xlane.xlu0 %5150 }
0x2443   : > { %8212 = vpow2.f32 %v5173_v35  ;;  %v5175_v23 = vmul.f32 1.442695, %v5164_v36  ;;  %v5165_v43 = vsub.f32 %v5133_v9, %v5151_v40 }
0x2444   : > { %v5154_v44 = vpop.xlane.xlu1 %5153 }
0x2445   : > { %8214 = vpow2.f32 %v5175_v23  ;;  %v5177_v46 = vmul.f32 1.442695, %v5165_v43  ;;  %v5166_v47 = vsub.f32 %v5134_v17, %v5154_v44 }
0x2446   : > { %v5157_v50 = vpop.xlane.xlu0 %5156 }
0x2447   : > { %8216 = vpow2.f32 %v5177_v46  ;;  %v5179_v51 = vmul.f32 1.442695, %v5166_v47  ;;  %v5167_v52 = vsub.f32 %v5135_v22, %v5157_v50  ;;  %v8020_v50 = vld [vmem:[%s10937_s9 + $0x10] sm:$0xff]  }
0x2448   : > { %v5160_v55 = vpop.xlane.xlu1 %5159  ;;  %7565 = vmatpush3.bf16.msra.mxu0 %v8020_v50 }
0x2449   : > { %v8209_v58 = vpop.eup %8208  ;;  %8218 = vpow2.f32 %v5179_v51  ;;  %v5181_v42 = vmul.f32 1.442695, %v5167_v52  ;;  %v5168_v56 = vsub.f32 %v5136_v25, %v5160_v55  ;;  %7566 = vmatprep.subr.bf16.mxu0 %v9091_v0  ;;  %v8021_v51 = vld [vmem:[%s10937_s9 + $0x18] sm:$0xff]   ;;  %s8882_s9 = sshll.u32 %s9094_s8, 4  ;;  %s8883_s9 = int_to_ptr.vmem [resolvable:$false] %s8882_s9 }
0x244a   : > { %v5185_v57 = vsel %vm3552_vm12, %v8209_v58, 0.0 }
0x244b   : > { %v8211_v12 = vpop.eup %8210  ;;  %8220 = vpow2.f32 %v5181_v42  ;;  %v5183_v60 = vmul.f32 1.442695, %v5168_v56  ;;  %5186 = vadd.xlane.f32.xlu0 %v5185_v57 }
0x244c   : > { %v5188_v15 = vsel %vm3552_vm12, %v8211_v12, 0.0  ;;  %7567 = vmatpush3.bf16.msra.mxu0 %v8021_v51 }
0x244d   : > { %v8213_v16 = vpop.eup %8212  ;;  %8222 = vpow2.f32 %v5183_v60  ;;  %5189 = vadd.xlane.f32.xlu1 %v5188_v15  ;;  %7580 = vmatprep.subr.bf16.mxu0 %v9091_v0 }
0x244e   : > { %v5191_v61 = vsel %vm3552_vm12, %v8213_v16, 0.0 }
0x244f   : > { %v8215_v63 = vpop.eup %8214  ;;  %5192 = vadd.xlane.f32.xlu0 %v5191_v61 }
0x2450   : > { %v5194_v2 = vsel %vm3552_vm12, %v8215_v63, 0.0 }
0x2451   : > { %v8217_v29 = vpop.eup %8216  ;;  %5195 = vadd.xlane.f32.xlu1 %v5194_v2 }
0x2452   : > { %v5197_v3 = vsel %vm3552_vm12, %v8217_v29, 0.0 }
0x2453   : > { %v8219_v4 = vpop.eup %8218  ;;  %5198 = vadd.xlane.f32.xlu0 %v5197_v3 }
0x2454   : > { %v5200_v6 = vsel %vm3552_vm12, %v8219_v4, 0.0 }
0x2455   : > { %v8221_v10 = vpop.eup %8220  ;;  %5201 = vadd.xlane.f32.xlu1 %v5200_v6 }
0x2456   : > { %v5203_v5 = vsel %vm3552_vm12, %v8221_v10, 0.0 }
0x2457   : > { %v8223_v7 = vpop.eup %8222  ;;  %5204 = vadd.xlane.f32.xlu0 %v5203_v5 }
0x2458   : > { %v5206_v8 = vsel %vm3552_vm12, %v8223_v7, 0.0 }
0x2459   : > { %5207 = vadd.xlane.f32.xlu1 %v5206_v8  ;;  %v8023_v8 = vld [vmem:[%s10938_s6 + $0x18] sm:$0xff]  }
0x24d8   : > { %v5187_v9 = vpop.xlane.xlu0 %5186 }
0x24d9   : > { %8224 = vrcp.f32 %v5187_v9 }
0x24da   : > { %v5190_v11 = vpop.xlane.xlu1 %5189 }
0x24db   : > { %8226 = vrcp.f32 %v5190_v11 }
0x24dc   : > { %v5193_v14 = vpop.xlane.xlu0 %5192 }
0x24dd   : > { %8228 = vrcp.f32 %v5193_v14 }
0x24de   : > { %v5196_v17 = vpop.xlane.xlu1 %5195 }
0x24df   : > { %8230 = vrcp.f32 %v5196_v17 }
0x24e0   : > { %v5199_v18 = vpop.xlane.xlu0 %5198 }
0x24e1   : > { %8232 = vrcp.f32 %v5199_v18 }
0x24e2   : > { %v5202_v19 = vpop.xlane.xlu1 %5201 }
0x24e3   : > { %v8225_v22 = vpop.eup %8224  ;;  %8234 = vrcp.f32 %v5202_v19 }
0x24e4   : > { %v5205_v24 = vpop.xlane.xlu0 %5204  ;;  %v5210_v26 = vmul.f32 %v8225_v22, %v8209_v58  ;;  %v7010_v22 = vld [vmem:[#allocation16 + $0x1] ss:$0 sm:$0xff] }
0x24e5   : > { %v8227_v34 = vpop.eup %8226  ;;  %8236 = vrcp.f32 %v5205_v24 }
0x24e6   : > { %v5208_v25 = vpop.xlane.xlu1 %5207  ;;  %v5212_v27 = vmul.f32 %v8227_v34, %v8211_v12 }
0x24e7   : > { %v8229_v54 = vpop.eup %8228  ;;  %8238 = vrcp.f32 %v5208_v25 }
0x24e8   : > { %v5225_v20 = vpack.c.bf16 %v5212_v27, %v5210_v26  ;;  %v5214_v30 = vmul.f32 %v8229_v54, %v8213_v16 }
0x24e9   : > { %v8231_v28 = vpop.eup %8230 }
0x24ea   : > { %v5216_v37 = vmul.f32 %v8231_v28, %v8215_v63  ;;  %7556 = vmatprep.mubr.msk.bf16.mxu1 %vm3552_vm12, %v5225_v20 }
0x24eb   : > { %v8233_v31 = vpop.eup %8232 }
0x24ec   : > { %v5226_v32 = vpack.c.bf16 %v5216_v37, %v5214_v30  ;;  %v5218_v35 = vmul.f32 %v8233_v31, %v8217_v29 }
0x24ed   : > { %v8235_v38 = vpop.eup %8234 }
0x24ee   : > { %7557 = vmatmul.mubr.msk.bf16.vlgmr.msra.gmra.mrb[76].mxu1 %vm3552_vm12, %v5226_v32  ;;  %v5220_v36 = vmul.f32 %v8235_v38, %v8219_v4 }
0x24ef   : > { %v8237_v40 = vpop.eup %8236 }
0x24f0   : > { %v5227_v23 = vpack.c.bf16 %v5220_v36, %v5218_v35  ;;  %v5222_v44 = vmul.f32 %v8237_v40, %v8221_v10 }
0x24f1   : > { %v8239_v43 = vpop.eup %8238 }
0x24f2   : > { %7560 = vmatprep.mubr.msk.bf16.mxu1 %vm3552_vm12, %v5227_v23  ;;  %v5224_v46 = vmul.f32 %v8239_v43, %v8223_v7  ;;  %v8022_v7 = vld [vmem:[%s10938_s6 + $0x10] sm:$0xff]   ;;  %v8025_v43 = vld [vmem:[%s10939_s3 + $0x18] sm:$0xff]  }
0x24f3   : > { %v8024_v23 = vld [vmem:[%s10939_s3 + $0x10] sm:$0xff]  }
0x24f4   : > { %v5228_v47 = vpack.c.bf16 %v5224_v46, %v5222_v44  ;;  %7573 = vmatpush3.bf16.msra.mxu1 %v8024_v23 }
0x24f5   : > { %7574 = vmatprep.subr.bf16.mxu1 %v9091_v0 }
0x24f6   : > { %7561 = vmatmul.mubr.msk.bf16.gmra.mrb[80].mxu1 %vm3552_vm12, %v5228_v47 }
0x24f7   : > { %7576 = vmatprep.mubr.msk.bf16.mxu1 %vm9092_vm0, %v9091_v0 }
0x24f8   : > { %7575 = vmatpush3.bf16.msra.mxu1 %v8025_v43 }
0x24f9   : > { %7588 = vmatprep.subr.bf16.mxu1 %v9091_v0 }
0x25c1   : > { %v7558_v52 = vpop.f32.mrb[76].mxu1 }
0x25c2   : > { %v5309_v55 = vmul.f32 %v10326_v41, %v7558_v52  ;;  %v5276_v58 = vpop.f32.mrb[77].mxu1 }
0x25c3   : > { %v5307_v42 = vmul.f32 %v10330_v45, %v5276_v58  ;;  %v7559_v56 = vpop.f32.mrb[78].mxu1 }
0x25c4   : > { %v5310_v57 = vmul.f32 %v10334_v48, %v7559_v56  ;;  %v5279_v12 = vpop.f32.mrb[79].mxu1 }
0x25c5   : > { %v5315_v60 = vadd.f32 %v5309_v55, %v5307_v42  ;;  %v5308_v15 = vmul.f32 %v10338_v53, %v5279_v12 }
0x25c7   : > { %v5316_v16 = vadd.f32 %v5310_v57, %v5308_v15 }
0x25c9   : > { %v7562_v61 = vpop.f32.mrb[80].mxu1 }
0x25ca   : > { %v5292_v63 = vpop.f32.mrb[81].mxu1  ;;  %v5313_v41 = vmul.f32 %v10346_v13, %v7562_v61 }
0x25cb   : > { %v5311_v2 = vmul.f32 %v10342_v59, %v5292_v63  ;;  %v7563_v29 = vpop.f32.mrb[82].mxu1  ;;  %v6984_v59 = vld [vmem:[#allocation13 + $0x1] ss:$0 sm:$0xff] }
0x25cc   : > { %v5295_v3 = vpop.f32.mrb[83].mxu1  ;;  %v5314_v48 = vmul.f32 %v10354_v1, %v7563_v29 }
0x25cd   : > { %v5317_v4 = vadd.f32 %v5315_v60, %v5311_v2  ;;  %v5312_v45 = vmul.f32 %v10350_v62, %v5295_v3  ;;  %v6988_v2 = vld [vmem:[#allocation25 + $0x1] ss:$0 sm:$0xff] }
0x25cf   : > { %v5319_v6 = vadd.f32 %v5317_v4, %v5313_v41  ;;  %v5318_v10 = vadd.f32 %v5316_v16, %v5312_v45  ;;  %v6989_v45 = vld [vmem:[#allocation26 + $0x1] ss:$0 sm:$0xff] }
0x25d1   : > { %v5320_v5 = vadd.f32 %v5318_v10, %v5314_v48 }
0x25d3   : > { %v5321_v53 = vpack.c.bf16 %v5320_v5, %v5319_v6  ;;  %v8026_v5 = vld [vmem:[%s10941_s13 + $0x10] sm:$0xff]  }
0x25d5   : > { %7569 = vmatmul.mubr.msk.bf16.vlgmr.msra.gmra.mrb[80].mxu0 %vm1880_vm1, %v5321_v53  ;;  %v8027_v53 = vld [vmem:[%s10941_s13 + $0x18] sm:$0xff]  }
0x25d6   : > { %7581 = vmatpush3.bf16.msra.mxu0 %v8022_v7  ;;  %7584 = vmatprep.mubr.msk.bf16.mxu0 %vm9092_vm0, %v9091_v0 }
0x25d7   : > { %7582 = vmatprep.subr.bf16.mxu0 %v9091_v0 }
0x25da   : > { %7583 = vmatpush3.bf16.msra.mxu0 %v8023_v8  ;;  %v7006_v8 = vld [vmem:[#allocation14 + $0x1] ss:$0 sm:$0xff] }
0x25dd   : > { %7585 = vmatmul.mubr.msk.bf16.vlgmr.msra.gmra.mrb[84].mxu0 %vm1880_vm1, %v10234_v49 }
0x26a8   : > { %v5377_v13 = vpop.f32.mrb[80].mxu0 }
0x26a9   : > { %v5378_v62 = vadd.f32 %v6984_v59, %v5377_v13  ;;  %v7570_v1 = vpop.f32.mrb[81].mxu0 }
0x26aa   : > { %v5380_v9 = vpop.f32.mrb[82].mxu0 }
0x26ab   : > { %v5384_v11 = vadd.f32 %v5378_v62, %v10394_v21  ;;  %v5381_v14 = vadd.f32 %v6984_v59, %v5380_v9  ;;  %v7571_v17 = vpop.f32.mrb[83].mxu0 }
0x26ad   : > { %v5385_v18 = vadd.f32 %v5381_v14, %v10396_v33  ;;  %v5390_v19 = vsel %vm1880_vm1, %v5384_v11, 0.0  ;;  %v10526_v14 = vld [vmem:[%s10935_s12] sm:$0xff] }
0x26ae   : > { %5391 = vadd.xlane.f32.xlu0 %v5390_v19 }
0x26af   : > { %v5393_v24 = vsel %vm1880_vm1, %v5385_v18, 0.0 }
0x26b0   : > { %5394 = vadd.xlane.f32.xlu1 %v5393_v24  ;;  %v5589_v34 = vpop.f32.mrb[84].mxu0  ;;  %v10538_v24 = vld [vmem:[%s10935_s12 + $0x30] sm:$0xff] }
0x26b1   : > { %v5590_v25 = vadd.f32 %v7010_v22, %v5589_v34  ;;  %v7586_v26 = vpop.f32.mrb[85].mxu0 }
0x26b2   : > { %v5592_v27 = vpop.f32.mrb[86].mxu0 }
0x26b3   : > { %v5665_v54 = vpack.c.bf16 %v5590_v25, %v5590_v25  ;;  %v7587_v20 = vpop.f32.mrb[87].mxu0  ;;  %v10542_v25 = vld [vmem:[%s10935_s12 + $0x8] sm:$0xff]  ;;  %v10546_v27 = vld [vmem:[%s10935_s12 + $0x18] sm:$0xff] }
0x26b4   : > { %v10550_v20 = vld [vmem:[%s10935_s12 + $0x28] sm:$0xff] }
0x26b5   : > { %v5679_v28 = vsel %vm1880_vm1, %v5665_v54, 0  ;;  %7660 = vmatprep.subr.msk.bf16.mxu0 %vm1880_vm1, %v5665_v54 }
0x26b6   : > { %7597 = vmatpush3.bf16.xpose.msra.mxu0 %v5679_v28 }
0x26b7   : > { %7616 = vmatprep.subr.bf16.mxu0 %v9091_v0 }
0x273b   : > { %v5392_v21 = vpop.xlane.xlu0 %5391 }
0x273c   : > { %v5396_v33 = vmul.f32 0.03125, %v5392_v21  ;;  %v10554_v21 = vld [vmem:[%s10935_s12 + $0x38] sm:$0xff] }
0x273d   : > { %v5395_v30 = vpop.xlane.xlu1 %5394 }
0x273e   : > { %v5398_v37 = vsub.f32 %v5384_v11, %v5396_v33  ;;  %v5397_v31 = vmul.f32 0.03125, %v5395_v30  ;;  %v7014_v30 = vld [vmem:[#allocation17 + $0x1] ss:$0 sm:$0xff] }
0x2740   : > { %v5399_v32 = vsub.f32 %v5385_v18, %v5397_v31  ;;  %v5400_v38 = vmul.f32 %v5398_v37, %v5398_v37  ;;  %v10530_v18 = vld [vmem:[%s10935_s12 + $0x10] sm:$0xff] }
0x2742   : > { %v5402_v35 = vsel %vm1880_vm1, %v5400_v38, 0.0  ;;  %v5401_v36 = vmul.f32 %v5399_v32, %v5399_v32 }
0x2743   : > { %5403 = vadd.xlane.f32.xlu0 %v5402_v35 }
0x2744   : > { %v5405_v40 = vsel %vm1880_vm1, %v5401_v36, 0.0 }
0x2745   : > { %5406 = vadd.xlane.f32.xlu1 %v5405_v40 }
0x27d0   : > { %v5404_v44 = vpop.xlane.xlu0 %5403 }
0x27d1   : > { %v5408_v46 = vmul.f32 0.032258064, %v5404_v44 }
0x27d2   : > { %v5407_v47 = vpop.xlane.xlu1 %5406 }
0x27d3   : > { %8240 = vrsqrt.f32 %v5408_v46  ;;  %v5409_v50 = vmul.f32 0.032258064, %v5407_v47  ;;  %vm5412_vm12 = vcmp.eq.f32.partialorder %v5408_v46, inf  ;;  %v5415_v55 = vand.u32 2147483648, %v5408_v46 }
0x27d4   : > { %vm5414_vm14 = vcmp.eq.f32.partialorder %v5408_v46, 0.0 }
0x27d5   : > { %8242 = vrsqrt.f32 %v5409_v50  ;;  %vm5419_vm9 = vcmp.eq.f32.partialorder %v5409_v50, inf  ;;  %v5422_v60 = vand.u32 2147483648, %v5409_v50  ;;  %vm5421_vm10 = vcmp.eq.f32.partialorder %v5409_v50, 0.0 }
0x27dd   : > { %v8241_v51 = vpop.eup %8240 }
0x27de   : > { %v5411_v52 = vmul.f32 %v8241_v51, %v5408_v46 }
0x27df   : > { %v8243_v58 = vpop.eup %8242 }
0x27e0   : > { %v5413_v42 = vsel %vm5412_vm12, %v5408_v46, %v5411_v52  ;;  %v5418_v57 = vmul.f32 %v8243_v58, %v5409_v50 }
0x27e1   : > { %v5416_v56 = vsel %vm5414_vm14, %v5415_v55, %v5413_v42 }
0x27e2   : > { %v5424_v12 = vadd.f32 1e-06, %v5416_v56  ;;  %v5420_v15 = vsel %vm5419_vm9, %v5409_v50, %v5418_v57 }
0x27e3   : > { %v5423_v16 = vsel %vm5421_vm10, %v5422_v60, %v5420_v15 }
0x27e4   : > { %8244 = vrcp.f32 %v5424_v12  ;;  %v5425_v61 = vadd.f32 1e-06, %v5423_v16 }
0x27e6   : > { %8246 = vrcp.f32 %v5425_v61 }
0x27ee   : > { %v8245_v63 = vpop.eup %8244 }
0x27ef   : > { %v5427_v29 = vmul.f32 %v8245_v63, %v5398_v37 }
0x27f0   : > { %v8247_v3 = vpop.eup %8246 }
0x27f1   : > { %v5429_v41 = vmul.f32 %v8247_v3, %v5399_v32  ;;  %v5436_v4 = vmul.f32 %v6988_v2, %v5427_v29 }
0x27f3   : > { %v5437_v6 = vmul.f32 %v6988_v2, %v5429_v41  ;;  %v10511_v48 = vadd.f32 %v6989_v45, %v5436_v4 }
0x27f5   : > { %v10513_v10 = vadd.f32 %v6989_v45, %v5437_v6 }
0x27f7   : > { %v5474_v7 = vpack.c.bf16 %v10513_v10, %v10511_v48 }
0x27f9   : > { %7577 = vmatmul.mubr.msk.bf16.vlgmr.msra.gmra.mrb[84].mxu1 %vm1880_vm1, %v5474_v7 }
0x27fa   : > { %7589 = vmatpush3.bf16.msra.mxu1 %v8026_v5  ;;  %7592 = vmatprep.mubr.msk.bf16.mxu1 %vm9092_vm0, %v9091_v0 }
0x27fb   : > { %7590 = vmatprep.subr.bf16.mxu1 %v9091_v0 }
0x27fe   : > { %7591 = vmatpush3.bf16.msra.mxu1 %v8027_v53 }
0x2801   : > { %7593 = vmatmul.mubr.msk.bf16.vlgmr.msra.gmra.mrb[88].mxu1 %vm1880_vm1, %v10234_v49  ;;  %v10534_v49 = vld [vmem:[%s10935_s12 + $0x20] sm:$0xff]  ;;  %s8884_s12 = scalar_lea.vmem %s8883_s9, 256 }
0x28cc   : > { %v5530_v59 = vpop.f32.mrb[84].mxu1 }
0x28cd   : > { %v5531_v13 = vadd.f32 %v7006_v8, %v5530_v59  ;;  %v7578_v62 = vpop.f32.mrb[85].mxu1 }
0x28ce   : > { %v5533_v1 = vpop.f32.mrb[86].mxu1 }
0x28cf   : > { %v7579_v9 = vpop.f32.mrb[87].mxu1  ;;  %v5534_v11 = vadd.f32 %v7006_v8, %v5533_v1  ;;  %v5653_v17 = vmul.f32 %v10526_v14, %v5531_v13  ;;  %v5655_v19 = vmul.f32 %v10530_v18, %v5531_v13  ;;  %v5657_v22 = vmul.f32 %v10534_v49, %v5531_v13 }
0x28d0   : > { %v5659_v34 = vmul.f32 %v10538_v24, %v5531_v13 }
0x28d1   : > { %v5654_v26 = vmul.f32 %v10542_v25, %v5534_v11  ;;  %v5656_v54 = vmul.f32 %v10546_v27, %v5534_v11  ;;  %v5658_v28 = vmul.f32 %v10550_v20, %v5534_v11  ;;  %v5660_v33 = vmul.f32 %v10554_v21, %v5534_v11 }
0x28d3   : > { %v5662_v37 = vpack.c.bf16 %v5656_v54, %v5655_v19  ;;  %v5661_v32 = vpack.c.bf16 %v5654_v26, %v5653_v17  ;;  %v5663_v38 = vpack.c.bf16 %v5658_v28, %v5657_v22  ;;  %v5664_v35 = vpack.c.bf16 %v5660_v33, %v5659_v34 }
0x28d4   : > { %v5647_v31 = vpop.f32.mrb[88].mxu1 }
0x28d5   : > { %v5648_v36 = vadd.f32 %v7014_v30, %v5647_v31  ;;  %v7594_v40 = vpop.f32.mrb[89].mxu1  ;;  %7598 = vmatprep.mubr.msk.bf16.mxu0 %vm1880_vm1, %v5661_v32 }
0x28d6   : > { %v5650_v23 = vpop.f32.mrb[90].mxu1  ;;  %7599 = vmatmul.mubr.msk.bf16.vlgmr.msra.gmra.mrb[88].mxu0 %vm1880_vm1, %v5662_v37 }
0x28d7   : > { %v5846_v43 = vpack.c.bf16 %v5648_v36, %v5648_v36  ;;  %v7595_v44 = vpop.f32.mrb[91].mxu1  ;;  %7602 = vmatprep.mubr.msk.bf16.mxu0 %vm1880_vm1, %v5663_v38 }
0x28d9   : > { %v5860_v46 = vsel %vm2169_vm5, %v5846_v43, 0  ;;  %7661 = vmatprep.subr.msk.bf16.mxu1 %vm2169_vm5, %v5846_v43 }
0x28da   : > { %7607 = vmatpush3.bf16.msra.mxu1 %v5860_v46 }
0x28db   : > { %7624 = vmatprep.subr.bf16.mxu1 %v9091_v0 }
0x28de   : > { %7603 = vmatmul.mubr.msk.bf16.gmra.mrb[92].mxu0 %vm1880_vm1, %v5664_v35 }
0x28df   : > { %7620 = vmatprep.mubr.msk.bf16.mxu0 %vm9092_vm0, %v9091_v0 }
0x29a9   : > { %v7600_v47 = vpop.f32.mrb[88].mxu0 }
0x29aa   : > { %v5715_v50 = vpop.f32.mrb[89].mxu0  ;;  %v5748_v42 = vsel %vm2110_vm3, -1e+09, %v7600_v47 }
0x29ab   : > { %v5746_v51 = vsel %vm2110_vm3, -1e+09, %v5715_v50  ;;  %v7601_v52 = vpop.f32.mrb[90].mxu0  ;;  %v5760_v60 = vsel %vm2115_vm4, %v5748_v42, -inf }
0x29ac   : > { %v5754_v55 = vsel %vm2115_vm4, %v5746_v51, -inf  ;;  %v5718_v58 = vpop.f32.mrb[91].mxu0  ;;  %v5749_v12 = vsel %vm2110_vm3, -1e+09, %v7601_v52 }
0x29ad   : > { %v5747_v56 = vsel %vm2110_vm3, -1e+09, %v5718_v58  ;;  %5755 = vmax.xlane.f32.xlu0 %v5754_v55  ;;  %v5763_v16 = vsel %vm2115_vm4, %v5749_v12, -inf }
0x29ae   : > { %v5757_v57 = vsel %vm2115_vm4, %v5747_v56, -inf }
0x29af   : > { %5758 = vmax.xlane.f32.xlu1 %v5757_v57 }
0x29b1   : > { %5761 = vmax.xlane.f32.xlu0 %v5760_v60  ;;  %v7604_v15 = vpop.f32.mrb[92].mxu0 }
0x29b2   : > { %v5731_v61 = vpop.f32.mrb[93].mxu0  ;;  %v5752_v41 = vsel %vm2110_vm3, -1e+09, %v7604_v15 }
0x29b3   : > { %v5750_v63 = vsel %vm2110_vm3, -1e+09, %v5731_v61  ;;  %5764 = vmax.xlane.f32.xlu1 %v5763_v16  ;;  %v7605_v2 = vpop.f32.mrb[94].mxu0  ;;  %v5772_v5 = vsel %vm2115_vm4, %v5752_v41, -inf }
0x29b4   : > { %v5766_v29 = vsel %vm2115_vm4, %v5750_v63, -inf  ;;  %v5734_v3 = vpop.f32.mrb[95].mxu0  ;;  %v5753_v6 = vsel %vm2110_vm3, -1e+09, %v7605_v2 }
0x29b5   : > { %v5751_v4 = vsel %vm2110_vm3, -1e+09, %v5734_v3  ;;  %5767 = vmax.xlane.f32.xlu0 %v5766_v29  ;;  %v5775_v7 = vsel %vm2115_vm4, %v5753_v6, -inf }
0x29b6   : > { %v5769_v45 = vsel %vm2115_vm4, %v5751_v4, -inf }
0x29b7   : > { %5770 = vmax.xlane.f32.xlu1 %v5769_v45 }
0x29b9   : > { %5773 = vmax.xlane.f32.xlu0 %v5772_v5 }
0x29bb   : > { %5776 = vmax.xlane.f32.xlu1 %v5775_v7 }
0x2a3a   : > { %v5756_v53 = vpop.xlane.xlu0 %5755 }
0x2a3b   : > { %v5778_v8 = vsub.f32 %v5746_v51, %v5756_v53 }
0x2a3c   : > { %v5759_v59 = vpop.xlane.xlu1 %5758 }
0x2a3d   : > { %v5786_v13 = vmul.f32 1.442695, %v5778_v8  ;;  %v5779_v62 = vsub.f32 %v5747_v56, %v5759_v59 }
0x2a3e   : > { %v5762_v1 = vpop.xlane.xlu0 %5761 }
0x2a3f   : > { %8248 = vpow2.f32 %v5786_v13  ;;  %v5788_v9 = vmul.f32 1.442695, %v5779_v62  ;;  %v5780_v11 = vsub.f32 %v5748_v42, %v5762_v1 }
0x2a40   : > { %v5765_v17 = vpop.xlane.xlu1 %5764 }
0x2a41   : > { %8250 = vpow2.f32 %v5788_v9  ;;  %v5790_v39 = vmul.f32 1.442695, %v5780_v11  ;;  %v5781_v19 = vsub.f32 %v5749_v12, %v5765_v17 }
0x2a42   : > { %v5768_v22 = vpop.xlane.xlu0 %5767 }
0x2a43   : > { %8252 = vpow2.f32 %v5790_v39  ;;  %v5792_v34 = vmul.f32 1.442695, %v5781_v19  ;;  %v5782_v26 = vsub.f32 %v5750_v63, %v5768_v22 }
0x2a44   : > { %v5771_v54 = vpop.xlane.xlu1 %5770 }
0x2a45   : > { %8254 = vpow2.f32 %v5792_v34  ;;  %v5794_v28 = vmul.f32 1.442695, %v5782_v26  ;;  %v5783_v33 = vsub.f32 %v5751_v4, %v5771_v54 }
0x2a46   : > { %v5774_v30 = vpop.xlane.xlu0 %5773 }
0x2a47   : > { %8256 = vpow2.f32 %v5794_v28  ;;  %v5796_v37 = vmul.f32 1.442695, %v5783_v33  ;;  %v5784_v31 = vsub.f32 %v5752_v41, %v5774_v30  ;;  %v8028_v28 = vld [vmem:[%s10942_s1 + $0x10] sm:$0xff]   ;;  %v8029_v33 = vld [vmem:[%s10942_s1 + $0x18] sm:$0xff]   ;;  %s10944_s1 = sld [smem:[#allocation94_spill]] }
0x2a48   : > { %v5777_v32 = vpop.xlane.xlu1 %5776  ;;  %7617 = vmatpush3.bf16.msra.mxu0 %v8028_v28 }
0x2a49   : > { %v8249_v38 = vpop.eup %8248  ;;  %8258 = vpow2.f32 %v5796_v37  ;;  %v5798_v35 = vmul.f32 1.442695, %v5784_v31  ;;  %v5785_v36 = vsub.f32 %v5753_v6, %v5777_v32  ;;  %7618 = vmatprep.subr.bf16.mxu0 %v9091_v0 }
0x2a4a   : > { %v5802_v40 = vsel %vm2115_vm4, %v8249_v38, 0.0 }
0x2a4b   : > { %v8251_v23 = vpop.eup %8250  ;;  %8260 = vpow2.f32 %v5798_v35  ;;  %v5800_v43 = vmul.f32 1.442695, %v5785_v36  ;;  %5803 = vadd.xlane.f32.xlu0 %v5802_v40 }
0x2a4c   : > { %v5805_v44 = vsel %vm2115_vm4, %v8251_v23, 0.0  ;;  %7619 = vmatpush3.bf16.msra.mxu0 %v8029_v33 }
0x2a4d   : > { %v8253_v46 = vpop.eup %8252  ;;  %8262 = vpow2.f32 %v5800_v43  ;;  %5806 = vadd.xlane.f32.xlu1 %v5805_v44  ;;  %7632 = vmatprep.subr.bf16.mxu0 %v9091_v0  ;;  %s10656_s3 = scalar_lea.hbm %s10944_s1, %s7065_s2 }
0x2a4e   : > { %v5808_v47 = vsel %vm2115_vm4, %v8253_v46, 0.0 }
0x2a4f   : > { %v8255_v50 = vpop.eup %8254  ;;  %5809 = vadd.xlane.f32.xlu0 %v5808_v47 }
0x2a50   : > { %v5811_v51 = vsel %vm2115_vm4, %v8255_v50, 0.0 }
0x2a51   : > { %v8257_v52 = vpop.eup %8256  ;;  %5812 = vadd.xlane.f32.xlu1 %v5811_v51 }
0x2a52   : > { %v5814_v55 = vsel %vm2115_vm4, %v8257_v52, 0.0 }
0x2a53   : > { %v8259_v58 = vpop.eup %8258  ;;  %5815 = vadd.xlane.f32.xlu0 %v5814_v55 }
0x2a54   : > { %v5817_v42 = vsel %vm2115_vm4, %v8259_v58, 0.0 }
0x2a55   : > { %v8261_v56 = vpop.eup %8260  ;;  %5818 = vadd.xlane.f32.xlu1 %v5817_v42 }
0x2a56   : > { %v5820_v57 = vsel %vm2115_vm4, %v8261_v56, 0.0 }
0x2a57   : > { %v8263_v12 = vpop.eup %8262  ;;  %5821 = vadd.xlane.f32.xlu0 %v5820_v57 }
0x2a58   : > { %v5823_v60 = vsel %vm2115_vm4, %v8263_v12, 0.0 }
0x2a59   : > { %5824 = vadd.xlane.f32.xlu1 %v5823_v60 }
0x2ad8   : > { %v5804_v15 = vpop.xlane.xlu0 %5803 }
0x2ad9   : > { %8264 = vrcp.f32 %v5804_v15 }
0x2ada   : > { %v5807_v16 = vpop.xlane.xlu1 %5806 }
0x2adb   : > { %8266 = vrcp.f32 %v5807_v16 }
0x2adc   : > { %v5810_v61 = vpop.xlane.xlu0 %5809 }
0x2add   : > { %8268 = vrcp.f32 %v5810_v61 }
0x2ade   : > { %v5813_v63 = vpop.xlane.xlu1 %5812 }
0x2adf   : > { %8270 = vrcp.f32 %v5813_v63 }
0x2ae0   : > { %v5816_v2 = vpop.xlane.xlu0 %5815 }
0x2ae1   : > { %8272 = vrcp.f32 %v5816_v2 }
0x2ae2   : > { %v5819_v29 = vpop.xlane.xlu1 %5818 }
0x2ae3   : > { %v8265_v3 = vpop.eup %8264  ;;  %8274 = vrcp.f32 %v5819_v29 }
0x2ae4   : > { %v5822_v41 = vpop.xlane.xlu0 %5821  ;;  %v5827_v6 = vmul.f32 %v8265_v3, %v8249_v38 }
0x2ae5   : > { %v8267_v4 = vpop.eup %8266  ;;  %8276 = vrcp.f32 %v5822_v41 }
0x2ae6   : > { %v5825_v45 = vpop.xlane.xlu1 %5824  ;;  %v5829_v5 = vmul.f32 %v8267_v4, %v8251_v23 }
0x2ae7   : > { %v8269_v7 = vpop.eup %8268  ;;  %8278 = vrcp.f32 %v5825_v45 }
0x2ae8   : > { %v5842_v53 = vpack.c.bf16 %v5829_v5, %v5827_v6  ;;  %v5831_v59 = vmul.f32 %v8269_v7, %v8253_v46  ;;  %v8030_v5 = vld [vmem:[#allocation20 + $0x10] sm:$0xff]   ;;  %v8031_v7 = vld [vmem:[#allocation20 + $0x18] sm:$0xff]  }
0x2ae9   : > { %v8271_v8 = vpop.eup %8270 }
0x2aea   : > { %v5833_v13 = vmul.f32 %v8271_v8, %v8255_v50  ;;  %7608 = vmatprep.mubr.msk.bf16.mxu1 %vm2115_vm4, %v5842_v53  ;;  %v8032_v53 = vld [vmem:[%s10943_s4 + $0x40] sm:$0xff]   ;;  %v8033_v8 = vld [vmem:[%s10943_s4 + $0x48] sm:$0xff]  }
0x2aeb   : > { %v8273_v62 = vpop.eup %8272 }
0x2aec   : > { %v5843_v1 = vpack.c.bf16 %v5833_v13, %v5831_v59  ;;  %v5835_v11 = vmul.f32 %v8273_v62, %v8257_v52  ;;  %v8034_v59 = vld [vmem:[%s10943_s4 + $0x50] sm:$0xff]   ;;  %v8035_v13 = vld [vmem:[%s10943_s4 + $0x58] sm:$0xff]   ;;  %v8036_v62 = vld [vmem:[%s10943_s4 + $0x60] sm:$0xff]  }
0x2aed   : > { %v8275_v9 = vpop.eup %8274 }
0x2aee   : > { %7609 = vmatmul.mubr.msk.bf16.vlgmr.msra.gmra.mrb[92].mxu1 %vm2115_vm4, %v5843_v1  ;;  %v5837_v17 = vmul.f32 %v8275_v9, %v8259_v58  ;;  %v8037_v1 = vld [vmem:[%s10943_s4 + $0x68] sm:$0xff]  }
0x2aef   : > { %v8277_v39 = vpop.eup %8276  ;;  %7625 = vmatpush3.bf16.msra.mxu1 %v8030_v5 }
0x2af0   : > { %v5844_v19 = vpack.c.bf16 %v5837_v17, %v5835_v11  ;;  %v5839_v34 = vmul.f32 %v8277_v39, %v8261_v56  ;;  %7626 = vmatprep.subr.bf16.mxu1 %v9091_v0 }
0x2af1   : > { %v8279_v22 = vpop.eup %8278 }
0x2af2   : > { %7612 = vmatprep.mubr.msk.bf16.mxu1 %vm2115_vm4, %v5844_v19  ;;  %v5841_v26 = vmul.f32 %v8279_v22, %v8263_v12 }
0x2af3   : > { %7627 = vmatpush3.bf16.msra.mxu1 %v8031_v7 }
0x2af4   : > { %v5845_v54 = vpack.c.bf16 %v5841_v26, %v5839_v34 }
0x2af6   : > { %7613 = vmatmul.mubr.msk.bf16.gmra.mrb[96].mxu1 %vm2115_vm4, %v5845_v54 }
0x2af7   : > { %7628 = vmatprep.mubr.msk.bf16.mxu1 %vm9092_vm0, %v9091_v0 }
0x2bc1   : > { %v7610_v30 = vpop.f32.mrb[92].mxu1 }
0x2bc2   : > { %v5929_v37 = vmul.f32 %v10530_v18, %v7610_v30  ;;  %v5896_v31 = vpop.f32.mrb[93].mxu1 }
0x2bc3   : > { %v5927_v32 = vmul.f32 %v10526_v14, %v5896_v31  ;;  %v7611_v38 = vpop.f32.mrb[94].mxu1 }
0x2bc4   : > { %v5930_v35 = vmul.f32 %v10546_v27, %v7611_v38  ;;  %v5899_v36 = vpop.f32.mrb[95].mxu1 }
0x2bc5   : > { %v5935_v40 = vadd.f32 %v5929_v37, %v5927_v32  ;;  %v5928_v23 = vmul.f32 %v10542_v25, %v5899_v36  ;;  %v7026_v25 = vld [vmem:[#allocation19 + $0x1] ss:$0 sm:$0xff]  ;;  %v7030_v36 = vld [vmem:[#allocation28 + $0x1] ss:$0 sm:$0xff] }
0x2bc7   : > { %v5936_v43 = vadd.f32 %v5930_v35, %v5928_v23 }
0x2bc9   : > { %v7614_v44 = vpop.f32.mrb[96].mxu1 }
0x2bca   : > { %v5912_v46 = vpop.f32.mrb[97].mxu1  ;;  %v5933_v52 = vmul.f32 %v10538_v24, %v7614_v44 }
0x2bcb   : > { %v5931_v47 = vmul.f32 %v10534_v49, %v5912_v46  ;;  %v7615_v50 = vpop.f32.mrb[98].mxu1  ;;  %v7031_v46 = vld [vmem:[#allocation29 + $0x1] ss:$0 sm:$0xff] }
0x2bcc   : > { %v5915_v51 = vpop.f32.mrb[99].mxu1  ;;  %v5934_v58 = vmul.f32 %v10554_v21, %v7615_v50 }
0x2bcd   : > { %v5937_v18 = vadd.f32 %v5935_v40, %v5931_v47  ;;  %v5932_v55 = vmul.f32 %v10550_v20, %v5915_v51 }
0x2bcf   : > { %v5939_v14 = vadd.f32 %v5937_v18, %v5933_v52  ;;  %v5938_v27 = vadd.f32 %v5936_v43, %v5932_v55  ;;  %v8038_v18 = vld [vmem:[%s10943_s4 + $0x70] sm:$0xff]   ;;  %v8039_v55 = vld [vmem:[%s10943_s4 + $0x78] sm:$0xff]   ;;  %s6336_s4 = sshll.u32 %s10238_s14, 4  ;;  %s6337_s4 = int_to_ptr.vmem [resolvable:$true] %s6336_s4 }
0x2bd0   : > { %s8878_s6 = scalar_lea.vmem %s6337_s4, 128  ;;  %p8885_p1 = scmp.lt.s32.totalorder %s6337_s4, %s8883_s9 }
0x2bd1   : > { %v5940_v42 = vadd.f32 %v5938_v27, %v5934_v58  ;;  %p8879_p8 = scmp.ne.s32.totalorder %s6337_s4, %s8878_s6  ;;  %p8886_p0 = scmp.lt.s32.totalorder %s8884_s12, %s8878_s6 }
0x2bd3   : > { %v5941_v56 = vpack.c.bf16 %v5940_v42, %v5939_v14  ;;  %v7048_v14 = vld [vmem:[#allocation22 + $0x1] ss:$0 sm:$0xff]  ;;  %p8880_p5 = pnand %p8879_p8, %p10945_p11  ;;  %p8887_p13 = por %p8886_p0, %p8885_p1 }
0x2bd5   : > { %7621 = vmatmul.mubr.msk.bf16.vlgmr.msra.gmra.mrb[96].mxu0 %vm1880_vm1, %v5941_v56  ;;  %p8881_p2 = pneg %p8880_p5 }
0x2bd6   : > { %7648 = vmatprep.mubr.msk.bf16.mxu0 %vm9092_vm0, %v9091_v0  ;;  %7633 = vmatpush3.bf16.msra.mxu0 %v8032_v53 }
0x2bd7   : > { %7634 = vmatprep.subr.bf16.mxu0 %v9091_v0  ;;  %p8888_p7 = pnand %p8887_p13, %p8881_p2 }
0x2bda   : > { %7635 = vmatpush3.bf16.msra.mxu0 %v8033_v8 }
0x2bdb   : > { %7636 = vmatprep.subr.bf16.mxu0 %v9091_v0 }
0x2bde   : > { %7637 = vmatpush3.bf16.msra.mxu0 %v8034_v59 }
0x2bdf   : > { %7638 = vmatprep.subr.bf16.mxu0 %v9091_v0 }
0x2be2   : > { %7639 = vmatpush3.bf16.msra.mxu0 %v8035_v13 }
0x2be3   : > { %7640 = vmatprep.subr.bf16.mxu0 %v9091_v0 }
0x2be6   : > { %7641 = vmatpush3.bf16.msra.mxu0 %v8036_v62 }
0x2be7   : > { %7642 = vmatprep.subr.bf16.mxu0 %v9091_v0 }
0x2bea   : > { %7643 = vmatpush3.bf16.msra.mxu0 %v8037_v1 }
0x2beb   : > { %7644 = vmatprep.subr.bf16.mxu0 %v9091_v0 }
0x2bee   : > { %7645 = vmatpush3.bf16.msra.mxu0 %v8038_v18 }
0x2bef   : > { %7646 = vmatprep.subr.bf16.mxu0 %v9091_v0 }
0x2bf2   : > { %7647 = vmatpush3.bf16.msra.mxu0 %v8039_v55 }
0x2ca8   : > { %v5997_v49 = vpop.f32.mrb[96].mxu0 }
0x2ca9   : > { %v5998_v57 = vadd.f32 %v7026_v25, %v5997_v49  ;;  %v7622_v12 = vpop.f32.mrb[97].mxu0 }
0x2caa   : > { %v6000_v60 = vpop.f32.mrb[98].mxu0 }
0x2cab   : > { %v6004_v24 = vadd.f32 %v5998_v57, %v10511_v48  ;;  %v6001_v15 = vadd.f32 %v7026_v25, %v6000_v60  ;;  %v7623_v20 = vpop.f32.mrb[99].mxu0 }
0x2cad   : > { %v6005_v16 = vadd.f32 %v6001_v15, %v10513_v10  ;;  %v6010_v21 = vsel %vm1880_vm1, %v6004_v24, 0.0 }
0x2cae   : > { %6011 = vadd.xlane.f32.xlu0 %v6010_v21 }
0x2caf   : > { %v6013_v61 = vsel %vm1880_vm1, %v6005_v16, 0.0 }
0x2cb0   : > { %6014 = vadd.xlane.f32.xlu1 %v6013_v61 }
0x2d3b   : > { %v6012_v63 = vpop.xlane.xlu0 %6011 }
0x2d3c   : > { %v6016_v2 = vmul.f32 0.03125, %v6012_v63 }
0x2d3d   : > { %v6015_v29 = vpop.xlane.xlu1 %6014 }
0x2d3e   : > { %v6018_v3 = vsub.f32 %v6004_v24, %v6016_v2  ;;  %v6017_v41 = vmul.f32 0.03125, %v6015_v29  ;;  %v7052_v24 = vld [vmem:[#allocation23 + $0x1] ss:$0 sm:$0xff] }
0x2d40   : > { %v6019_v4 = vsub.f32 %v6005_v16, %v6017_v41  ;;  %v6020_v45 = vmul.f32 %v6018_v3, %v6018_v3 }
0x2d42   : > { %v6022_v48 = vsel %vm1880_vm1, %v6020_v45, 0.0  ;;  %v6021_v6 = vmul.f32 %v6019_v4, %v6019_v4 }
0x2d43   : > { %6023 = vadd.xlane.f32.xlu0 %v6022_v48 }
0x2d44   : > { %v6025_v10 = vsel %vm1880_vm1, %v6021_v6, 0.0 }
0x2d45   : > { %6026 = vadd.xlane.f32.xlu1 %v6025_v10 }
0x2dd0   : > { %v6024_v9 = vpop.xlane.xlu0 %6023 }
0x2dd1   : > { %v6028_v11 = vmul.f32 0.032258064, %v6024_v9 }
0x2dd2   : > { %v6027_v17 = vpop.xlane.xlu1 %6026 }
0x2dd3   : > { %8280 = vrsqrt.f32 %v6028_v11  ;;  %v6029_v39 = vmul.f32 0.032258064, %v6027_v17  ;;  %vm6032_vm0 = vcmp.eq.f32.partialorder %v6028_v11, inf  ;;  %v6035_v34 = vand.u32 2147483648, %v6028_v11 }
0x2dd4   : > { %vm6034_vm3 = vcmp.eq.f32.partialorder %v6028_v11, 0.0 }
0x2dd5   : > { %8282 = vrsqrt.f32 %v6029_v39  ;;  %vm6039_vm4 = vcmp.eq.f32.partialorder %v6029_v39, inf  ;;  %v6042_v37 = vand.u32 2147483648, %v6029_v39  ;;  %vm6041_vm5 = vcmp.eq.f32.partialorder %v6029_v39, 0.0 }
0x2ddd   : > { %v8281_v19 = vpop.eup %8280 }
0x2dde   : > { %v6031_v22 = vmul.f32 %v8281_v19, %v6028_v11 }
0x2ddf   : > { %v8283_v26 = vpop.eup %8282 }
0x2de0   : > { %v6033_v54 = vsel %vm6032_vm0, %v6028_v11, %v6031_v22  ;;  %v6038_v33 = vmul.f32 %v8283_v26, %v6029_v39 }
0x2de1   : > { %v6036_v28 = vsel %vm6034_vm3, %v6035_v34, %v6033_v54 }
0x2de2   : > { %v6044_v30 = vadd.f32 1e-06, %v6036_v28  ;;  %v6040_v31 = vsel %vm6039_vm4, %v6029_v39, %v6038_v33 }
0x2de3   : > { %v6043_v32 = vsel %vm6041_vm5, %v6042_v37, %v6040_v31 }
0x2de4   : > { %8284 = vrcp.f32 %v6044_v30  ;;  %v6045_v38 = vadd.f32 1e-06, %v6043_v32 }
0x2de6   : > { %8286 = vrcp.f32 %v6045_v38 }
0x2dee   : > { %v8285_v35 = vpop.eup %8284 }
0x2def   : > { %v6047_v40 = vmul.f32 %v8285_v35, %v6018_v3 }
0x2df0   : > { %v8287_v23 = vpop.eup %8286 }
0x2df1   : > { %v6049_v43 = vmul.f32 %v8287_v23, %v6019_v4  ;;  %v6056_v44 = vmul.f32 %v7030_v36, %v6047_v40 }
0x2df3   : > { %v6057_v47 = vmul.f32 %v7030_v36, %v6049_v43  ;;  %v6064_v50 = vadd.f32 %v7031_v46, %v6056_v44 }
0x2df5   : > { %v6065_v51 = vadd.f32 %v7031_v46, %v6057_v47 }
0x2df7   : > { %v6092_v52 = vpack.c.bf16 %v6065_v51, %v6064_v50 }
0x2df9   : > { %7629 = vmatmul.mubr.msk.bf16.vlgmr.msra.gmra.mrb[100].mxu1 %vm1880_vm1, %v6092_v52 }
0x2ecc   : > { %v6148_v58 = vpop.f32.mrb[100].mxu1 }
0x2ecd   : > { %v6149_v27 = vadd.f32 %v7048_v14, %v6148_v58  ;;  %v7630_v42 = vpop.f32.mrb[101].mxu1 }
0x2ece   : > { %v6151_v56 = vpop.f32.mrb[102].mxu1 }
0x2ecf   : > { %v6152_v25 = vadd.f32 %v7048_v14, %v6151_v56  ;;  %v7631_v49 = vpop.f32.mrb[103].mxu1  ;;  %v6155_v57 = vmax.f32 %v6149_v27, 0.0 }
0x2ed1   : > { %v6156_v12 = vmax.f32 %v6152_v25, 0.0 }
0x2ed3   : > { %v6157_v60 = vpack.c.bf16 %v6156_v12, %v6155_v57 }
0x2ed5   : > { %7649 = vmatmul.mubr.bf16.vlgmr.msra.gmra.mrb[100].mxu0 %v6157_v60 }
0x2fa8   : > { %v6246_v15 = vpop.f32.mrb[100].mxu0 }
0x2fa9   : > { %v6247_v20 = vadd.f32 %v7052_v24, %v6246_v15  ;;  %v7650_v16 = vpop.f32.mrb[101].mxu0 }
0x2faa   : > { %v6249_v21 = vpop.f32.mrb[102].mxu0 }
0x2fab   : > { %v6253_v61 = vadd.f32 %v6247_v20, %v6064_v50  ;;  %v6250_v0 = vadd.f32 %v7052_v24, %v6249_v21  ;;  %v7651_v63 = vpop.f32.mrb[103].mxu0 }
0x2fad   : > { %v6254_v2 = vadd.f32 %v6250_v0, %v6065_v51  ;;  %v6259_v29 = vsel %vm1880_vm1, %v6253_v61, 0.0 }
0x2fae   : > { %6260 = vadd.xlane.f32.xlu0 %v6259_v29 }
0x2faf   : > { %v6262_v3 = vsel %vm1880_vm1, %v6254_v2, 0.0 }
0x2fb0   : > { %6263 = vadd.xlane.f32.xlu1 %v6262_v3 }
0x303b   : > { %v6261_v41 = vpop.xlane.xlu0 %6260 }
0x303c   : > { %v6265_v4 = vmul.f32 0.03125, %v6261_v41 }
0x303d   : > { %v6264_v45 = vpop.xlane.xlu1 %6263 }
0x303e   : > { %v10644_v48 = vsub.f32 %v6253_v61, %v6265_v4  ;;  %v6266_v6 = vmul.f32 0.03125, %v6264_v45 }
0x3040   : > { %v10646_v10 = vsub.f32 %v6254_v2, %v6266_v6  ;;  %v6269_v5 = vmul.f32 %v10644_v48, %v10644_v48 }
0x3042   : > { %v6271_v7 = vsel %vm1880_vm1, %v6269_v5, 0.0  ;;  %v6270_v53 = vmul.f32 %v10646_v10, %v10646_v10 }
0x3043   : > { %6272 = vadd.xlane.f32.xlu0 %v6271_v7 }
0x3044   : > { %v6274_v8 = vsel %vm1880_vm1, %v6270_v53, 0.0 }
0x3045   : > { %6275 = vadd.xlane.f32.xlu1 %v6274_v8 }
0x3046   : > { %8891 = shalt.err (!%p8888_p7)
}
0x3047   : > { %s8892_s2 = scalar_lea.hbm %s10656_s3, 128  ;;  %s8896_s8 = scalar_lea.hbm %s10944_s1, 256 }
0x3048   : > { %p8893_p6 = scmp.ne.s32.totalorder %s10656_s3, %s8892_s2  ;;  %p8897_p3 = scmp.lt.u32.totalorder %s10656_s3, %s10944_s1 }
0x3049   : > { %p8898_p10 = scmp.lt.u32.totalorder %s8896_s8, %s8892_s2  ;;  %p8900_p8 = scmp.lt.u32.totalorder %s8892_s2, %s10656_s3 }
0x304a   : > { %p8894_p9 = pnand %p8893_p6, %p10945_p11 }
0x304b   : > { %p8899_p12 = por %p8898_p10, %p8897_p3 }
0x304c   : > { %p8895_p4 = pneg %p8894_p9 }
0x304d   : > { %p8901_p5 = por %p8900_p8, %p8899_p12 }
0x304f   : > { %p8902_p2 = pnand %p8901_p5, %p8895_p4 }
0x3051   : > { %8905 = shalt.err (!%p8902_p2)
}
0x3052   : > { %7736 = dma.vmem_to_hbm [thread:$0]  (%p10945_p11), %s6337_s4, 128, %s10656_s3, %s6318_s5   ;;  %v7061_v31 = vld [vmem:[#allocation31 + $0x1] ss:$0 sm:$0xff]  ;;  %v7062_v38 = vld [vmem:[#allocation32 + $0x1] ss:$0 sm:$0xff] }
0x3053   : > { %s10946_s4 = sld [smem:[#allocation95_spill]]  ;;  %s6758_s14 = sshll.u32 %s9781_s10, 4 }
0x3054   : > { %s7071_s3 = sshll.u32 %s9374_s18, 8  ;;  %s1815_s5 = scalar_lea.vmem [#allocation35], %s6758_s14 }
0x3055   : > { %s6349_s12 = sshll.u32 %s1815_s5, 4  ;;  %s6323_s6 = scalar_lea.sflag [#allocation36], %s9781_s10  ;;  %s10681_s12 = int_to_ptr.vmem [resolvable:$true] %s6349_s12 }
0x3056   : > { %s8906_s2 = scalar_lea.vmem %s10681_s12, 256  ;;  %s9095_s18 = smov [#allocation35]  }
0x3057   : > { %p8907_p1 = scmp.ne.s32.totalorder %s10681_s12, %s8906_s2  ;;  %s8910_s8 = sshll.u32 %s9095_s18, 4  ;;  %s8911_s8 = int_to_ptr.vmem [resolvable:$false] %s8910_s8 }
0x3058   : > { %s8912_s14 = scalar_lea.vmem %s8911_s8, 512  ;;  %p8913_p7 = scmp.lt.s32.totalorder %s10681_s12, %s8911_s8 }
0x3059   : > { %s10679_s9 = scalar_lea.hbm %s10946_s4, %s7071_s3  ;;  %p8908_p0 = pnand %p8907_p1, %p10945_p11 }
0x305a   : > { %p8914_p6 = scmp.lt.s32.totalorder %s8912_s14, %s8906_s2 }
0x305b   : > { %p8909_p13 = pneg %p8908_p0 }
0x305c   : > { %p8915_p9 = por %p8914_p6, %p8913_p7 }
0x305e   : > { %p8916_p4 = pnand %p8915_p9, %p8909_p13 }
0x30d0   : > { %v6273_v59 = vpop.xlane.xlu0 %6272 }
0x30d1   : > { %v6277_v13 = vmul.f32 0.032258064, %v6273_v59 }
0x30d2   : > { %v6276_v62 = vpop.xlane.xlu1 %6275 }
0x30d3   : > { %8288 = vrsqrt.f32 %v6277_v13  ;;  %v6278_v1 = vmul.f32 0.032258064, %v6276_v62  ;;  %vm6281_vm11 = vcmp.eq.f32.partialorder %v6277_v13, inf  ;;  %v6284_v17 = vand.u32 2147483648, %v6277_v13 }
0x30d4   : > { %vm6283_vm13 = vcmp.eq.f32.partialorder %v6277_v13, 0.0 }
0x30d5   : > { %8290 = vrsqrt.f32 %v6278_v1  ;;  %vm6288_vm15 = vcmp.eq.f32.partialorder %v6278_v1, inf  ;;  %v6291_v54 = vand.u32 2147483648, %v6278_v1  ;;  %vm6290_vm2 = vcmp.eq.f32.partialorder %v6278_v1, 0.0 }
0x30dd   : > { %v8289_v9 = vpop.eup %8288 }
0x30de   : > { %v6280_v11 = vmul.f32 %v8289_v9, %v6277_v13 }
0x30df   : > { %v8291_v39 = vpop.eup %8290 }
0x30e0   : > { %v6282_v19 = vsel %vm6281_vm11, %v6277_v13, %v6280_v11  ;;  %v6287_v34 = vmul.f32 %v8291_v39, %v6278_v1 }
0x30e1   : > { %v6285_v22 = vsel %vm6283_vm13, %v6284_v17, %v6282_v19 }
0x30e2   : > { %v6293_v26 = vadd.f32 1e-06, %v6285_v22  ;;  %v6289_v28 = vsel %vm6288_vm15, %v6278_v1, %v6287_v34 }
0x30e3   : > { %v6292_v33 = vsel %vm6290_vm2, %v6291_v54, %v6289_v28 }
0x30e4   : > { %8292 = vrcp.f32 %v6293_v26  ;;  %v6294_v30 = vadd.f32 1e-06, %v6292_v33 }
0x30e6   : > { %8294 = vrcp.f32 %v6294_v30 }
0x30ee   : > { %v8293_v37 = vpop.eup %8292 }
0x30ef   : > { %v6296_v32 = vmul.f32 %v8293_v37, %v10644_v48 }
0x30f0   : > { %v8295_v35 = vpop.eup %8294 }
0x30f1   : > { %v6305_v36 = vmul.f32 %v7061_v31, %v6296_v32  ;;  %v6298_v40 = vmul.f32 %v8295_v35, %v10646_v10 }
0x30f3   : > { %v6313_v23 = vadd.f32 %v7062_v38, %v6305_v36  ;;  %v6306_v43 = vmul.f32 %v7061_v31, %v6298_v40 }
0x30f5   : > { %6315 = vst.msk [vmem:[%s1815_s5] sm:$0xff] %vm1880_vm1, %v6313_v23  ;;  %v6314_v44 = vadd.f32 %v7062_v38, %v6306_v43 }
0x30f7   : > { %6316 = vst.msk [vmem:[%s1815_s5 + $0x8] sm:$0xff] %vm1880_vm1, %v6314_v44 }
0x30f8   : > { %8919 = shalt.err (!%p8916_p4)
}
0x30f9   : > { %s8920_s3 = scalar_lea.hbm %s10679_s9, 256  ;;  %s8924_s5 = scalar_lea.hbm %s10946_s4, 512 }
0x30fa   : > { %p8921_p3 = scmp.ne.s32.totalorder %s10679_s9, %s8920_s3  ;;  %p8925_p8 = scmp.lt.u32.totalorder %s10679_s9, %s10946_s4 }
0x30fb   : > { %p8926_p5 = scmp.lt.u32.totalorder %s8924_s5, %s8920_s3  ;;  %p8928_p1 = scmp.lt.u32.totalorder %s8920_s3, %s10679_s9 }
0x30fc   : > { %p8922_p10 = pnand %p8921_p3, %p10945_p11 }
0x30fd   : > { %p8927_p2 = por %p8926_p5, %p8925_p8 }
0x30fe   : > { %p8923_p12 = pneg %p8922_p10 }
0x30ff   : > { %p8929_p0 = por %p8928_p1, %p8927_p2 }
0x3101   : > { %p8930_p13 = pnand %p8929_p0, %p8923_p12 }
0x3103   : > { %8933 = shalt.err (!%p8930_p13)
}
0x3104   : > { %s9096_s2 = smov 128   ;;  %s9097_s18 = smov 8  }
0x3105   : > { %7737 = dma.vmem_to_hbm [thread:$0]  (%p10945_p11), %s10681_s12, 256, %s10679_s9, %s6323_s6, %s9096_s2, %s9096_s2, %s9097_s18  }
0x3106 PF: > { %s10947_s8 = sld [smem:[#allocation99_spill]]  ;;  %s6364_s14 = sand.u32 1, %s9004_s7  }
0x3107   : > { %p10949_p6 = scmp.ge.s32.totalorder %s9016_s11, 2  ;;  %s6365_s3 = scalar_lea.sflag [#allocation4], %s6364_s14 }
0x310c   : > { %p10948_p7 = scmp.ne.s32.totalorder %s10947_s8, 0 }
0x310e   : > { %p7803_p9 = pnand %p10949_p6, %p10948_p7 }
0x3110   : > { %8995 = dma.done.wait (!%p7803_p9), %s6365_s3, 128  }
0x3111   : > { %8997 = vsyncadd (!%p7803_p9), %s6365_s3, 4294967168  ;;  %s6374_s5 = scalar_lea.sflag [#allocation36], %s6364_s14 }
0x3112   : > { %8999 = dma.done.wait (!%p7803_p9), %s6374_s5, 256  }
0x3113   : > { %9001 = vsyncadd (!%p7803_p9), %s6374_s5, 4294967040  ;;  %s10950_s11 = sld [smem:[#allocation97_spill]]  ;;  %s10951_s1 = sld [smem:[#allocation96_spill]] }
0x3114   : > { %s10952_s10 = sld [smem:[#allocation98_spill]]  ;;  %s10953_s7 = smov %s9008_s0 }
0x3119   : > { %p128_p11 = scmp.ge.s32.totalorder %s10950_s11, 4   ;;  %s10954_s0 = smov %s10951_s1 }
0x311b   :  { %130 = sbr.rel (!%p128_p11) target bundleno = 120 (0x78), region = 460 }
0x3122   :  { %6379 = vsyncpa [#allocation3], 1 }
0x3123   :  { %6381 = vsyncpa [#allocation3 + $0x1], 1 }
0x3124   :  { %6382 = vsyncpa [#allocation6], 1 }
0x3125   :  { %6384 = vsyncpa [#allocation6 + $0x1], 1 }
0x3126   :  { %6385 = vsyncpa [#allocation9], 1 }
0x3127   :  { %6386 = vsyncpa [#allocation12], 1 }
0x3128   :  { %6387 = vsyncpa [#allocation15], 1 }
0x3129   :  { %6388 = vsyncpa [#allocation18], 1 }
0x312a   :  { %6389 = vsyncpa [#allocation21], 1 }
0x312b   :  { %6390 = vsyncpa [#allocation24], 1 }
0x312c   :  { %6391 = vsyncpa [#allocation27], 1 }
0x312d   :  { %6392 = vsyncpa [#allocation30], 1 }
0x312e   :  { %6393 = vsyncpa [#allocation33], 1 }
0x312f   :  { %6394 = vsyncpa [#allocation4], 1 }
0x3130   :  { %6396 = vsyncpa [#allocation4 + $0x1], 1 }
0x3131   :  { %6397 = vsyncpa [#allocation36], 1 }
0x3132   :  { %6399 = vsyncpa [#allocation36 + $0x1], 1 }

</bundles_post_ra>
